<compile_context>
chip_gen: v7x
topology: tpu7x:2x2x1
jax: 0.10.0
libtpu: 0.0.40
codegen_flags: <defaults>
</compile_context>

<pallas_src>
import jax
import jax.numpy as jnp
from jax.experimental import pallas as pl
from jax.experimental.pallas import tpu as pltpu

# ----------------------------- small config ---------------------------------
B = 2                 # batch
L_TXT = 7             # text tokens
L_VIS = 1             # visual tokens (features.unsqueeze(1) -> 1 token)
S = L_TXT + L_VIS     # total sequence
H = 32                # bert hidden_size
NH = 4                # attention heads
DH = H // NH
INTER = 64            # FFN intermediate size
N_LAYERS = 2
VIS_DIM = 2048        # bert_config.visual_embedding_dim = 2048 (hardcoded)
VOCAB = 50
MAX_POS = 64
N_CLASSES = 3         # config.num_class
N_CLS_HEADS = 13
LN_EPS_BERT = 1e-12   # transformer LayerNorm eps
LN_EPS_CLS = 1e-5     # nn.LayerNorm default eps (classifier heads)
NEG_SLOPE = 0.01      # nn.LeakyReLU default


# ------------------------------ helpers -------------------------------------
def _layernorm(x, g, b, eps):
    mu = jnp.mean(x, axis=-1, keepdims=True)
    var = jnp.mean((x - mu) ** 2, axis=-1, keepdims=True)
    return (x - mu) * jax.lax.rsqrt(var + eps) * g + b


def _leaky_relu(x):
    return jnp.where(x > 0, x, NEG_SLOPE * x)


# ------------------------- fused Pallas kernel -------------------------------
def fused_kernel(emb_ref, feat_ref, mask_ref,
                 visw_ref, visb_ref, elng_ref, elnb_ref,
                 wqkv_ref, bqkv_ref, wo_ref, bo_ref, ln1g_ref, ln1b_ref,
                 wi_ref, bi_ref, wf_ref, bf_ref, ln2g_ref, ln2b_ref,
                 wp_ref, bp_ref,
                 w1_ref, b1_ref, g1_ref, be1_ref,
                 w2_ref, b2_ref, g2_ref, be2_ref,
                 w3_ref, b3_ref,
                 out_ref):
    # ---- embeddings: fused visual projection + visual-slot add + LayerNorm ----
    # feat: (B, 2048) fp32, visw: (2048, H) fp32 -> visual token embedding (B, H)
    vis_row = jnp.dot(feat_ref[...], visw_ref[...],
                      preferred_element_type=jnp.float32) + visb_ref[...]     # (B, H)
    vis_full = jnp.broadcast_to(vis_row[:, None, :], (B, S, H)).reshape(B * S, H)
    row = jax.lax.broadcasted_iota(jnp.int32, (B * S, 1), 0)
    vis_slot = (row % S == (S - 1)).astype(jnp.float32)                        # (B*S, 1)
    x = emb_ref[...] + vis_slot * vis_full          # text rows untouched, visual rows filled
    x = _layernorm(x, elng_ref[...], elnb_ref[...], LN_EPS_BERT)               # (B*S, H)

    mask = mask_ref[...]                 # (B, 1, S) additive attention bias
    scale = 1.0 / (DH ** 0.5)

    # ---- encoder layers (static unroll over N_LAYERS) ----
    for l in range(N_LAYERS):
        qkv = jnp.dot(x, wqkv_ref[l],
                      preferred_element_type=jnp.float32) + bqkv_ref[l]        # (B*S, 3H)
        q3 = qkv[:, 0 * H:1 * H].reshape(B, S, H)
        k3 = qkv[:, 1 * H:2 * H].reshape(B, S, H)
        v3 = qkv[:, 2 * H:3 * H].reshape(B, S, H)

        ctx_heads = []
        for h in range(NH):              # static unroll; each head batched over B
            sl = slice(h * DH, (h + 1) * DH)
            qh, kh, vh = q3[:, :, sl], k3[:, :, sl], v3[:, :, sl]
            scores = jax.lax.dot_general(
                qh, kh, (((2,), (2,)), ((0,), (0,))),
                preferred_element_type=jnp.float32) * scale                    # (B, S, S)
            scores = scores + mask
            m = jnp.max(scores, axis=-1, keepdims=True)
            e = jnp.exp(scores - m)
            p = e * pl.reciprocal(jnp.sum(e, axis=-1, keepdims=True), approx=True)
            ctx_heads.append(jax.lax.dot_general(
                p, vh, (((2,), (1,)), ((0,), (0,))),
                preferred_element_type=jnp.float32))                           # (B, S, DH)
        ctx = jnp.concatenate(ctx_heads, axis=-1).reshape(B * S, H)

        attn_out = jnp.dot(ctx, wo_ref[l],
                           preferred_element_type=jnp.float32) + bo_ref[l]
        x1 = _layernorm(x + attn_out, ln1g_ref[l], ln1b_ref[l], LN_EPS_BERT)

        # TODO(synk): HF Roberta uses exact erf-GELU; tanh-approximate GELU kept
        # here for robust Mosaic lowering (max abs diff ~1e-3).
        inter = jax.nn.gelu(
            jnp.dot(x1, wi_ref[l], preferred_element_type=jnp.float32) + bi_ref[l],
            approximate=True)
        ffn = jnp.dot(inter, wf_ref[l],
                      preferred_element_type=jnp.float32) + bf_ref[l]
        x = _layernorm(x1 + ffn, ln2g_ref[l], ln2b_ref[l], LN_EPS_BERT)

    # ---- pooler: CLS token = row b*S of the flattened activation ----
    cls = jnp.concatenate([x[b * S:b * S + 1, :] for b in range(B)], axis=0)   # (B, H)
    pooled = jnp.tanh(jnp.dot(cls, wp_ref[...],
                              preferred_element_type=jnp.float32) + bp_ref[...])

    # ---- 13 classifier heads, batched over the head axis (no grid) ----
    xh = jnp.broadcast_to(pooled.astype(jnp.bfloat16)[None, :, :],
                          (N_CLS_HEADS, B, H))                                 # (13, B, H)
    h1 = jnp.einsum('hbk,hkn->hbn', xh, w1_ref[...],
                    preferred_element_type=jnp.float32) + b1_ref[...]          # (13, B, 512)
    h1 = _leaky_relu(_layernorm(h1, g1_ref[...], be1_ref[...], LN_EPS_CLS))
    h2 = jnp.einsum('hbk,hkn->hbn', h1.astype(jnp.bfloat16), w2_ref[...],
                    preferred_element_type=jnp.float32) + b2_ref[...]          # (13, B, 256)
    h2 = _leaky_relu(_layernorm(h2, g2_ref[...], be2_ref[...], LN_EPS_CLS))
    # w3 is stored as (heads, C, in) — contract over the shared last dim.
    out_ref[...] = jnp.einsum('hbk,hck->hbc', h2.astype(jnp.bfloat16), w3_ref[...],
                              preferred_element_type=jnp.float32) + b3_ref[...]


def fused_forward(emb_txt, features, mask_bias, vis_bconst, params):
    enc, clsp = params["enc"], params["cls"]
    # No grid: everything fits in VMEM (~6.5 MB padded weights), so the whole
    # forward is a single invocation — one launch, whole arrays resident in VMEM.
    return pl.pallas_call(
        fused_kernel,
        out_shape=jax.ShapeDtypeStruct((N_CLS_HEADS, B, N_CLASSES), jnp.float32),
        compiler_params=pltpu.CompilerParams(vmem_limit_bytes=32 * 1024 * 1024),
    )(emb_txt, features, mask_bias,
      params["vis_proj_w"], vis_bconst, params["emb_ln_g"], params["emb_ln_b"],
      enc["wqkv"], enc["bqkv"], enc["wo"], enc["bo"], enc["ln1g"], enc["ln1b"],
      enc["wi"], enc["bi"], enc["wf"], enc["bf"], enc["ln2g"], enc["ln2b"],
      params["pool_w"], params["pool_b"],
      clsp["w1"], clsp["b1"], clsp["g1"], clsp["be1"],
      clsp["w2"], clsp["b2"], clsp["g2"], clsp["be2"],
      clsp["w3"], clsp["b3"])


# ---------------------------- parameter init ---------------------------------
def init_params(key):
    keys = iter(jax.random.split(key, 64))

    def nrm(shape, scale=0.02, dtype=jnp.float32):
        return (scale * jax.random.normal(next(keys), shape)).astype(dtype)

    p = {
        "word_emb": nrm((VOCAB, H)),
        "pos_emb": nrm((MAX_POS, H)),
        "type_emb": nrm((2, H)),
        "vis_proj_w": nrm((VIS_DIM, H)),            # fp32: small vs classifier tail
        "vis_proj_b": jnp.zeros((H,), jnp.float32),
        "vis_type_emb": nrm((2, H)),
        "vis_pos_emb": nrm((MAX_POS, H)),
        "emb_ln_g": jnp.ones((1, H), jnp.float32),
        "emb_ln_b": jnp.zeros((1, H), jnp.float32),
        "pool_w": nrm((H, H)),
        "pool_b": jnp.zeros((1, H), jnp.float32),
    }

    # Encoder layer weights stacked along a leading layer axis; Q/K/V packed.
    p["enc"] = {
        "wqkv": nrm((N_LAYERS, H, 3 * H)),
        "bqkv": jnp.zeros((N_LAYERS, 1, 3 * H), jnp.float32),
        "wo": nrm((N_LAYERS, H, H)),
        "bo": jnp.zeros((N_LAYERS, 1, H), jnp.float32),
        "ln1g": jnp.ones((N_LAYERS, 1, H), jnp.float32),
        "ln1b": jnp.zeros((N_LAYERS, 1, H), jnp.float32),
        "wi": nrm((N_LAYERS, H, INTER)),
        "bi": jnp.zeros((N_LAYERS, 1, INTER), jnp.float32),
        "wf": nrm((N_LAYERS, INTER, H)),
        "bf": jnp.zeros((N_LAYERS, 1, H), jnp.float32),
        "ln2g": jnp.ones((N_LAYERS, 1, H), jnp.float32),
        "ln2b": jnp.zeros((N_LAYERS, 1, H), jnp.float32),
    }

    # Classifier: heads stacked along a leading axis; big weights in bf16
    # (mem-bound tail), fp32 accumulation inside the kernel.
    p["cls"] = {
        "w1": nrm((N_CLS_HEADS, H, 512), dtype=jnp.bfloat16),
        "b1": jnp.zeros((N_CLS_HEADS, 1, 512), jnp.float32),
        "g1": jnp.ones((N_CLS_HEADS, 1, 512), jnp.float32),
        "be1": jnp.zeros((N_CLS_HEADS, 1, 512), jnp.float32),
        "w2": nrm((N_CLS_HEADS, 512, 256), dtype=jnp.bfloat16),
        "b2": jnp.zeros((N_CLS_HEADS, 1, 256), jnp.float32),
        "g2": jnp.ones((N_CLS_HEADS, 1, 256), jnp.float32),
        "be2": jnp.zeros((N_CLS_HEADS, 1, 256), jnp.float32),
        # (heads, C, in) orientation (PyTorch nn.Linear.weight layout) to avoid
        # padding the 3-wide output dim up to 128 lanes in HBM/VMEM.
        "w3": nrm((N_CLS_HEADS, N_CLASSES, 256), dtype=jnp.bfloat16),
        "b3": jnp.zeros((N_CLS_HEADS, 1, N_CLASSES), jnp.float32),
    }
    return p


# ------------------------------- forward --------------------------------------
def forward(params, input_ids, input_masks, segment_ids, features):
    # --- VisualBert text embeddings (glue: table gathers stay in plain JAX) ---
    # TODO(synk): embedding-table gathers have no clean Pallas equivalent at this
    # scale; kept as XLA glue feeding the fused kernel.
    pos_ids = jnp.arange(L_TXT)
    text_emb = (params["word_emb"][input_ids]
                + params["pos_emb"][pos_ids][None, :, :]
                + params["type_emb"][segment_ids])                       # (B, L_TXT, H)
    # pad the visual slot with zeros -> (B, S, H), flatten to (B*S, H)
    emb_txt = jnp.pad(text_emb, ((0, 0), (0, L_VIS), (0, 0))).reshape(B * S, H)

    # constant part of the visual-token embedding: proj bias + token_type=1 + pos=0
    vis_bconst = (params["vis_proj_b"]
                  + params["vis_type_emb"][1]
                  + params["vis_pos_emb"][0]).reshape(1, H)

    # extended attention mask: text mask ++ visual_attention_mask (all ones)
    mask = jnp.concatenate(
        [input_masks.astype(jnp.float32), jnp.ones((B, L_VIS), jnp.float32)], axis=1)
    mask_bias = ((1.0 - mask) * -1e9).reshape(B, 1, S)

    # --- single fused Pallas kernel: vis-proj + emb LN + encoder x2 + pooler
    #     + 13 classifiers ---
    logits = fused_forward(emb_txt, features, mask_bias, vis_bconst, params)
    return tuple(logits[i] for i in range(N_CLS_HEADS))


# -------------------------------- main ----------------------------------------
if __name__ == "__main__":
    key = jax.random.PRNGKey(0)
    k_ids, k_feat, k_params = jax.random.split(key, 3)

    input_ids = jax.random.randint(k_ids, (B, L_TXT), 0, VOCAB, dtype=jnp.int32)
    input_masks = jnp.array([[1, 1, 1, 1, 1, 1, 1],
                             [1, 1, 1, 1, 1, 0, 0]], dtype=jnp.float32)
    segment_ids = jnp.zeros((B, L_TXT), dtype=jnp.int32)
    features = jax.random.normal(k_feat, (B, VIS_DIM), dtype=jnp.float32)

    params = init_params(k_params)

    fwd = jax.jit(forward)
    out = fwd(params, input_ids, input_masks, segment_ids, features)
    jax.block_until_ready(out)

    assert len(out) == N_CLS_HEADS
    assert all(o.shape == (B, N_CLASSES) for o in out)
    assert all(bool(jnp.all(jnp.isfinite(o))) for o in out)
    print("KERNEL_OK")
</pallas_src>

<mosaic_0001>
module attributes {stable_mosaic.version = 11 : i64} {
  func.func @fused_kernel(%arg0: memref<16x32xf32, #tpu.memory_space<vmem>>, %arg1: memref<2x2048xf32, #tpu.memory_space<vmem>>, %arg2: memref<2x1x8xf32, #tpu.memory_space<vmem>>, %arg3: memref<2048x32xf32, #tpu.memory_space<vmem>>, %arg4: memref<1x32xf32, #tpu.memory_space<vmem>>, %arg5: memref<1x32xf32, #tpu.memory_space<vmem>>, %arg6: memref<1x32xf32, #tpu.memory_space<vmem>>, %arg7: memref<2x32x96xf32, #tpu.memory_space<vmem>>, %arg8: memref<2x1x96xf32, #tpu.memory_space<vmem>>, %arg9: memref<2x32x32xf32, #tpu.memory_space<vmem>>, %arg10: memref<2x1x32xf32, #tpu.memory_space<vmem>>, %arg11: memref<2x1x32xf32, #tpu.memory_space<vmem>>, %arg12: memref<2x1x32xf32, #tpu.memory_space<vmem>>, %arg13: memref<2x32x64xf32, #tpu.memory_space<vmem>>, %arg14: memref<2x1x64xf32, #tpu.memory_space<vmem>>, %arg15: memref<2x64x32xf32, #tpu.memory_space<vmem>>, %arg16: memref<2x1x32xf32, #tpu.memory_space<vmem>>, %arg17: memref<2x1x32xf32, #tpu.memory_space<vmem>>, %arg18: memref<2x1x32xf32, #tpu.memory_space<vmem>>, %arg19: memref<32x32xf32, #tpu.memory_space<vmem>>, %arg20: memref<1x32xf32, #tpu.memory_space<vmem>>, %arg21: memref<13x32x512xbf16, #tpu.memory_space<vmem>>, %arg22: memref<13x1x512xf32, #tpu.memory_space<vmem>>, %arg23: memref<13x1x512xf32, #tpu.memory_space<vmem>>, %arg24: memref<13x1x512xf32, #tpu.memory_space<vmem>>, %arg25: memref<13x512x256xbf16, #tpu.memory_space<vmem>>, %arg26: memref<13x1x256xf32, #tpu.memory_space<vmem>>, %arg27: memref<13x1x256xf32, #tpu.memory_space<vmem>>, %arg28: memref<13x1x256xf32, #tpu.memory_space<vmem>>, %arg29: memref<13x3x256xbf16, #tpu.memory_space<vmem>>, %arg30: memref<13x1x3xf32, #tpu.memory_space<vmem>>, %arg31: memref<13x2x3xf32, #tpu.memory_space<vmem>>) attributes {dimension_semantics = [], scalar_prefetch = 0 : i64, scratch_operands = 0 : i64, tpu.core_type = #tpu.core_type<tc>} {
    %c0 = arith.constant 0 : index
    %c0_0 = arith.constant 0 : index
    %0 = vector.load %arg1[%c0, %c0_0] : memref<2x2048xf32, #tpu.memory_space<vmem>>, vector<2x2048xf32>
    %c0_1 = arith.constant 0 : index
    %c0_2 = arith.constant 0 : index
    %1 = vector.load %arg3[%c0_1, %c0_2] : memref<2048x32xf32, #tpu.memory_space<vmem>>, vector<2048x32xf32>
    %cst = arith.constant dense<0.000000e+00> : vector<2x32xf32>
    %2 = tpu.matmul %0, %1, %cst {dimension_numbers = #tpu.dot_dimension_numbers<[1], [0], [0], [1], [0, 0, 1, 1], [], []>} : vector<2x2048xf32>, vector<2048x32xf32>, vector<2x32xf32> -> vector<2x32xf32>
    %c0_3 = arith.constant 0 : index
    %c0_4 = arith.constant 0 : index
    %3 = vector.load %arg4[%c0_3, %c0_4] : memref<1x32xf32, #tpu.memory_space<vmem>>, vector<1x32xf32>
    %4 = vector.broadcast %3 : vector<1x32xf32> to vector<2x32xf32>
    %5 = arith.addf %2, %4 : vector<2x32xf32>
    %6 = vector.shape_cast %5 : vector<2x32xf32> to vector<2x1x32xf32>
    %7 = vector.shape_cast %6 : vector<2x1x32xf32> to vector<2x1x32xf32>
    %8 = vector.broadcast %7 : vector<2x1x32xf32> to vector<2x8x32xf32>
    %9 = vector.shape_cast %8 : vector<2x8x32xf32> to vector<16x32xf32>
    %10 = tpu.iota {dimensions = array<i32: 0>} : vector<16x1xi32>
    %c8_i32 = arith.constant 8 : i32
    %c0_i32 = arith.constant 0 : i32
    %11 = arith.cmpi eq, %c8_i32, %c0_i32 : i32
    %c1_i32 = arith.constant 1 : i32
    %12 = arith.select %11, %c1_i32, %c8_i32 : i32
    %13 = vector.broadcast %12 : i32 to vector<16x1xi32>
    %14 = arith.remsi %10, %13 : vector<16x1xi32>
    %c0_i32_5 = arith.constant 0 : i32
    %15 = vector.broadcast %c0_i32_5 : i32 to vector<16x1xi32>
    %16 = arith.cmpi ne, %14, %15 : vector<16x1xi32>
    %c0_i32_6 = arith.constant 0 : i32
    %17 = vector.broadcast %c0_i32_6 : i32 to vector<16x1xi32>
    %18 = arith.cmpi slt, %14, %17 : vector<16x1xi32>
    %c0_i32_7 = arith.constant 0 : i32
    %19 = arith.cmpi slt, %12, %c0_i32_7 : i32
    %20 = vector.broadcast %19 : i1 to vector<16x1xi1>
    %21 = vector.broadcast %20 : vector<16x1xi1> to vector<16x1xi1>
    %22 = arith.xori %18, %21 : vector<16x1xi1>
    %23 = arith.andi %22, %16 : vector<16x1xi1>
    %24 = vector.broadcast %12 : i32 to vector<16x1xi32>
    %25 = arith.addi %14, %24 : vector<16x1xi32>
    %26 = arith.select %23, %25, %14 : vector<16x1xi1>, vector<16x1xi32>
    %c7_i32 = arith.constant 7 : i32
    %27 = vector.broadcast %c7_i32 : i32 to vector<16x1xi32>
    %28 = arith.cmpi eq, %26, %27 : vector<16x1xi32>
    %29 = arith.extui %28 : vector<16x1xi1> to vector<16x1xi32>
    %30 = arith.sitofp %29 : vector<16x1xi32> to vector<16x1xf32>
    %c0_8 = arith.constant 0 : index
    %c0_9 = arith.constant 0 : index
    %31 = vector.load %arg0[%c0_8, %c0_9] : memref<16x32xf32, #tpu.memory_space<vmem>>, vector<16x32xf32>
    %32 = vector.broadcast %30 : vector<16x1xf32> to vector<16x32xf32>
    %33 = arith.mulf %32, %9 : vector<16x32xf32>
    %34 = arith.addf %31, %33 : vector<16x32xf32>
    %c0_10 = arith.constant 0 : index
    %c0_11 = arith.constant 0 : index
    %35 = vector.load %arg5[%c0_10, %c0_11] : memref<1x32xf32, #tpu.memory_space<vmem>>, vector<1x32xf32>
    %c0_12 = arith.constant 0 : index
    %c0_13 = arith.constant 0 : index
    %36 = vector.load %arg6[%c0_12, %c0_13] : memref<1x32xf32, #tpu.memory_space<vmem>>, vector<1x32xf32>
    %cst_14 = arith.constant dense<0.000000e+00> : vector<16xf32>
    %37 = vector.multi_reduction <add>, %34, %cst_14 [1] : vector<16x32xf32> to vector<16xf32>
    %38 = vector.shape_cast %37 : vector<16xf32> to vector<16x1xf32>
    %cst_15 = arith.constant 3.200000e+01 : f32
    %39 = vector.broadcast %cst_15 : f32 to vector<16x1xf32>
    %40 = arith.divf %38, %39 : vector<16x1xf32>
    %41 = vector.broadcast %40 : vector<16x1xf32> to vector<16x32xf32>
    %42 = arith.subf %34, %41 : vector<16x32xf32>
    %43 = arith.mulf %42, %42 : vector<16x32xf32>
    %cst_16 = arith.constant dense<0.000000e+00> : vector<16xf32>
    %44 = vector.multi_reduction <add>, %43, %cst_16 [1] : vector<16x32xf32> to vector<16xf32>
    %45 = vector.shape_cast %44 : vector<16xf32> to vector<16x1xf32>
    %cst_17 = arith.constant 3.200000e+01 : f32
    %46 = vector.broadcast %cst_17 : f32 to vector<16x1xf32>
    %47 = arith.divf %45, %46 : vector<16x1xf32>
    %48 = vector.broadcast %40 : vector<16x1xf32> to vector<16x32xf32>
    %49 = arith.subf %34, %48 : vector<16x32xf32>
    %cst_18 = arith.constant 9.99999996E-13 : f32
    %50 = vector.broadcast %cst_18 : f32 to vector<16x1xf32>
    %51 = arith.addf %47, %50 : vector<16x1xf32>
    %52 = math.rsqrt %51 : vector<16x1xf32>
    %53 = vector.broadcast %52 : vector<16x1xf32> to vector<16x32xf32>
    %54 = arith.mulf %49, %53 : vector<16x32xf32>
    %55 = vector.broadcast %35 : vector<1x32xf32> to vector<16x32xf32>
    %56 = arith.mulf %54, %55 : vector<16x32xf32>
    %57 = vector.broadcast %36 : vector<1x32xf32> to vector<16x32xf32>
    %58 = arith.addf %56, %57 : vector<16x32xf32>
    %c0_19 = arith.constant 0 : index
    %c0_20 = arith.constant 0 : index
    %c0_21 = arith.constant 0 : index
    %59 = vector.load %arg2[%c0_19, %c0_20, %c0_21] : memref<2x1x8xf32, #tpu.memory_space<vmem>>, vector<2x1x8xf32>
    %c0_22 = arith.constant 0 : index
    %c0_23 = arith.constant 0 : index
    %c0_24 = arith.constant 0 : index
    %60 = vector.load %arg7[%c0_22, %c0_23, %c0_24] : memref<2x32x96xf32, #tpu.memory_space<vmem>>, vector<1x32x96xf32>
    %61 = vector.shape_cast %60 : vector<1x32x96xf32> to vector<32x96xf32>
    %cst_25 = arith.constant dense<0.000000e+00> : vector<16x96xf32>
    %62 = tpu.matmul %58, %61, %cst_25 {dimension_numbers = #tpu.dot_dimension_numbers<[1], [0], [0], [1], [0, 0, 1, 1], [], []>} : vector<16x32xf32>, vector<32x96xf32>, vector<16x96xf32> -> vector<16x96xf32>
    %c0_26 = arith.constant 0 : index
    %c0_27 = arith.constant 0 : index
    %c0_28 = arith.constant 0 : index
    %63 = vector.load %arg8[%c0_26, %c0_27, %c0_28] : memref<2x1x96xf32, #tpu.memory_space<vmem>>, vector<1x1x96xf32>
    %64 = vector.shape_cast %63 : vector<1x1x96xf32> to vector<1x96xf32>
    %65 = vector.broadcast %64 : vector<1x96xf32> to vector<16x96xf32>
    %66 = arith.addf %62, %65 : vector<16x96xf32>
    %67 = vector.extract_strided_slice %66 {offsets = [0, 0], sizes = [16, 32], strides = [1, 1]} : vector<16x96xf32> to vector<16x32xf32>
    %68 = vector.shape_cast %67 : vector<16x32xf32> to vector<2x8x32xf32>
    %69 = vector.extract_strided_slice %66 {offsets = [0, 32], sizes = [16, 32], strides = [1, 1]} : vector<16x96xf32> to vector<16x32xf32>
    %70 = vector.shape_cast %69 : vector<16x32xf32> to vector<2x8x32xf32>
    %71 = vector.extract_strided_slice %66 {offsets = [0, 64], sizes = [16, 32], strides = [1, 1]} : vector<16x96xf32> to vector<16x32xf32>
    %72 = vector.shape_cast %71 : vector<16x32xf32> to vector<2x8x32xf32>
    %73 = vector.extract_strided_slice %68 {offsets = [0, 0, 0], sizes = [2, 8, 8], strides = [1, 1, 1]} : vector<2x8x32xf32> to vector<2x8x8xf32>
    %74 = vector.extract_strided_slice %70 {offsets = [0, 0, 0], sizes = [2, 8, 8], strides = [1, 1, 1]} : vector<2x8x32xf32> to vector<2x8x8xf32>
    %75 = vector.extract_strided_slice %72 {offsets = [0, 0, 0], sizes = [2, 8, 8], strides = [1, 1, 1]} : vector<2x8x32xf32> to vector<2x8x8xf32>
    %cst_29 = arith.constant dense<0.000000e+00> : vector<2x8x8xf32>
    %76 = tpu.matmul %73, %74, %cst_29 {dimension_numbers = #tpu.dot_dimension_numbers<[2], [2], [1], [1], [0, 0, 0, 1, 1, 1], [0], [0]>} : vector<2x8x8xf32>, vector<2x8x8xf32>, vector<2x8x8xf32> -> vector<2x8x8xf32>
    %cst_30 = arith.constant 0.353553385 : f32
    %77 = vector.broadcast %cst_30 : f32 to vector<2x8x8xf32>
    %78 = arith.mulf %76, %77 : vector<2x8x8xf32>
    %79 = vector.broadcast %59 : vector<2x1x8xf32> to vector<2x8x8xf32>
    %80 = arith.addf %78, %79 : vector<2x8x8xf32>
    %cst_31 = arith.constant dense<0xFF800000> : vector<2x8xf32>
    %81 = vector.multi_reduction <maximumf>, %80, %cst_31 [2] : vector<2x8x8xf32> to vector<2x8xf32>
    %82 = vector.shape_cast %81 : vector<2x8xf32> to vector<2x8x1xf32>
    %83 = vector.broadcast %82 : vector<2x8x1xf32> to vector<2x8x8xf32>
    %84 = arith.subf %80, %83 : vector<2x8x8xf32>
    %85 = math.exp %84 : vector<2x8x8xf32>
    %cst_32 = arith.constant dense<0.000000e+00> : vector<2x8xf32>
    %86 = vector.multi_reduction <add>, %85, %cst_32 [2] : vector<2x8x8xf32> to vector<2x8xf32>
    %87 = vector.shape_cast %86 : vector<2x8xf32> to vector<2x8x1xf32>
    %88 = tpu.reciprocal %87 {approx = true} : vector<2x8x1xf32> -> vector<2x8x1xf32>
    %89 = vector.broadcast %88 : vector<2x8x1xf32> to vector<2x8x8xf32>
    %90 = arith.mulf %85, %89 : vector<2x8x8xf32>
    %cst_33 = arith.constant dense<0.000000e+00> : vector<2x8x8xf32>
    %91 = tpu.matmul %90, %75, %cst_33 {dimension_numbers = #tpu.dot_dimension_numbers<[2], [1], [1], [2], [0, 0, 0, 1, 1, 2], [0], [0]>} : vector<2x8x8xf32>, vector<2x8x8xf32>, vector<2x8x8xf32> -> vector<2x8x8xf32>
    %92 = vector.extract_strided_slice %68 {offsets = [0, 0, 8], sizes = [2, 8, 8], strides = [1, 1, 1]} : vector<2x8x32xf32> to vector<2x8x8xf32>
    %93 = vector.extract_strided_slice %70 {offsets = [0, 0, 8], sizes = [2, 8, 8], strides = [1, 1, 1]} : vector<2x8x32xf32> to vector<2x8x8xf32>
    %94 = vector.extract_strided_slice %72 {offsets = [0, 0, 8], sizes = [2, 8, 8], strides = [1, 1, 1]} : vector<2x8x32xf32> to vector<2x8x8xf32>
    %cst_34 = arith.constant dense<0.000000e+00> : vector<2x8x8xf32>
    %95 = tpu.matmul %92, %93, %cst_34 {dimension_numbers = #tpu.dot_dimension_numbers<[2], [2], [1], [1], [0, 0, 0, 1, 1, 1], [0], [0]>} : vector<2x8x8xf32>, vector<2x8x8xf32>, vector<2x8x8xf32> -> vector<2x8x8xf32>
    %cst_35 = arith.constant 0.353553385 : f32
    %96 = vector.broadcast %cst_35 : f32 to vector<2x8x8xf32>
    %97 = arith.mulf %95, %96 : vector<2x8x8xf32>
    %98 = vector.broadcast %59 : vector<2x1x8xf32> to vector<2x8x8xf32>
    %99 = arith.addf %97, %98 : vector<2x8x8xf32>
    %cst_36 = arith.constant dense<0xFF800000> : vector<2x8xf32>
    %100 = vector.multi_reduction <maximumf>, %99, %cst_36 [2] : vector<2x8x8xf32> to vector<2x8xf32>
    %101 = vector.shape_cast %100 : vector<2x8xf32> to vector<2x8x1xf32>
    %102 = vector.broadcast %101 : vector<2x8x1xf32> to vector<2x8x8xf32>
    %103 = arith.subf %99, %102 : vector<2x8x8xf32>
    %104 = math.exp %103 : vector<2x8x8xf32>
    %cst_37 = arith.constant dense<0.000000e+00> : vector<2x8xf32>
    %105 = vector.multi_reduction <add>, %104, %cst_37 [2] : vector<2x8x8xf32> to vector<2x8xf32>
    %106 = vector.shape_cast %105 : vector<2x8xf32> to vector<2x8x1xf32>
    %107 = tpu.reciprocal %106 {approx = true} : vector<2x8x1xf32> -> vector<2x8x1xf32>
    %108 = vector.broadcast %107 : vector<2x8x1xf32> to vector<2x8x8xf32>
    %109 = arith.mulf %104, %108 : vector<2x8x8xf32>
    %cst_38 = arith.constant dense<0.000000e+00> : vector<2x8x8xf32>
    %110 = tpu.matmul %109, %94, %cst_38 {dimension_numbers = #tpu.dot_dimension_numbers<[2], [1], [1], [2], [0, 0, 0, 1, 1, 2], [0], [0]>} : vector<2x8x8xf32>, vector<2x8x8xf32>, vector<2x8x8xf32> -> vector<2x8x8xf32>
    %111 = vector.extract_strided_slice %68 {offsets = [0, 0, 16], sizes = [2, 8, 8], strides = [1, 1, 1]} : vector<2x8x32xf32> to vector<2x8x8xf32>
    %112 = vector.extract_strided_slice %70 {offsets = [0, 0, 16], sizes = [2, 8, 8], strides = [1, 1, 1]} : vector<2x8x32xf32> to vector<2x8x8xf32>
    %113 = vector.extract_strided_slice %72 {offsets = [0, 0, 16], sizes = [2, 8, 8], strides = [1, 1, 1]} : vector<2x8x32xf32> to vector<2x8x8xf32>
    %cst_39 = arith.constant dense<0.000000e+00> : vector<2x8x8xf32>
    %114 = tpu.matmul %111, %112, %cst_39 {dimension_numbers = #tpu.dot_dimension_numbers<[2], [2], [1], [1], [0, 0, 0, 1, 1, 1], [0], [0]>} : vector<2x8x8xf32>, vector<2x8x8xf32>, vector<2x8x8xf32> -> vector<2x8x8xf32>
    %cst_40 = arith.constant 0.353553385 : f32
    %115 = vector.broadcast %cst_40 : f32 to vector<2x8x8xf32>
    %116 = arith.mulf %114, %115 : vector<2x8x8xf32>
    %117 = vector.broadcast %59 : vector<2x1x8xf32> to vector<2x8x8xf32>
    %118 = arith.addf %116, %117 : vector<2x8x8xf32>
    %cst_41 = arith.constant dense<0xFF800000> : vector<2x8xf32>
    %119 = vector.multi_reduction <maximumf>, %118, %cst_41 [2] : vector<2x8x8xf32> to vector<2x8xf32>
    %120 = vector.shape_cast %119 : vector<2x8xf32> to vector<2x8x1xf32>
    %121 = vector.broadcast %120 : vector<2x8x1xf32> to vector<2x8x8xf32>
    %122 = arith.subf %118, %121 : vector<2x8x8xf32>
    %123 = math.exp %122 : vector<2x8x8xf32>
    %cst_42 = arith.constant dense<0.000000e+00> : vector<2x8xf32>
    %124 = vector.multi_reduction <add>, %123, %cst_42 [2] : vector<2x8x8xf32> to vector<2x8xf32>
    %125 = vector.shape_cast %124 : vector<2x8xf32> to vector<2x8x1xf32>
    %126 = tpu.reciprocal %125 {approx = true} : vector<2x8x1xf32> -> vector<2x8x1xf32>
    %127 = vector.broadcast %126 : vector<2x8x1xf32> to vector<2x8x8xf32>
    %128 = arith.mulf %123, %127 : vector<2x8x8xf32>
    %cst_43 = arith.constant dense<0.000000e+00> : vector<2x8x8xf32>
    %129 = tpu.matmul %128, %113, %cst_43 {dimension_numbers = #tpu.dot_dimension_numbers<[2], [1], [1], [2], [0, 0, 0, 1, 1, 2], [0], [0]>} : vector<2x8x8xf32>, vector<2x8x8xf32>, vector<2x8x8xf32> -> vector<2x8x8xf32>
    %130 = vector.extract_strided_slice %68 {offsets = [0, 0, 24], sizes = [2, 8, 8], strides = [1, 1, 1]} : vector<2x8x32xf32> to vector<2x8x8xf32>
    %131 = vector.extract_strided_slice %70 {offsets = [0, 0, 24], sizes = [2, 8, 8], strides = [1, 1, 1]} : vector<2x8x32xf32> to vector<2x8x8xf32>
    %132 = vector.extract_strided_slice %72 {offsets = [0, 0, 24], sizes = [2, 8, 8], strides = [1, 1, 1]} : vector<2x8x32xf32> to vector<2x8x8xf32>
    %cst_44 = arith.constant dense<0.000000e+00> : vector<2x8x8xf32>
    %133 = tpu.matmul %130, %131, %cst_44 {dimension_numbers = #tpu.dot_dimension_numbers<[2], [2], [1], [1], [0, 0, 0, 1, 1, 1], [0], [0]>} : vector<2x8x8xf32>, vector<2x8x8xf32>, vector<2x8x8xf32> -> vector<2x8x8xf32>
    %cst_45 = arith.constant 0.353553385 : f32
    %134 = vector.broadcast %cst_45 : f32 to vector<2x8x8xf32>
    %135 = arith.mulf %133, %134 : vector<2x8x8xf32>
    %136 = vector.broadcast %59 : vector<2x1x8xf32> to vector<2x8x8xf32>
    %137 = arith.addf %135, %136 : vector<2x8x8xf32>
    %cst_46 = arith.constant dense<0xFF800000> : vector<2x8xf32>
    %138 = vector.multi_reduction <maximumf>, %137, %cst_46 [2] : vector<2x8x8xf32> to vector<2x8xf32>
    %139 = vector.shape_cast %138 : vector<2x8xf32> to vector<2x8x1xf32>
    %140 = vector.broadcast %139 : vector<2x8x1xf32> to vector<2x8x8xf32>
    %141 = arith.subf %137, %140 : vector<2x8x8xf32>
    %142 = math.exp %141 : vector<2x8x8xf32>
    %cst_47 = arith.constant dense<0.000000e+00> : vector<2x8xf32>
    %143 = vector.multi_reduction <add>, %142, %cst_47 [2] : vector<2x8x8xf32> to vector<2x8xf32>
    %144 = vector.shape_cast %143 : vector<2x8xf32> to vector<2x8x1xf32>
    %145 = tpu.reciprocal %144 {approx = true} : vector<2x8x1xf32> -> vector<2x8x1xf32>
    %146 = vector.broadcast %145 : vector<2x8x1xf32> to vector<2x8x8xf32>
    %147 = arith.mulf %142, %146 : vector<2x8x8xf32>
    %cst_48 = arith.constant dense<0.000000e+00> : vector<2x8x8xf32>
    %148 = tpu.matmul %147, %132, %cst_48 {dimension_numbers = #tpu.dot_dimension_numbers<[2], [1], [1], [2], [0, 0, 0, 1, 1, 2], [0], [0]>} : vector<2x8x8xf32>, vector<2x8x8xf32>, vector<2x8x8xf32> -> vector<2x8x8xf32>
    %149 = tpu.concatenate %91, %110, %129, %148 in 2 : vector<2x8x8xf32>, vector<2x8x8xf32>, vector<2x8x8xf32>, vector<2x8x8xf32> -> vector<2x8x32xf32>
    %150 = vector.shape_cast %149 : vector<2x8x32xf32> to vector<16x32xf32>
    %c0_49 = arith.constant 0 : index
    %c0_50 = arith.constant 0 : index
    %c0_51 = arith.constant 0 : index
    %151 = vector.load %arg9[%c0_49, %c0_50, %c0_51] : memref<2x32x32xf32, #tpu.memory_space<vmem>>, vector<1x32x32xf32>
    %152 = vector.shape_cast %151 : vector<1x32x32xf32> to vector<32x32xf32>
    %cst_52 = arith.constant dense<0.000000e+00> : vector<16x32xf32>
    %153 = tpu.matmul %150, %152, %cst_52 {dimension_numbers = #tpu.dot_dimension_numbers<[1], [0], [0], [1], [0, 0, 1, 1], [], []>} : vector<16x32xf32>, vector<32x32xf32>, vector<16x32xf32> -> vector<16x32xf32>
    %c0_53 = arith.constant 0 : index
    %c0_54 = arith.constant 0 : index
    %c0_55 = arith.constant 0 : index
    %154 = vector.load %arg10[%c0_53, %c0_54, %c0_55] : memref<2x1x32xf32, #tpu.memory_space<vmem>>, vector<1x1x32xf32>
    %155 = vector.shape_cast %154 : vector<1x1x32xf32> to vector<1x32xf32>
    %156 = vector.broadcast %155 : vector<1x32xf32> to vector<16x32xf32>
    %157 = arith.addf %153, %156 : vector<16x32xf32>
    %158 = arith.addf %58, %157 : vector<16x32xf32>
    %c0_56 = arith.constant 0 : index
    %c0_57 = arith.constant 0 : index
    %c0_58 = arith.constant 0 : index
    %159 = vector.load %arg11[%c0_56, %c0_57, %c0_58] : memref<2x1x32xf32, #tpu.memory_space<vmem>>, vector<1x1x32xf32>
    %160 = vector.shape_cast %159 : vector<1x1x32xf32> to vector<1x32xf32>
    %c0_59 = arith.constant 0 : index
    %c0_60 = arith.constant 0 : index
    %c0_61 = arith.constant 0 : index
    %161 = vector.load %arg12[%c0_59, %c0_60, %c0_61] : memref<2x1x32xf32, #tpu.memory_space<vmem>>, vector<1x1x32xf32>
    %162 = vector.shape_cast %161 : vector<1x1x32xf32> to vector<1x32xf32>
    %cst_62 = arith.constant dense<0.000000e+00> : vector<16xf32>
    %163 = vector.multi_reduction <add>, %158, %cst_62 [1] : vector<16x32xf32> to vector<16xf32>
    %164 = vector.shape_cast %163 : vector<16xf32> to vector<16x1xf32>
    %cst_63 = arith.constant 3.200000e+01 : f32
    %165 = vector.broadcast %cst_63 : f32 to vector<16x1xf32>
    %166 = arith.divf %164, %165 : vector<16x1xf32>
    %167 = vector.broadcast %166 : vector<16x1xf32> to vector<16x32xf32>
    %168 = arith.subf %158, %167 : vector<16x32xf32>
    %169 = arith.mulf %168, %168 : vector<16x32xf32>
    %cst_64 = arith.constant dense<0.000000e+00> : vector<16xf32>
    %170 = vector.multi_reduction <add>, %169, %cst_64 [1] : vector<16x32xf32> to vector<16xf32>
    %171 = vector.shape_cast %170 : vector<16xf32> to vector<16x1xf32>
    %cst_65 = arith.constant 3.200000e+01 : f32
    %172 = vector.broadcast %cst_65 : f32 to vector<16x1xf32>
    %173 = arith.divf %171, %172 : vector<16x1xf32>
    %174 = vector.broadcast %166 : vector<16x1xf32> to vector<16x32xf32>
    %175 = arith.subf %158, %174 : vector<16x32xf32>
    %cst_66 = arith.constant 9.99999996E-13 : f32
    %176 = vector.broadcast %cst_66 : f32 to vector<16x1xf32>
    %177 = arith.addf %173, %176 : vector<16x1xf32>
    %178 = math.rsqrt %177 : vector<16x1xf32>
    %179 = vector.broadcast %178 : vector<16x1xf32> to vector<16x32xf32>
    %180 = arith.mulf %175, %179 : vector<16x32xf32>
    %181 = vector.broadcast %160 : vector<1x32xf32> to vector<16x32xf32>
    %182 = arith.mulf %180, %181 : vector<16x32xf32>
    %183 = vector.broadcast %162 : vector<1x32xf32> to vector<16x32xf32>
    %184 = arith.addf %182, %183 : vector<16x32xf32>
    %c0_67 = arith.constant 0 : index
    %c0_68 = arith.constant 0 : index
    %c0_69 = arith.constant 0 : index
    %185 = vector.load %arg13[%c0_67, %c0_68, %c0_69] : memref<2x32x64xf32, #tpu.memory_space<vmem>>, vector<1x32x64xf32>
    %186 = vector.shape_cast %185 : vector<1x32x64xf32> to vector<32x64xf32>
    %cst_70 = arith.constant dense<0.000000e+00> : vector<16x64xf32>
    %187 = tpu.matmul %184, %186, %cst_70 {dimension_numbers = #tpu.dot_dimension_numbers<[1], [0], [0], [1], [0, 0, 1, 1], [], []>} : vector<16x32xf32>, vector<32x64xf32>, vector<16x64xf32> -> vector<16x64xf32>
    %c0_71 = arith.constant 0 : index
    %c0_72 = arith.constant 0 : index
    %c0_73 = arith.constant 0 : index
    %188 = vector.load %arg14[%c0_71, %c0_72, %c0_73] : memref<2x1x64xf32, #tpu.memory_space<vmem>>, vector<1x1x64xf32>
    %189 = vector.shape_cast %188 : vector<1x1x64xf32> to vector<1x64xf32>
    %190 = vector.broadcast %189 : vector<1x64xf32> to vector<16x64xf32>
    %191 = arith.addf %187, %190 : vector<16x64xf32>
    %192 = arith.mulf %191, %191 : vector<16x64xf32>
    %193 = arith.mulf %191, %192 : vector<16x64xf32>
    %cst_74 = arith.constant 4.471500e-02 : f32
    %194 = vector.broadcast %cst_74 : f32 to vector<16x64xf32>
    %195 = arith.mulf %194, %193 : vector<16x64xf32>
    %196 = arith.addf %191, %195 : vector<16x64xf32>
    %cst_75 = arith.constant 0.797884583 : f32
    %197 = vector.broadcast %cst_75 : f32 to vector<16x64xf32>
    %198 = arith.mulf %197, %196 : vector<16x64xf32>
    %199 = math.tanh %198 : vector<16x64xf32>
    %cst_76 = arith.constant 1.000000e+00 : f32
    %200 = vector.broadcast %cst_76 : f32 to vector<16x64xf32>
    %201 = arith.addf %200, %199 : vector<16x64xf32>
    %cst_77 = arith.constant 5.000000e-01 : f32
    %202 = vector.broadcast %cst_77 : f32 to vector<16x64xf32>
    %203 = arith.mulf %202, %201 : vector<16x64xf32>
    %204 = arith.mulf %191, %203 : vector<16x64xf32>
    %c0_78 = arith.constant 0 : index
    %c0_79 = arith.constant 0 : index
    %c0_80 = arith.constant 0 : index
    %205 = vector.load %arg15[%c0_78, %c0_79, %c0_80] : memref<2x64x32xf32, #tpu.memory_space<vmem>>, vector<1x64x32xf32>
    %206 = vector.shape_cast %205 : vector<1x64x32xf32> to vector<64x32xf32>
    %cst_81 = arith.constant dense<0.000000e+00> : vector<16x32xf32>
    %207 = tpu.matmul %204, %206, %cst_81 {dimension_numbers = #tpu.dot_dimension_numbers<[1], [0], [0], [1], [0, 0, 1, 1], [], []>} : vector<16x64xf32>, vector<64x32xf32>, vector<16x32xf32> -> vector<16x32xf32>
    %c0_82 = arith.constant 0 : index
    %c0_83 = arith.constant 0 : index
    %c0_84 = arith.constant 0 : index
    %208 = vector.load %arg16[%c0_82, %c0_83, %c0_84] : memref<2x1x32xf32, #tpu.memory_space<vmem>>, vector<1x1x32xf32>
    %209 = vector.shape_cast %208 : vector<1x1x32xf32> to vector<1x32xf32>
    %210 = vector.broadcast %209 : vector<1x32xf32> to vector<16x32xf32>
    %211 = arith.addf %207, %210 : vector<16x32xf32>
    %212 = arith.addf %184, %211 : vector<16x32xf32>
    %c0_85 = arith.constant 0 : index
    %c0_86 = arith.constant 0 : index
    %c0_87 = arith.constant 0 : index
    %213 = vector.load %arg17[%c0_85, %c0_86, %c0_87] : memref<2x1x32xf32, #tpu.memory_space<vmem>>, vector<1x1x32xf32>
    %214 = vector.shape_cast %213 : vector<1x1x32xf32> to vector<1x32xf32>
    %c0_88 = arith.constant 0 : index
    %c0_89 = arith.constant 0 : index
    %c0_90 = arith.constant 0 : index
    %215 = vector.load %arg18[%c0_88, %c0_89, %c0_90] : memref<2x1x32xf32, #tpu.memory_space<vmem>>, vector<1x1x32xf32>
    %216 = vector.shape_cast %215 : vector<1x1x32xf32> to vector<1x32xf32>
    %cst_91 = arith.constant dense<0.000000e+00> : vector<16xf32>
    %217 = vector.multi_reduction <add>, %212, %cst_91 [1] : vector<16x32xf32> to vector<16xf32>
    %218 = vector.shape_cast %217 : vector<16xf32> to vector<16x1xf32>
    %cst_92 = arith.constant 3.200000e+01 : f32
    %219 = vector.broadcast %cst_92 : f32 to vector<16x1xf32>
    %220 = arith.divf %218, %219 : vector<16x1xf32>
    %221 = vector.broadcast %220 : vector<16x1xf32> to vector<16x32xf32>
    %222 = arith.subf %212, %221 : vector<16x32xf32>
    %223 = arith.mulf %222, %222 : vector<16x32xf32>
    %cst_93 = arith.constant dense<0.000000e+00> : vector<16xf32>
    %224 = vector.multi_reduction <add>, %223, %cst_93 [1] : vector<16x32xf32> to vector<16xf32>
    %225 = vector.shape_cast %224 : vector<16xf32> to vector<16x1xf32>
    %cst_94 = arith.constant 3.200000e+01 : f32
    %226 = vector.broadcast %cst_94 : f32 to vector<16x1xf32>
    %227 = arith.divf %225, %226 : vector<16x1xf32>
    %228 = vector.broadcast %220 : vector<16x1xf32> to vector<16x32xf32>
    %229 = arith.subf %212, %228 : vector<16x32xf32>
    %cst_95 = arith.constant 9.99999996E-13 : f32
    %230 = vector.broadcast %cst_95 : f32 to vector<16x1xf32>
    %231 = arith.addf %227, %230 : vector<16x1xf32>
    %232 = math.rsqrt %231 : vector<16x1xf32>
    %233 = vector.broadcast %232 : vector<16x1xf32> to vector<16x32xf32>
    %234 = arith.mulf %229, %233 : vector<16x32xf32>
    %235 = vector.broadcast %214 : vector<1x32xf32> to vector<16x32xf32>
    %236 = arith.mulf %234, %235 : vector<16x32xf32>
    %237 = vector.broadcast %216 : vector<1x32xf32> to vector<16x32xf32>
    %238 = arith.addf %236, %237 : vector<16x32xf32>
    %c1 = arith.constant 1 : index
    %c0_96 = arith.constant 0 : index
    %c0_97 = arith.constant 0 : index
    %239 = vector.load %arg7[%c1, %c0_96, %c0_97] : memref<2x32x96xf32, #tpu.memory_space<vmem>>, vector<1x32x96xf32>
    %240 = vector.shape_cast %239 : vector<1x32x96xf32> to vector<32x96xf32>
    %cst_98 = arith.constant dense<0.000000e+00> : vector<16x96xf32>
    %241 = tpu.matmul %238, %240, %cst_98 {dimension_numbers = #tpu.dot_dimension_numbers<[1], [0], [0], [1], [0, 0, 1, 1], [], []>} : vector<16x32xf32>, vector<32x96xf32>, vector<16x96xf32> -> vector<16x96xf32>
    %c1_99 = arith.constant 1 : index
    %c0_100 = arith.constant 0 : index
    %c0_101 = arith.constant 0 : index
    %242 = vector.load %arg8[%c1_99, %c0_100, %c0_101] : memref<2x1x96xf32, #tpu.memory_space<vmem>>, vector<1x1x96xf32>
    %243 = vector.shape_cast %242 : vector<1x1x96xf32> to vector<1x96xf32>
    %244 = vector.broadcast %243 : vector<1x96xf32> to vector<16x96xf32>
    %245 = arith.addf %241, %244 : vector<16x96xf32>
    %246 = vector.extract_strided_slice %245 {offsets = [0, 0], sizes = [16, 32], strides = [1, 1]} : vector<16x96xf32> to vector<16x32xf32>
    %247 = vector.shape_cast %246 : vector<16x32xf32> to vector<2x8x32xf32>
    %248 = vector.extract_strided_slice %245 {offsets = [0, 32], sizes = [16, 32], strides = [1, 1]} : vector<16x96xf32> to vector<16x32xf32>
    %249 = vector.shape_cast %248 : vector<16x32xf32> to vector<2x8x32xf32>
    %250 = vector.extract_strided_slice %245 {offsets = [0, 64], sizes = [16, 32], strides = [1, 1]} : vector<16x96xf32> to vector<16x32xf32>
    %251 = vector.shape_cast %250 : vector<16x32xf32> to vector<2x8x32xf32>
    %252 = vector.extract_strided_slice %247 {offsets = [0, 0, 0], sizes = [2, 8, 8], strides = [1, 1, 1]} : vector<2x8x32xf32> to vector<2x8x8xf32>
    %253 = vector.extract_strided_slice %249 {offsets = [0, 0, 0], sizes = [2, 8, 8], strides = [1, 1, 1]} : vector<2x8x32xf32> to vector<2x8x8xf32>
    %254 = vector.extract_strided_slice %251 {offsets = [0, 0, 0], sizes = [2, 8, 8], strides = [1, 1, 1]} : vector<2x8x32xf32> to vector<2x8x8xf32>
    %cst_102 = arith.constant dense<0.000000e+00> : vector<2x8x8xf32>
    %255 = tpu.matmul %252, %253, %cst_102 {dimension_numbers = #tpu.dot_dimension_numbers<[2], [2], [1], [1], [0, 0, 0, 1, 1, 1], [0], [0]>} : vector<2x8x8xf32>, vector<2x8x8xf32>, vector<2x8x8xf32> -> vector<2x8x8xf32>
    %cst_103 = arith.constant 0.353553385 : f32
    %256 = vector.broadcast %cst_103 : f32 to vector<2x8x8xf32>
    %257 = arith.mulf %255, %256 : vector<2x8x8xf32>
    %258 = vector.broadcast %59 : vector<2x1x8xf32> to vector<2x8x8xf32>
    %259 = arith.addf %257, %258 : vector<2x8x8xf32>
    %cst_104 = arith.constant dense<0xFF800000> : vector<2x8xf32>
    %260 = vector.multi_reduction <maximumf>, %259, %cst_104 [2] : vector<2x8x8xf32> to vector<2x8xf32>
    %261 = vector.shape_cast %260 : vector<2x8xf32> to vector<2x8x1xf32>
    %262 = vector.broadcast %261 : vector<2x8x1xf32> to vector<2x8x8xf32>
    %263 = arith.subf %259, %262 : vector<2x8x8xf32>
    %264 = math.exp %263 : vector<2x8x8xf32>
    %cst_105 = arith.constant dense<0.000000e+00> : vector<2x8xf32>
    %265 = vector.multi_reduction <add>, %264, %cst_105 [2] : vector<2x8x8xf32> to vector<2x8xf32>
    %266 = vector.shape_cast %265 : vector<2x8xf32> to vector<2x8x1xf32>
    %267 = tpu.reciprocal %266 {approx = true} : vector<2x8x1xf32> -> vector<2x8x1xf32>
    %268 = vector.broadcast %267 : vector<2x8x1xf32> to vector<2x8x8xf32>
    %269 = arith.mulf %264, %268 : vector<2x8x8xf32>
    %cst_106 = arith.constant dense<0.000000e+00> : vector<2x8x8xf32>
    %270 = tpu.matmul %269, %254, %cst_106 {dimension_numbers = #tpu.dot_dimension_numbers<[2], [1], [1], [2], [0, 0, 0, 1, 1, 2], [0], [0]>} : vector<2x8x8xf32>, vector<2x8x8xf32>, vector<2x8x8xf32> -> vector<2x8x8xf32>
    %271 = vector.extract_strided_slice %247 {offsets = [0, 0, 8], sizes = [2, 8, 8], strides = [1, 1, 1]} : vector<2x8x32xf32> to vector<2x8x8xf32>
    %272 = vector.extract_strided_slice %249 {offsets = [0, 0, 8], sizes = [2, 8, 8], strides = [1, 1, 1]} : vector<2x8x32xf32> to vector<2x8x8xf32>
    %273 = vector.extract_strided_slice %251 {offsets = [0, 0, 8], sizes = [2, 8, 8], strides = [1, 1, 1]} : vector<2x8x32xf32> to vector<2x8x8xf32>
    %cst_107 = arith.constant dense<0.000000e+00> : vector<2x8x8xf32>
    %274 = tpu.matmul %271, %272, %cst_107 {dimension_numbers = #tpu.dot_dimension_numbers<[2], [2], [1], [1], [0, 0, 0, 1, 1, 1], [0], [0]>} : vector<2x8x8xf32>, vector<2x8x8xf32>, vector<2x8x8xf32> -> vector<2x8x8xf32>
    %cst_108 = arith.constant 0.353553385 : f32
    %275 = vector.broadcast %cst_108 : f32 to vector<2x8x8xf32>
    %276 = arith.mulf %274, %275 : vector<2x8x8xf32>
    %277 = vector.broadcast %59 : vector<2x1x8xf32> to vector<2x8x8xf32>
    %278 = arith.addf %276, %277 : vector<2x8x8xf32>
    %cst_109 = arith.constant dense<0xFF800000> : vector<2x8xf32>
    %279 = vector.multi_reduction <maximumf>, %278, %cst_109 [2] : vector<2x8x8xf32> to vector<2x8xf32>
    %280 = vector.shape_cast %279 : vector<2x8xf32> to vector<2x8x1xf32>
    %281 = vector.broadcast %280 : vector<2x8x1xf32> to vector<2x8x8xf32>
    %282 = arith.subf %278, %281 : vector<2x8x8xf32>
    %283 = math.exp %282 : vector<2x8x8xf32>
    %cst_110 = arith.constant dense<0.000000e+00> : vector<2x8xf32>
    %284 = vector.multi_reduction <add>, %283, %cst_110 [2] : vector<2x8x8xf32> to vector<2x8xf32>
    %285 = vector.shape_cast %284 : vector<2x8xf32> to vector<2x8x1xf32>
    %286 = tpu.reciprocal %285 {approx = true} : vector<2x8x1xf32> -> vector<2x8x1xf32>
    %287 = vector.broadcast %286 : vector<2x8x1xf32> to vector<2x8x8xf32>
    %288 = arith.mulf %283, %287 : vector<2x8x8xf32>
    %cst_111 = arith.constant dense<0.000000e+00> : vector<2x8x8xf32>
    %289 = tpu.matmul %288, %273, %cst_111 {dimension_numbers = #tpu.dot_dimension_numbers<[2], [1], [1], [2], [0, 0, 0, 1, 1, 2], [0], [0]>} : vector<2x8x8xf32>, vector<2x8x8xf32>, vector<2x8x8xf32> -> vector<2x8x8xf32>
    %290 = vector.extract_strided_slice %247 {offsets = [0, 0, 16], sizes = [2, 8, 8], strides = [1, 1, 1]} : vector<2x8x32xf32> to vector<2x8x8xf32>
    %291 = vector.extract_strided_slice %249 {offsets = [0, 0, 16], sizes = [2, 8, 8], strides = [1, 1, 1]} : vector<2x8x32xf32> to vector<2x8x8xf32>
    %292 = vector.extract_strided_slice %251 {offsets = [0, 0, 16], sizes = [2, 8, 8], strides = [1, 1, 1]} : vector<2x8x32xf32> to vector<2x8x8xf32>
    %cst_112 = arith.constant dense<0.000000e+00> : vector<2x8x8xf32>
    %293 = tpu.matmul %290, %291, %cst_112 {dimension_numbers = #tpu.dot_dimension_numbers<[2], [2], [1], [1], [0, 0, 0, 1, 1, 1], [0], [0]>} : vector<2x8x8xf32>, vector<2x8x8xf32>, vector<2x8x8xf32> -> vector<2x8x8xf32>
    %cst_113 = arith.constant 0.353553385 : f32
    %294 = vector.broadcast %cst_113 : f32 to vector<2x8x8xf32>
    %295 = arith.mulf %293, %294 : vector<2x8x8xf32>
    %296 = vector.broadcast %59 : vector<2x1x8xf32> to vector<2x8x8xf32>
    %297 = arith.addf %295, %296 : vector<2x8x8xf32>
    %cst_114 = arith.constant dense<0xFF800000> : vector<2x8xf32>
    %298 = vector.multi_reduction <maximumf>, %297, %cst_114 [2] : vector<2x8x8xf32> to vector<2x8xf32>
    %299 = vector.shape_cast %298 : vector<2x8xf32> to vector<2x8x1xf32>
    %300 = vector.broadcast %299 : vector<2x8x1xf32> to vector<2x8x8xf32>
    %301 = arith.subf %297, %300 : vector<2x8x8xf32>
    %302 = math.exp %301 : vector<2x8x8xf32>
    %cst_115 = arith.constant dense<0.000000e+00> : vector<2x8xf32>
    %303 = vector.multi_reduction <add>, %302, %cst_115 [2] : vector<2x8x8xf32> to vector<2x8xf32>
    %304 = vector.shape_cast %303 : vector<2x8xf32> to vector<2x8x1xf32>
    %305 = tpu.reciprocal %304 {approx = true} : vector<2x8x1xf32> -> vector<2x8x1xf32>
    %306 = vector.broadcast %305 : vector<2x8x1xf32> to vector<2x8x8xf32>
    %307 = arith.mulf %302, %306 : vector<2x8x8xf32>
    %cst_116 = arith.constant dense<0.000000e+00> : vector<2x8x8xf32>
    %308 = tpu.matmul %307, %292, %cst_116 {dimension_numbers = #tpu.dot_dimension_numbers<[2], [1], [1], [2], [0, 0, 0, 1, 1, 2], [0], [0]>} : vector<2x8x8xf32>, vector<2x8x8xf32>, vector<2x8x8xf32> -> vector<2x8x8xf32>
    %309 = vector.extract_strided_slice %247 {offsets = [0, 0, 24], sizes = [2, 8, 8], strides = [1, 1, 1]} : vector<2x8x32xf32> to vector<2x8x8xf32>
    %310 = vector.extract_strided_slice %249 {offsets = [0, 0, 24], sizes = [2, 8, 8], strides = [1, 1, 1]} : vector<2x8x32xf32> to vector<2x8x8xf32>
    %311 = vector.extract_strided_slice %251 {offsets = [0, 0, 24], sizes = [2, 8, 8], strides = [1, 1, 1]} : vector<2x8x32xf32> to vector<2x8x8xf32>
    %cst_117 = arith.constant dense<0.000000e+00> : vector<2x8x8xf32>
    %312 = tpu.matmul %309, %310, %cst_117 {dimension_numbers = #tpu.dot_dimension_numbers<[2], [2], [1], [1], [0, 0, 0, 1, 1, 1], [0], [0]>} : vector<2x8x8xf32>, vector<2x8x8xf32>, vector<2x8x8xf32> -> vector<2x8x8xf32>
    %cst_118 = arith.constant 0.353553385 : f32
    %313 = vector.broadcast %cst_118 : f32 to vector<2x8x8xf32>
    %314 = arith.mulf %312, %313 : vector<2x8x8xf32>
    %315 = vector.broadcast %59 : vector<2x1x8xf32> to vector<2x8x8xf32>
    %316 = arith.addf %314, %315 : vector<2x8x8xf32>
    %cst_119 = arith.constant dense<0xFF800000> : vector<2x8xf32>
    %317 = vector.multi_reduction <maximumf>, %316, %cst_119 [2] : vector<2x8x8xf32> to vector<2x8xf32>
    %318 = vector.shape_cast %317 : vector<2x8xf32> to vector<2x8x1xf32>
    %319 = vector.broadcast %318 : vector<2x8x1xf32> to vector<2x8x8xf32>
    %320 = arith.subf %316, %319 : vector<2x8x8xf32>
    %321 = math.exp %320 : vector<2x8x8xf32>
    %cst_120 = arith.constant dense<0.000000e+00> : vector<2x8xf32>
    %322 = vector.multi_reduction <add>, %321, %cst_120 [2] : vector<2x8x8xf32> to vector<2x8xf32>
    %323 = vector.shape_cast %322 : vector<2x8xf32> to vector<2x8x1xf32>
    %324 = tpu.reciprocal %323 {approx = true} : vector<2x8x1xf32> -> vector<2x8x1xf32>
    %325 = vector.broadcast %324 : vector<2x8x1xf32> to vector<2x8x8xf32>
    %326 = arith.mulf %321, %325 : vector<2x8x8xf32>
    %cst_121 = arith.constant dense<0.000000e+00> : vector<2x8x8xf32>
    %327 = tpu.matmul %326, %311, %cst_121 {dimension_numbers = #tpu.dot_dimension_numbers<[2], [1], [1], [2], [0, 0, 0, 1, 1, 2], [0], [0]>} : vector<2x8x8xf32>, vector<2x8x8xf32>, vector<2x8x8xf32> -> vector<2x8x8xf32>
    %328 = tpu.concatenate %270, %289, %308, %327 in 2 : vector<2x8x8xf32>, vector<2x8x8xf32>, vector<2x8x8xf32>, vector<2x8x8xf32> -> vector<2x8x32xf32>
    %329 = vector.shape_cast %328 : vector<2x8x32xf32> to vector<16x32xf32>
    %c1_122 = arith.constant 1 : index
    %c0_123 = arith.constant 0 : index
    %c0_124 = arith.constant 0 : index
    %330 = vector.load %arg9[%c1_122, %c0_123, %c0_124] : memref<2x32x32xf32, #tpu.memory_space<vmem>>, vector<1x32x32xf32>
    %331 = vector.shape_cast %330 : vector<1x32x32xf32> to vector<32x32xf32>
    %cst_125 = arith.constant dense<0.000000e+00> : vector<16x32xf32>
    %332 = tpu.matmul %329, %331, %cst_125 {dimension_numbers = #tpu.dot_dimension_numbers<[1], [0], [0], [1], [0, 0, 1, 1], [], []>} : vector<16x32xf32>, vector<32x32xf32>, vector<16x32xf32> -> vector<16x32xf32>
    %c1_126 = arith.constant 1 : index
    %c0_127 = arith.constant 0 : index
    %c0_128 = arith.constant 0 : index
    %333 = vector.load %arg10[%c1_126, %c0_127, %c0_128] : memref<2x1x32xf32, #tpu.memory_space<vmem>>, vector<1x1x32xf32>
    %334 = vector.shape_cast %333 : vector<1x1x32xf32> to vector<1x32xf32>
    %335 = vector.broadcast %334 : vector<1x32xf32> to vector<16x32xf32>
    %336 = arith.addf %332, %335 : vector<16x32xf32>
    %337 = arith.addf %238, %336 : vector<16x32xf32>
    %c1_129 = arith.constant 1 : index
    %c0_130 = arith.constant 0 : index
    %c0_131 = arith.constant 0 : index
    %338 = vector.load %arg11[%c1_129, %c0_130, %c0_131] : memref<2x1x32xf32, #tpu.memory_space<vmem>>, vector<1x1x32xf32>
    %339 = vector.shape_cast %338 : vector<1x1x32xf32> to vector<1x32xf32>
    %c1_132 = arith.constant 1 : index
    %c0_133 = arith.constant 0 : index
    %c0_134 = arith.constant 0 : index
    %340 = vector.load %arg12[%c1_132, %c0_133, %c0_134] : memref<2x1x32xf32, #tpu.memory_space<vmem>>, vector<1x1x32xf32>
    %341 = vector.shape_cast %340 : vector<1x1x32xf32> to vector<1x32xf32>
    %cst_135 = arith.constant dense<0.000000e+00> : vector<16xf32>
    %342 = vector.multi_reduction <add>, %337, %cst_135 [1] : vector<16x32xf32> to vector<16xf32>
    %343 = vector.shape_cast %342 : vector<16xf32> to vector<16x1xf32>
    %cst_136 = arith.constant 3.200000e+01 : f32
    %344 = vector.broadcast %cst_136 : f32 to vector<16x1xf32>
    %345 = arith.divf %343, %344 : vector<16x1xf32>
    %346 = vector.broadcast %345 : vector<16x1xf32> to vector<16x32xf32>
    %347 = arith.subf %337, %346 : vector<16x32xf32>
    %348 = arith.mulf %347, %347 : vector<16x32xf32>
    %cst_137 = arith.constant dense<0.000000e+00> : vector<16xf32>
    %349 = vector.multi_reduction <add>, %348, %cst_137 [1] : vector<16x32xf32> to vector<16xf32>
    %350 = vector.shape_cast %349 : vector<16xf32> to vector<16x1xf32>
    %cst_138 = arith.constant 3.200000e+01 : f32
    %351 = vector.broadcast %cst_138 : f32 to vector<16x1xf32>
    %352 = arith.divf %350, %351 : vector<16x1xf32>
    %353 = vector.broadcast %345 : vector<16x1xf32> to vector<16x32xf32>
    %354 = arith.subf %337, %353 : vector<16x32xf32>
    %cst_139 = arith.constant 9.99999996E-13 : f32
    %355 = vector.broadcast %cst_139 : f32 to vector<16x1xf32>
    %356 = arith.addf %352, %355 : vector<16x1xf32>
    %357 = math.rsqrt %356 : vector<16x1xf32>
    %358 = vector.broadcast %357 : vector<16x1xf32> to vector<16x32xf32>
    %359 = arith.mulf %354, %358 : vector<16x32xf32>
    %360 = vector.broadcast %339 : vector<1x32xf32> to vector<16x32xf32>
    %361 = arith.mulf %359, %360 : vector<16x32xf32>
    %362 = vector.broadcast %341 : vector<1x32xf32> to vector<16x32xf32>
    %363 = arith.addf %361, %362 : vector<16x32xf32>
    %c1_140 = arith.constant 1 : index
    %c0_141 = arith.constant 0 : index
    %c0_142 = arith.constant 0 : index
    %364 = vector.load %arg13[%c1_140, %c0_141, %c0_142] : memref<2x32x64xf32, #tpu.memory_space<vmem>>, vector<1x32x64xf32>
    %365 = vector.shape_cast %364 : vector<1x32x64xf32> to vector<32x64xf32>
    %cst_143 = arith.constant dense<0.000000e+00> : vector<16x64xf32>
    %366 = tpu.matmul %363, %365, %cst_143 {dimension_numbers = #tpu.dot_dimension_numbers<[1], [0], [0], [1], [0, 0, 1, 1], [], []>} : vector<16x32xf32>, vector<32x64xf32>, vector<16x64xf32> -> vector<16x64xf32>
    %c1_144 = arith.constant 1 : index
    %c0_145 = arith.constant 0 : index
    %c0_146 = arith.constant 0 : index
    %367 = vector.load %arg14[%c1_144, %c0_145, %c0_146] : memref<2x1x64xf32, #tpu.memory_space<vmem>>, vector<1x1x64xf32>
    %368 = vector.shape_cast %367 : vector<1x1x64xf32> to vector<1x64xf32>
    %369 = vector.broadcast %368 : vector<1x64xf32> to vector<16x64xf32>
    %370 = arith.addf %366, %369 : vector<16x64xf32>
    %371 = arith.mulf %370, %370 : vector<16x64xf32>
    %372 = arith.mulf %370, %371 : vector<16x64xf32>
    %cst_147 = arith.constant 4.471500e-02 : f32
    %373 = vector.broadcast %cst_147 : f32 to vector<16x64xf32>
    %374 = arith.mulf %373, %372 : vector<16x64xf32>
    %375 = arith.addf %370, %374 : vector<16x64xf32>
    %cst_148 = arith.constant 0.797884583 : f32
    %376 = vector.broadcast %cst_148 : f32 to vector<16x64xf32>
    %377 = arith.mulf %376, %375 : vector<16x64xf32>
    %378 = math.tanh %377 : vector<16x64xf32>
    %cst_149 = arith.constant 1.000000e+00 : f32
    %379 = vector.broadcast %cst_149 : f32 to vector<16x64xf32>
    %380 = arith.addf %379, %378 : vector<16x64xf32>
    %cst_150 = arith.constant 5.000000e-01 : f32
    %381 = vector.broadcast %cst_150 : f32 to vector<16x64xf32>
    %382 = arith.mulf %381, %380 : vector<16x64xf32>
    %383 = arith.mulf %370, %382 : vector<16x64xf32>
    %c1_151 = arith.constant 1 : index
    %c0_152 = arith.constant 0 : index
    %c0_153 = arith.constant 0 : index
    %384 = vector.load %arg15[%c1_151, %c0_152, %c0_153] : memref<2x64x32xf32, #tpu.memory_space<vmem>>, vector<1x64x32xf32>
    %385 = vector.shape_cast %384 : vector<1x64x32xf32> to vector<64x32xf32>
    %cst_154 = arith.constant dense<0.000000e+00> : vector<16x32xf32>
    %386 = tpu.matmul %383, %385, %cst_154 {dimension_numbers = #tpu.dot_dimension_numbers<[1], [0], [0], [1], [0, 0, 1, 1], [], []>} : vector<16x64xf32>, vector<64x32xf32>, vector<16x32xf32> -> vector<16x32xf32>
    %c1_155 = arith.constant 1 : index
    %c0_156 = arith.constant 0 : index
    %c0_157 = arith.constant 0 : index
    %387 = vector.load %arg16[%c1_155, %c0_156, %c0_157] : memref<2x1x32xf32, #tpu.memory_space<vmem>>, vector<1x1x32xf32>
    %388 = vector.shape_cast %387 : vector<1x1x32xf32> to vector<1x32xf32>
    %389 = vector.broadcast %388 : vector<1x32xf32> to vector<16x32xf32>
    %390 = arith.addf %386, %389 : vector<16x32xf32>
    %391 = arith.addf %363, %390 : vector<16x32xf32>
    %c1_158 = arith.constant 1 : index
    %c0_159 = arith.constant 0 : index
    %c0_160 = arith.constant 0 : index
    %392 = vector.load %arg17[%c1_158, %c0_159, %c0_160] : memref<2x1x32xf32, #tpu.memory_space<vmem>>, vector<1x1x32xf32>
    %393 = vector.shape_cast %392 : vector<1x1x32xf32> to vector<1x32xf32>
    %c1_161 = arith.constant 1 : index
    %c0_162 = arith.constant 0 : index
    %c0_163 = arith.constant 0 : index
    %394 = vector.load %arg18[%c1_161, %c0_162, %c0_163] : memref<2x1x32xf32, #tpu.memory_space<vmem>>, vector<1x1x32xf32>
    %395 = vector.shape_cast %394 : vector<1x1x32xf32> to vector<1x32xf32>
    %cst_164 = arith.constant dense<0.000000e+00> : vector<16xf32>
    %396 = vector.multi_reduction <add>, %391, %cst_164 [1] : vector<16x32xf32> to vector<16xf32>
    %397 = vector.shape_cast %396 : vector<16xf32> to vector<16x1xf32>
    %cst_165 = arith.constant 3.200000e+01 : f32
    %398 = vector.broadcast %cst_165 : f32 to vector<16x1xf32>
    %399 = arith.divf %397, %398 : vector<16x1xf32>
    %400 = vector.broadcast %399 : vector<16x1xf32> to vector<16x32xf32>
    %401 = arith.subf %391, %400 : vector<16x32xf32>
    %402 = arith.mulf %401, %401 : vector<16x32xf32>
    %cst_166 = arith.constant dense<0.000000e+00> : vector<16xf32>
    %403 = vector.multi_reduction <add>, %402, %cst_166 [1] : vector<16x32xf32> to vector<16xf32>
    %404 = vector.shape_cast %403 : vector<16xf32> to vector<16x1xf32>
    %cst_167 = arith.constant 3.200000e+01 : f32
    %405 = vector.broadcast %cst_167 : f32 to vector<16x1xf32>
    %406 = arith.divf %404, %405 : vector<16x1xf32>
    %407 = vector.broadcast %399 : vector<16x1xf32> to vector<16x32xf32>
    %408 = arith.subf %391, %407 : vector<16x32xf32>
    %cst_168 = arith.constant 9.99999996E-13 : f32
    %409 = vector.broadcast %cst_168 : f32 to vector<16x1xf32>
    %410 = arith.addf %406, %409 : vector<16x1xf32>
    %411 = math.rsqrt %410 : vector<16x1xf32>
    %412 = vector.broadcast %411 : vector<16x1xf32> to vector<16x32xf32>
    %413 = arith.mulf %408, %412 : vector<16x32xf32>
    %414 = vector.broadcast %393 : vector<1x32xf32> to vector<16x32xf32>
    %415 = arith.mulf %413, %414 : vector<16x32xf32>
    %416 = vector.broadcast %395 : vector<1x32xf32> to vector<16x32xf32>
    %417 = arith.addf %415, %416 : vector<16x32xf32>
    %418 = vector.extract_strided_slice %417 {offsets = [0, 0], sizes = [1, 32], strides = [1, 1]} : vector<16x32xf32> to vector<1x32xf32>
    %419 = vector.extract_strided_slice %417 {offsets = [8, 0], sizes = [1, 32], strides = [1, 1]} : vector<16x32xf32> to vector<1x32xf32>
    %420 = tpu.concatenate %418, %419 in 0 : vector<1x32xf32>, vector<1x32xf32> -> vector<2x32xf32>
    %c0_169 = arith.constant 0 : index
    %c0_170 = arith.constant 0 : index
    %421 = vector.load %arg19[%c0_169, %c0_170] : memref<32x32xf32, #tpu.memory_space<vmem>>, vector<32x32xf32>
    %cst_171 = arith.constant dense<0.000000e+00> : vector<2x32xf32>
    %422 = tpu.matmul %420, %421, %cst_171 {dimension_numbers = #tpu.dot_dimension_numbers<[1], [0], [0], [1], [0, 0, 1, 1], [], []>} : vector<2x32xf32>, vector<32x32xf32>, vector<2x32xf32> -> vector<2x32xf32>
    %c0_172 = arith.constant 0 : index
    %c0_173 = arith.constant 0 : index
    %423 = vector.load %arg20[%c0_172, %c0_173] : memref<1x32xf32, #tpu.memory_space<vmem>>, vector<1x32xf32>
    %424 = vector.broadcast %423 : vector<1x32xf32> to vector<2x32xf32>
    %425 = arith.addf %422, %424 : vector<2x32xf32>
    %426 = math.tanh %425 : vector<2x32xf32>
    %427 = arith.truncf %426 : vector<2x32xf32> to vector<2x32xbf16>
    %428 = vector.shape_cast %427 : vector<2x32xbf16> to vector<1x2x32xbf16>
    %429 = vector.shape_cast %428 : vector<1x2x32xbf16> to vector<1x2x32xbf16>
    %430 = vector.broadcast %429 : vector<1x2x32xbf16> to vector<13x2x32xbf16>
    %c0_174 = arith.constant 0 : index
    %c0_175 = arith.constant 0 : index
    %c0_176 = arith.constant 0 : index
    %431 = vector.load %arg21[%c0_174, %c0_175, %c0_176] : memref<13x32x512xbf16, #tpu.memory_space<vmem>>, vector<13x32x512xbf16>
    "tpu.trace_start"() <{level = 10 : i32, message = "hbk,hkn->hbn"}> : () -> ()
    %cst_177 = arith.constant dense<0.000000e+00> : vector<13x2x512xf32>
    %432 = tpu.matmul %430, %431, %cst_177 {dimension_numbers = #tpu.dot_dimension_numbers<[2], [1], [1], [2], [0, 0, 0, 1, 1, 2], [0], [0]>} : vector<13x2x32xbf16>, vector<13x32x512xbf16>, vector<13x2x512xf32> -> vector<13x2x512xf32>
    "tpu.trace_stop"() : () -> ()
    %c0_178 = arith.constant 0 : index
    %c0_179 = arith.constant 0 : index
    %c0_180 = arith.constant 0 : index
    %433 = vector.load %arg22[%c0_178, %c0_179, %c0_180] : memref<13x1x512xf32, #tpu.memory_space<vmem>>, vector<13x1x512xf32>
    %434 = vector.broadcast %433 : vector<13x1x512xf32> to vector<13x2x512xf32>
    %435 = arith.addf %432, %434 : vector<13x2x512xf32>
    %c0_181 = arith.constant 0 : index
    %c0_182 = arith.constant 0 : index
    %c0_183 = arith.constant 0 : index
    %436 = vector.load %arg23[%c0_181, %c0_182, %c0_183] : memref<13x1x512xf32, #tpu.memory_space<vmem>>, vector<13x1x512xf32>
    %c0_184 = arith.constant 0 : index
    %c0_185 = arith.constant 0 : index
    %c0_186 = arith.constant 0 : index
    %437 = vector.load %arg24[%c0_184, %c0_185, %c0_186] : memref<13x1x512xf32, #tpu.memory_space<vmem>>, vector<13x1x512xf32>
    %cst_187 = arith.constant dense<0.000000e+00> : vector<13x2xf32>
    %438 = vector.multi_reduction <add>, %435, %cst_187 [2] : vector<13x2x512xf32> to vector<13x2xf32>
    %439 = vector.shape_cast %438 : vector<13x2xf32> to vector<13x2x1xf32>
    %cst_188 = arith.constant 5.120000e+02 : f32
    %440 = vector.broadcast %cst_188 : f32 to vector<13x2x1xf32>
    %441 = arith.divf %439, %440 : vector<13x2x1xf32>
    %442 = vector.broadcast %441 : vector<13x2x1xf32> to vector<13x2x512xf32>
    %443 = arith.subf %435, %442 : vector<13x2x512xf32>
    %444 = arith.mulf %443, %443 : vector<13x2x512xf32>
    %cst_189 = arith.constant dense<0.000000e+00> : vector<13x2xf32>
    %445 = vector.multi_reduction <add>, %444, %cst_189 [2] : vector<13x2x512xf32> to vector<13x2xf32>
    %446 = vector.shape_cast %445 : vector<13x2xf32> to vector<13x2x1xf32>
    %cst_190 = arith.constant 5.120000e+02 : f32
    %447 = vector.broadcast %cst_190 : f32 to vector<13x2x1xf32>
    %448 = arith.divf %446, %447 : vector<13x2x1xf32>
    %449 = vector.broadcast %441 : vector<13x2x1xf32> to vector<13x2x512xf32>
    %450 = arith.subf %435, %449 : vector<13x2x512xf32>
    %cst_191 = arith.constant 9.99999974E-6 : f32
    %451 = vector.broadcast %cst_191 : f32 to vector<13x2x1xf32>
    %452 = arith.addf %448, %451 : vector<13x2x1xf32>
    %453 = math.rsqrt %452 : vector<13x2x1xf32>
    %454 = vector.broadcast %453 : vector<13x2x1xf32> to vector<13x2x512xf32>
    %455 = arith.mulf %450, %454 : vector<13x2x512xf32>
    %456 = vector.broadcast %436 : vector<13x1x512xf32> to vector<13x2x512xf32>
    %457 = arith.mulf %455, %456 : vector<13x2x512xf32>
    %458 = vector.broadcast %437 : vector<13x1x512xf32> to vector<13x2x512xf32>
    %459 = arith.addf %457, %458 : vector<13x2x512xf32>
    %cst_192 = arith.constant 0.000000e+00 : f32
    %460 = vector.broadcast %cst_192 : f32 to vector<13x2x512xf32>
    %461 = arith.cmpf ogt, %459, %460 : vector<13x2x512xf32>
    %cst_193 = arith.constant 0.00999999977 : f32
    %462 = vector.broadcast %cst_193 : f32 to vector<13x2x512xf32>
    %463 = arith.mulf %462, %459 : vector<13x2x512xf32>
    %464 = arith.select %461, %459, %463 : vector<13x2x512xi1>, vector<13x2x512xf32>
    %465 = arith.truncf %464 : vector<13x2x512xf32> to vector<13x2x512xbf16>
    %c0_194 = arith.constant 0 : index
    %c0_195 = arith.constant 0 : index
    %c0_196 = arith.constant 0 : index
    %466 = vector.load %arg25[%c0_194, %c0_195, %c0_196] : memref<13x512x256xbf16, #tpu.memory_space<vmem>>, vector<13x512x256xbf16>
    "tpu.trace_start"() <{level = 10 : i32, message = "hbk,hkn->hbn"}> : () -> ()
    %cst_197 = arith.constant dense<0.000000e+00> : vector<13x2x256xf32>
    %467 = tpu.matmul %465, %466, %cst_197 {dimension_numbers = #tpu.dot_dimension_numbers<[2], [1], [1], [2], [0, 0, 0, 1, 1, 2], [0], [0]>} : vector<13x2x512xbf16>, vector<13x512x256xbf16>, vector<13x2x256xf32> -> vector<13x2x256xf32>
    "tpu.trace_stop"() : () -> ()
    %c0_198 = arith.constant 0 : index
    %c0_199 = arith.constant 0 : index
    %c0_200 = arith.constant 0 : index
    %468 = vector.load %arg26[%c0_198, %c0_199, %c0_200] : memref<13x1x256xf32, #tpu.memory_space<vmem>>, vector<13x1x256xf32>
    %469 = vector.broadcast %468 : vector<13x1x256xf32> to vector<13x2x256xf32>
    %470 = arith.addf %467, %469 : vector<13x2x256xf32>
    %c0_201 = arith.constant 0 : index
    %c0_202 = arith.constant 0 : index
    %c0_203 = arith.constant 0 : index
    %471 = vector.load %arg27[%c0_201, %c0_202, %c0_203] : memref<13x1x256xf32, #tpu.memory_space<vmem>>, vector<13x1x256xf32>
    %c0_204 = arith.constant 0 : index
    %c0_205 = arith.constant 0 : index
    %c0_206 = arith.constant 0 : index
    %472 = vector.load %arg28[%c0_204, %c0_205, %c0_206] : memref<13x1x256xf32, #tpu.memory_space<vmem>>, vector<13x1x256xf32>
    %cst_207 = arith.constant dense<0.000000e+00> : vector<13x2xf32>
    %473 = vector.multi_reduction <add>, %470, %cst_207 [2] : vector<13x2x256xf32> to vector<13x2xf32>
    %474 = vector.shape_cast %473 : vector<13x2xf32> to vector<13x2x1xf32>
    %cst_208 = arith.constant 2.560000e+02 : f32
    %475 = vector.broadcast %cst_208 : f32 to vector<13x2x1xf32>
    %476 = arith.divf %474, %475 : vector<13x2x1xf32>
    %477 = vector.broadcast %476 : vector<13x2x1xf32> to vector<13x2x256xf32>
    %478 = arith.subf %470, %477 : vector<13x2x256xf32>
    %479 = arith.mulf %478, %478 : vector<13x2x256xf32>
    %cst_209 = arith.constant dense<0.000000e+00> : vector<13x2xf32>
    %480 = vector.multi_reduction <add>, %479, %cst_209 [2] : vector<13x2x256xf32> to vector<13x2xf32>
    %481 = vector.shape_cast %480 : vector<13x2xf32> to vector<13x2x1xf32>
    %cst_210 = arith.constant 2.560000e+02 : f32
    %482 = vector.broadcast %cst_210 : f32 to vector<13x2x1xf32>
    %483 = arith.divf %481, %482 : vector<13x2x1xf32>
    %484 = vector.broadcast %476 : vector<13x2x1xf32> to vector<13x2x256xf32>
    %485 = arith.subf %470, %484 : vector<13x2x256xf32>
    %cst_211 = arith.constant 9.99999974E-6 : f32
    %486 = vector.broadcast %cst_211 : f32 to vector<13x2x1xf32>
    %487 = arith.addf %483, %486 : vector<13x2x1xf32>
    %488 = math.rsqrt %487 : vector<13x2x1xf32>
    %489 = vector.broadcast %488 : vector<13x2x1xf32> to vector<13x2x256xf32>
    %490 = arith.mulf %485, %489 : vector<13x2x256xf32>
    %491 = vector.broadcast %471 : vector<13x1x256xf32> to vector<13x2x256xf32>
    %492 = arith.mulf %490, %491 : vector<13x2x256xf32>
    %493 = vector.broadcast %472 : vector<13x1x256xf32> to vector<13x2x256xf32>
    %494 = arith.addf %492, %493 : vector<13x2x256xf32>
    %cst_212 = arith.constant 0.000000e+00 : f32
    %495 = vector.broadcast %cst_212 : f32 to vector<13x2x256xf32>
    %496 = arith.cmpf ogt, %494, %495 : vector<13x2x256xf32>
    %cst_213 = arith.constant 0.00999999977 : f32
    %497 = vector.broadcast %cst_213 : f32 to vector<13x2x256xf32>
    %498 = arith.mulf %497, %494 : vector<13x2x256xf32>
    %499 = arith.select %496, %494, %498 : vector<13x2x256xi1>, vector<13x2x256xf32>
    %500 = arith.truncf %499 : vector<13x2x256xf32> to vector<13x2x256xbf16>
    %c0_214 = arith.constant 0 : index
    %c0_215 = arith.constant 0 : index
    %c0_216 = arith.constant 0 : index
    %501 = vector.load %arg29[%c0_214, %c0_215, %c0_216] : memref<13x3x256xbf16, #tpu.memory_space<vmem>>, vector<13x3x256xbf16>
    "tpu.trace_start"() <{level = 10 : i32, message = "hbk,hck->hbc"}> : () -> ()
    %cst_217 = arith.constant dense<0.000000e+00> : vector<13x2x3xf32>
    %502 = tpu.matmul %500, %501, %cst_217 {dimension_numbers = #tpu.dot_dimension_numbers<[2], [2], [1], [1], [0, 0, 0, 1, 1, 1], [0], [0]>} : vector<13x2x256xbf16>, vector<13x3x256xbf16>, vector<13x2x3xf32> -> vector<13x2x3xf32>
    "tpu.trace_stop"() : () -> ()
    %c0_218 = arith.constant 0 : index
    %c0_219 = arith.constant 0 : index
    %c0_220 = arith.constant 0 : index
    %503 = vector.load %arg30[%c0_218, %c0_219, %c0_220] : memref<13x1x3xf32, #tpu.memory_space<vmem>>, vector<13x1x3xf32>
    %504 = vector.broadcast %503 : vector<13x1x3xf32> to vector<13x2x3xf32>
    %505 = arith.addf %502, %504 : vector<13x2x3xf32>
    %c0_221 = arith.constant 0 : index
    %c0_222 = arith.constant 0 : index
    %c0_223 = arith.constant 0 : index
    %506 = vector.load %arg31[%c0_221, %c0_222, %c0_223] : memref<13x2x3xf32, #tpu.memory_space<vmem>>, vector<13x2x3xf32>
    tpu.vector_store %arg31[%c0_221, %c0_222, %c0_223], %505 {strides = array<i32>} : memref<13x2x3xf32, #tpu.memory_space<vmem>>, vector<13x2x3xf32>,
    return
  }
}

</mosaic_0001>

<bundles_post_ra>
// kernel: forward.1
= control target key start
LH: loop header
LB: loop body
LE: loop exit
PB: predicated region body
PF: predicated region fallthrough
CT: control target
= control target key end

     0   :  { %s20749_s6 = smov 1   ;;  %s20750_s10 = smov 2   ;;  %s23592_s0 = inlined_call_operand.smem [shape: u32[32], index: -1, kind: input, shape index: {}] }
   0x1   :  { %s20838_s5 = sld [smem:[%s23592_s0]]   ;;  %s20751_s14 = smov 3  }
   0x2   :  { %s20843_s9 = sld [smem:[%s23592_s0 + %s20749_s6]]   ;;  %s20752_s18 = smov 4  }
   0x3   :  { %s20848_s13 = sld [smem:[%s23592_s0 + %s20750_s10]]   ;;  %s20753_s22 = smov 5  }
   0x4   :  { %s20853_s17 = sld [smem:[%s23592_s0 + %s20751_s14]]   ;;  %s20754_s26 = smov 6  }
   0x5   :  { %s20858_s21 = sld [smem:[%s23592_s0 + %s20752_s18]]   ;;  %s20755_s30 = smov 7  }
   0x6   :  { %s20863_s25 = sld [smem:[%s23592_s0 + %s20753_s22]]   ;;  %s20756_s4 = smov 8  }
   0x7   :  { %23612 = sst [smem:[#allocation52_spill]] %s20838_s5  ;;  %s20757_s10 = smov 9  }
   0x8   :  { %s20868_s29 = sld [smem:[%s23592_s0 + %s20754_s26]]   ;;  %s20758_s15 = smov 10  }
   0x9   :  { %23613 = sst [smem:[#allocation53_spill]] %s20848_s13  ;;  %s20759_s20 = smov 11  }
   0xa   :  { %23614 = sst [smem:[#allocation54_spill]] %s20853_s17  ;;  %s20760_s26 = smov 12  }
   0xb   :  { %23615 = sst [smem:[#allocation55_spill]] %s20858_s21  ;;  %s20761_s1 = smov 13  }
   0xc   :  { %s20873_s3 = sld [smem:[%s23592_s0 + %s20755_s30]]   ;;  %s20762_s7 = smov 14  }
   0xd   :  { %s20878_s8 = sld [smem:[%s23592_s0 + %s20756_s4]]   ;;  %s20764_s22 = smov 16  }
   0xe   :  { %s20883_s14 = sld [smem:[%s23592_s0 + %s20757_s10]]   ;;  %s20765_s28 = smov 17  }
   0xf   :  { %s20888_s19 = sld [smem:[%s23592_s0 + %s20758_s15]]   ;;  %s20763_s15 = smov 15  }
  0x10   :  { %s20893_s24 = sld [smem:[%s23592_s0 + %s20759_s20]]  }
  0x11   :  { %s20898_s30 = sld [smem:[%s23592_s0 + %s20760_s26]]  }
  0x12   :  { %s20903_s6 = sld [smem:[%s23592_s0 + %s20761_s1]]  }
  0x13   :  { %s20908_s12 = sld [smem:[%s23592_s0 + %s20762_s7]]   ;;  %s20766_s7 = smov 18  }
  0x14   :  { %s20913_s20 = sld [smem:[%s23592_s0 + %s20763_s15]]   ;;  %s20767_s15 = smov 19  }
  0x15   :  { %23616 = sst [smem:[#allocation56_spill]] %s20888_s19 }
  0x16   :  { %s20918_s27 = sld [smem:[%s23592_s0 + %s20764_s22]]   ;;  %s20768_s22 = smov 20  }
  0x17   :  { %23617 = sst [smem:[#allocation57_spill]] %s20898_s30 }
  0x18   :  { %s20923_s4 = sld [smem:[%s23592_s0 + %s20765_s28]]   ;;  %s20769_s28 = smov 21  }
  0x19   :  { %23618 = sst [smem:[#allocation58_spill]] %s20908_s12 }
  0x1a   :  { %23619 = sst [smem:[#allocation59_spill]] %s20913_s20 }
  0x1b   :  { %s20928_s13 = sld [smem:[%s23592_s0 + %s20766_s7]]   ;;  %s20770_s7 = smov 22  }
  0x1c   :  { %s20933_s20 = sld [smem:[%s23592_s0 + %s20767_s15]]   ;;  %s20771_s15 = smov 23  }
  0x1d   :  { %s20938_s5 = sld [smem:[%s23592_s0 + %s20768_s22]]   ;;  %s20772_s22 = smov 24  }
  0x1e   :  { %23620 = sst [smem:[#allocation60_spill]] %s20923_s4 }
  0x1f   :  { %s20943_s21 = sld [smem:[%s23592_s0 + %s20769_s28]]   ;;  %s20773_s28 = smov 25  }
  0x20   :  { %s20948_s17 = sld [smem:[%s23592_s0 + %s20770_s7]]   ;;  %s20774_s7 = smov 26  }
  0x21   :  { %s20958_s4 = sld [smem:[%s23592_s0 + %s20772_s22]]   ;;  %s20776_s22 = smov 28  }
  0x22   :  { %23621 = sst [smem:[#allocation61_spill]] %s20933_s20 }
  0x23   :  { %s20953_s20 = sld [smem:[%s23592_s0 + %s20771_s15]]   ;;  %s20775_s15 = smov 27  }
  0x24   :  { %s20968_s12 = sld [smem:[%s23592_s0 + %s20774_s7]]   ;;  %s20778_s7 = smov 30  }
  0x25   :  { %23622 = sst [smem:[#allocation62_spill]] %s20943_s21 }
  0x26   :  { %s20963_s21 = sld [smem:[%s23592_s0 + %s20773_s28]]   ;;  %s20777_s28 = smov 29  }
  0x27   :  { %s20978_s30 = sld [smem:[%s23592_s0 + %s20776_s22]]  }
  0x28   :  { %s20988_s19 = sld [smem:[%s23592_s0 + %s20778_s7]]  }
  0x29   :  { %23623 = sst [smem:[#allocation63_spill]] %s20953_s20 }
  0x2a   :  { %s20973_s20 = sld [smem:[%s23592_s0 + %s20775_s15]]   ;;  %s20779_s15 = smov 31  }
  0x2c   :  { %23624 = sst [smem:[#allocation64_spill]] %s20963_s21 }
  0x2d   :  { %s20983_s21 = sld [smem:[%s23592_s0 + %s20777_s28]]  }
  0x30   :  { %23625 = sst [smem:[#allocation65_spill]] %s20973_s20 }
  0x31   :  { %s20993_s20 = sld [smem:[%s23592_s0 + %s20779_s15]]  }
  0x32   :  { %68 = vsyncpa [#allocation3], 0 }
  0x33   :  { %69 = vsyncpa [#allocation5], 0 }
  0x34   :  { %70 = vsyncpa [#allocation8], 0 }
  0x35   :  { %71 = vsyncpa [#allocation11], 0 }
  0x36   :  { %72 = vsyncpa [#allocation14], 0 }
  0x37   :  { %73 = vsyncpa [#allocation17], 0 }
  0x38   :  { %74 = vsyncpa [#allocation20], 0 }
  0x39   :  { %75 = vsyncpa [#allocation23], 0 }
  0x3a   :  { %76 = vsyncpa [#allocation26], 0 }
  0x3b   :  { %77 = vsyncpa [#allocation29], 0 }
  0x3c   :  { %78 = vsyncpa [#allocation32], 0 }
  0x3d   :  { %79 = vsyncpa [#allocation35], 0 }
  0x3e   :  { %80 = vsyncpa [#allocation38], 0  ;;  %s20780_s22 = smov [#allocation4]   ;;  %s20781_s0 = smov [#allocation7]  }
  0x3f   :  { %s105_s23 = sshll.u32 %s20780_s22, 4  ;;  %s124_s26 = sshll.u32 %s20781_s0, 4  ;;  %s106_s23 = int_to_ptr.vmem [resolvable:$true] %s105_s23  ;;  %s20995_s26 = int_to_ptr.vmem [resolvable:$true] %s124_s26 }
  0x40   :  { %s20195_s28 = scalar_lea.hbm %s20863_s25, 16 }
  0x41   :  { %p20196_p0 = scmp.ne.s32.totalorder %s20863_s25, %s20195_s28  ;;  %p20199_p1 = scmp.lt.u32.totalorder %s20195_s28, %s20863_s25 }
  0x43   :  { %p20201_p2 = pnand %p20199_p1, %p20196_p0 }
  0x45   :  { %20204 = shalt.err (!%p20201_p2)
}
  0x46   :  { %s20205_s1 = scalar_lea.vmem %s106_s23, 16  ;;  %s20209_s2 = scalar_lea.vmem %s106_s23, 32 }
  0x47   :  { %p20206_p3 = scmp.ne.s32.totalorder %s106_s23, %s20205_s1  ;;  %p20210_p4 = scmp.lt.s32.totalorder %s106_s23, %s106_s23 }
  0x48   :  { %p20211_p5 = scmp.lt.s32.totalorder %s20209_s2, %s20205_s1 }
  0x4a   :  { %p20212_p6 = por %p20211_p5, %p20210_p4 }
  0x4c   :  { %p20213_p7 = pnand %p20212_p6, %p20206_p3 }
  0x4e   :  { %20216 = shalt.err (!%p20213_p7)
}
  0x4f   :  { %108 = dma.hbm_to_vmem [thread:$0]  %s20863_s25, 16, %s106_s23, [#allocation5]  }
  0x50   :  { %s20217_s7 = scalar_lea.hbm %s20873_s3, 1024 }
  0x51   :  { %p20218_p8 = scmp.ne.s32.totalorder %s20873_s3, %s20217_s7  ;;  %p20221_p9 = scmp.lt.u32.totalorder %s20217_s7, %s20873_s3 }
  0x53   :  { %p20223_p10 = pnand %p20221_p9, %p20218_p8 }
  0x55   :  { %20226 = shalt.err (!%p20223_p10)
}
  0x56   :  { %s20227_s10 = scalar_lea.vmem %s20995_s26, 1024  ;;  %p20232_p12 = scmp.lt.s32.totalorder %s20995_s26, %s20995_s26 }
  0x57   :  { %p20228_p11 = scmp.ne.s32.totalorder %s20995_s26, %s20227_s10  ;;  %p20233_p13 = scmp.lt.s32.totalorder %s20227_s10, %s20227_s10 }
  0x59   :  { %p20234_p0 = por %p20233_p13, %p20232_p12 }
  0x5b   :  { %p20235_p1 = pnand %p20234_p0, %p20228_p11 }
  0x5d   :  { %20238 = shalt.err (!%p20235_p1)
}
  0x5e   :  { %s20782_s11 = smov 128   ;;  %s20783_s25 = smov 8  }
  0x5f   :  { %130 = dma.hbm_to_vmem [thread:$0]  %s20873_s3, 1024, %s20995_s26, [#allocation8], %s20782_s11, %s20782_s11, %s20783_s25  }
  0x60   :  { %s20784_s15 = smov [#allocation10]   ;;  %s20239_s18 = scalar_lea.hbm %s20883_s14, 1024 }
  0x61   :  { %s148_s16 = sshll.u32 %s20784_s15, 4  ;;  %p20240_p2 = scmp.ne.s32.totalorder %s20883_s14, %s20239_s18  ;;  %s149_s16 = int_to_ptr.vmem [resolvable:$true] %s148_s16 }
  0x62   :  { %p20243_p3 = scmp.lt.u32.totalorder %s20239_s18, %s20883_s14 }
  0x64   :  { %p20245_p4 = pnand %p20243_p3, %p20240_p2 }
  0x66   :  { %20248 = shalt.err (!%p20245_p4)
}
  0x67   :  { %s20249_s22 = scalar_lea.vmem %s149_s16, 1024  ;;  %p20254_p6 = scmp.lt.s32.totalorder %s149_s16, %s149_s16 }
  0x68   :  { %p20250_p5 = scmp.ne.s32.totalorder %s149_s16, %s20249_s22  ;;  %p20255_p7 = scmp.lt.s32.totalorder %s20249_s22, %s20249_s22 }
  0x6a   :  { %p20256_p8 = por %p20255_p7, %p20254_p6 }
  0x6c   :  { %p20257_p9 = pnand %p20256_p8, %p20250_p5 }
  0x6e   :  { %20260 = shalt.err (!%p20257_p9)
}
  0x6f   :  { %154 = dma.hbm_to_vmem [thread:$0]  %s20883_s14, 1024, %s149_s16, [#allocation11], %s20782_s11, %s20782_s11, %s20783_s25  }
  0x70   :  { %s20785_s3 = smov [#allocation13]   ;;  %s20786_s0 = smov [#allocation16]  }
  0x71   :  { %s172_s23 = sshll.u32 %s20785_s3, 4  ;;  %s196_s26 = sshll.u32 %s20786_s0, 4  ;;  %s173_s23 = int_to_ptr.vmem [resolvable:$true] %s172_s23  ;;  %s197_s26 = int_to_ptr.vmem [resolvable:$true] %s196_s26 }
  0x72   :  { %s20261_s28 = scalar_lea.hbm %s20893_s24, 32 }
  0x73   :  { %p20262_p10 = scmp.ne.s32.totalorder %s20893_s24, %s20261_s28  ;;  %p20265_p11 = scmp.lt.u32.totalorder %s20261_s28, %s20893_s24 }
  0x75   :  { %p20267_p12 = pnand %p20265_p11, %p20262_p10 }
  0x77   :  { %20270 = shalt.err (!%p20267_p12)
}
  0x78   :  { %s20271_s1 = scalar_lea.vmem %s173_s23, 32  ;;  %p20276_p0 = scmp.lt.s32.totalorder %s173_s23, %s173_s23 }
  0x79   :  { %p20272_p13 = scmp.ne.s32.totalorder %s173_s23, %s20271_s1  ;;  %p20277_p1 = scmp.lt.s32.totalorder %s20271_s1, %s20271_s1 }
  0x7b   :  { %p20278_p2 = por %p20277_p1, %p20276_p0 }
  0x7d   :  { %p20279_p3 = pnand %p20278_p2, %p20272_p13 }
  0x7f   :  { %20282 = shalt.err (!%p20279_p3)
}
  0x80   :  { %s20787_s2 = smov 16   ;;  %s20788_s14 = smov 1  }
  0x81   :  { %178 = dma.hbm_to_vmem [thread:$0]  %s20893_s24, 32, %s173_s23, [#allocation14], %s20787_s2, %s20787_s2, %s20788_s14  }
  0x82   :  { %s20283_s7 = scalar_lea.hbm %s20903_s6, 1024 }
  0x83   :  { %p20284_p4 = scmp.ne.s32.totalorder %s20903_s6, %s20283_s7  ;;  %p20287_p5 = scmp.lt.u32.totalorder %s20283_s7, %s20903_s6 }
  0x85   :  { %p20289_p6 = pnand %p20287_p5, %p20284_p4 }
  0x87   :  { %20292 = shalt.err (!%p20289_p6)
}
  0x88   :  { %s20293_s10 = scalar_lea.vmem %s197_s26, 1024  ;;  %p20298_p8 = scmp.lt.s32.totalorder %s197_s26, %s197_s26 }
  0x89   :  { %p20294_p7 = scmp.ne.s32.totalorder %s197_s26, %s20293_s10  ;;  %p20299_p9 = scmp.lt.s32.totalorder %s20293_s10, %s20293_s10 }
  0x8b   :  { %p20300_p10 = por %p20299_p9, %p20298_p8 }
  0x8d   :  { %p20301_p11 = pnand %p20300_p10, %p20294_p7 }
  0x8f   :  { %20304 = shalt.err (!%p20301_p11)
}
  0x90   :  { %202 = dma.hbm_to_vmem [thread:$0]  %s20903_s6, 1024, %s197_s26, [#allocation17], %s20782_s11, %s20782_s11, %s20783_s25  }
  0x91   :  { %s20789_s24 = smov [#allocation19]   ;;  %s20790_s16 = smov [#allocation22]  }
  0x92   :  { %s222_s15 = sshll.u32 %s20789_s24, 4  ;;  %s246_s18 = sshll.u32 %s20790_s16, 4  ;;  %s223_s15 = int_to_ptr.vmem [resolvable:$true] %s222_s15  ;;  %s247_s18 = int_to_ptr.vmem [resolvable:$true] %s246_s18 }
  0x93   :  { %s20305_s22 = scalar_lea.hbm %s20918_s27, 32 }
  0x94   :  { %p20306_p12 = scmp.ne.s32.totalorder %s20918_s27, %s20305_s22  ;;  %p20309_p13 = scmp.lt.u32.totalorder %s20305_s22, %s20918_s27 }
  0x96   :  { %p20311_p0 = pnand %p20309_p13, %p20306_p12 }
  0x98   :  { %20314 = shalt.err (!%p20311_p0)
}
  0x99   :  { %s20315_s3 = scalar_lea.vmem %s223_s15, 32  ;;  %p20320_p2 = scmp.lt.s32.totalorder %s223_s15, %s223_s15 }
  0x9a   :  { %p20316_p1 = scmp.ne.s32.totalorder %s223_s15, %s20315_s3  ;;  %p20321_p3 = scmp.lt.s32.totalorder %s20315_s3, %s20315_s3 }
  0x9c   :  { %p20322_p4 = por %p20321_p3, %p20320_p2 }
  0x9e   :  { %p20323_p5 = pnand %p20322_p4, %p20316_p1 }
  0xa0   :  { %20326 = shalt.err (!%p20323_p5)
}
  0xa1   :  { %228 = dma.hbm_to_vmem [thread:$0]  %s20918_s27, 32, %s223_s15, [#allocation20], %s20787_s2, %s20787_s2, %s20788_s14  }
  0xa2   :  { %s20327_s6 = scalar_lea.hbm %s20928_s13, 32 }
  0xa3   :  { %p20328_p6 = scmp.ne.s32.totalorder %s20928_s13, %s20327_s6  ;;  %p20331_p7 = scmp.lt.u32.totalorder %s20327_s6, %s20928_s13 }
  0xa5   :  { %p20333_p8 = pnand %p20331_p7, %p20328_p6 }
  0xa7   :  { %20336 = shalt.err (!%p20333_p8)
}
  0xa8   :  { %s20337_s23 = scalar_lea.vmem %s247_s18, 32  ;;  %p20342_p10 = scmp.lt.s32.totalorder %s247_s18, %s247_s18 }
  0xa9   :  { %p20338_p9 = scmp.ne.s32.totalorder %s247_s18, %s20337_s23  ;;  %p20343_p11 = scmp.lt.s32.totalorder %s20337_s23, %s20337_s23 }
  0xab   :  { %p20344_p12 = por %p20343_p11, %p20342_p10 }
  0xad   :  { %p20345_p13 = pnand %p20344_p12, %p20338_p9 }
  0xaf   :  { %20348 = shalt.err (!%p20345_p13)
}
  0xb0   :  { %252 = dma.hbm_to_vmem [thread:$0]  %s20928_s13, 32, %s247_s18, [#allocation23], %s20787_s2, %s20787_s2, %s20788_s14  }
  0xb1   :  { %s20791_s27 = smov [#allocation25]   ;;  %s20792_s26 = smov [#allocation28]  }
  0xb2   :  { %s271_s0 = sshll.u32 %s20791_s27, 4  ;;  %s292_s28 = sshll.u32 %s20792_s26, 4  ;;  %s272_s0 = int_to_ptr.vmem [resolvable:$true] %s271_s0  ;;  %s293_s28 = int_to_ptr.vmem [resolvable:$true] %s292_s28 }
  0xb3   :  { %s20349_s1 = scalar_lea.hbm %s20938_s5, 16 }
  0xb4   :  { %p20350_p0 = scmp.ne.s32.totalorder %s20938_s5, %s20349_s1  ;;  %p20353_p1 = scmp.lt.u32.totalorder %s20349_s1, %s20938_s5 }
  0xb6   :  { %p20355_p2 = pnand %p20353_p1, %p20350_p0 }
  0xb8   :  { %20358 = shalt.err (!%p20355_p2)
}
  0xb9   :  { %s20359_s7 = scalar_lea.vmem %s272_s0, 16  ;;  %s20363_s10 = scalar_lea.vmem %s272_s0, 32 }
  0xba   :  { %p20360_p3 = scmp.ne.s32.totalorder %s272_s0, %s20359_s7  ;;  %p20364_p4 = scmp.lt.s32.totalorder %s272_s0, %s272_s0 }
  0xbb   :  { %p20365_p5 = scmp.lt.s32.totalorder %s20363_s10, %s20359_s7 }
  0xbd   :  { %p20366_p6 = por %p20365_p5, %p20364_p4 }
  0xbf   :  { %p20367_p7 = pnand %p20366_p6, %p20360_p3 }
  0xc1   :  { %20370 = shalt.err (!%p20367_p7)
}
  0xc2   :  { %274 = dma.hbm_to_vmem [thread:$0]  %s20938_s5, 16, %s272_s0, [#allocation26]  }
  0xc3   :  { %s20371_s13 = scalar_lea.hbm %s20948_s17, 832 }
  0xc4   :  { %p20372_p8 = scmp.ne.s32.totalorder %s20948_s17, %s20371_s13  ;;  %p20375_p9 = scmp.lt.u32.totalorder %s20371_s13, %s20948_s17 }
  0xc6   :  { %p20377_p10 = pnand %p20375_p9, %p20372_p8 }
  0xc8   :  { %20380 = shalt.err (!%p20377_p10)
}
  0xc9   :  { %s20381_s24 = scalar_lea.vmem %s293_s28, 832  ;;  %p20386_p12 = scmp.lt.s32.totalorder %s293_s28, %s293_s28 }
  0xca   :  { %p20382_p11 = scmp.ne.s32.totalorder %s293_s28, %s20381_s24  ;;  %p20387_p13 = scmp.lt.s32.totalorder %s20381_s24, %s20381_s24 }
  0xcc   :  { %p20388_p0 = por %p20387_p13, %p20386_p12 }
  0xce   :  { %p20389_p1 = pnand %p20388_p0, %p20382_p11 }
  0xd0   :  { %20392 = shalt.err (!%p20389_p1)
}
  0xd1   :  { %s20793_s15 = smov 64   ;;  %s20794_s16 = smov 4  }
  0xd2   :  { %298 = dma.hbm_to_vmem [thread:$0]  %s20948_s17, 832, %s293_s28, [#allocation29], %s20793_s15, %s20793_s15, %s20794_s16  }
  0xd3   :  { %s20795_s5 = smov [#allocation31]   ;;  %s20796_s22 = smov [#allocation34]  }
  0xd4   :  { %s316_s18 = sshll.u32 %s20795_s5, 4  ;;  %s340_s3 = sshll.u32 %s20796_s22, 4  ;;  %s317_s18 = int_to_ptr.vmem [resolvable:$true] %s316_s18  ;;  %s341_s3 = int_to_ptr.vmem [resolvable:$true] %s340_s3 }
  0xd5   :  { %s20393_s6 = scalar_lea.hbm %s20958_s4, 832 }
  0xd6   :  { %p20394_p2 = scmp.ne.s32.totalorder %s20958_s4, %s20393_s6  ;;  %p20397_p3 = scmp.lt.u32.totalorder %s20393_s6, %s20958_s4 }
  0xd8   :  { %p20399_p4 = pnand %p20397_p3, %p20394_p2 }
  0xda   :  { %20402 = shalt.err (!%p20399_p4)
}
  0xdb   :  { %s20403_s23 = scalar_lea.vmem %s317_s18, 832  ;;  %p20408_p6 = scmp.lt.s32.totalorder %s317_s18, %s317_s18 }
  0xdc   :  { %p20404_p5 = scmp.ne.s32.totalorder %s317_s18, %s20403_s23  ;;  %p20409_p7 = scmp.lt.s32.totalorder %s20403_s23, %s20403_s23 }
  0xde   :  { %p20410_p8 = por %p20409_p7, %p20408_p6 }
  0xe0   :  { %p20411_p9 = pnand %p20410_p8, %p20404_p5 }
  0xe2   :  { %20414 = shalt.err (!%p20411_p9)
}
  0xe3   :  { %322 = dma.hbm_to_vmem [thread:$0]  %s20958_s4, 832, %s317_s18, [#allocation32], %s20793_s15, %s20793_s15, %s20794_s16  }
  0xe4   :  { %s20415_s17 = scalar_lea.hbm %s20968_s12, 416 }
  0xe5   :  { %p20416_p10 = scmp.ne.s32.totalorder %s20968_s12, %s20415_s17  ;;  %p20419_p11 = scmp.lt.u32.totalorder %s20415_s17, %s20968_s12 }
  0xe7   :  { %p20421_p12 = pnand %p20419_p11, %p20416_p10 }
  0xe9   :  { %20424 = shalt.err (!%p20421_p12)
}
  0xea   :  { %s20425_s27 = scalar_lea.vmem %s341_s3, 416  ;;  %p20430_p0 = scmp.lt.s32.totalorder %s341_s3, %s341_s3 }
  0xeb   :  { %p20426_p13 = scmp.ne.s32.totalorder %s341_s3, %s20425_s27  ;;  %p20431_p1 = scmp.lt.s32.totalorder %s20425_s27, %s20425_s27 }
  0xed   :  { %p20432_p2 = por %p20431_p1, %p20430_p0 }
  0xef   :  { %p20433_p3 = pnand %p20432_p2, %p20426_p13 }
  0xf1   :  { %20436 = shalt.err (!%p20433_p3)
}
  0xf2   :  { %s20797_s0 = smov 32   ;;  %s20798_s26 = smov 2  }
  0xf3   :  { %346 = dma.hbm_to_vmem [thread:$0]  %s20968_s12, 416, %s341_s3, [#allocation35], %s20797_s0, %s20797_s0, %s20798_s26  }
  0xf4   :  { %s20799_s4 = smov [#allocation2]   ;;  %s20800_s1 = smov [#allocation6]  }
  0xf5   :  { %s89_s28 = sshll.u32 %s20799_s4, 4  ;;  %s115_s7 = sshll.u32 %s20800_s1, 4  ;;  %s90_s28 = int_to_ptr.vmem [resolvable:$true] %s89_s28  ;;  %s116_s7 = int_to_ptr.vmem [resolvable:$true] %s115_s7 }
  0xf6   :  { %s20437_s10 = scalar_lea.hbm %s20843_s9, 512 }
  0xf7   :  { %p20438_p4 = scmp.ne.s32.totalorder %s20843_s9, %s20437_s10  ;;  %p20441_p5 = scmp.lt.u32.totalorder %s20437_s10, %s20843_s9 }
  0xf9   :  { %p20443_p6 = pnand %p20441_p5, %p20438_p4 }
  0xfb   :  { %20446 = shalt.err (!%p20443_p6)
}
  0xfc   :  { %s20447_s13 = scalar_lea.vmem %s90_s28, 512  ;;  %p20452_p8 = scmp.lt.s32.totalorder %s90_s28, %s90_s28 }
  0xfd   :  { %p20448_p7 = scmp.ne.s32.totalorder %s90_s28, %s20447_s13  ;;  %p20453_p9 = scmp.lt.s32.totalorder %s20447_s13, %s20447_s13 }
  0xff   :  { %p20454_p10 = por %p20453_p9, %p20452_p8 }
 0x101   :  { %p20455_p11 = pnand %p20454_p10, %p20448_p7 }
 0x103   :  { %20458 = shalt.err (!%p20455_p11)
}
 0x104   :  { %92 = dma.hbm_to_vmem [thread:$0]  %s20843_s9, 512, %s90_s28, [#allocation3]  }
 0x105   :  { %s20459_s12 = scalar_lea.hbm %s20868_s29, 16 }
 0x106   :  { %p20460_p12 = scmp.ne.s32.totalorder %s20868_s29, %s20459_s12  ;;  %p20463_p13 = scmp.lt.u32.totalorder %s20459_s12, %s20868_s29 }
 0x108   :  { %p20465_p0 = pnand %p20463_p13, %p20460_p12 }
 0x10a   :  { %20468 = shalt.err (!%p20465_p0)
}
 0x10b   :  { %s20469_s24 = scalar_lea.vmem %s116_s7, 16  ;;  %s20473_s5 = scalar_lea.vmem %s116_s7, 32 }
 0x10c   :  { %p20470_p1 = scmp.ne.s32.totalorder %s116_s7, %s20469_s24  ;;  %p20474_p2 = scmp.lt.s32.totalorder %s116_s7, %s116_s7 }
 0x10d   :  { %p20475_p3 = scmp.lt.s32.totalorder %s20473_s5, %s20469_s24 }
 0x10f   :  { %p20476_p4 = por %p20475_p3, %p20474_p2 }
 0x111   :  { %p20477_p5 = pnand %p20476_p4, %p20470_p1 }
 0x113   :  { %20480 = shalt.err (!%p20477_p5)
}
 0x114   :  { %118 = dma.hbm_to_vmem [thread:$0]  %s20868_s29, 16, %s116_s7, [#allocation5]  }
 0x115   :  { %s20801_s9 = smov [#allocation9]   ;;  %s20802_s22 = smov [#allocation12]  }
 0x116   :  { %s136_s18 = sshll.u32 %s20801_s9, 4  ;;  %s160_s3 = sshll.u32 %s20802_s22, 4  ;;  %s137_s18 = int_to_ptr.vmem [resolvable:$true] %s136_s18  ;;  %s161_s3 = int_to_ptr.vmem [resolvable:$true] %s160_s3 }
 0x117   :  { %s20481_s6 = scalar_lea.hbm %s20878_s8, 32 }
 0x118   :  { %p20482_p6 = scmp.ne.s32.totalorder %s20878_s8, %s20481_s6  ;;  %p20485_p7 = scmp.lt.u32.totalorder %s20481_s6, %s20878_s8 }
 0x11a   :  { %p20487_p8 = pnand %p20485_p7, %p20482_p6 }
 0x11c   :  { %20490 = shalt.err (!%p20487_p8)
}
 0x11d   :  { %s20491_s23 = scalar_lea.vmem %s137_s18, 32  ;;  %p20496_p10 = scmp.lt.s32.totalorder %s137_s18, %s137_s18 }
 0x11e   :  { %p20492_p9 = scmp.ne.s32.totalorder %s137_s18, %s20491_s23  ;;  %p20497_p11 = scmp.lt.s32.totalorder %s20491_s23, %s20491_s23 }
 0x120   :  { %p20498_p12 = por %p20497_p11, %p20496_p10 }
 0x122   :  { %p20499_p13 = pnand %p20498_p12, %p20492_p9 }
 0x124   :  { %20502 = shalt.err (!%p20499_p13)
}
 0x125   :  { %s23626_s29 = sld [smem:[#allocation56_spill]] }
 0x126   :  { %142 = dma.hbm_to_vmem [thread:$0]  %s20878_s8, 32, %s137_s18, [#allocation8], %s20787_s2, %s20787_s2, %s20788_s14  }
 0x12b   :  { %s20503_s17 = scalar_lea.hbm %s23626_s29, 32 }
 0x12c   :  { %p20504_p0 = scmp.ne.s32.totalorder %s23626_s29, %s20503_s17  ;;  %p20507_p1 = scmp.lt.u32.totalorder %s20503_s17, %s23626_s29 }
 0x12e   :  { %p20509_p2 = pnand %p20507_p1, %p20504_p0 }
 0x130   :  { %20512 = shalt.err (!%p20509_p2)
}
 0x131   :  { %s20513_s27 = scalar_lea.vmem %s161_s3, 32  ;;  %p20518_p4 = scmp.lt.s32.totalorder %s161_s3, %s161_s3 }
 0x132   :  { %p20514_p3 = scmp.ne.s32.totalorder %s161_s3, %s20513_s27  ;;  %p20519_p5 = scmp.lt.s32.totalorder %s20513_s27, %s20513_s27 }
 0x134   :  { %p20520_p6 = por %p20519_p5, %p20518_p4 }
 0x136   :  { %p20521_p7 = pnand %p20520_p6, %p20514_p3 }
 0x138   :  { %20524 = shalt.err (!%p20521_p7)
}
 0x139   :  { %s23627_s4 = sld [smem:[#allocation57_spill]]  ;;  %s20803_s8 = smov [#allocation15]  }
 0x13a   :  { %166 = dma.hbm_to_vmem [thread:$0]  %s23626_s29, 32, %s161_s3, [#allocation11], %s20787_s2, %s20787_s2, %s20788_s14  }
 0x13b   :  { %s184_s28 = sshll.u32 %s20803_s8, 4  ;;  %s20804_s1 = smov [#allocation18]   ;;  %s185_s28 = int_to_ptr.vmem [resolvable:$true] %s184_s28 }
 0x13c   :  { %s208_s7 = sshll.u32 %s20804_s1, 4  ;;  %s209_s7 = int_to_ptr.vmem [resolvable:$true] %s208_s7 }
 0x13f   :  { %s20525_s10 = scalar_lea.hbm %s23627_s4, 32 }
 0x140   :  { %p20526_p8 = scmp.ne.s32.totalorder %s23627_s4, %s20525_s10  ;;  %p20529_p9 = scmp.lt.u32.totalorder %s20525_s10, %s23627_s4 }
 0x142   :  { %p20531_p10 = pnand %p20529_p9, %p20526_p8 }
 0x144   :  { %20534 = shalt.err (!%p20531_p10)
}
 0x145   :  { %s20535_s13 = scalar_lea.vmem %s185_s28, 32  ;;  %p20540_p12 = scmp.lt.s32.totalorder %s185_s28, %s185_s28 }
 0x146   :  { %p20536_p11 = scmp.ne.s32.totalorder %s185_s28, %s20535_s13  ;;  %p20541_p13 = scmp.lt.s32.totalorder %s20535_s13, %s20535_s13 }
 0x148   :  { %p20542_p0 = por %p20541_p13, %p20540_p12 }
 0x14a   :  { %p20543_p1 = pnand %p20542_p0, %p20536_p11 }
 0x14c   :  { %20546 = shalt.err (!%p20543_p1)
}
 0x14d   :  { %s23628_s12 = sld [smem:[#allocation58_spill]] }
 0x14e   :  { %190 = dma.hbm_to_vmem [thread:$0]  %s23627_s4, 32, %s185_s28, [#allocation14], %s20787_s2, %s20787_s2, %s20788_s14  }
 0x153   :  { %s20547_s24 = scalar_lea.hbm %s23628_s12, 32 }
 0x154   :  { %p20548_p2 = scmp.ne.s32.totalorder %s23628_s12, %s20547_s24  ;;  %p20551_p3 = scmp.lt.u32.totalorder %s20547_s24, %s23628_s12 }
 0x156   :  { %p20553_p4 = pnand %p20551_p3, %p20548_p2 }
 0x158   :  { %20556 = shalt.err (!%p20553_p4)
}
 0x159   :  { %s20557_s5 = scalar_lea.vmem %s209_s7, 32  ;;  %p20562_p6 = scmp.lt.s32.totalorder %s209_s7, %s209_s7 }
 0x15a   :  { %p20558_p5 = scmp.ne.s32.totalorder %s209_s7, %s20557_s5  ;;  %p20563_p7 = scmp.lt.s32.totalorder %s20557_s5, %s20557_s5 }
 0x15c   :  { %p20564_p8 = por %p20563_p7, %p20562_p6 }
 0x15e   :  { %p20565_p9 = pnand %p20564_p8, %p20558_p5 }
 0x160   :  { %20568 = shalt.err (!%p20565_p9)
}
 0x161   :  { %s23629_s9 = sld [smem:[#allocation60_spill]]  ;;  %s20805_s18 = smov [#allocation21]  }
 0x162   :  { %214 = dma.hbm_to_vmem [thread:$0]  %s23628_s12, 32, %s209_s7, [#allocation17], %s20787_s2, %s20787_s2, %s20788_s14  }
 0x163   :  { %s234_s22 = sshll.u32 %s20805_s18, 4  ;;  %s20806_s3 = smov [#allocation24]   ;;  %s235_s22 = int_to_ptr.vmem [resolvable:$true] %s234_s22 }
 0x164   :  { %s258_s6 = sshll.u32 %s20806_s3, 4  ;;  %s259_s6 = int_to_ptr.vmem [resolvable:$true] %s258_s6 }
 0x167   :  { %s20569_s23 = scalar_lea.hbm %s23629_s9, 32 }
 0x168   :  { %p20570_p10 = scmp.ne.s32.totalorder %s23629_s9, %s20569_s23  ;;  %p20573_p11 = scmp.lt.u32.totalorder %s20569_s23, %s23629_s9 }
 0x16a   :  { %p20575_p12 = pnand %p20573_p11, %p20570_p10 }
 0x16c   :  { %20578 = shalt.err (!%p20575_p12)
}
 0x16d   :  { %s20579_s29 = scalar_lea.vmem %s235_s22, 32  ;;  %p20584_p0 = scmp.lt.s32.totalorder %s235_s22, %s235_s22 }
 0x16e   :  { %p20580_p13 = scmp.ne.s32.totalorder %s235_s22, %s20579_s29  ;;  %p20585_p1 = scmp.lt.s32.totalorder %s20579_s29, %s20579_s29 }
 0x170   :  { %p20586_p2 = por %p20585_p1, %p20584_p0 }
 0x172   :  { %p20587_p3 = pnand %p20586_p2, %p20580_p13 }
 0x174   :  { %20590 = shalt.err (!%p20587_p3)
}
 0x175   :  { %s23630_s17 = sld [smem:[#allocation61_spill]] }
 0x176   :  { %240 = dma.hbm_to_vmem [thread:$0]  %s23629_s9, 32, %s235_s22, [#allocation20], %s20787_s2, %s20787_s2, %s20788_s14  }
 0x17b   :  { %s20591_s27 = scalar_lea.hbm %s23630_s17, 512 }
 0x17c   :  { %p20592_p4 = scmp.ne.s32.totalorder %s23630_s17, %s20591_s27  ;;  %p20595_p5 = scmp.lt.u32.totalorder %s20591_s27, %s23630_s17 }
 0x17e   :  { %p20597_p6 = pnand %p20595_p5, %p20592_p4 }
 0x180   :  { %20600 = shalt.err (!%p20597_p6)
}
 0x181   :  { %s20601_s4 = scalar_lea.vmem %s259_s6, 512  ;;  %p20606_p8 = scmp.lt.s32.totalorder %s259_s6, %s259_s6 }
 0x182   :  { %p20602_p7 = scmp.ne.s32.totalorder %s259_s6, %s20601_s4  ;;  %p20607_p9 = scmp.lt.s32.totalorder %s20601_s4, %s20601_s4 }
 0x184   :  { %p20608_p10 = por %p20607_p9, %p20606_p8 }
 0x186   :  { %p20609_p11 = pnand %p20608_p10, %p20602_p7 }
 0x188   :  { %20612 = shalt.err (!%p20609_p11)
}
 0x189   :  { %s23631_s8 = sld [smem:[#allocation62_spill]]  ;;  %s20807_s14 = smov [#allocation27]  }
 0x18a   :  { %264 = dma.hbm_to_vmem [thread:$0]  %s23630_s17, 512, %s259_s6, [#allocation23], %s20782_s11, %s20782_s11, %s20783_s25  }
 0x18b   :  { %s280_s28 = sshll.u32 %s20807_s14, 4  ;;  %s281_s28 = int_to_ptr.vmem [resolvable:$true] %s280_s28 }
 0x18f   :  { %s20613_s1 = scalar_lea.hbm %s23631_s8, 13312 }
 0x190   :  { %p20614_p12 = scmp.ne.s32.totalorder %s23631_s8, %s20613_s1  ;;  %p20617_p13 = scmp.lt.u32.totalorder %s20613_s1, %s23631_s8 }
 0x192   :  { %p20619_p0 = pnand %p20617_p13, %p20614_p12 }
 0x194   :  { %20622 = shalt.err (!%p20619_p0)
}
 0x195   :  { %s20623_s7 = scalar_lea.vmem %s281_s28, 13312  ;;  %p20628_p2 = scmp.lt.s32.totalorder %s281_s28, %s281_s28 }
 0x196   :  { %p20624_p1 = scmp.ne.s32.totalorder %s281_s28, %s20623_s7  ;;  %p20629_p3 = scmp.lt.s32.totalorder %s20623_s7, %s20623_s7 }
 0x198   :  { %p20630_p4 = por %p20629_p3, %p20628_p2 }
 0x19a   :  { %p20631_p5 = pnand %p20630_p4, %p20624_p1 }
 0x19c   :  { %20634 = shalt.err (!%p20631_p5)
}
 0x19d   :  { %s20808_s10 = smov 256   ;;  %s23632_s13 = sld [smem:[#allocation63_spill]] }
 0x19e   :  { %286 = dma.hbm_to_vmem [thread:$0]  %s23631_s8, 13312, %s281_s28, [#allocation26], %s20808_s10, %s20808_s10, %s20787_s2  }
 0x19f   :  { %s20809_s12 = smov [#allocation30]   ;;  %s20810_s5 = smov [#allocation33]  }
 0x1a0   :  { %s304_s24 = sshll.u32 %s20809_s12, 4  ;;  %s328_s9 = sshll.u32 %s20810_s5, 4  ;;  %s305_s24 = int_to_ptr.vmem [resolvable:$true] %s304_s24  ;;  %s329_s9 = int_to_ptr.vmem [resolvable:$true] %s328_s9 }
 0x1a3   :  { %s20635_s18 = scalar_lea.hbm %s23632_s13, 832 }
 0x1a4   :  { %p20636_p6 = scmp.ne.s32.totalorder %s23632_s13, %s20635_s18  ;;  %p20639_p7 = scmp.lt.u32.totalorder %s20635_s18, %s23632_s13 }
 0x1a6   :  { %p20641_p8 = pnand %p20639_p7, %p20636_p6 }
 0x1a8   :  { %20644 = shalt.err (!%p20641_p8)
}
 0x1a9   :  { %s20645_s22 = scalar_lea.vmem %s305_s24, 832  ;;  %p20650_p10 = scmp.lt.s32.totalorder %s305_s24, %s305_s24 }
 0x1aa   :  { %p20646_p9 = scmp.ne.s32.totalorder %s305_s24, %s20645_s22  ;;  %p20651_p11 = scmp.lt.s32.totalorder %s20645_s22, %s20645_s22 }
 0x1ac   :  { %p20652_p12 = por %p20651_p11, %p20650_p10 }
 0x1ae   :  { %p20653_p13 = pnand %p20652_p12, %p20646_p9 }
 0x1b0   :  { %20656 = shalt.err (!%p20653_p13)
}
 0x1b1   :  { %s23633_s3 = sld [smem:[#allocation64_spill]] }
 0x1b2   :  { %310 = dma.hbm_to_vmem [thread:$0]  %s23632_s13, 832, %s305_s24, [#allocation29], %s20793_s15, %s20793_s15, %s20794_s16  }
 0x1b7   :  { %s20657_s6 = scalar_lea.hbm %s23633_s3, 106496 }
 0x1b8   :  { %p20658_p0 = scmp.ne.s32.totalorder %s23633_s3, %s20657_s6  ;;  %p20661_p1 = scmp.lt.u32.totalorder %s20657_s6, %s23633_s3 }
 0x1ba   :  { %p20663_p2 = pnand %p20661_p1, %p20658_p0 }
 0x1bc   :  { %20666 = shalt.err (!%p20663_p2)
}
 0x1bd   :  { %s20667_s23 = scalar_lea.vmem %s329_s9, 106496  ;;  %p20672_p4 = scmp.lt.s32.totalorder %s329_s9, %s329_s9 }
 0x1be   :  { %p20668_p3 = scmp.ne.s32.totalorder %s329_s9, %s20667_s23  ;;  %p20673_p5 = scmp.lt.s32.totalorder %s20667_s23, %s20667_s23 }
 0x1c0   :  { %p20674_p6 = por %p20673_p5, %p20672_p4 }
 0x1c2   :  { %p20675_p7 = pnand %p20674_p6, %p20668_p3 }
 0x1c4   :  { %20678 = shalt.err (!%p20675_p7)
}
 0x1c5   :  { %s23634_s29 = sld [smem:[#allocation65_spill]]  ;;  %s20811_s16 = smov [#allocation36]  }
 0x1c6   :  { %334 = dma.hbm_to_vmem [thread:$0]  %s23633_s3, 106496, %s329_s9, [#allocation32], %s20782_s11, %s20782_s11, %s20783_s25  }
 0x1c7   :  { %s352_s17 = sshll.u32 %s20811_s16, 4  ;;  %s20812_s27 = smov [#allocation37]   ;;  %s353_s17 = int_to_ptr.vmem [resolvable:$true] %s352_s17 }
 0x1c8   :  { %s364_s4 = sshll.u32 %s20812_s27, 4  ;;  %s365_s4 = int_to_ptr.vmem [resolvable:$true] %s364_s4 }
 0x1cb   :  { %s20679_s8 = scalar_lea.hbm %s23634_s29, 416 }
 0x1cc   :  { %p20680_p8 = scmp.ne.s32.totalorder %s23634_s29, %s20679_s8  ;;  %p20683_p9 = scmp.lt.u32.totalorder %s20679_s8, %s23634_s29 }
 0x1ce   :  { %p20685_p10 = pnand %p20683_p9, %p20680_p8 }
 0x1d0   :  { %20688 = shalt.err (!%p20685_p10)
}
 0x1d1   :  { %s20689_s14 = scalar_lea.vmem %s353_s17, 416  ;;  %p20694_p12 = scmp.lt.s32.totalorder %s353_s17, %s353_s17 }
 0x1d2   :  { %p20690_p11 = scmp.ne.s32.totalorder %s353_s17, %s20689_s14  ;;  %p20695_p13 = scmp.lt.s32.totalorder %s20689_s14, %s20689_s14 }
 0x1d4   :  { %p20696_p0 = por %p20695_p13, %p20694_p12 }
 0x1d6   :  { %p20697_p1 = pnand %p20696_p0, %p20690_p11 }
 0x1d8   :  { %20700 = shalt.err (!%p20697_p1)
}
 0x1d9   :  { %358 = dma.hbm_to_vmem [thread:$0]  %s23634_s29, 416, %s353_s17, [#allocation35], %s20797_s0, %s20797_s0, %s20798_s26  }
 0x1da   :  { %s20701_s11 = scalar_lea.hbm %s20978_s30, 416 }
 0x1db   :  { %p20702_p2 = scmp.ne.s32.totalorder %s20978_s30, %s20701_s11  ;;  %p20705_p3 = scmp.lt.u32.totalorder %s20701_s11, %s20978_s30 }
 0x1dd   :  { %p20707_p4 = pnand %p20705_p3, %p20702_p2 }
 0x1df   :  { %20710 = shalt.err (!%p20707_p4)
}
 0x1e0   :  { %s20711_s28 = scalar_lea.vmem %s365_s4, 416  ;;  %p20716_p6 = scmp.lt.s32.totalorder %s365_s4, %s365_s4 }
 0x1e1   :  { %p20712_p5 = scmp.ne.s32.totalorder %s365_s4, %s20711_s28  ;;  %p20717_p7 = scmp.lt.s32.totalorder %s20711_s28, %s20711_s28 }
 0x1e3   :  { %p20718_p8 = por %p20717_p7, %p20716_p6 }
 0x1e5   :  { %p20719_p9 = pnand %p20718_p8, %p20712_p5 }
 0x1e7   :  { %20722 = shalt.err (!%p20719_p9)
}
 0x1e8   :  { %370 = dma.hbm_to_vmem [thread:$0]  %s20978_s30, 416, %s365_s4, [#allocation38], %s20797_s0, %s20797_s0, %s20798_s26  }
 0x1e9   :  { %20723 = dma.done.wait [#allocation3], 512  }
 0x1ea   :  { %20724 = vsyncadd [#allocation3], 4294966784 }
 0x1eb   :  { %20725 = dma.done.wait [#allocation5], 32  }
 0x1ec   :  { %20726 = vsyncadd [#allocation5], 4294967264 }
 0x1ed   :  { %20727 = dma.done.wait [#allocation8], 1056  }
 0x1ee   :  { %20728 = vsyncadd [#allocation8], 4294966240 }
 0x1ef   :  { %20729 = dma.done.wait [#allocation11], 1056  }
 0x1f0   :  { %20730 = vsyncadd [#allocation11], 4294966240 }
 0x1f1   :  { %20731 = dma.done.wait [#allocation14], 64  }
 0x1f2   :  { %20732 = vsyncadd [#allocation14], 4294967232 }
 0x1f3   :  { %20733 = dma.done.wait [#allocation17], 1056  }
 0x1f4   :  { %20734 = vsyncadd [#allocation17], 4294966240 }
 0x1f5   :  { %20735 = dma.done.wait [#allocation20], 64  }
 0x1f6   :  { %20736 = vsyncadd [#allocation20], 4294967232 }
 0x1f7   :  { %20737 = dma.done.wait [#allocation23], 544  }
 0x1f8   :  { %20738 = vsyncadd [#allocation23], 4294966752 }
 0x1f9   :  { %20739 = dma.done.wait [#allocation26], 13328  }
 0x1fa   :  { %20740 = vsyncadd [#allocation26], 4294953968 }
 0x1fb   :  { %20741 = dma.done.wait [#allocation29], 1664  }
 0x1fc   :  { %20742 = vsyncadd [#allocation29], 4294965632 }
 0x1fd   :  { %20743 = dma.done.wait [#allocation32], 107328  }
 0x1fe   :  { %20744 = vsyncadd [#allocation32], 4294859968 }
 0x1ff   :  { %20745 = dma.done.wait [#allocation35], 832  }
 0x200   :  { %20746 = vsyncadd [#allocation35], 4294966464 }
 0x201   :  { %20747 = dma.done.wait [#allocation38], 416  }
 0x202   :  { %20748 = vsyncadd [#allocation38], 4294966880  ;;  %s23635_s30 = sld [smem:[#allocation54_spill]]  ;;  %v20813_v47 = vmov 1983009808   ;;  %v723_v49 = vlaneseq  ;;  %s23636_s0 = sld [smem:[#allocation55_spill]] }
 0x203   :  { %v721_v48 = vunpack.c.l.s4 %v20813_v47  ;;  %s23637_s26 = sld [smem:[#allocation52_spill]]  ;;  %vm1437_vm2 = vcmask 261120   ;;  %vm20816_vm3 = vmmov 0   ;;  %s23638_s1 = sld [smem:[#allocation53_spill]]  ;;  %vm1578_vm4 = vcmask 64512  }
 0x204   :  { %s20817_s7 = smov 96   ;;  %s20818_s10 = smov 88   ;;  %vm2951_vm5 = vcmask 195584   ;;  %vm2948_vm6 = vcmask 130048   ;;  %vm3217_vm7 = vcmask 523264   ;;  %vm5206_vm8 = vcmask 1040384  }
 0x205   :  { %v722_v63 = vunpack.c.0.s8 %v721_v48  ;;  %s20819_s13 = smov 120   ;;  %s20820_s12 = smov 56   ;;  %vm7299_vm9 = vcmask 1041408  }
 0x206   :  { %s20821_s24 = smov 80   ;;  %s20822_s5 = smov 112  }
 0x207   :  { %s20823_s9 = smov 48   ;;  %s20824_s18 = smov 72  }
 0x208   :  { %v468_v0 = vld [vmem:[%s23635_s30 + $0x80] sm:$0xff]  ;;  %v469_v1 = vld [vmem:[%s23635_s30 + $0x88] sm:$0xff]  ;;  %v470_v11 = vld [vmem:[%s23635_s30 + $0x90] sm:$0xff]  ;;  %s20825_s22 = smov 104   ;;  %s20826_s3 = smov 40  }
 0x209   :  { %v452_v2 = vld [vmem:[%s23635_s30] sm:$0xff]  ;;  %v18138_v3 = vpack.c.bf16 %v469_v1, %v468_v0  ;;  %v453_v4 = vld [vmem:[%s23635_s30 + $0x8] sm:$0xff]  ;;  %v471_v13 = vld [vmem:[%s23635_s30 + $0x98] sm:$0xff]  ;;  %v21198_v0 = vshrl.u32 %v723_v49, 7  ;;  %s20827_s6 = smov 24   ;;  %s23639_s23 = sld [smem:[#allocation59_spill]] }
 0x20a   :  { %v500_v5 = vld [vmem:[%s23635_s30 + $0x180] sm:$0xff]  ;;  %v501_v6 = vld [vmem:[%s23635_s30 + $0x188] sm:$0xff]  ;;  %v18140_v7 = vpack.c.bf16 %v453_v4, %v452_v2  ;;  %v454_v14 = vld [vmem:[%s23635_s30 + $0x10] sm:$0xff]  ;;  %v18142_v16 = vpack.c.bf16 %v471_v13, %v470_v11 }
 0x20b   :  { %v18170_v8 = vpack.c.bf16 %v501_v6, %v500_v5  ;;  %v484_v9 = vld [vmem:[%s23635_s30 + $0x100] sm:$0xff]  ;;  %v485_v10 = vld [vmem:[%s23635_s30 + $0x108] sm:$0xff]  ;;  %18139 = vmatprep.subr.bf16.mxu0 %v18138_v3  ;;  %v455_v15 = vld [vmem:[%s23635_s30 + $0x18] sm:$0xff]  ;;  %v21209_v13 = vsub.s32 %v722_v63, %v21198_v0 }
 0x20c   :  { %v18172_v12 = vpack.c.bf16 %v485_v10, %v484_v9  ;;  %18141 = vmatpush3.bf16.msra.mxu0 %v18140_v7  ;;  %v18144_v17 = vpack.c.bf16 %v455_v15, %v454_v14  ;;  %v502_v18 = vld [vmem:[%s23635_s30 + $0x190] sm:$0xff]  ;;  %v503_v19 = vld [vmem:[%s23635_s30 + $0x198] sm:$0xff]  ;;  %v472_v23 = vld [vmem:[%s23635_s30 + $0xa0] sm:$0xff] }
 0x20d   :  { %18171 = vmatprep.subr.bf16.mxu1 %v18170_v8  ;;  %v486_v20 = vld [vmem:[%s23635_s30 + $0x110] sm:$0xff]  ;;  %v18174_v21 = vpack.c.bf16 %v503_v19, %v502_v18  ;;  %v487_v22 = vld [vmem:[%s23635_s30 + $0x118] sm:$0xff]  ;;  %v473_v24 = vld [vmem:[%s23635_s30 + $0xa8] sm:$0xff]  ;;  %18143 = vmatprep.subr.bf16.mxu0 %v18142_v16 }
 0x20e   :  { %18173 = vmatpush3.bf16.msra.mxu1 %v18172_v12  ;;  %v18176_v25 = vpack.c.bf16 %v487_v22, %v486_v20  ;;  %v18146_v26 = vpack.c.bf16 %v473_v24, %v472_v23  ;;  %v456_v27 = vld [vmem:[%s23635_s30 + $0x20] sm:$0xff]  ;;  %v457_v28 = vld [vmem:[%s23635_s30 + $0x28] sm:$0xff]  ;;  %v474_v35 = vld [vmem:[%s23635_s30 + $0xb0] sm:$0xff] }
 0x20f   :  { %v504_v29 = vld [vmem:[%s23635_s30 + $0x1a0] sm:$0xff]  ;;  %18175 = vmatprep.subr.bf16.mxu1 %v18174_v21  ;;  %v505_v30 = vld [vmem:[%s23635_s30 + $0x1a8] sm:$0xff]  ;;  %v18148_v33 = vpack.c.bf16 %v457_v28, %v456_v27  ;;  %v475_v36 = vld [vmem:[%s23635_s30 + $0xb8] sm:$0xff] }
 0x210   :  { %v488_v31 = vld [vmem:[%s23635_s30 + $0x120] sm:$0xff]  ;;  %v489_v32 = vld [vmem:[%s23635_s30 + $0x128] sm:$0xff]  ;;  %18145 = vmatpush3.bf16.msra.mxu0 %v18144_v17  ;;  %v18178_v34 = vpack.c.bf16 %v505_v30, %v504_v29  ;;  %v458_v37 = vld [vmem:[%s23635_s30 + $0x30] sm:$0xff]  ;;  %v18150_v39 = vpack.c.bf16 %v475_v36, %v474_v35 }
 0x211   :  { %18147 = vmatprep.subr.bf16.mxu0 %v18146_v26  ;;  %v18180_v38 = vpack.c.bf16 %v489_v32, %v488_v31  ;;  %v459_v40 = vld [vmem:[%s23635_s30 + $0x38] sm:$0xff]  ;;  %v506_v41 = vld [vmem:[%s23635_s30 + $0x1b0] sm:$0xff]  ;;  %v476_v46 = vld [vmem:[%s23635_s30 + $0xc0] sm:$0xff] }
 0x212   :  { %18177 = vmatpush3.bf16.msra.mxu1 %v18176_v25  ;;  %v507_v42 = vld [vmem:[%s23635_s30 + $0x1b8] sm:$0xff]  ;;  %v490_v44 = vld [vmem:[%s23635_s30 + $0x130] sm:$0xff]  ;;  %v477_v50 = vld [vmem:[%s23635_s30 + $0xc8] sm:$0xff]  ;;  %v18152_v51 = vpack.c.bf16 %v459_v40, %v458_v37 }
 0x213   :  { %18179 = vmatprep.subr.bf16.mxu1 %v18178_v34  ;;  %v18182_v43 = vpack.c.bf16 %v507_v42, %v506_v41  ;;  %v491_v45 = vld [vmem:[%s23635_s30 + $0x138] sm:$0xff]  ;;  %v508_v52 = vld [vmem:[%s23635_s30 + $0x1c0] sm:$0xff]  ;;  %v509_v53 = vld [vmem:[%s23635_s30 + $0x1c8] sm:$0xff]  ;;  %v18154_v55 = vpack.c.bf16 %v477_v50, %v476_v46 }
 0x214   :  { %18149 = vmatpush3.bf16.msra.mxu0 %v18148_v33  ;;  %v18184_v54 = vpack.c.bf16 %v491_v45, %v490_v44  ;;  %v460_v56 = vld [vmem:[%s23635_s30 + $0x40] sm:$0xff]  ;;  %v461_v57 = vld [vmem:[%s23635_s30 + $0x48] sm:$0xff]  ;;  %v18186_v59 = vpack.c.bf16 %v509_v53, %v508_v52  ;;  %v478_v61 = vld [vmem:[%s23635_s30 + $0xd0] sm:$0xff] }
 0x215   :  { %18151 = vmatprep.subr.bf16.mxu0 %v18150_v39  ;;  %v492_v58 = vld [vmem:[%s23635_s30 + $0x140] sm:$0xff]  ;;  %v493_v60 = vld [vmem:[%s23635_s30 + $0x148] sm:$0xff]  ;;  %v479_v62 = vld [vmem:[%s23635_s30 + $0xd8] sm:$0xff]  ;;  %v18156_v3 = vpack.c.bf16 %v461_v57, %v460_v56 }
 0x216   :  { %18181 = vmatpush3.bf16.msra.mxu1 %v18180_v38  ;;  %v510_v1 = vld [vmem:[%s23635_s30 + $0x1d0] sm:$0xff]  ;;  %v511_v2 = vld [vmem:[%s23635_s30 + $0x1d8] sm:$0xff]  ;;  %v18188_v4 = vpack.c.bf16 %v493_v60, %v492_v58  ;;  %v18158_v5 = vpack.c.bf16 %v479_v62, %v478_v61  ;;  %v480_v11 = vld [vmem:[%s23635_s30 + $0xe0] sm:$0xff] }
 0x217   :  { %18183 = vmatprep.subr.bf16.mxu1 %v18182_v43  ;;  %v462_v6 = vld [vmem:[%s23635_s30 + $0x50] sm:$0xff]  ;;  %v463_v7 = vld [vmem:[%s23635_s30 + $0x58] sm:$0xff]  ;;  %v18190_v9 = vpack.c.bf16 %v511_v2, %v510_v1  ;;  %v481_v12 = vld [vmem:[%s23635_s30 + $0xe8] sm:$0xff] }
 0x218   :  { %18153 = vmatpush3.bf16.msra.mxu0 %v18152_v51  ;;  %v494_v8 = vld [vmem:[%s23635_s30 + $0x150] sm:$0xff]  ;;  %v495_v10 = vld [vmem:[%s23635_s30 + $0x158] sm:$0xff]  ;;  %v512_v14 = vld [vmem:[%s23635_s30 + $0x1e0] sm:$0xff]  ;;  %v18160_v16 = vpack.c.bf16 %v463_v7, %v462_v6  ;;  %v18162_v19 = vpack.c.bf16 %v481_v12, %v480_v11 }
 0x219   :  { %18155 = vmatprep.subr.bf16.mxu0 %v18154_v55  ;;  %v513_v15 = vld [vmem:[%s23635_s30 + $0x1e8] sm:$0xff]  ;;  %v464_v17 = vld [vmem:[%s23635_s30 + $0x60] sm:$0xff]  ;;  %v18192_v18 = vpack.c.bf16 %v495_v10, %v494_v8  ;;  %v482_v25 = vld [vmem:[%s23635_s30 + $0xf0] sm:$0xff] }
 0x21a   :  { %18185 = vmatpush3.bf16.msra.mxu1 %v18184_v54  ;;  %v465_v20 = vld [vmem:[%s23635_s30 + $0x68] sm:$0xff]  ;;  %v496_v21 = vld [vmem:[%s23635_s30 + $0x160] sm:$0xff]  ;;  %v18194_v23 = vpack.c.bf16 %v513_v15, %v512_v14  ;;  %v483_v26 = vld [vmem:[%s23635_s30 + $0xf8] sm:$0xff] }
 0x21b   :  { %18187 = vmatprep.subr.bf16.mxu1 %v18186_v59  ;;  %v448_v22 = vld [vmem:[#allocation2] sm:$0xff]  ;;  %v497_v24 = vld [vmem:[%s23635_s30 + $0x168] sm:$0xff]  ;;  %v514_v29 = vld [vmem:[%s23635_s30 + $0x1f0] sm:$0xff]  ;;  %v18164_v31 = vpack.c.bf16 %v465_v20, %v464_v17  ;;  %v18166_v35 = vpack.c.bf16 %v483_v26, %v482_v25 }
 0x21c   :  { %18157 = vmatpush3.bf16.msra.mxu0 %v18156_v3  ;;  %v726_v27 = vrot.slane %v448_v22, %v21209_v13  ;;  %v719_v28 = vcombine.high %v448_v22, %v448_v22  ;;  %v515_v30 = vld [vmem:[%s23635_s30 + $0x1f8] sm:$0xff]  ;;  %v18196_v34 = vpack.c.bf16 %v497_v24, %v496_v21  ;;  %v466_v36 = vld [vmem:[%s23635_s30 + $0x70] sm:$0xff]  ;;  %v532_v41 = vld [vmem:[%s23635_s30 + $0x280] sm:$0xff] }
 0x21d   :  { %18159 = vmatprep.subr.bf16.mxu0 %v18158_v5  ;;  %v467_v37 = vld [vmem:[%s23635_s30 + $0x78] sm:$0xff]  ;;  %v498_v38 = vld [vmem:[%s23635_s30 + $0x170] sm:$0xff]  ;;  %v18198_v39 = vpack.c.bf16 %v515_v30, %v514_v29  ;;  %v533_v42 = vld [vmem:[%s23635_s30 + $0x288] sm:$0xff] }
 0x21e   :  { %18189 = vmatpush3.bf16.msra.mxu1 %v18188_v4  ;;  %v734_v32 = vcombine.high %v726_v27, %v726_v27  ;;  %v733_v33 = vrot.slane %v719_v28, %v21209_v13  ;;  %v499_v40 = vld [vmem:[%s23635_s30 + $0x178] sm:$0xff]  ;;  %v564_v44 = vld [vmem:[%s23635_s30 + $0x380] sm:$0xff]  ;;  %v565_v45 = vld [vmem:[%s23635_s30 + $0x388] sm:$0xff]  ;;  %v18168_v46 = vpack.c.bf16 %v467_v37, %v466_v36  ;;  %v18202_v48 = vpack.c.bf16 %v533_v42, %v532_v41 }
 0x21f   :  { %18191 = vmatprep.subr.bf16.mxu1 %v18190_v9  ;;  %v18200_v47 = vpack.c.bf16 %v499_v40, %v498_v38  ;;  %v516_v49 = vld [vmem:[%s23635_s30 + $0x200] sm:$0xff]  ;;  %v517_v50 = vld [vmem:[%s23635_s30 + $0x208] sm:$0xff]  ;;  %v18234_v52 = vpack.c.bf16 %v565_v45, %v564_v44  ;;  %v534_v54 = vld [vmem:[%s23635_s30 + $0x290] sm:$0xff] }
 0x220   :  { %18161 = vmatpush3.bf16.msra.mxu0 %v18160_v16  ;;  %867 = vmatprep.mubr.f32.mxu0 %v734_v32  ;;  %v735_v43 = vcombine.high %v733_v33, %v733_v33  ;;  %v548_v51 = vld [vmem:[%s23635_s30 + $0x300] sm:$0xff]  ;;  %v549_v53 = vld [vmem:[%s23635_s30 + $0x308] sm:$0xff]  ;;  %v535_v55 = vld [vmem:[%s23635_s30 + $0x298] sm:$0xff]  ;;  %v18204_v58 = vpack.c.bf16 %v517_v50, %v516_v49 }
 0x221   :  { %18163 = vmatprep.subr.bf16.mxu0 %v18162_v19  ;;  %v566_v56 = vld [vmem:[%s23635_s30 + $0x390] sm:$0xff]  ;;  %v567_v57 = vld [vmem:[%s23635_s30 + $0x398] sm:$0xff]  ;;  %v18236_v59 = vpack.c.bf16 %v549_v53, %v548_v51  ;;  %v18206_v60 = vpack.c.bf16 %v535_v55, %v534_v54  ;;  %v536_v3 = vld [vmem:[%s23635_s30 + $0x2a0] sm:$0xff] }
 0x222   :  { %18193 = vmatpush3.bf16.msra.mxu1 %v18192_v18  ;;  %937 = vmatprep.mubr.f32.mxu1 %v735_v43  ;;  %v518_v61 = vld [vmem:[%s23635_s30 + $0x210] sm:$0xff]  ;;  %v519_v62 = vld [vmem:[%s23635_s30 + $0x218] sm:$0xff]  ;;  %v18238_v1 = vpack.c.bf16 %v567_v57, %v566_v56  ;;  %v537_v4 = vld [vmem:[%s23635_s30 + $0x2a8] sm:$0xff] }
 0x223   :  { %18195 = vmatprep.subr.bf16.mxu1 %v18194_v23  ;;  %v550_v63 = vld [vmem:[%s23635_s30 + $0x310] sm:$0xff]  ;;  %v551_v2 = vld [vmem:[%s23635_s30 + $0x318] sm:$0xff]  ;;  %v568_v5 = vld [vmem:[%s23635_s30 + $0x3a0] sm:$0xff]  ;;  %v18208_v7 = vpack.c.bf16 %v519_v62, %v518_v61  ;;  %v18210_v9 = vpack.c.bf16 %v537_v4, %v536_v3 }
 0x224   :  { %18165 = vmatpush3.bf16.msra.mxu0 %v18164_v31  ;;  %v569_v6 = vld [vmem:[%s23635_s30 + $0x3a8] sm:$0xff]  ;;  %v18240_v8 = vpack.c.bf16 %v551_v2, %v550_v63  ;;  %v520_v10 = vld [vmem:[%s23635_s30 + $0x220] sm:$0xff]  ;;  %v538_v16 = vld [vmem:[%s23635_s30 + $0x2b0] sm:$0xff] }
 0x225   :  { %18167 = vmatprep.subr.bf16.mxu0 %v18166_v35  ;;  %v521_v11 = vld [vmem:[%s23635_s30 + $0x228] sm:$0xff]  ;;  %v552_v12 = vld [vmem:[%s23635_s30 + $0x320] sm:$0xff]  ;;  %v18242_v14 = vpack.c.bf16 %v569_v6, %v568_v5  ;;  %v539_v17 = vld [vmem:[%s23635_s30 + $0x2b8] sm:$0xff] }
 0x226   :  { %18197 = vmatpush3.bf16.msra.mxu1 %v18196_v34  ;;  %v553_v15 = vld [vmem:[%s23635_s30 + $0x328] sm:$0xff]  ;;  %v570_v18 = vld [vmem:[%s23635_s30 + $0x3b0] sm:$0xff]  ;;  %v571_v19 = vld [vmem:[%s23635_s30 + $0x3b8] sm:$0xff]  ;;  %v18212_v20 = vpack.c.bf16 %v521_v11, %v520_v10  ;;  %v18214_v22 = vpack.c.bf16 %v539_v17, %v538_v16 }
 0x227   :  { %18199 = vmatprep.subr.bf16.mxu1 %v18198_v39  ;;  %v18244_v21 = vpack.c.bf16 %v553_v15, %v552_v12  ;;  %v522_v23 = vld [vmem:[%s23635_s30 + $0x230] sm:$0xff]  ;;  %v523_v24 = vld [vmem:[%s23635_s30 + $0x238] sm:$0xff]  ;;  %v18246_v26 = vpack.c.bf16 %v571_v19, %v570_v18  ;;  %v540_v28 = vld [vmem:[%s23635_s30 + $0x2c0] sm:$0xff] }
 0x228   :  { %18169 = vmatpush3.bf16.msra.mxu0 %v18168_v46  ;;  %v554_v25 = vld [vmem:[%s23635_s30 + $0x330] sm:$0xff]  ;;  %v541_v29 = vld [vmem:[%s23635_s30 + $0x2c8] sm:$0xff]  ;;  %v572_v30 = vld [vmem:[%s23635_s30 + $0x3c0] sm:$0xff] }
 0x229   :  { %18203 = vmatprep.subr.bf16.mxu0 %v18202_v48  ;;  %v573_v31 = vld [vmem:[%s23635_s30 + $0x3c8] sm:$0xff]  ;;  %v18218_v37 = vpack.c.bf16 %v541_v29, %v540_v28  ;;  %v524_v38 = vld [vmem:[%s23635_s30 + $0x240] sm:$0xff]  ;;  %v542_v43 = vld [vmem:[%s23635_s30 + $0x2d0] sm:$0xff] }
 0x22a   :  { %18201 = vmatpush3.bf16.msra.mxu1 %v18200_v47  ;;  %v449_v32 = vld [vmem:[#allocation2 + $0x8] sm:$0xff]  ;;  %v556_v40 = vld [vmem:[%s23635_s30 + $0x340] sm:$0xff]  ;;  %v18250_v41 = vpack.c.bf16 %v573_v31, %v572_v30  ;;  %v543_v44 = vld [vmem:[%s23635_s30 + $0x2d8] sm:$0xff] }
 0x22b   :  { %18235 = vmatprep.subr.bf16.mxu1 %v18234_v52  ;;  %868 = vmatmul.mubr.f32.vlgmr.msra.gmra.mrb[0].mxu0 %v726_v27  ;;  %v555_v27 = vld [vmem:[%s23635_s30 + $0x338] sm:$0xff]  ;;  %v21264_v34 = vrot.slane %v449_v32, %v21209_v13  ;;  %v736_v35 = vcombine.high %v449_v32, %v449_v32  ;;  %v525_v39 = vld [vmem:[%s23635_s30 + $0x248] sm:$0xff]  ;;  %v574_v47 = vld [vmem:[%s23635_s30 + $0x3d0] sm:$0xff]  ;;  %v18222_v52 = vpack.c.bf16 %v543_v44, %v542_v43 }
 0x22c   :  { %18205 = vmatpush3.bf16.msra.mxu0 %v18204_v58  ;;  %v18248_v36 = vpack.c.bf16 %v555_v27, %v554_v25  ;;  %v557_v42 = vld [vmem:[%s23635_s30 + $0x348] sm:$0xff]  ;;  %v575_v48 = vld [vmem:[%s23635_s30 + $0x3d8] sm:$0xff]  ;;  %v18220_v49 = vpack.c.bf16 %v525_v39, %v524_v38  ;;  %v526_v53 = vld [vmem:[%s23635_s30 + $0x250] sm:$0xff] }
 0x22d   :  { %938 = vmatmul.mubr.f32.vlgmr.msra.gmra.mrb[0].mxu1 %v733_v33  ;;  %18207 = vmatprep.subr.bf16.mxu0 %v18206_v60  ;;  %v18216_v33 = vpack.c.bf16 %v523_v24, %v522_v23  ;;  %v751_v45 = vcombine.high %v21264_v34, %v21264_v34  ;;  %v21275_v46 = vrot.slane %v736_v35, %v21209_v13  ;;  %v527_v54 = vld [vmem:[%s23635_s30 + $0x258] sm:$0xff]  ;;  %v558_v55 = vld [vmem:[%s23635_s30 + $0x350] sm:$0xff]  ;;  %v544_v58 = vld [vmem:[%s23635_s30 + $0x2e0] sm:$0xff] }
 0x22e   :  { %18237 = vmatpush3.bf16.msra.mxu1 %v18236_v59  ;;  %v18252_v51 = vpack.c.bf16 %v557_v42, %v556_v40  ;;  %v18254_v56 = vpack.c.bf16 %v575_v48, %v574_v47  ;;  %v559_v57 = vld [vmem:[%s23635_s30 + $0x358] sm:$0xff]  ;;  %v545_v59 = vld [vmem:[%s23635_s30 + $0x2e8] sm:$0xff]  ;;  %v576_v60 = vld [vmem:[%s23635_s30 + $0x3e0] sm:$0xff]  ;;  %v18224_v62 = vpack.c.bf16 %v527_v54, %v526_v53 }
 0x22f   :  { %18239 = vmatprep.subr.bf16.mxu1 %v18238_v1  ;;  %1007 = vmatprep.mubr.f32.mxu0 %v751_v45  ;;  %v752_v50 = vcombine.high %v21275_v46, %v21275_v46  ;;  %v577_v61 = vld [vmem:[%s23635_s30 + $0x3e8] sm:$0xff]  ;;  %v18256_v63 = vpack.c.bf16 %v559_v57, %v558_v55  ;;  %v18226_v1 = vpack.c.bf16 %v545_v59, %v544_v58  ;;  %v528_v2 = vld [vmem:[%s23635_s30 + $0x260] sm:$0xff]  ;;  %v579_v10 = vld [vmem:[%s23635_s30 + $0x3f8] sm:$0xff] }
 0x230   :  { %18209 = vmatpush3.bf16.msra.mxu0 %v18208_v7  ;;  %v529_v3 = vld [vmem:[%s23635_s30 + $0x268] sm:$0xff]  ;;  %v560_v4 = vld [vmem:[%s23635_s30 + $0x360] sm:$0xff]  ;;  %v18258_v5 = vpack.c.bf16 %v577_v61, %v576_v60  ;;  %v546_v7 = vld [vmem:[%s23635_s30 + $0x2f0] sm:$0xff] }
 0x231   :  { %18211 = vmatprep.subr.bf16.mxu0 %v18210_v9  ;;  %1077 = vmatprep.mubr.f32.mxu1 %v752_v50  ;;  %v561_v6 = vld [vmem:[%s23635_s30 + $0x368] sm:$0xff]  ;;  %v578_v9 = vld [vmem:[%s23635_s30 + $0x3f0] sm:$0xff]  ;;  %v18228_v11 = vpack.c.bf16 %v529_v3, %v528_v2  ;;  %v531_v16 = vld [vmem:[%s23635_s30 + $0x278] sm:$0xff] }
 0x232   :  { %18241 = vmatpush3.bf16.msra.mxu1 %v18240_v8  ;;  %v547_v8 = vld [vmem:[%s23635_s30 + $0x2f8] sm:$0xff]  ;;  %v18260_v12 = vpack.c.bf16 %v561_v6, %v560_v4  ;;  %v530_v15 = vld [vmem:[%s23635_s30 + $0x270] sm:$0xff]  ;;  %v18262_v18 = vpack.c.bf16 %v579_v10, %v578_v9  ;;  %v629_v23 = vld [vmem:[%s23635_s30 + $0x588] sm:$0xff] }
 0x233   :  { %18243 = vmatprep.subr.bf16.mxu1 %v18242_v14  ;;  %v18230_v14 = vpack.c.bf16 %v547_v8, %v546_v7  ;;  %v562_v17 = vld [vmem:[%s23635_s30 + $0x370] sm:$0xff]  ;;  %v563_v19 = vld [vmem:[%s23635_s30 + $0x378] sm:$0xff]  ;;  %v18232_v24 = vpack.c.bf16 %v531_v16, %v530_v15  ;;  %v580_v25 = vld [vmem:[%s23635_s30 + $0x400] sm:$0xff] }
 0x234   :  { %18213 = vmatpush3.bf16.msra.mxu0 %v18212_v20  ;;  %v596_v20 = vld [vmem:[%s23635_s30 + $0x480] sm:$0xff]  ;;  %v581_v28 = vld [vmem:[%s23635_s30 + $0x408] sm:$0xff]  ;;  %v598_v32 = vld [vmem:[%s23635_s30 + $0x490] sm:$0xff] }
 0x235   :  { %18215 = vmatprep.subr.bf16.mxu0 %v18214_v22  ;;  %v628_v22 = vld [vmem:[%s23635_s30 + $0x580] sm:$0xff]  ;;  %v613_v30 = vld [vmem:[%s23635_s30 + $0x508] sm:$0xff]  ;;  %v630_v35 = vld [vmem:[%s23635_s30 + $0x590] sm:$0xff] }
 0x236   :  { %18245 = vmatpush3.bf16.msra.mxu1 %v18244_v21  ;;  %v597_v21 = vld [vmem:[%s23635_s30 + $0x488] sm:$0xff]  ;;  %v612_v29 = vld [vmem:[%s23635_s30 + $0x500] sm:$0xff]  ;;  %v18298_v31 = vpack.c.bf16 %v629_v23, %v628_v22  ;;  %v450_v39 = vld [vmem:[#allocation2 + $0x10] sm:$0xff] }
 0x237   :  { %18247 = vmatprep.subr.bf16.mxu1 %v18246_v26  ;;  %v18264_v26 = vpack.c.bf16 %v563_v19, %v562_v17  ;;  %v18266_v27 = vpack.c.bf16 %v597_v21, %v596_v20  ;;  %v18300_v38 = vpack.c.bf16 %v613_v30, %v612_v29  ;;  %v583_v42 = vld [vmem:[%s23635_s30 + $0x418] sm:$0xff]  ;;  %v614_v43 = vld [vmem:[%s23635_s30 + $0x510] sm:$0xff]  ;;  %v21317_v44 = vrot.slane %v450_v39, %v21209_v13  ;;  %v601_v50 = vld [vmem:[%s23635_s30 + $0x4a8] sm:$0xff] }
 0x238   :  { %18217 = vmatpush3.bf16.msra.mxu0 %v18216_v33  ;;  %v599_v33 = vld [vmem:[%s23635_s30 + $0x498] sm:$0xff]  ;;  %v753_v45 = vcombine.high %v450_v39, %v450_v39  ;;  %v584_v57 = vld [vmem:[%s23635_s30 + $0x420] sm:$0xff]  ;;  %v585_v58 = vld [vmem:[%s23635_s30 + $0x428] sm:$0xff] }
 0x239   :  { %18219 = vmatprep.subr.bf16.mxu0 %v18218_v37  ;;  %v18268_v37 = vpack.c.bf16 %v581_v28, %v580_v25  ;;  %v18270_v40 = vpack.c.bf16 %v599_v33, %v598_v32  ;;  %v615_v48 = vld [vmem:[%s23635_s30 + $0x518] sm:$0xff]  ;;  %v768_v53 = vcombine.high %v21317_v44, %v21317_v44  ;;  %v616_v59 = vld [vmem:[%s23635_s30 + $0x520] sm:$0xff]  ;;  %v18276_v3 = vpack.c.bf16 %v585_v58, %v584_v57  ;;  %v586_v6 = vld [vmem:[%s23635_s30 + $0x430] sm:$0xff] }
 0x23a   :  { %18249 = vmatpush3.bf16.msra.mxu1 %v18248_v36  ;;  %v631_v36 = vld [vmem:[%s23635_s30 + $0x598] sm:$0xff]  ;;  %v21328_v54 = vrot.slane %v753_v45, %v21209_v13  ;;  %v618_v8 = vld [vmem:[%s23635_s30 + $0x530] sm:$0xff]  ;;  %v637_v15 = vld [vmem:[%s23635_s30 + $0x5c8] sm:$0xff] }
 0x23b   :  { %18251 = vmatprep.subr.bf16.mxu1 %v18250_v41  ;;  %v582_v41 = vld [vmem:[%s23635_s30 + $0x410] sm:$0xff]  ;;  %v18302_v47 = vpack.c.bf16 %v631_v36, %v630_v35  ;;  %v635_v2 = vld [vmem:[%s23635_s30 + $0x5b8] sm:$0xff]  ;;  %v588_v19 = vld [vmem:[%s23635_s30 + $0x440] sm:$0xff] }
 0x23c   :  { %18221 = vmatpush3.bf16.msra.mxu0 %v18220_v49  ;;  %v600_v49 = vld [vmem:[%s23635_s30 + $0x4a0] sm:$0xff]  ;;  %v18272_v55 = vpack.c.bf16 %v583_v42, %v582_v41  ;;  %v769_v60 = vcombine.high %v21328_v54, %v21328_v54  ;;  %v587_v7 = vld [vmem:[%s23635_s30 + $0x438] sm:$0xff]  ;;  %v589_v20 = vld [vmem:[%s23635_s30 + $0x448] sm:$0xff] }
 0x23d   :  { %18223 = vmatprep.subr.bf16.mxu0 %v18222_v52  ;;  %v633_v52 = vld [vmem:[%s23635_s30 + $0x5a8] sm:$0xff]  ;;  %v619_v10 = vld [vmem:[%s23635_s30 + $0x538] sm:$0xff]  ;;  %v18280_v16 = vpack.c.bf16 %v587_v7, %v586_v6  ;;  %v620_v21 = vld [vmem:[%s23635_s30 + $0x540] sm:$0xff]  ;;  %v18284_v28 = vpack.c.bf16 %v589_v20, %v588_v19 }
 0x23e   :  { %18253 = vmatpush3.bf16.msra.mxu1 %v18252_v51  ;;  %v632_v51 = vld [vmem:[%s23635_s30 + $0x5a0] sm:$0xff]  ;;  %v18312_v17 = vpack.c.bf16 %v619_v10, %v618_v8  ;;  %v621_v23 = vld [vmem:[%s23635_s30 + $0x548] sm:$0xff]  ;;  %v607_v25 = vld [vmem:[%s23635_s30 + $0x4d8] sm:$0xff] }
 0x23f   :  { %18255 = vmatprep.subr.bf16.mxu1 %v18254_v56  ;;  %v18274_v56 = vpack.c.bf16 %v601_v50, %v600_v49  ;;  %v18306_v61 = vpack.c.bf16 %v633_v52, %v632_v51  ;;  %v18316_v29 = vpack.c.bf16 %v621_v23, %v620_v21  ;;  %v591_v32 = vld [vmem:[%s23635_s30 + $0x458] sm:$0xff]  ;;  %v622_v33 = vld [vmem:[%s23635_s30 + $0x550] sm:$0xff]  ;;  %v592_v39 = vld [vmem:[%s23635_s30 + $0x460] sm:$0xff] }
 0x240   :  { %18225 = vmatpush3.bf16.msra.mxu0 %v18224_v62  ;;  %v617_v62 = vld [vmem:[%s23635_s30 + $0x528] sm:$0xff]  ;;  %v623_v36 = vld [vmem:[%s23635_s30 + $0x558] sm:$0xff]  ;;  %v624_v45 = vld [vmem:[%s23635_s30 + $0x560] sm:$0xff] }
 0x241   :  { %18227 = vmatprep.subr.bf16.mxu0 %v18226_v1  ;;  %v634_v1 = vld [vmem:[%s23635_s30 + $0x5b0] sm:$0xff]  ;;  %v18308_v4 = vpack.c.bf16 %v617_v62, %v616_v59  ;;  %v641_v41 = vld [vmem:[%s23635_s30 + $0x5e8] sm:$0xff]  ;;  %v611_v51 = vld [vmem:[%s23635_s30 + $0x4f8] sm:$0xff] }
 0x242   :  { %18257 = vmatpush3.bf16.msra.mxu1 %v18256_v63  ;;  %v603_v63 = vld [vmem:[%s23635_s30 + $0x4b8] sm:$0xff]  ;;  %v18310_v9 = vpack.c.bf16 %v635_v2, %v634_v1  ;;  %v610_v50 = vld [vmem:[%s23635_s30 + $0x4f0] sm:$0xff]  ;;  %v661_v62 = vld [vmem:[%s23635_s30 + $0x688] sm:$0xff] }
 0x243   :  { %18259 = vmatprep.subr.bf16.mxu1 %v18258_v5  ;;  %v642_v52 = vld [vmem:[%s23635_s30 + $0x5f0] sm:$0xff]  ;;  %v595_v57 = vld [vmem:[%s23635_s30 + $0x478] sm:$0xff]  ;;  %v692_v1 = vld [vmem:[%s23635_s30 + $0x780] sm:$0xff] }
 0x244   :  { %18229 = vmatpush3.bf16.msra.mxu0 %v18228_v11  ;;  %v604_v11 = vld [vmem:[%s23635_s30 + $0x4c0] sm:$0xff]  ;;  %v626_v59 = vld [vmem:[%s23635_s30 + $0x570] sm:$0xff]  ;;  %v693_v2 = vld [vmem:[%s23635_s30 + $0x788] sm:$0xff] }
 0x245   :  { %18231 = vmatprep.subr.bf16.mxu0 %v18230_v14  ;;  %v636_v14 = vld [vmem:[%s23635_s30 + $0x5c0] sm:$0xff]  ;;  %v662_v10 = vld [vmem:[%s23635_s30 + $0x690] sm:$0xff]  ;;  %v647_v20 = vld [vmem:[%s23635_s30 + $0x618] sm:$0xff] }
 0x246   :  { %18261 = vmatpush3.bf16.msra.mxu1 %v18260_v12  ;;  %v605_v12 = vld [vmem:[%s23635_s30 + $0x4c8] sm:$0xff]  ;;  %v18314_v22 = vpack.c.bf16 %v637_v15, %v636_v14  ;;  %v676_v8 = vld [vmem:[%s23635_s30 + $0x700] sm:$0xff]  ;;  %v694_v15 = vld [vmem:[%s23635_s30 + $0x790] sm:$0xff] }
 0x247   :  { %18263 = vmatprep.subr.bf16.mxu1 %v18262_v18  ;;  %v18282_v18 = vpack.c.bf16 %v605_v12, %v604_v11  ;;  %v663_v11 = vld [vmem:[%s23635_s30 + $0x698] sm:$0xff]  ;;  %v646_v19 = vld [vmem:[%s23635_s30 + $0x610] sm:$0xff] }
 0x248   :  { %18233 = vmatpush3.bf16.msra.mxu0 %v18232_v24  ;;  %v606_v24 = vld [vmem:[%s23635_s30 + $0x4d0] sm:$0xff] }
 0x249   :  { %18267 = vmatprep.subr.bf16.mxu0 %v18266_v27  ;;  %v639_v27 = vld [vmem:[%s23635_s30 + $0x5d8] sm:$0xff]  ;;  %v18286_v30 = vpack.c.bf16 %v607_v25, %v606_v24  ;;  %v678_v23 = vld [vmem:[%s23635_s30 + $0x710] sm:$0xff]  ;;  %v664_v25 = vld [vmem:[%s23635_s30 + $0x6a0] sm:$0xff] }
 0x24a   :  { %18265 = vmatpush3.bf16.msra.mxu1 %v18264_v26  ;;  %v638_v26 = vld [vmem:[%s23635_s30 + $0x5d0] sm:$0xff]  ;;  %v679_v24 = vld [vmem:[%s23635_s30 + $0x718] sm:$0xff] }
 0x24b   :  { %18299 = vmatprep.subr.bf16.mxu1 %v18298_v31  ;;  %1008 = vmatmul.mubr.f32.vlgmr.msra.gmra.mrb[2].mxu0 %v21264_v34  ;;  %v18304_v34 = vpack.c.bf16 %v615_v48, %v614_v43  ;;  %v590_v31 = vld [vmem:[%s23635_s30 + $0x450] sm:$0xff]  ;;  %v18318_v35 = vpack.c.bf16 %v639_v27, %v638_v26  ;;  %v593_v43 = vld [vmem:[%s23635_s30 + $0x468] sm:$0xff]  ;;  %v18320_v48 = vpack.c.bf16 %v623_v36, %v622_v33 }
 0x24c   :  { %18269 = vmatpush3.bf16.msra.mxu0 %v18268_v37  ;;  %1147 = vmatprep.mubr.f32.mxu0 %v768_v53  ;;  %v608_v37 = vld [vmem:[%s23635_s30 + $0x4e0] sm:$0xff]  ;;  %v18288_v42 = vpack.c.bf16 %v591_v32, %v590_v31  ;;  %v18292_v58 = vpack.c.bf16 %v593_v43, %v592_v39  ;;  %v665_v26 = vld [vmem:[%s23635_s30 + $0x6a8] sm:$0xff]  ;;  %v18336_v36 = vpack.c.bf16 %v647_v20, %v646_v19  ;;  %v666_v39 = vld [vmem:[%s23635_s30 + $0x6b0] sm:$0xff] }
 0x24d   :  { %1078 = vmatmul.mubr.f32.vlgmr.msra.gmra.mrb[2].mxu1 %v21275_v46  ;;  %18271 = vmatprep.subr.bf16.mxu0 %v18270_v40  ;;  %v602_v46 = vld [vmem:[%s23635_s30 + $0x4b0] sm:$0xff]  ;;  %v640_v40 = vld [vmem:[%s23635_s30 + $0x5e0] sm:$0xff]  ;;  %v649_v33 = vld [vmem:[%s23635_s30 + $0x628] sm:$0xff] }
 0x24e   :  { %18301 = vmatpush3.bf16.msra.mxu1 %v18300_v38  ;;  %1217 = vmatprep.mubr.f32.mxu1 %v769_v60  ;;  %v18278_v5 = vpack.c.bf16 %v603_v63, %v602_v46  ;;  %v609_v38 = vld [vmem:[%s23635_s30 + $0x4e8] sm:$0xff]  ;;  %v18322_v53 = vpack.c.bf16 %v641_v41, %v640_v40  ;;  %v627_v60 = vld [vmem:[%s23635_s30 + $0x578] sm:$0xff]  ;;  %v18294_v63 = vpack.c.bf16 %v611_v51, %v610_v50  ;;  %v648_v32 = vld [vmem:[%s23635_s30 + $0x620] sm:$0xff] }
 0x24f   :  { %18303 = vmatprep.subr.bf16.mxu1 %v18302_v47  ;;  %v625_v47 = vld [vmem:[%s23635_s30 + $0x568] sm:$0xff]  ;;  %v18290_v49 = vpack.c.bf16 %v609_v38, %v608_v37  ;;  %v18328_v12 = vpack.c.bf16 %v627_v60, %v626_v59  ;;  %v680_v37 = vld [vmem:[%s23635_s30 + $0x720] sm:$0xff]  ;;  %v667_v40 = vld [vmem:[%s23635_s30 + $0x6b8] sm:$0xff]  ;;  %v18338_v41 = vpack.c.bf16 %v665_v26, %v664_v25 }
 0x250   :  { %18273 = vmatpush3.bf16.msra.mxu0 %v18272_v55  ;;  %v643_v55 = vld [vmem:[%s23635_s30 + $0x5f8] sm:$0xff]  ;;  %v18324_v46 = vpack.c.bf16 %v625_v47, %v624_v45  ;;  %v681_v38 = vld [vmem:[%s23635_s30 + $0x728] sm:$0xff]  ;;  %v668_v51 = vld [vmem:[%s23635_s30 + $0x6c0] sm:$0xff] }
 0x251   :  { %18275 = vmatprep.subr.bf16.mxu0 %v18274_v56  ;;  %v594_v56 = vld [vmem:[%s23635_s30 + $0x470] sm:$0xff]  ;;  %v699_v43 = vld [vmem:[%s23635_s30 + $0x7b8] sm:$0xff]  ;;  %v653_v59 = vld [vmem:[%s23635_s30 + $0x648] sm:$0xff] }
 0x252   :  { %18305 = vmatpush3.bf16.msra.mxu1 %v18304_v34  ;;  %v451_v34 = vld [vmem:[#allocation2 + $0x18] sm:$0xff]  ;;  %v18296_v7 = vpack.c.bf16 %v595_v57, %v594_v56  ;;  %v701_v56 = vld [vmem:[%s23635_s30 + $0x7c8] sm:$0xff]  ;;  %v656_v20 = vld [vmem:[%s23635_s30 + $0x660] sm:$0xff] }
 0x253   :  { %18307 = vmatprep.subr.bf16.mxu1 %v18306_v61  ;;  %v660_v61 = vld [vmem:[%s23635_s30 + $0x680] sm:$0xff]  ;;  %v770_v6 = vcombine.high %v451_v34, %v451_v34  ;;  %v651_v47 = vld [vmem:[%s23635_s30 + $0x638] sm:$0xff]  ;;  %v689_v25 = vld [vmem:[%s23635_s30 + $0x768] sm:$0xff] }
 0x254   :  { %18277 = vmatpush3.bf16.msra.mxu0 %v18276_v3  ;;  %v18326_v3 = vpack.c.bf16 %v643_v55, %v642_v52  ;;  %v18330_v14 = vpack.c.bf16 %v661_v62, %v660_v61  ;;  %v683_v50 = vld [vmem:[%s23635_s30 + $0x738] sm:$0xff]  ;;  %v669_v52 = vld [vmem:[%s23635_s30 + $0x6c8] sm:$0xff]  ;;  %v18342_v55 = vpack.c.bf16 %v667_v40, %v666_v39  ;;  %v684_v61 = vld [vmem:[%s23635_s30 + $0x740] sm:$0xff] }
 0x255   :  { %18279 = vmatprep.subr.bf16.mxu0 %v18278_v5  ;;  %v645_v5 = vld [vmem:[%s23635_s30 + $0x608] sm:$0xff]  ;;  %v21395_v21 = vrot.slane %v770_v6, %v21209_v13  ;;  %v654_v6 = vld [vmem:[%s23635_s30 + $0x650] sm:$0xff] }
 0x256   :  { %18309 = vmatpush3.bf16.msra.mxu1 %v18308_v4  ;;  %v644_v4 = vld [vmem:[%s23635_s30 + $0x600] sm:$0xff]  ;;  %v685_v62 = vld [vmem:[%s23635_s30 + $0x748] sm:$0xff]  ;;  %v674_v26 = vld [vmem:[%s23635_s30 + $0x6f0] sm:$0xff] }
 0x257   :  { %18311 = vmatprep.subr.bf16.mxu1 %v18310_v9  ;;  %v677_v9 = vld [vmem:[%s23635_s30 + $0x708] sm:$0xff] }
 0x258   :  { %18281 = vmatpush3.bf16.msra.mxu0 %v18280_v16  ;;  %v695_v16 = vld [vmem:[%s23635_s30 + $0x798] sm:$0xff]  ;;  %v18364_v27 = vpack.c.bf16 %v677_v9, %v676_v8  ;;  %v686_v9 = vld [vmem:[%s23635_s30 + $0x750] sm:$0xff] }
 0x259   :  { %18283 = vmatprep.subr.bf16.mxu0 %v18282_v18  ;;  %v21390_v18 = vrot.slane %v451_v34, %v21209_v13  ;;  %v18366_v13 = vpack.c.bf16 %v695_v16, %v694_v15  ;;  %v700_v34 = vld [vmem:[%s23635_s30 + $0x7c0] sm:$0xff] }
 0x25a   :  { %18313 = vmatpush3.bf16.msra.mxu1 %v18312_v17  ;;  %v18362_v17 = vpack.c.bf16 %v693_v2, %v692_v1  ;;  %v18346_v2 = vpack.c.bf16 %v669_v52, %v668_v51  ;;  %v704_v16 = vld [vmem:[%s23635_s30 + $0x7e0] sm:$0xff] }
 0x25b   :  { %18315 = vmatprep.subr.bf16.mxu1 %v18314_v22  ;;  %v18332_v22 = vpack.c.bf16 %v645_v5, %v644_v4  ;;  %v785_v31 = vcombine.high %v21390_v18, %v21390_v18  ;;  %v703_v4 = vld [vmem:[%s23635_s30 + $0x7d8] sm:$0xff]  ;;  %v18378_v5 = vpack.c.bf16 %v701_v56, %v700_v34 }
 0x25c   :  { %18285 = vmatpush3.bf16.msra.mxu0 %v18284_v28  ;;  %v18334_v28 = vpack.c.bf16 %v663_v11, %v662_v10  ;;  %v687_v10 = vld [vmem:[%s23635_s30 + $0x758] sm:$0xff]  ;;  %v672_v11 = vld [vmem:[%s23635_s30 + $0x6e0] sm:$0xff] }
 0x25d   :  { %18287 = vmatprep.subr.bf16.mxu0 %v18286_v30  ;;  %v697_v30 = vld [vmem:[%s23635_s30 + $0x7a8] sm:$0xff] }
 0x25e   :  { %18317 = vmatpush3.bf16.msra.mxu1 %v18316_v29  ;;  %v696_v29 = vld [vmem:[%s23635_s30 + $0x7a0] sm:$0xff] }
 0x25f   :  { %18319 = vmatprep.subr.bf16.mxu1 %v18318_v35  ;;  %v786_v35 = vcombine.high %v21395_v21, %v21395_v21  ;;  %v18370_v45 = vpack.c.bf16 %v697_v30, %v696_v29  ;;  %v706_v30 = vld [vmem:[%s23635_s30 + $0x7f0] sm:$0xff] }
 0x260   :  { %18289 = vmatpush3.bf16.msra.mxu0 %v18288_v42  ;;  %v698_v42 = vld [vmem:[%s23635_s30 + $0x7b0] sm:$0xff] }
 0x261   :  { %18291 = vmatprep.subr.bf16.mxu0 %v18290_v49  ;;  %v682_v49 = vld [vmem:[%s23635_s30 + $0x730] sm:$0xff]  ;;  %v18374_v57 = vpack.c.bf16 %v699_v43, %v698_v42  ;;  %v20814_v42 = vmov 0.0   ;;  %v16373_v43 = vld [vmem:[%s23636_s0] ss:$0 sm:$0xff] }
 0x262   :  { %18321 = vmatpush3.bf16.msra.mxu1 %v18320_v48  ;;  %v18340_v48 = vpack.c.bf16 %v649_v33, %v648_v32  ;;  %v18376_v1 = vpack.c.bf16 %v683_v50, %v682_v49  ;;  %v658_v32 = vld [vmem:[%s23635_s30 + $0x670] sm:$0xff]  ;;  %v659_v33 = vld [vmem:[%s23635_s30 + $0x678] sm:$0xff] }
 0x263   :  { %18323 = vmatprep.subr.bf16.mxu1 %v18322_v53  ;;  %v18372_v53 = vpack.c.bf16 %v681_v38, %v680_v37  ;;  %v691_v37 = vld [vmem:[%s23635_s30 + $0x778] sm:$0xff] }
 0x264   :  { %18293 = vmatpush3.bf16.msra.mxu0 %v18292_v58  ;;  %v652_v58 = vld [vmem:[%s23635_s30 + $0x640] sm:$0xff] }
 0x265   :  { %18295 = vmatprep.subr.bf16.mxu0 %v18294_v63  ;;  %v671_v63 = vld [vmem:[%s23635_s30 + $0x6d8] sm:$0xff]  ;;  %v18348_v8 = vpack.c.bf16 %v653_v59, %v652_v58 }
 0x266   :  { %18325 = vmatpush3.bf16.msra.mxu1 %v18324_v46  ;;  %v670_v46 = vld [vmem:[%s23635_s30 + $0x6d0] sm:$0xff] }
 0x267   :  { %18327 = vmatprep.subr.bf16.mxu1 %v18326_v3  ;;  %v702_v3 = vld [vmem:[%s23635_s30 + $0x7d0] sm:$0xff]  ;;  %v18350_v15 = vpack.c.bf16 %v671_v63, %v670_v46 }
 0x268   :  { %18297 = vmatpush3.bf16.msra.mxu0 %v18296_v7  ;;  %v655_v7 = vld [vmem:[%s23635_s30 + $0x658] sm:$0xff]  ;;  %v18382_v19 = vpack.c.bf16 %v703_v4, %v702_v3  ;;  %v20815_v3 = vmov 1966171168  }
 0x269   :  { %18331 = vmatprep.subr.bf16.mxu0 %v18330_v14  ;;  %v18380_v14 = vpack.c.bf16 %v685_v62, %v684_v61  ;;  %v1365_v4 = vunpack.c.l.s4 %v20815_v3 }
 0x26a   :  { %18329 = vmatpush3.bf16.msra.mxu1 %v18328_v12  ;;  %v673_v12 = vld [vmem:[%s23635_s30 + $0x6e8] sm:$0xff] }
 0x26b   :  { %18363 = vmatprep.subr.bf16.mxu1 %v18362_v17  ;;  %1148 = vmatmul.mubr.f32.vlgmr.msra.gmra.mrb[4].mxu0 %v21317_v44  ;;  %v18368_v44 = vpack.c.bf16 %v679_v24, %v678_v23  ;;  %v705_v17 = vld [vmem:[%s23635_s30 + $0x7e8] sm:$0xff]  ;;  %v18352_v23 = vpack.c.bf16 %v655_v7, %v654_v6  ;;  %v688_v24 = vld [vmem:[%s23635_s30 + $0x760] sm:$0xff]  ;;  %v18354_v29 = vpack.c.bf16 %v673_v12, %v672_v11  ;;  %v1366_v6 = vunpack.c.0.s8 %v1365_v4 }
 0x26c   :  { %18333 = vmatpush3.bf16.msra.mxu0 %v18332_v22  ;;  %1287 = vmatprep.mubr.f32.mxu0 %v785_v31  ;;  %v657_v22 = vld [vmem:[%s23635_s30 + $0x668] sm:$0xff]  ;;  %v707_v31 = vld [vmem:[%s23635_s30 + $0x7f8] sm:$0xff]  ;;  %v18388_v38 = vpack.c.bf16 %v689_v25, %v688_v24  ;;  %v1398_v11 = vadd.s32 8, %v21198_v0 }
 0x26d   :  { %1218 = vmatmul.mubr.f32.vlgmr.msra.gmra.mrb[4].mxu1 %v21328_v54  ;;  %18335 = vmatprep.subr.bf16.mxu0 %v18334_v28  ;;  %v650_v54 = vld [vmem:[%s23635_s30 + $0x630] sm:$0xff]  ;;  %v18384_v28 = vpack.c.bf16 %v687_v10, %v686_v9  ;;  %v18390_v40 = vpack.c.bf16 %v707_v31, %v706_v30  ;;  %v1430_v30 = vld [vmem:[%s23637_s26 + $0x8] sm:$0xff] }
 0x26e   :  { %18365 = vmatpush3.bf16.msra.mxu1 %v18364_v27  ;;  %1357 = vmatprep.mubr.f32.mxu1 %v786_v35  ;;  %v18344_v60 = vpack.c.bf16 %v651_v47, %v650_v54  ;;  %v675_v27 = vld [vmem:[%s23635_s30 + $0x6f8] sm:$0xff]  ;;  %v18356_v35 = vpack.c.bf16 %v657_v22, %v656_v20  ;;  %v21461_v20 = vsub.s32 0, %v21198_v0 }
 0x26f   :  { %18367 = vmatprep.subr.bf16.mxu1 %v18366_v13  ;;  %v18386_v13 = vpack.c.bf16 %v705_v17, %v704_v16  ;;  %v18358_v39 = vpack.c.bf16 %v675_v27, %v674_v26  ;;  %v1403_v16 = vand.u32 7, %v21198_v0  ;;  %v1429_v26 = vld [vmem:[%s23637_s26] sm:$0xff] }
 0x270   :  { %18337 = vmatpush3.bf16.msra.mxu0 %v18336_v36  ;;  %v690_v36 = vld [vmem:[%s23635_s30 + $0x770] sm:$0xff] }
 0x271   :  { %18339 = vmatprep.subr.bf16.mxu0 %v18338_v41  ;;  %v18392_v41 = vpack.c.bf16 %v691_v37, %v690_v36  ;;  %vm1423_vm0 = vcmp.eq.s32.totalorder %v1403_v16, 7 }
 0x272   :  { %18369 = vmatpush3.bf16.msra.mxu1 %v18368_v44  ;;  %v18360_v44 = vpack.c.bf16 %v659_v33, %v658_v32  ;;  %v16374_v25 = vsel %vm1423_vm0, 1.0, %v20814_v42 }
 0x273   :  { %18371 = vmatprep.subr.bf16.mxu1 %v18370_v45 }
 0x274   :  { %18341 = vmatpush3.bf16.msra.mxu0 %v18340_v48 }
 0x275   :  { %18343 = vmatprep.subr.bf16.mxu0 %v18342_v55 }
 0x276   :  { %18373 = vmatpush3.bf16.msra.mxu1 %v18372_v53 }
 0x277   :  { %18375 = vmatprep.subr.bf16.mxu1 %v18374_v57 }
 0x278   :  { %18345 = vmatpush3.bf16.msra.mxu0 %v18344_v60 }
 0x279   :  { %18347 = vmatprep.subr.bf16.mxu0 %v18346_v2 }
 0x27a   :  { %18377 = vmatpush3.bf16.msra.mxu1 %v18376_v1 }
 0x27b   :  { %18379 = vmatprep.subr.bf16.mxu1 %v18378_v5 }
 0x27c   :  { %18349 = vmatpush3.bf16.msra.mxu0 %v18348_v8 }
 0x27d   :  { %18351 = vmatprep.subr.bf16.mxu0 %v18350_v15  ;;  %v1369_v15 = vsub.s32 %v1366_v6, %v21198_v0 }
 0x27e   :  { %18381 = vmatpush3.bf16.msra.mxu1 %v18380_v14 }
 0x27f   :  { %18383 = vmatprep.subr.bf16.mxu1 %v18382_v19  ;;  %v1410_v19 = vand.u32 7, %v1398_v11 }
 0x280   :  { %18353 = vmatpush3.bf16.msra.mxu0 %v18352_v23 }
 0x281   :  { %18355 = vmatprep.subr.bf16.mxu0 %v18354_v29  ;;  %vm1424_vm1 = vcmp.eq.s32.totalorder %v1410_v19, 7 }
 0x282   :  { %18385 = vmatpush3.bf16.msra.mxu1 %v18384_v28  ;;  %v16375_v29 = vsel %vm1424_vm1, 1.0, %v20814_v42 }
 0x283   :  { %18387 = vmatprep.subr.bf16.mxu1 %v18386_v13 }
 0x284   :  { %18357 = vmatpush3.bf16.msra.mxu0 %v18356_v35 }
 0x285   :  { %18359 = vmatprep.subr.bf16.mxu0 %v18358_v39 }
 0x286   :  { %18389 = vmatpush3.bf16.msra.mxu1 %v18388_v38 }
 0x287   :  { %18391 = vmatprep.subr.bf16.mxu1 %v18390_v40 }
 0x288   :  { %18361 = vmatpush3.bf16.msra.mxu0 %v18360_v44 }
 0x28a   :  { %18393 = vmatpush3.bf16.msra.mxu1 %v18392_v41 }
 0x28b   :  { %1288 = vmatmul.mubr.f32.vlgmr.msra.gmra.mrb[6].mxu0 %v21390_v18  ;;  %17874 = vmatprep.subr.mxu1 %v20814_v42 }
 0x28d   :  { %1358 = vmatmul.mubr.f32.vlgmr.msra.gmra.mrb[6].mxu1 %v21395_v21 }
 0x28e   :  { %17876 = vmatprep.mubr.msk.f32.mxu1 %vm20816_vm3, %v20814_v42 }
 0x2fe   :  { %v17490_v45 = vpop.f32.mrb[0].mxu0 }
 0x2ff   :  { %v17491_v54 = vpop.f32.mrb[1].mxu0 }
 0x300   :  { %v17525_v47 = vpop.f32.mrb[0].mxu1  ;;  %v17492_v48 = vadd.f32 %v17491_v54, %v17490_v45 }
 0x301   :  { %v17526_v49 = vpop.f32.mrb[1].mxu1 }
 0x302   :  { %v17527_v50 = vadd.f32 %v17526_v49, %v17525_v47  ;;  %v870_v51 = vadd.f32 %v17492_v48, %v16373_v43  ;;  %v1483_v49 = vld [vmem:[#allocation7] sm:$0xff] }
 0x304   :  { %v940_v52 = vadd.f32 %v17527_v50, %v870_v51  ;;  %v1484_v50 = vld [vmem:[#allocation7 + $0x8] sm:$0xff]  ;;  %v1485_v51 = vld [vmem:[#allocation7 + $0x10] sm:$0xff] }
 0x31e   :  { %v17560_v53 = vpop.f32.mrb[2].mxu0 }
 0x31f   :  { %v17561_v55 = vpop.f32.mrb[3].mxu0 }
 0x320   :  { %v17595_v34 = vpop.f32.mrb[2].mxu1  ;;  %v17562_v56 = vadd.f32 %v17561_v55, %v17560_v53  ;;  %v1486_v53 = vld [vmem:[#allocation7 + $0x18] sm:$0xff] }
 0x321   :  { %v17596_v57 = vpop.f32.mrb[3].mxu1  ;;  %v18398_v55 = vpack.c.bf16 %v1486_v53, %v1485_v51 }
 0x322   :  { %v17597_v18 = vadd.f32 %v17596_v57, %v17595_v34  ;;  %v1010_v58 = vadd.f32 %v17562_v56, %v940_v52  ;;  %v18394_v52 = vpack.c.bf16 %v1484_v50, %v1483_v49 }
 0x324   :  { %v1080_v21 = vadd.f32 %v17597_v18, %v1010_v58  ;;  %18395 = vmatprep.subr.bf16.mxu0 %v18394_v52 }
 0x325   :  { %18397 = vmatpush3.bf16.msra.mxu0 %v18394_v52 }
 0x326   :  { %18399 = vmatprep.subr.bf16.mxu0 %v18398_v55 }
 0x329   :  { %18401 = vmatpush3.bf16.msra.mxu0 %v18398_v55 }
 0x32a   :  { %17884 = vmatprep.subr.mxu0 %v20814_v42 }
 0x33e   :  { %v17630_v59 = vpop.f32.mrb[4].mxu0 }
 0x33f   :  { %v17631_v60 = vpop.f32.mrb[5].mxu0 }
 0x340   :  { %v17665_v61 = vpop.f32.mrb[4].mxu1  ;;  %v17632_v62 = vadd.f32 %v17631_v60, %v17630_v59  ;;  %v16376_v60 = vld [vmem:[#allocation4] ss:$0 sm:$0xff] }
 0x341   :  { %v17666_v46 = vpop.f32.mrb[5].mxu1 }
 0x342   :  { %v17667_v63 = vadd.f32 %v17666_v46, %v17665_v61  ;;  %v1150_v1 = vadd.f32 %v17632_v62, %v1080_v21  ;;  %v16377_v62 = vld [vmem:[#allocation6] ss:$0 sm:$0xff] }
 0x344   :  { %v1220_v2 = vadd.f32 %v17667_v63, %v1150_v1 }
 0x35e   :  { %v17700_v5 = vpop.f32.mrb[6].mxu0 }
 0x35f   :  { %v17701_v7 = vpop.f32.mrb[7].mxu0 }
 0x360   :  { %v17735_v8 = vpop.f32.mrb[6].mxu1  ;;  %v17702_v9 = vadd.f32 %v17701_v7, %v17700_v5  ;;  %v16378_v5 = vld [vmem:[#allocation9] ss:$0 sm:$0xff] }
 0x361   :  { %v17736_v10 = vpop.f32.mrb[7].mxu1 }
 0x362   :  { %v17737_v12 = vadd.f32 %v17736_v10, %v17735_v8  ;;  %v1290_v14 = vadd.f32 %v17702_v9, %v1220_v2 }
 0x364   :  { %v1360_v17 = vadd.f32 %v17737_v12, %v1290_v14  ;;  %v21507_v14 = vld [vmem:[%s23638_s1] ss:$0 sm:$0xff] }
 0x366   :  { %v1370_v22 = vrot.slane %v1360_v17, %v1369_v15 }
 0x368   :  { %v1371_v23 = vcombine.high %v1370_v22, %v1370_v22  ;;  %v1378_v24 = vrot.slane %v1370_v22, %v1369_v15  ;;  %v21511_v22 = vld [vmem:[%s23638_s1 + $0x1] ss:$0 sm:$0xff] }
 0x36a   :  { %v1389_v27 = vrot.slane %v1378_v24, %v21461_v20  ;;  %v1385_v28 = vrot.slane %v1371_v23, %v1369_v15 }
 0x36c   :  { %v1431_v13 = vmul.f32 %v16374_v25, %v1389_v27  ;;  %v1393_v31 = vrot.slane %v1385_v28, %v21461_v20 }
 0x36e   :  { %v1433_v32 = vadd.f32 %v1431_v13, %v1429_v26  ;;  %v1432_v33 = vmul.f32 %v16375_v29, %v1393_v31 }
 0x370   :  { %v1438_v35 = vsel %vm1437_vm2, %v1433_v32, 0.0  ;;  %v1434_v36 = vadd.f32 %v1432_v33, %v1430_v30 }
 0x371   :  { %1439 = vadd.xlane.f32.xlu0 %v1438_v35 }
 0x372   :  { %v1441_v37 = vsel %vm1437_vm2, %v1434_v36, 0.0 }
 0x375   :  { %1442 = vadd.xlane.f32.xlu0 %v1441_v37 }
 0x3fe   :  { %v1440_v38 = vpop.xlane.xlu0 %1439 }
 0x3ff   :  { %v1445_v39 = vmul.f32 0.03125, %v1440_v38 }
 0x401   :  { %v1447_v40 = vsub.f32 %v1433_v32, %v1445_v39 }
 0x402   :  { %v1443_v44 = vpop.xlane.xlu0 %1442 }
 0x403   :  { %v1446_v41 = vmul.f32 0.03125, %v1443_v44  ;;  %v1449_v43 = vmul.f32 %v1447_v40, %v1447_v40 }
 0x405   :  { %v1448_v45 = vsub.f32 %v1434_v36, %v1446_v41  ;;  %v1451_v54 = vsel %vm1437_vm2, %v1449_v43, 0.0 }
 0x406   :  { %1452 = vadd.xlane.f32.xlu1 %v1451_v54 }
 0x407   :  { %v1450_v47 = vmul.f32 %v1448_v45, %v1448_v45 }
 0x409   :  { %v1454_v48 = vsel %vm1437_vm2, %v1450_v47, 0.0 }
 0x40a   :  { %1455 = vadd.xlane.f32.xlu1 %v1454_v48 }
 0x493   :  { %v1453_v34 = vpop.xlane.xlu1 %1452 }
 0x494   :  { %v1457_v56 = vmul.f32 0.03125, %v1453_v34 }
 0x496   :  { %v1459_v57 = vadd.f32 1e-12, %v1457_v56 }
 0x497   :  { %v1456_v18 = vpop.xlane.xlu1 %1455 }
 0x498   :  { %20047 = vrsqrt.f32 %v1459_v57  ;;  %v1458_v58 = vmul.f32 0.03125, %v1456_v18 }
 0x49a   :  { %v1460_v21 = vadd.f32 1e-12, %v1458_v58 }
 0x49c   :  { %20049 = vrsqrt.f32 %v1460_v21 }
 0x4a2   :  { %v20048_v59 = vpop.eup %20047 }
 0x4a3   :  { %v1463_v61 = vmul.f32 %v20048_v59, %v1447_v40 }
 0x4a5   :  { %v1471_v46 = vmul.f32 %v16376_v60, %v1463_v61 }
 0x4a6   :  { %v20050_v63 = vpop.eup %20049 }
 0x4a7   :  { %v1464_v1 = vmul.f32 %v20050_v63, %v1448_v45  ;;  %v21474_v2 = vadd.f32 %v16377_v62, %v1471_v46 }
 0x4a9   :  { %v1472_v3 = vmul.f32 %v16376_v60, %v1464_v1  ;;  %17871 = vmatprep.mubr.msk.f32.mxu0 %vm1437_vm2, %v21474_v2 }
 0x4ab   :  { %v21478_v4 = vadd.f32 %v16377_v62, %v1472_v3 }
 0x4ad   :  { %17872 = vmatmul.mubr.msk.f32.vlgmr.msra.gmra.mrb[8].mxu0 %vm1437_vm2, %v21478_v4 }
 0x4ae   :  { %17886 = vmatprep.mubr.msk.f32.mxu0 %vm20816_vm3, %v20814_v42 }
 0x580   :  { %v17873_v6 = vpop.f32.mrb[8].mxu0 }
 0x581   :  { %v21486_v7 = vadd.f32 %v17873_v6, %v16378_v5  ;;  %v1566_v8 = vpop.f32.mrb[9].mxu0 }
 0x582   :  { %v21488_v9 = vadd.f32 %v16378_v5, %v1566_v8 }
 0x583   :  { %1654 = vrot.lane.b32.xlu1 %v21486_v7, %s20817_s7 }
 0x584   :  { %1576 = vrot.lane.b32.xlu0 %v21488_v9, %s20817_s7 }
 0x5f5   :  { %v1655_v11 = vpop.permute.xlu1 %1654 }
 0x5f6   :  { %v1577_v10 = vpop.permute.xlu0 %1576 }
 0x5f7   :  { %17875 = vmatpush3.xpose.msk.msra.mxu1 %vm1578_vm4, %v1577_v10 }
 0x5f8   :  { %17879 = vmatprep.subr.mxu1 %v20814_v42 }
 0x5fa   :  { %17877 = vmatmul.mubr.msk.f32.vlgmr.msra.gmra.mrb[8].mxu1 %vm1578_vm4, %v21488_v9 }
 0x5fb   :  { %17880 = vmatpush3.xpose.msk.msra.mxu1 %vm1578_vm4, %v1655_v11  ;;  %17881 = vmatprep.mubr.msk.f32.mxu1 %vm20816_vm3, %v20814_v42 }
 0x5fc   :  { %17889 = vmatprep.subr.mxu1 %v20814_v42 }
 0x5fe   :  { %17882 = vmatmul.mubr.msk.f32.vlgmr.msra.gmra.mrb[10].mxu1 %vm1578_vm4, %v21486_v7 }
 0x5ff   :  { %17891 = vmatprep.mubr.msk.f32.mxu1 %vm20816_vm3, %v20814_v42 }
 0x6cd   :  { %v1649_v12 = vpop.f32.mrb[8].mxu1 }
 0x6ce   :  { %v1730_v15 = vmul.f32 0.35355338, %v1649_v12  ;;  %v17878_v16 = vpop.f32.mrb[9].mxu1 }
 0x6d0   :  { %v1744_v17 = vadd.f32 %v21507_v14, %v1730_v15 }
 0x6d1   :  { %v1726_v19 = vpop.f32.mrb[10].mxu1 }
 0x6d2   :  { %v1731_v23 = vmul.f32 0.35355338, %v1726_v19  ;;  %v17883_v24 = vpop.f32.mrb[11].mxu1  ;;  %v1746_v25 = vsel %vm1578_vm4, %v1744_v17, -inf }
 0x6d3   :  { %1747 = vmax.xlane.f32.xlu1 %v1746_v25 }
 0x6d4   :  { %v1745_v26 = vadd.f32 %v21511_v22, %v1731_v23 }
 0x6d6   :  { %v1749_v27 = vsel %vm1578_vm4, %v1745_v26, -inf }
 0x6d7   :  { %1750 = vmax.xlane.f32.xlu0 %v1749_v27 }
 0x6e4   :  { %1844 = vrot.lane.b32.xlu1 %v21486_v7, %s20793_s15 }
 0x6e8   :  { %1922 = vrot.lane.b32.xlu1 %v21488_v9, %s20818_s10 }
 0x6ec   :  { %2000 = vrot.lane.b32.xlu1 %v21486_v7, %s20818_s10 }
 0x6ed   :  { %1768 = vrot.lane.b32.xlu0 %v21488_v9, %s20793_s15 }
 0x760   :  { %v1748_v28 = vpop.xlane.xlu1 %1747 }
 0x761   :  { %v1752_v29 = vsub.f32 %v1744_v17, %v1748_v28 }
 0x763   :  { %v1754_v30 = vmul.f32 1.442695, %v1752_v29 }
 0x764   :  { %v1845_v13 = vpop.permute.xlu1 %1844  ;;  %v1751_v31 = vpop.xlane.xlu0 %1750 }
 0x765   :  { %20051 = vpow2.f32 %v1754_v30  ;;  %v1753_v32 = vsub.f32 %v1745_v26, %v1751_v31  ;;  %17890 = vmatpush3.msra.mxu1 %v1845_v13 }
 0x766   :  { %17899 = vmatprep.subr.mxu1 %v20814_v42 }
 0x767   :  { %v1756_v33 = vmul.f32 1.442695, %v1753_v32 }
 0x768   :  { %v1769_v35 = vpop.permute.xlu0 %1768  ;;  %v1923_v40 = vpop.permute.xlu1 %1922 }
 0x769   :  { %20053 = vpow2.f32 %v1756_v33  ;;  %17885 = vmatpush3.msra.mxu0 %v1769_v35 }
 0x76a   :  { %17894 = vmatprep.subr.mxu0 %v20814_v42 }
 0x76c   :  { %v2001_v44 = vpop.permute.xlu1 %2000 }
 0x76f   :  { %v20052_v36 = vpop.eup %20051 }
 0x770   :  { %v1758_v37 = vsel %vm1578_vm4, %v20052_v36, 0.0 }
 0x771   :  { %1759 = vadd.xlane.f32.xlu0 %v1758_v37 }
 0x773   :  { %v20054_v38 = vpop.eup %20053 }
 0x774   :  { %v1761_v39 = vsel %vm1578_vm4, %v20054_v38, 0.0 }
 0x775   :  { %1762 = vadd.xlane.f32.xlu1 %v1761_v39 }
 0x786   :  { %1998 = vrot.lane.b32.xlu1 %v21486_v7, %s20819_s13 }
 0x787   :  { %1920 = vrot.lane.b32.xlu0 %v21488_v9, %s20819_s13 }
 0x7fe   :  { %v1760_v41 = vpop.xlane.xlu0 %1759 }
 0x7ff   :  { %20055 = vrcp.f32 %v1760_v41 }
 0x802   :  { %v1763_v43 = vpop.xlane.xlu1 %1762  ;;  %v1921_v49 = vpop.permute.xlu0 %1920 }
 0x803   :  { %20057 = vrcp.f32 %v1763_v43 }
 0x806   :  { %v1999_v50 = vpop.permute.xlu1 %1998 }
 0x809   :  { %v20056_v45 = vpop.eup %20055 }
 0x80a   :  { %v1766_v54 = vmul.f32 %v20056_v45, %v20052_v36 }
 0x80c   :  { %17887 = vmatmul.mubr.msk.f32.vlgmr.msra.gmra.mrb[10].mxu0 %vm1578_vm4, %v1766_v54 }
 0x80d   :  { %v20058_v47 = vpop.eup %20057  ;;  %17895 = vmatpush3.xpose.msk.msra.mxu0 %vm1578_vm4, %v1923_v40  ;;  %17896 = vmatprep.mubr.msk.f32.mxu0 %vm20816_vm3, %v20814_v42 }
 0x80e   :  { %v1767_v48 = vmul.f32 %v20058_v47, %v20054_v38  ;;  %17904 = vmatprep.subr.mxu0 %v20814_v42 }
 0x810   :  { %17892 = vmatmul.mubr.msk.f32.vlgmr.msra.gmra.mrb[12].mxu1 %vm1578_vm4, %v1767_v48  ;;  %17897 = vmatmul.mubr.msk.f32.vlgmr.msra.gmra.mrb[12].mxu0 %vm1578_vm4, %v1921_v49 }
 0x811   :  { %17900 = vmatpush3.xpose.msk.msra.mxu1 %vm1578_vm4, %v2001_v44  ;;  %17901 = vmatprep.mubr.msk.f32.mxu1 %vm20816_vm3, %v20814_v42 }
 0x812   :  { %17909 = vmatprep.subr.mxu1 %v20814_v42  ;;  %17906 = vmatprep.mubr.msk.f32.mxu0 %vm20816_vm3, %v20814_v42 }
 0x814   :  { %17902 = vmatmul.mubr.msk.f32.vlgmr.msra.gmra.mrb[14].mxu1 %vm1578_vm4, %v1999_v50 }
 0x815   :  { %17911 = vmatprep.mubr.msk.f32.mxu1 %vm20816_vm3, %v20814_v42 }
 0x8df   :  { %v21548_v51 = vpop.f32.mrb[10].mxu0 }
 0x8e0   :  { %v17888_v52 = vpop.f32.mrb[11].mxu0 }
 0x8e3   :  { %v21550_v53 = vpop.f32.mrb[12].mxu1  ;;  %v1994_v55 = vpop.f32.mrb[12].mxu0 }
 0x8e4   :  { %v2076_v34 = vmul.f32 0.35355338, %v1994_v55  ;;  %v17893_v56 = vpop.f32.mrb[13].mxu1  ;;  %v17898_v57 = vpop.f32.mrb[13].mxu0 }
 0x8e6   :  { %v2078_v18 = vadd.f32 %v21507_v14, %v2076_v34 }
 0x8e7   :  { %v2072_v58 = vpop.f32.mrb[14].mxu1 }
 0x8e8   :  { %v2077_v21 = vmul.f32 0.35355338, %v2072_v58  ;;  %v17903_v59 = vpop.f32.mrb[15].mxu1  ;;  %v2080_v60 = vsel %vm1578_vm4, %v2078_v18, -inf }
 0x8e9   :  { %2081 = vmax.xlane.f32.xlu0 %v2080_v60 }
 0x8ea   :  { %v2079_v61 = vadd.f32 %v21511_v22, %v2077_v21 }
 0x8ec   :  { %v2083_v62 = vsel %vm1578_vm4, %v2079_v61, -inf }
 0x8ed   :  { %2084 = vmax.xlane.f32.xlu1 %v2083_v62 }
 0x8fe   :  { %2178 = vrot.lane.b32.xlu1 %v21486_v7, %s20820_s12 }
 0x8ff   :  { %2102 = vrot.lane.b32.xlu0 %v21488_v9, %s20820_s12 }
 0x902   :  { %2256 = vrot.lane.b32.xlu1 %v21488_v9, %s20821_s24 }
 0x906   :  { %2334 = vrot.lane.b32.xlu1 %v21486_v7, %s20821_s24 }
 0x90a   :  { %2332 = vrot.lane.b32.xlu1 %v21486_v7, %s20822_s5 }
 0x976   :  { %v2082_v46 = vpop.xlane.xlu0 %2081 }
 0x977   :  { %v2086_v63 = vsub.f32 %v2078_v18, %v2082_v46 }
 0x979   :  { %v2088_v1 = vmul.f32 1.442695, %v2086_v63 }
 0x97a   :  { %v2103_v3 = vpop.permute.xlu0 %2102  ;;  %v2085_v5 = vpop.xlane.xlu1 %2084 }
 0x97b   :  { %20059 = vpow2.f32 %v2088_v1  ;;  %v2087_v6 = vsub.f32 %v2079_v61, %v2085_v5  ;;  %17905 = vmatpush3.msra.mxu0 %v2103_v3 }
 0x97c   :  { %17914 = vmatprep.subr.mxu0 %v20814_v42 }
 0x97d   :  { %v2090_v8 = vmul.f32 1.442695, %v2087_v6 }
 0x97e   :  { %v2179_v10 = vpop.permute.xlu1 %2178 }
 0x97f   :  { %20061 = vpow2.f32 %v2090_v8  ;;  %17910 = vmatpush3.msra.mxu1 %v2179_v10 }
 0x980   :  { %17919 = vmatprep.subr.mxu1 %v20814_v42 }
 0x982   :  { %v2257_v23 = vpop.permute.xlu1 %2256 }
 0x985   :  { %v20060_v11 = vpop.eup %20059 }
 0x986   :  { %v2092_v12 = vsel %vm1578_vm4, %v20060_v11, 0.0  ;;  %v2335_v27 = vpop.permute.xlu1 %2334 }
 0x987   :  { %2093 = vadd.xlane.f32.xlu0 %v2092_v12 }
 0x989   :  { %v20062_v15 = vpop.eup %20061 }
 0x98a   :  { %v2095_v16 = vsel %vm1578_vm4, %v20062_v15, 0.0  ;;  %v2333_v30 = vpop.permute.xlu1 %2332 }
 0x98b   :  { %2096 = vadd.xlane.f32.xlu0 %v2095_v16 }
 0x9a1   :  { %2254 = vrot.lane.b32.xlu0 %v21488_v9, %s20822_s5 }
 0xa14   :  { %v2094_v17 = vpop.xlane.xlu0 %2093 }
 0xa15   :  { %20063 = vrcp.f32 %v2094_v17 }
 0xa18   :  { %v2097_v19 = vpop.xlane.xlu0 %2096 }
 0xa19   :  { %20065 = vrcp.f32 %v2097_v19 }
 0xa1c   :  { %v2255_v29 = vpop.permute.xlu0 %2254 }
 0xa1f   :  { %v20064_v24 = vpop.eup %20063 }
 0xa20   :  { %v2100_v25 = vmul.f32 %v20064_v24, %v20060_v11 }
 0xa22   :  { %17907 = vmatmul.mubr.msk.f32.vlgmr.msra.gmra.mrb[14].mxu0 %vm1578_vm4, %v2100_v25 }
 0xa23   :  { %v20066_v26 = vpop.eup %20065  ;;  %17915 = vmatpush3.xpose.msk.msra.mxu0 %vm1578_vm4, %v2257_v23  ;;  %17916 = vmatprep.mubr.msk.f32.mxu0 %vm20816_vm3, %v20814_v42 }
 0xa24   :  { %v2101_v28 = vmul.f32 %v20066_v26, %v20062_v15  ;;  %17924 = vmatprep.subr.mxu0 %v20814_v42 }
 0xa26   :  { %17912 = vmatmul.mubr.msk.f32.vlgmr.msra.gmra.mrb[16].mxu1 %vm1578_vm4, %v2101_v28  ;;  %17917 = vmatmul.mubr.msk.f32.vlgmr.msra.gmra.mrb[16].mxu0 %vm1578_vm4, %v2255_v29 }
 0xa27   :  { %17920 = vmatpush3.xpose.msk.msra.mxu1 %vm1578_vm4, %v2335_v27  ;;  %17921 = vmatprep.mubr.msk.f32.mxu1 %vm20816_vm3, %v20814_v42 }
 0xa28   :  { %17929 = vmatprep.subr.mxu1 %v20814_v42  ;;  %17926 = vmatprep.mubr.msk.f32.mxu0 %vm20816_vm3, %v20814_v42 }
 0xa2a   :  { %17922 = vmatmul.mubr.msk.f32.vlgmr.msra.gmra.mrb[18].mxu1 %vm1578_vm4, %v2333_v30 }
 0xa2b   :  { %17931 = vmatprep.mubr.msk.f32.mxu1 %vm20816_vm3, %v20814_v42 }
 0xaf5   :  { %v21588_v13 = vpop.f32.mrb[14].mxu0 }
 0xaf6   :  { %v17908_v31 = vpop.f32.mrb[15].mxu0 }
 0xaf9   :  { %v21590_v32 = vpop.f32.mrb[16].mxu1  ;;  %v2328_v33 = vpop.f32.mrb[16].mxu0 }
 0xafa   :  { %v2410_v35 = vmul.f32 0.35355338, %v2328_v33  ;;  %v17913_v36 = vpop.f32.mrb[17].mxu1  ;;  %v17918_v37 = vpop.f32.mrb[17].mxu0 }
 0xafc   :  { %v2412_v38 = vadd.f32 %v21507_v14, %v2410_v35 }
 0xafd   :  { %v2406_v39 = vpop.f32.mrb[18].mxu1 }
 0xafe   :  { %v2411_v40 = vmul.f32 0.35355338, %v2406_v39  ;;  %v17923_v44 = vpop.f32.mrb[19].mxu1  ;;  %v2414_v41 = vsel %vm1578_vm4, %v2412_v38, -inf }
 0xaff   :  { %2415 = vmax.xlane.f32.xlu0 %v2414_v41 }
 0xb00   :  { %v2413_v43 = vadd.f32 %v21511_v22, %v2411_v40 }
 0xb02   :  { %v2417_v45 = vsel %vm1578_vm4, %v2413_v43, -inf }
 0xb03   :  { %2418 = vmax.xlane.f32.xlu1 %v2417_v45 }
 0xb14   :  { %2512 = vrot.lane.b32.xlu1 %v21486_v7, %s20823_s9 }
 0xb15   :  { %2436 = vrot.lane.b32.xlu0 %v21488_v9, %s20823_s9 }
 0xb18   :  { %2590 = vrot.lane.b32.xlu1 %v21488_v9, %s20824_s18 }
 0xb1c   :  { %2668 = vrot.lane.b32.xlu1 %v21486_v7, %s20824_s18 }
 0xb20   :  { %2666 = vrot.lane.b32.xlu1 %v21486_v7, %s20825_s22 }
 0xb8c   :  { %v2416_v54 = vpop.xlane.xlu0 %2415 }
 0xb8d   :  { %v2420_v47 = vsub.f32 %v2412_v38, %v2416_v54  ;;  %v2954_v54 = vld [vmem:[#allocation10] sm:$0xff] }
 0xb8f   :  { %v2422_v48 = vmul.f32 1.442695, %v2420_v47  ;;  %v2955_v47 = vld [vmem:[#allocation10 + $0x8] sm:$0xff] }
 0xb90   :  { %v2437_v49 = vpop.permute.xlu0 %2436  ;;  %v2419_v50 = vpop.xlane.xlu1 %2418 }
 0xb91   :  { %20067 = vpow2.f32 %v2422_v48  ;;  %v2421_v52 = vsub.f32 %v2413_v43, %v2419_v50  ;;  %17925 = vmatpush3.msra.mxu0 %v2437_v49  ;;  %v18402_v48 = vpack.c.bf16 %v2955_v47, %v2954_v54  ;;  %v2957_v49 = vld [vmem:[#allocation10 + $0x18] sm:$0xff] }
 0xb92   :  { %17934 = vmatprep.subr.mxu0 %v20814_v42 }
 0xb93   :  { %v2424_v55 = vmul.f32 1.442695, %v2421_v52 }
 0xb94   :  { %v2513_v34 = vpop.permute.xlu1 %2512 }
 0xb95   :  { %20069 = vpow2.f32 %v2424_v55  ;;  %17930 = vmatpush3.msra.mxu1 %v2513_v34 }
 0xb96   :  { %17939 = vmatprep.subr.mxu1 %v20814_v42 }
 0xb98   :  { %v2591_v60 = vpop.permute.xlu1 %2590 }
 0xb9b   :  { %v20068_v56 = vpop.eup %20067 }
 0xb9c   :  { %v2426_v57 = vsel %vm1578_vm4, %v20068_v56, 0.0  ;;  %v2669_v63 = vpop.permute.xlu1 %2668 }
 0xb9d   :  { %2427 = vadd.xlane.f32.xlu0 %v2426_v57 }
 0xb9f   :  { %v20070_v18 = vpop.eup %20069 }
 0xba0   :  { %v2429_v58 = vsel %vm1578_vm4, %v20070_v18, 0.0  ;;  %v2667_v5 = vpop.permute.xlu1 %2666 }
 0xba1   :  { %2430 = vadd.xlane.f32.xlu0 %v2429_v58 }
 0xbb7   :  { %2588 = vrot.lane.b32.xlu0 %v21488_v9, %s20825_s22 }
 0xc2a   :  { %v2428_v21 = vpop.xlane.xlu0 %2427 }
 0xc2b   :  { %20071 = vrcp.f32 %v2428_v21 }
 0xc2e   :  { %v2431_v59 = vpop.xlane.xlu0 %2430 }
 0xc2f   :  { %20073 = vrcp.f32 %v2431_v59 }
 0xc32   :  { %v2589_v3 = vpop.permute.xlu0 %2588 }
 0xc35   :  { %v20072_v61 = vpop.eup %20071 }
 0xc36   :  { %v2434_v62 = vmul.f32 %v20072_v61, %v20068_v56 }
 0xc38   :  { %17927 = vmatmul.mubr.msk.f32.vlgmr.msra.gmra.mrb[18].mxu0 %vm1578_vm4, %v2434_v62 }
 0xc39   :  { %v20074_v46 = vpop.eup %20073  ;;  %17935 = vmatpush3.xpose.msk.msra.mxu0 %vm1578_vm4, %v2591_v60  ;;  %17936 = vmatprep.mubr.msk.f32.mxu0 %vm20816_vm3, %v20814_v42 }
 0xc3a   :  { %v2435_v1 = vmul.f32 %v20074_v46, %v20070_v18  ;;  %17944 = vmatprep.subr.mxu0 %v20814_v42 }
 0xc3c   :  { %17932 = vmatmul.mubr.msk.f32.vlgmr.msra.gmra.mrb[20].mxu1 %vm1578_vm4, %v2435_v1  ;;  %17937 = vmatmul.mubr.msk.f32.vlgmr.msra.gmra.mrb[20].mxu0 %vm1578_vm4, %v2589_v3 }
 0xc3d   :  { %17940 = vmatpush3.xpose.msk.msra.mxu1 %vm1578_vm4, %v2669_v63  ;;  %17941 = vmatprep.mubr.msk.f32.mxu1 %vm20816_vm3, %v20814_v42 }
 0xc3e   :  { %17949 = vmatprep.subr.mxu1 %v20814_v42  ;;  %17946 = vmatprep.mubr.msk.f32.mxu0 %vm20816_vm3, %v20814_v42 }
 0xc40   :  { %17942 = vmatmul.mubr.msk.f32.vlgmr.msra.gmra.mrb[22].mxu1 %vm1578_vm4, %v2667_v5 }
 0xc41   :  { %17951 = vmatprep.mubr.msk.f32.mxu1 %vm20816_vm3, %v20814_v42 }
 0xd0b   :  { %v2508_v6 = vpop.f32.mrb[18].mxu0 }
 0xd0c   :  { %v17928_v8 = vpop.f32.mrb[19].mxu0 }
 0xd0f   :  { %v2584_v10 = vpop.f32.mrb[20].mxu1  ;;  %v2662_v11 = vpop.f32.mrb[20].mxu0 }
 0xd10   :  { %v2744_v12 = vmul.f32 0.35355338, %v2662_v11  ;;  %v17933_v15 = vpop.f32.mrb[21].mxu1  ;;  %v17938_v16 = vpop.f32.mrb[21].mxu0 }
 0xd12   :  { %v2746_v17 = vadd.f32 %v21507_v14, %v2744_v12 }
 0xd13   :  { %v2740_v19 = vpop.f32.mrb[22].mxu1 }
 0xd14   :  { %v2745_v23 = vmul.f32 0.35355338, %v2740_v19  ;;  %v17943_v24 = vpop.f32.mrb[23].mxu1  ;;  %v2748_v25 = vsel %vm1578_vm4, %v2746_v17, -inf }
 0xd15   :  { %2749 = vmax.xlane.f32.xlu0 %v2748_v25 }
 0xd16   :  { %v2747_v26 = vadd.f32 %v21511_v22, %v2745_v23 }
 0xd18   :  { %v2751_v27 = vsel %vm1578_vm4, %v2747_v26, -inf }
 0xd19   :  { %2752 = vmax.xlane.f32.xlu1 %v2751_v27 }
 0xd2a   :  { %2846 = vrot.lane.b32.xlu1 %v21486_v7, %s20826_s3 }
 0xd2e   :  { %2924 = vrot.lane.b32.xlu1 %v21588_v13, %s20783_s25 }
 0xd32   :  { %2926 = vrot.lane.b32.xlu1 %v21590_v32, %s20783_s25 }
 0xd36   :  { %2934 = vrot.lane.b32.xlu1 %v2584_v10, %s20787_s2 }
 0xda2   :  { %v2750_v28 = vpop.xlane.xlu0 %2749 }
 0xda3   :  { %v2754_v29 = vsub.f32 %v2746_v17, %v2750_v28 }
 0xda5   :  { %v2756_v30 = vmul.f32 1.442695, %v2754_v29  ;;  %v3093_v29 = vld [vmem:[#allocation16 + $0x8] sm:$0xff] }
 0xda6   :  { %v2753_v31 = vpop.xlane.xlu1 %2752 }
 0xda7   :  { %20075 = vpow2.f32 %v2756_v30  ;;  %v2755_v33 = vsub.f32 %v2747_v26, %v2753_v31  ;;  %v3094_v30 = vld [vmem:[#allocation16 + $0x10] sm:$0xff] }
 0xda9   :  { %v2758_v35 = vmul.f32 1.442695, %v2755_v33  ;;  %v3095_v33 = vld [vmem:[#allocation16 + $0x18] sm:$0xff] }
 0xdaa   :  { %v2847_v36 = vpop.permute.xlu1 %2846 }
 0xdab   :  { %20077 = vpow2.f32 %v2758_v35  ;;  %17950 = vmatpush3.msra.mxu1 %v2847_v36  ;;  %v18414_v35 = vpack.c.bf16 %v3095_v33, %v3094_v30 }
 0xdae   :  { %v2925_v57 = vpop.permute.xlu1 %2924 }
 0xdaf   :  { %v2946_v21 = vsel %vm1578_vm4, %v21548_v51, %v2925_v57  ;;  %v16407_v51 = vld [vmem:[#allocation12] ss:$0 sm:$0xff] }
 0xdb0   :  { %v3206_v57 = vld [vmem:[%s23639_s23 + $0x20] sm:$0xff] }
 0xdb1   :  { %v20076_v37 = vpop.eup %20075 }
 0xdb2   :  { %v2760_v7 = vsel %vm1578_vm4, %v20076_v37, 0.0  ;;  %v2927_v18 = vpop.permute.xlu1 %2926 }
 0xdb3   :  { %2761 = vadd.xlane.f32.xlu0 %v2760_v7  ;;  %v2947_v46 = vsel %vm1578_vm4, %v21550_v53, %v2927_v18  ;;  %v3207_v18 = vld [vmem:[%s23639_s23 + $0x28] sm:$0xff] }
 0xdb5   :  { %v20078_v13 = vpop.eup %20077 }
 0xdb6   :  { %v2763_v38 = vsel %vm1578_vm4, %v20078_v13, 0.0  ;;  %v2935_v59 = vpop.permute.xlu1 %2934 }
 0xdb7   :  { %2764 = vadd.xlane.f32.xlu0 %v2763_v38  ;;  %v2950_v63 = vsel %vm2948_vm6, %v2947_v46, %v2935_v59  ;;  %v3209_v59 = vld [vmem:[%s23639_s23 + $0x38] sm:$0xff] }
 0xdcd   :  { %2770 = vrot.lane.b32.xlu0 %v21488_v9, %s20826_s3  ;;  %v2956_v9 = vld [vmem:[#allocation10 + $0x10] sm:$0xff] }
 0xdce   :  { %v18406_v50 = vpack.c.bf16 %v2957_v49, %v2956_v9  ;;  %v3202_v49 = vld [vmem:[%s23639_s23] sm:$0xff] }
 0xdd1   :  { %2932 = vrot.lane.b32.xlu0 %v2508_v6, %s20787_s2 }
 0xe40   :  { %v2762_v32 = vpop.xlane.xlu0 %2761 }
 0xe41   :  { %20079 = vrcp.f32 %v2762_v32 }
 0xe44   :  { %v2765_v39 = vpop.xlane.xlu0 %2764 }
 0xe45   :  { %20081 = vrcp.f32 %v2765_v39 }
 0xe48   :  { %v2771_v40 = vpop.permute.xlu0 %2770 }
 0xe49   :  { %17945 = vmatpush3.msra.mxu0 %v2771_v40  ;;  %v16410_v40 = vld [vmem:[#allocation13] ss:$0 sm:$0xff] }
 0xe4a   :  { %18403 = vmatprep.subr.bf16.mxu0 %v18402_v48 }
 0xe4b   :  { %v20080_v44 = vpop.eup %20079 }
 0xe4c   :  { %v2768_v41 = vmul.f32 %v20080_v44, %v20076_v37  ;;  %v2933_v58 = vpop.permute.xlu0 %2932 }
 0xe4d   :  { %v2949_v60 = vsel %vm2948_vm6, %v2946_v21, %v2933_v58  ;;  %v18426_v58 = vpack.c.bf16 %v3207_v18, %v3206_v57  ;;  %v3208_v21 = vld [vmem:[%s23639_s23 + $0x30] sm:$0xff] }
 0xe4e   :  { %17947 = vmatmul.mubr.msk.f32.vlgmr.msra.gmra.mrb[22].mxu0 %vm1578_vm4, %v2768_v41  ;;  %v16411_v41 = vld [vmem:[#allocation15] ss:$0 sm:$0xff] }
 0xe4f   :  { %v20082_v43 = vpop.eup %20081  ;;  %18405 = vmatpush3.bf16.msra.mxu0 %v18402_v48 }
 0xe50   :  { %v2769_v45 = vmul.f32 %v20082_v43, %v20078_v13  ;;  %18407 = vmatprep.subr.bf16.mxu0 %v18406_v50 }
 0xe52   :  { %17952 = vmatmul.mubr.msk.f32.vlgmr.msra.gmra.mrb[24].mxu1 %vm1578_vm4, %v2769_v45 }
 0xe53   :  { %18409 = vmatpush3.bf16.msra.mxu0 %v18406_v50  ;;  %v3203_v50 = vld [vmem:[%s23639_s23 + $0x8] sm:$0xff] }
 0xf21   :  { %v2842_v52 = vpop.f32.mrb[22].mxu0 }
 0xf22   :  { %2940 = vrot.lane.b32.xlu0 %v2842_v52, %s20827_s6  ;;  %v17948_v55 = vpop.f32.mrb[23].mxu0  ;;  %v18418_v52 = vpack.c.bf16 %v3203_v50, %v3202_v49 }
 0xf23   :  { %v3204_v55 = vld [vmem:[%s23639_s23 + $0x10] sm:$0xff] }
 0xf25   :  { %v2918_v34 = vpop.f32.mrb[24].mxu1 }
 0xf26   :  { %2942 = vrot.lane.b32.xlu1 %v2918_v34, %s20827_s6  ;;  %v17953_v56 = vpop.f32.mrb[25].mxu1  ;;  %v3205_v34 = vld [vmem:[%s23639_s23 + $0x18] sm:$0xff] }
 0xf27   :  { %v18422_v56 = vpack.c.bf16 %v3205_v34, %v3204_v55 }
 0xf94   :  { %v2941_v61 = vpop.permute.xlu0 %2940 }
 0xf95   :  { %v2952_v62 = vsel %vm2951_vm5, %v2949_v60, %v2941_v61  ;;  %v18430_v60 = vpack.c.bf16 %v3209_v59, %v3208_v21  ;;  %v16412_v61 = vld [vmem:[#allocation18] ss:$0 sm:$0xff] }
 0xf96   :  { %17962 = vmatprep.mubr.msk.f32.mxu0 %vm1437_vm2, %v2952_v62 }
 0xf98   :  { %v2943_v1 = vpop.permute.xlu1 %2942 }
 0xf99   :  { %v2953_v3 = vsel %vm2951_vm5, %v2950_v63, %v2943_v1 }
 0xf9a   :  { %17963 = vmatmul.mubr.msk.f32.vlgmr.msra.gmra.mrb[24].mxu0 %vm1437_vm2, %v2953_v3 }
0x106d   :  { %v17964_v5 = vpop.f32.mrb[24].mxu0 }
0x106e   :  { %v3043_v6 = vadd.f32 %v17964_v5, %v16407_v51  ;;  %v3037_v8 = vpop.f32.mrb[25].mxu0 }
0x106f   :  { %v3038_v10 = vadd.f32 %v16407_v51, %v3037_v8 }
0x1070   :  { %v3047_v11 = vadd.f32 %v3043_v6, %v21478_v4 }
0x1071   :  { %v3046_v12 = vadd.f32 %v3038_v10, %v21474_v2  ;;  %v3092_v2 = vld [vmem:[#allocation16] sm:$0xff] }
0x1072   :  { %v3053_v15 = vsel %vm1437_vm2, %v3047_v11, 0.0  ;;  %v18410_v31 = vpack.c.bf16 %v3093_v29, %v3092_v2 }
0x1073   :  { %3054 = vadd.xlane.f32.xlu1 %v3053_v15  ;;  %v3050_v53 = vsel %vm1437_vm2, %v3046_v12, 0.0 }
0x1074   :  { %3051 = vadd.xlane.f32.xlu0 %v3050_v53  ;;  %18411 = vmatprep.subr.bf16.mxu0 %v18410_v31 }
0x1075   :  { %18413 = vmatpush3.bf16.msra.mxu0 %v18410_v31 }
0x1076   :  { %18415 = vmatprep.subr.bf16.mxu0 %v18414_v35 }
0x1079   :  { %18417 = vmatpush3.bf16.msra.mxu0 %v18414_v35 }
0x107a   :  { %18419 = vmatprep.subr.bf16.mxu0 %v18418_v52 }
0x1100   :  { %v3055_v16 = vpop.xlane.xlu1 %3054 }
0x1101   :  { %v3057_v17 = vmul.f32 0.03125, %v3055_v16  ;;  %v3052_v19 = vpop.xlane.xlu0 %3051 }
0x1102   :  { %v3056_v23 = vmul.f32 0.03125, %v3052_v19 }
0x1103   :  { %v3059_v24 = vsub.f32 %v3047_v11, %v3057_v17 }
0x1104   :  { %v3058_v25 = vsub.f32 %v3046_v12, %v3056_v23 }
0x1105   :  { %v3061_v28 = vmul.f32 %v3059_v24, %v3059_v24 }
0x1106   :  { %v3060_v26 = vmul.f32 %v3058_v25, %v3058_v25 }
0x1107   :  { %v3065_v4 = vsel %vm1437_vm2, %v3061_v28, 0.0  ;;  %v16415_v28 = vld [vmem:[#allocation19] ss:$0 sm:$0xff] }
0x1108   :  { %v3062_v27 = vsel %vm1437_vm2, %v3060_v26, 0.0 }
0x1109   :  { %3063 = vadd.xlane.f32.xlu0 %v3062_v27 }
0x110d   :  { %3066 = vadd.xlane.f32.xlu0 %v3065_v4 }
0x1196   :  { %v3064_v36 = vpop.xlane.xlu0 %3063 }
0x1197   :  { %v3068_v37 = vmul.f32 0.03125, %v3064_v36 }
0x1199   :  { %v3070_v7 = vadd.f32 1e-12, %v3068_v37 }
0x119a   :  { %v3067_v13 = vpop.xlane.xlu0 %3066 }
0x119b   :  { %20083 = vrsqrt.f32 %v3070_v7  ;;  %v3069_v38 = vmul.f32 0.03125, %v3067_v13 }
0x119d   :  { %v3071_v32 = vadd.f32 1e-12, %v3069_v38 }
0x119f   :  { %20085 = vrsqrt.f32 %v3071_v32 }
0x11a5   :  { %v20084_v39 = vpop.eup %20083 }
0x11a6   :  { %v3074_v44 = vmul.f32 %v20084_v39, %v3058_v25 }
0x11a8   :  { %v3082_v43 = vmul.f32 %v16410_v40, %v3074_v44 }
0x11a9   :  { %v20086_v45 = vpop.eup %20085 }
0x11aa   :  { %v3075_v54 = vmul.f32 %v20086_v45, %v3059_v24  ;;  %v3090_v47 = vadd.f32 %v16411_v41, %v3082_v43  ;;  %v3346_v45 = vld [vmem:[#allocation7 + $0x20] sm:$0xff] }
0x11ac   :  { %v3083_v48 = vmul.f32 %v16410_v40, %v3075_v54  ;;  %17973 = vmatprep.mubr.msk.f32.mxu0 %vm1437_vm2, %v3090_v47  ;;  %v3347_v54 = vld [vmem:[#allocation7 + $0x28] sm:$0xff] }
0x11ae   :  { %v3091_v9 = vadd.f32 %v16411_v41, %v3083_v48  ;;  %v18434_v48 = vpack.c.bf16 %v3347_v54, %v3346_v45 }
0x11b0   :  { %17974 = vmatmul.mubr.msk.f32.vlgmr.msra.gmra.mrb[26].mxu0 %vm1437_vm2, %v3091_v9  ;;  %18435 = vmatprep.subr.bf16.mxu1 %v18434_v48 }
0x11b1   :  { %18421 = vmatpush3.bf16.msra.mxu0 %v18418_v52  ;;  %18437 = vmatpush3.bf16.msra.mxu1 %v18434_v48 }
0x11b2   :  { %18423 = vmatprep.subr.bf16.mxu0 %v18422_v56 }
0x11b5   :  { %18425 = vmatpush3.bf16.msra.mxu0 %v18422_v56 }
0x11b6   :  { %18427 = vmatprep.subr.bf16.mxu0 %v18426_v58 }
0x11b9   :  { %18429 = vmatpush3.bf16.msra.mxu0 %v18426_v58  ;;  %v16418_v58 = vld [vmem:[#allocation21] ss:$0 sm:$0xff] }
0x11ba   :  { %18431 = vmatprep.subr.bf16.mxu0 %v18430_v60 }
0x11bd   :  { %18433 = vmatpush3.bf16.msra.mxu0 %v18430_v60 }
0x11be   :  { %18016 = vmatprep.subr.mxu0 %v20814_v42 }
0x1283   :  { %v17975_v62 = vpop.f32.mrb[26].mxu0 }
0x1284   :  { %v3181_v46 = vadd.f32 %v17975_v62, %v16412_v61  ;;  %v3175_v63 = vpop.f32.mrb[27].mxu0 }
0x1285   :  { %v3176_v1 = vadd.f32 %v16412_v61, %v3175_v63  ;;  %v16419_v61 = vld [vmem:[#allocation22] ss:$0 sm:$0xff] }
0x1286   :  { %v3185_v3 = vmul.f32 %v3181_v46, %v3181_v46 }
0x1287   :  { %v3184_v51 = vmul.f32 %v3176_v1, %v3176_v1 }
0x1288   :  { %v3187_v5 = vmul.f32 %v3185_v3, %v3181_v46  ;;  %v16420_v3 = vld [vmem:[#allocation9 + $0x1] ss:$0 sm:$0xff] }
0x1289   :  { %v3186_v6 = vmul.f32 %v3184_v51, %v3176_v1 }
0x128a   :  { %v3189_v8 = vmul.f32 0.044715, %v3187_v5 }
0x128b   :  { %v3188_v10 = vmul.f32 0.044715, %v3186_v6 }
0x128c   :  { %v3191_v11 = vadd.f32 %v3189_v8, %v3181_v46 }
0x128d   :  { %v3190_v12 = vadd.f32 %v3188_v10, %v3176_v1 }
0x128e   :  { %v3193_v15 = vmul.f32 0.7978846, %v3191_v11 }
0x128f   :  { %v3192_v53 = vmul.f32 0.7978846, %v3190_v12 }
0x1290   :  { %20087 = vtanh.f32 %v3193_v15 }
0x1291   :  { %20089 = vtanh.f32 %v3192_v53 }
0x129a   :  { %v20088_v16 = vpop.eup %20087 }
0x129b   :  { %v20090_v17 = vpop.eup %20089  ;;  %v3197_v19 = vadd.f32 1.0, %v20088_v16 }
0x129c   :  { %v3196_v23 = vadd.f32 1.0, %v20090_v17 }
0x129d   :  { %v3199_v24 = vmul.f32 0.5, %v3197_v19 }
0x129e   :  { %v3198_v25 = vmul.f32 0.5, %v3196_v23 }
0x129f   :  { %v3201_v27 = vmul.f32 %v3199_v24, %v3181_v46 }
0x12a0   :  { %v3200_v26 = vmul.f32 %v3198_v25, %v3176_v1 }
0x12a2   :  { %17992 = vmatprep.mubr.msk.f32.mxu0 %vm3217_vm7, %v3200_v26 }
0x12a3   :  { %17993 = vmatmul.mubr.msk.f32.vlgmr.msra.gmra.mrb[28].mxu0 %vm3217_vm7, %v3201_v27 }
0x12a4   :  { %18018 = vmatprep.mubr.msk.f32.mxu0 %vm20816_vm3, %v20814_v42 }
0x1376   :  { %v17994_v4 = vpop.f32.mrb[28].mxu0 }
0x1377   :  { %v3296_v2 = vadd.f32 %v17994_v4, %v16415_v28  ;;  %v3290_v29 = vpop.f32.mrb[29].mxu0 }
0x1378   :  { %v3291_v30 = vadd.f32 %v16415_v28, %v3290_v29 }
0x1379   :  { %v3300_v31 = vadd.f32 %v3296_v2, %v3091_v9  ;;  %v3349_v9 = vld [vmem:[#allocation7 + $0x38] sm:$0xff] }
0x137a   :  { %v3299_v33 = vadd.f32 %v3291_v30, %v3090_v47  ;;  %v3348_v47 = vld [vmem:[#allocation7 + $0x30] sm:$0xff] }
0x137b   :  { %v3306_v35 = vsel %vm1437_vm2, %v3300_v31, 0.0  ;;  %v18438_v49 = vpack.c.bf16 %v3349_v9, %v3348_v47 }
0x137c   :  { %3307 = vadd.xlane.f32.xlu1 %v3306_v35  ;;  %v3303_v36 = vsel %vm1437_vm2, %v3299_v33, 0.0 }
0x137d   :  { %3304 = vadd.xlane.f32.xlu0 %v3303_v36  ;;  %18439 = vmatprep.subr.bf16.mxu1 %v18438_v49 }
0x137e   :  { %18441 = vmatpush3.bf16.msra.mxu1 %v18438_v49 }
0x137f   :  { %18006 = vmatprep.subr.mxu1 %v20814_v42 }
0x1409   :  { %v3308_v37 = vpop.xlane.xlu1 %3307 }
0x140a   :  { %v3310_v7 = vmul.f32 0.03125, %v3308_v37  ;;  %v3305_v13 = vpop.xlane.xlu0 %3304 }
0x140b   :  { %v3309_v38 = vmul.f32 0.03125, %v3305_v13 }
0x140c   :  { %v3312_v32 = vsub.f32 %v3300_v31, %v3310_v7 }
0x140d   :  { %v3311_v39 = vsub.f32 %v3299_v33, %v3309_v38 }
0x140e   :  { %v3314_v40 = vmul.f32 %v3312_v32, %v3312_v32 }
0x140f   :  { %v3313_v44 = vmul.f32 %v3311_v39, %v3311_v39 }
0x1410   :  { %v3318_v41 = vsel %vm1437_vm2, %v3314_v40, 0.0 }
0x1411   :  { %3319 = vadd.xlane.f32.xlu1 %v3318_v41  ;;  %v3315_v43 = vsel %vm1437_vm2, %v3313_v44, 0.0 }
0x1412   :  { %3316 = vadd.xlane.f32.xlu0 %v3315_v43 }
0x149e   :  { %v3320_v50 = vpop.xlane.xlu1 %3319 }
0x149f   :  { %v3322_v52 = vmul.f32 0.03125, %v3320_v50  ;;  %v3317_v55 = vpop.xlane.xlu0 %3316 }
0x14a0   :  { %v3321_v34 = vmul.f32 0.03125, %v3317_v55 }
0x14a1   :  { %v3324_v56 = vadd.f32 1e-12, %v3322_v52  ;;  %v21755_v52 = vld [vmem:[%s23638_s1] ss:$0 sm:$0xff] }
0x14a2   :  { %v3323_v57 = vadd.f32 1e-12, %v3321_v34 }
0x14a3   :  { %20091 = vrsqrt.f32 %v3324_v56 }
0x14a4   :  { %20093 = vrsqrt.f32 %v3323_v57 }
0x14ad   :  { %v20092_v18 = vpop.eup %20091 }
0x14ae   :  { %v20094_v21 = vpop.eup %20093  ;;  %v3328_v59 = vmul.f32 %v20092_v18, %v3312_v32 }
0x14af   :  { %v3327_v60 = vmul.f32 %v20094_v21, %v3311_v39 }
0x14b0   :  { %v3336_v62 = vmul.f32 %v16418_v58, %v3328_v59 }
0x14b1   :  { %v3335_v46 = vmul.f32 %v16418_v58, %v3327_v60  ;;  %v21760_v58 = vld [vmem:[%s23638_s1 + $0x1] ss:$0 sm:$0xff] }
0x14b2   :  { %v21686_v1 = vadd.f32 %v16419_v61, %v3336_v62 }
0x14b3   :  { %v21684_v63 = vadd.f32 %v16419_v61, %v3335_v46 }
0x14b5   :  { %18003 = vmatprep.mubr.msk.f32.mxu1 %vm1437_vm2, %v21684_v63 }
0x14b6   :  { %18004 = vmatmul.mubr.msk.f32.vlgmr.msra.gmra.mrb[26].mxu1 %vm1437_vm2, %v21686_v1 }
0x14b7   :  { %18008 = vmatprep.mubr.msk.f32.mxu1 %vm20816_vm3, %v20814_v42 }
0x1589   :  { %v18005_v51 = vpop.f32.mrb[26].mxu1 }
0x158a   :  { %v21694_v5 = vadd.f32 %v18005_v51, %v16420_v3  ;;  %v3430_v6 = vpop.f32.mrb[27].mxu1 }
0x158b   :  { %v21696_v8 = vadd.f32 %v16420_v3, %v3430_v6 }
0x158c   :  { %3517 = vrot.lane.b32.xlu1 %v21694_v5, %s20817_s7 }
0x158d   :  { %3440 = vrot.lane.b32.xlu0 %v21696_v8, %s20817_s7 }
0x15fe   :  { %v3518_v11 = vpop.permute.xlu1 %3517 }
0x15ff   :  { %v3441_v10 = vpop.permute.xlu0 %3440 }
0x1600   :  { %18007 = vmatpush3.xpose.msk.msra.mxu1 %vm1578_vm4, %v3441_v10 }
0x1601   :  { %18011 = vmatprep.subr.mxu1 %v20814_v42 }
0x1603   :  { %18009 = vmatmul.mubr.msk.f32.vlgmr.msra.gmra.mrb[28].mxu1 %vm1578_vm4, %v21696_v8 }
0x1604   :  { %18012 = vmatpush3.xpose.msk.msra.mxu1 %vm1578_vm4, %v3518_v11  ;;  %18013 = vmatprep.mubr.msk.f32.mxu1 %vm20816_vm3, %v20814_v42 }
0x1605   :  { %18021 = vmatprep.subr.mxu1 %v20814_v42 }
0x1607   :  { %18014 = vmatmul.mubr.msk.f32.vlgmr.msra.gmra.mrb[30].mxu1 %vm1578_vm4, %v21694_v5 }
0x1608   :  { %18023 = vmatprep.mubr.msk.f32.mxu1 %vm20816_vm3, %v20814_v42 }
0x16d6   :  { %v3512_v12 = vpop.f32.mrb[28].mxu1 }
0x16d7   :  { %v3593_v15 = vmul.f32 0.35355338, %v3512_v12  ;;  %v18010_v53 = vpop.f32.mrb[29].mxu1 }
0x16d9   :  { %v3595_v16 = vadd.f32 %v21507_v14, %v3593_v15 }
0x16da   :  { %v3589_v17 = vpop.f32.mrb[30].mxu1 }
0x16db   :  { %v3594_v19 = vmul.f32 0.35355338, %v3589_v17  ;;  %v18015_v23 = vpop.f32.mrb[31].mxu1  ;;  %v3597_v24 = vsel %vm1578_vm4, %v3595_v16, -inf }
0x16dc   :  { %3598 = vmax.xlane.f32.xlu1 %v3597_v24 }
0x16dd   :  { %v3596_v25 = vadd.f32 %v21511_v22, %v3594_v19 }
0x16df   :  { %v3600_v26 = vsel %vm1578_vm4, %v3596_v25, -inf }
0x16e0   :  { %3601 = vmax.xlane.f32.xlu0 %v3600_v26 }
0x16ed   :  { %3695 = vrot.lane.b32.xlu1 %v21694_v5, %s20793_s15 }
0x16f1   :  { %3773 = vrot.lane.b32.xlu1 %v21696_v8, %s20818_s10 }
0x16f5   :  { %3851 = vrot.lane.b32.xlu1 %v21694_v5, %s20818_s10 }
0x16f6   :  { %3619 = vrot.lane.b32.xlu0 %v21696_v8, %s20793_s15 }
0x1769   :  { %v3599_v14 = vpop.xlane.xlu1 %3598 }
0x176a   :  { %v3603_v27 = vsub.f32 %v3595_v16, %v3599_v14 }
0x176c   :  { %v3605_v28 = vmul.f32 1.442695, %v3603_v27 }
0x176d   :  { %v3696_v4 = vpop.permute.xlu1 %3695  ;;  %v3602_v22 = vpop.xlane.xlu0 %3601 }
0x176e   :  { %20095 = vpow2.f32 %v3605_v28  ;;  %v3604_v2 = vsub.f32 %v3596_v25, %v3602_v22  ;;  %18022 = vmatpush3.msra.mxu1 %v3696_v4 }
0x176f   :  { %18031 = vmatprep.subr.mxu1 %v20814_v42 }
0x1770   :  { %v3607_v29 = vmul.f32 1.442695, %v3604_v2 }
0x1771   :  { %v3620_v30 = vpop.permute.xlu0 %3619  ;;  %v3774_v37 = vpop.permute.xlu1 %3773 }
0x1772   :  { %20097 = vpow2.f32 %v3607_v29  ;;  %18017 = vmatpush3.msra.mxu0 %v3620_v30 }
0x1773   :  { %18026 = vmatprep.subr.mxu0 %v20814_v42 }
0x1775   :  { %v3852_v7 = vpop.permute.xlu1 %3851 }
0x1778   :  { %v20096_v31 = vpop.eup %20095 }
0x1779   :  { %v3609_v33 = vsel %vm1578_vm4, %v20096_v31, 0.0 }
0x177a   :  { %3610 = vadd.xlane.f32.xlu0 %v3609_v33 }
0x177c   :  { %v20098_v35 = vpop.eup %20097 }
0x177d   :  { %v3612_v36 = vsel %vm1578_vm4, %v20098_v35, 0.0 }
0x177e   :  { %3613 = vadd.xlane.f32.xlu1 %v3612_v36 }
0x178f   :  { %3849 = vrot.lane.b32.xlu1 %v21694_v5, %s20819_s13 }
0x1790   :  { %3771 = vrot.lane.b32.xlu0 %v21696_v8, %s20819_s13 }
0x1807   :  { %v3611_v13 = vpop.xlane.xlu0 %3610 }
0x1808   :  { %20099 = vrcp.f32 %v3611_v13 }
0x180b   :  { %v3614_v38 = vpop.xlane.xlu1 %3613  ;;  %v3772_v41 = vpop.permute.xlu0 %3771 }
0x180c   :  { %20101 = vrcp.f32 %v3614_v38 }
0x180f   :  { %v3850_v43 = vpop.permute.xlu1 %3849 }
0x1812   :  { %v20100_v32 = vpop.eup %20099 }
0x1813   :  { %v3617_v39 = vmul.f32 %v20100_v32, %v20096_v31 }
0x1815   :  { %18019 = vmatmul.mubr.msk.f32.vlgmr.msra.gmra.mrb[30].mxu0 %vm1578_vm4, %v3617_v39 }
0x1816   :  { %v20102_v40 = vpop.eup %20101  ;;  %18027 = vmatpush3.xpose.msk.msra.mxu0 %vm1578_vm4, %v3774_v37  ;;  %18028 = vmatprep.mubr.msk.f32.mxu0 %vm20816_vm3, %v20814_v42 }
0x1817   :  { %v3618_v44 = vmul.f32 %v20102_v40, %v20098_v35  ;;  %18036 = vmatprep.subr.mxu0 %v20814_v42 }
0x1819   :  { %18024 = vmatmul.mubr.msk.f32.vlgmr.msra.gmra.mrb[32].mxu1 %vm1578_vm4, %v3618_v44  ;;  %18029 = vmatmul.mubr.msk.f32.vlgmr.msra.gmra.mrb[32].mxu0 %vm1578_vm4, %v3772_v41 }
0x181a   :  { %18032 = vmatpush3.xpose.msk.msra.mxu1 %vm1578_vm4, %v3852_v7  ;;  %18033 = vmatprep.mubr.msk.f32.mxu1 %vm20816_vm3, %v20814_v42 }
0x181b   :  { %18041 = vmatprep.subr.mxu1 %v20814_v42  ;;  %18038 = vmatprep.mubr.msk.f32.mxu0 %vm20816_vm3, %v20814_v42 }
0x181d   :  { %18034 = vmatmul.mubr.msk.f32.vlgmr.msra.gmra.mrb[34].mxu1 %vm1578_vm4, %v3850_v43 }
0x181e   :  { %18043 = vmatprep.mubr.msk.f32.mxu1 %vm20816_vm3, %v20814_v42 }
0x18e8   :  { %v21750_v45 = vpop.f32.mrb[30].mxu0 }
0x18e9   :  { %v18020_v54 = vpop.f32.mrb[31].mxu0 }
0x18ec   :  { %v21752_v47 = vpop.f32.mrb[32].mxu1  ;;  %v3845_v48 = vpop.f32.mrb[32].mxu0 }
0x18ed   :  { %v3927_v9 = vmul.f32 0.35355338, %v3845_v48  ;;  %v18025_v49 = vpop.f32.mrb[33].mxu1  ;;  %v18030_v50 = vpop.f32.mrb[33].mxu0 }
0x18ef   :  { %v3929_v55 = vadd.f32 %v21755_v52, %v3927_v9 }
0x18f0   :  { %v3923_v34 = vpop.f32.mrb[34].mxu1 }
0x18f1   :  { %v3928_v56 = vmul.f32 0.35355338, %v3923_v34  ;;  %v18035_v57 = vpop.f32.mrb[35].mxu1  ;;  %v3931_v18 = vsel %vm1578_vm4, %v3929_v55, -inf }
0x18f2   :  { %3932 = vmax.xlane.f32.xlu0 %v3931_v18 }
0x18f3   :  { %v3930_v21 = vadd.f32 %v21760_v58, %v3928_v56 }
0x18f5   :  { %v3934_v59 = vsel %vm1578_vm4, %v3930_v21, -inf }
0x18f6   :  { %3935 = vmax.xlane.f32.xlu1 %v3934_v59 }
0x1907   :  { %4029 = vrot.lane.b32.xlu1 %v21694_v5, %s20820_s12 }
0x1908   :  { %3953 = vrot.lane.b32.xlu0 %v21696_v8, %s20820_s12 }
0x190b   :  { %4107 = vrot.lane.b32.xlu1 %v21696_v8, %s20821_s24 }
0x190f   :  { %4185 = vrot.lane.b32.xlu1 %v21694_v5, %s20821_s24 }
0x1913   :  { %4183 = vrot.lane.b32.xlu1 %v21694_v5, %s20822_s5 }
0x197f   :  { %v3933_v60 = vpop.xlane.xlu0 %3932 }
0x1980   :  { %v3937_v61 = vsub.f32 %v3929_v55, %v3933_v60 }
0x1982   :  { %v3939_v62 = vmul.f32 1.442695, %v3937_v61 }
0x1983   :  { %v3954_v46 = vpop.permute.xlu0 %3953  ;;  %v3936_v3 = vpop.xlane.xlu1 %3935 }
0x1984   :  { %20103 = vpow2.f32 %v3939_v62  ;;  %v3938_v51 = vsub.f32 %v3930_v21, %v3936_v3  ;;  %18037 = vmatpush3.msra.mxu0 %v3954_v46 }
0x1985   :  { %18046 = vmatprep.subr.mxu0 %v20814_v42 }
0x1986   :  { %v3941_v6 = vmul.f32 1.442695, %v3938_v51 }
0x1987   :  { %v4030_v10 = vpop.permute.xlu1 %4029 }
0x1988   :  { %20105 = vpow2.f32 %v3941_v6  ;;  %18042 = vmatpush3.msra.mxu1 %v4030_v10 }
0x1989   :  { %18051 = vmatprep.subr.mxu1 %v20814_v42 }
0x198b   :  { %v4108_v19 = vpop.permute.xlu1 %4107 }
0x198e   :  { %v20104_v11 = vpop.eup %20103 }
0x198f   :  { %v3943_v12 = vsel %vm1578_vm4, %v20104_v11, 0.0  ;;  %v4186_v26 = vpop.permute.xlu1 %4185 }
0x1990   :  { %3944 = vadd.xlane.f32.xlu0 %v3943_v12 }
0x1992   :  { %v20106_v15 = vpop.eup %20105 }
0x1993   :  { %v3946_v53 = vsel %vm1578_vm4, %v20106_v15, 0.0  ;;  %v4184_v28 = vpop.permute.xlu1 %4183 }
0x1994   :  { %3947 = vadd.xlane.f32.xlu0 %v3946_v53 }
0x19aa   :  { %4105 = vrot.lane.b32.xlu0 %v21696_v8, %s20822_s5 }
0x1a1d   :  { %v3945_v16 = vpop.xlane.xlu0 %3944 }
0x1a1e   :  { %20107 = vrcp.f32 %v3945_v16 }
0x1a21   :  { %v3948_v17 = vpop.xlane.xlu0 %3947 }
0x1a22   :  { %20109 = vrcp.f32 %v3948_v17 }
0x1a25   :  { %v4106_v27 = vpop.permute.xlu0 %4105 }
0x1a28   :  { %v20108_v23 = vpop.eup %20107 }
0x1a29   :  { %v3951_v24 = vmul.f32 %v20108_v23, %v20104_v11 }
0x1a2b   :  { %18039 = vmatmul.mubr.msk.f32.vlgmr.msra.gmra.mrb[34].mxu0 %vm1578_vm4, %v3951_v24 }
0x1a2c   :  { %v20110_v25 = vpop.eup %20109  ;;  %18047 = vmatpush3.xpose.msk.msra.mxu0 %vm1578_vm4, %v4108_v19  ;;  %18048 = vmatprep.mubr.msk.f32.mxu0 %vm20816_vm3, %v20814_v42 }
0x1a2d   :  { %v3952_v14 = vmul.f32 %v20110_v25, %v20106_v15  ;;  %18056 = vmatprep.subr.mxu0 %v20814_v42 }
0x1a2f   :  { %18044 = vmatmul.mubr.msk.f32.vlgmr.msra.gmra.mrb[36].mxu1 %vm1578_vm4, %v3952_v14  ;;  %18049 = vmatmul.mubr.msk.f32.vlgmr.msra.gmra.mrb[36].mxu0 %vm1578_vm4, %v4106_v27 }
0x1a30   :  { %18052 = vmatpush3.xpose.msk.msra.mxu1 %vm1578_vm4, %v4186_v26  ;;  %18053 = vmatprep.mubr.msk.f32.mxu1 %vm20816_vm3, %v20814_v42 }
0x1a31   :  { %18061 = vmatprep.subr.mxu1 %v20814_v42  ;;  %18058 = vmatprep.mubr.msk.f32.mxu0 %vm20816_vm3, %v20814_v42 }
0x1a33   :  { %18054 = vmatmul.mubr.msk.f32.vlgmr.msra.gmra.mrb[38].mxu1 %vm1578_vm4, %v4184_v28 }
0x1a34   :  { %18063 = vmatprep.mubr.msk.f32.mxu1 %vm20816_vm3, %v20814_v42 }
0x1afe   :  { %v21796_v4 = vpop.f32.mrb[34].mxu0 }
0x1aff   :  { %v18040_v22 = vpop.f32.mrb[35].mxu0 }
0x1b02   :  { %v21798_v2 = vpop.f32.mrb[36].mxu1  ;;  %v4179_v29 = vpop.f32.mrb[36].mxu0 }
0x1b03   :  { %v4261_v30 = vmul.f32 0.35355338, %v4179_v29  ;;  %v18045_v31 = vpop.f32.mrb[37].mxu1  ;;  %v18050_v33 = vpop.f32.mrb[37].mxu0 }
0x1b05   :  { %v4263_v35 = vadd.f32 %v21755_v52, %v4261_v30 }
0x1b06   :  { %v4257_v36 = vpop.f32.mrb[38].mxu1 }
0x1b07   :  { %v4262_v37 = vmul.f32 0.35355338, %v4257_v36  ;;  %v18055_v7 = vpop.f32.mrb[39].mxu1  ;;  %v4265_v13 = vsel %vm1578_vm4, %v4263_v35, -inf }
0x1b08   :  { %4266 = vmax.xlane.f32.xlu0 %v4265_v13 }
0x1b09   :  { %v4264_v38 = vadd.f32 %v21760_v58, %v4262_v37 }
0x1b0b   :  { %v4268_v32 = vsel %vm1578_vm4, %v4264_v38, -inf }
0x1b0c   :  { %4269 = vmax.xlane.f32.xlu1 %v4268_v32  ;;  %v4805_v32 = vld [vmem:[#allocation10 + $0x28] sm:$0xff] }
0x1b1d   :  { %4363 = vrot.lane.b32.xlu1 %v21694_v5, %s20823_s9 }
0x1b1e   :  { %4287 = vrot.lane.b32.xlu0 %v21696_v8, %s20823_s9 }
0x1b21   :  { %4441 = vrot.lane.b32.xlu1 %v21696_v8, %s20824_s18 }
0x1b25   :  { %4519 = vrot.lane.b32.xlu1 %v21694_v5, %s20824_s18 }
0x1b29   :  { %4517 = vrot.lane.b32.xlu1 %v21694_v5, %s20825_s22 }
0x1b95   :  { %v4267_v39 = vpop.xlane.xlu0 %4266 }
0x1b96   :  { %v4271_v40 = vsub.f32 %v4263_v35, %v4267_v39 }
0x1b98   :  { %v4273_v44 = vmul.f32 1.442695, %v4271_v40  ;;  %v4807_v40 = vld [vmem:[#allocation10 + $0x38] sm:$0xff] }
0x1b99   :  { %v4288_v41 = vpop.permute.xlu0 %4287  ;;  %v4270_v43 = vpop.xlane.xlu1 %4269 }
0x1b9a   :  { %20111 = vpow2.f32 %v4273_v44  ;;  %v4272_v54 = vsub.f32 %v4264_v38, %v4270_v43  ;;  %18057 = vmatpush3.msra.mxu0 %v4288_v41  ;;  %v4804_v38 = vld [vmem:[#allocation10 + $0x20] sm:$0xff] }
0x1b9b   :  { %18066 = vmatprep.subr.mxu0 %v20814_v42  ;;  %v18442_v39 = vpack.c.bf16 %v4805_v32, %v4804_v38 }
0x1b9c   :  { %v4275_v48 = vmul.f32 1.442695, %v4272_v54 }
0x1b9d   :  { %v4364_v9 = vpop.permute.xlu1 %4363 }
0x1b9e   :  { %20113 = vpow2.f32 %v4275_v48  ;;  %18062 = vmatpush3.msra.mxu1 %v4364_v9 }
0x1b9f   :  { %18071 = vmatprep.subr.mxu1 %v20814_v42 }
0x1ba1   :  { %v4442_v18 = vpop.permute.xlu1 %4441 }
0x1ba4   :  { %v20112_v49 = vpop.eup %20111 }
0x1ba5   :  { %v4277_v50 = vsel %vm1578_vm4, %v20112_v49, 0.0  ;;  %v4520_v61 = vpop.permute.xlu1 %4519 }
0x1ba6   :  { %4278 = vadd.xlane.f32.xlu0 %v4277_v50 }
0x1ba8   :  { %v20114_v55 = vpop.eup %20113 }
0x1ba9   :  { %v4280_v34 = vsel %vm1578_vm4, %v20114_v55, 0.0  ;;  %v4518_v3 = vpop.permute.xlu1 %4517 }
0x1baa   :  { %4281 = vadd.xlane.f32.xlu0 %v4280_v34 }
0x1bc0   :  { %4439 = vrot.lane.b32.xlu0 %v21696_v8, %s20825_s22 }
0x1c33   :  { %v4279_v56 = vpop.xlane.xlu0 %4278 }
0x1c34   :  { %20115 = vrcp.f32 %v4279_v56 }
0x1c37   :  { %v4282_v57 = vpop.xlane.xlu0 %4281 }
0x1c38   :  { %20117 = vrcp.f32 %v4282_v57 }
0x1c3b   :  { %v4440_v46 = vpop.permute.xlu0 %4439 }
0x1c3e   :  { %v20116_v21 = vpop.eup %20115 }
0x1c3f   :  { %v4285_v59 = vmul.f32 %v20116_v21, %v20112_v49 }
0x1c41   :  { %18059 = vmatmul.mubr.msk.f32.vlgmr.msra.gmra.mrb[38].mxu0 %vm1578_vm4, %v4285_v59 }
0x1c42   :  { %v20118_v60 = vpop.eup %20117  ;;  %18067 = vmatpush3.xpose.msk.msra.mxu0 %vm1578_vm4, %v4442_v18  ;;  %18068 = vmatprep.mubr.msk.f32.mxu0 %vm20816_vm3, %v20814_v42 }
0x1c43   :  { %v4286_v62 = vmul.f32 %v20118_v60, %v20114_v55  ;;  %18076 = vmatprep.subr.mxu0 %v20814_v42 }
0x1c45   :  { %18064 = vmatmul.mubr.msk.f32.vlgmr.msra.gmra.mrb[40].mxu1 %vm1578_vm4, %v4286_v62  ;;  %18069 = vmatmul.mubr.msk.f32.vlgmr.msra.gmra.mrb[40].mxu0 %vm1578_vm4, %v4440_v46  ;;  %v16447_v62 = vld [vmem:[#allocation12 + $0x1] ss:$0 sm:$0xff] }
0x1c46   :  { %18072 = vmatpush3.xpose.msk.msra.mxu1 %vm1578_vm4, %v4520_v61  ;;  %18073 = vmatprep.mubr.msk.f32.mxu1 %vm20816_vm3, %v20814_v42 }
0x1c47   :  { %18081 = vmatprep.subr.mxu1 %v20814_v42  ;;  %18078 = vmatprep.mubr.msk.f32.mxu0 %vm20816_vm3, %v20814_v42 }
0x1c49   :  { %18074 = vmatmul.mubr.msk.f32.vlgmr.msra.gmra.mrb[42].mxu1 %vm1578_vm4, %v4518_v3 }
0x1c4a   :  { %18083 = vmatprep.mubr.msk.f32.mxu1 %vm20816_vm3, %v20814_v42 }
0x1d14   :  { %v4359_v51 = vpop.f32.mrb[38].mxu0 }
0x1d15   :  { %v18060_v6 = vpop.f32.mrb[39].mxu0 }
0x1d18   :  { %v4435_v10 = vpop.f32.mrb[40].mxu1  ;;  %v4513_v11 = vpop.f32.mrb[40].mxu0 }
0x1d19   :  { %v4595_v12 = vmul.f32 0.35355338, %v4513_v11  ;;  %v18065_v15 = vpop.f32.mrb[41].mxu1  ;;  %v18070_v53 = vpop.f32.mrb[41].mxu0 }
0x1d1b   :  { %v4597_v16 = vadd.f32 %v21755_v52, %v4595_v12 }
0x1d1c   :  { %v4591_v17 = vpop.f32.mrb[42].mxu1 }
0x1d1d   :  { %v4596_v19 = vmul.f32 0.35355338, %v4591_v17  ;;  %v18075_v23 = vpop.f32.mrb[43].mxu1  ;;  %v4599_v24 = vsel %vm1578_vm4, %v4597_v16, -inf }
0x1d1e   :  { %4600 = vmax.xlane.f32.xlu0 %v4599_v24 }
0x1d1f   :  { %v4598_v25 = vadd.f32 %v21760_v58, %v4596_v19 }
0x1d21   :  { %v4602_v26 = vsel %vm1578_vm4, %v4598_v25, -inf }
0x1d22   :  { %4603 = vmax.xlane.f32.xlu1 %v4602_v26  ;;  %v4947_v26 = vld [vmem:[#allocation16 + $0x28] sm:$0xff] }
0x1d33   :  { %4697 = vrot.lane.b32.xlu1 %v21694_v5, %s20826_s3 }
0x1d37   :  { %4775 = vrot.lane.b32.xlu1 %v21796_v4, %s20783_s25 }
0x1d3b   :  { %4777 = vrot.lane.b32.xlu1 %v21798_v2, %s20783_s25 }
0x1d3f   :  { %4785 = vrot.lane.b32.xlu1 %v4435_v10, %s20787_s2 }
0x1dab   :  { %v4601_v52 = vpop.xlane.xlu0 %4600 }
0x1dac   :  { %v4605_v14 = vsub.f32 %v4597_v16, %v4601_v52 }
0x1dae   :  { %v4607_v27 = vmul.f32 1.442695, %v4605_v14  ;;  %v4948_v14 = vld [vmem:[#allocation16 + $0x30] sm:$0xff] }
0x1daf   :  { %v4604_v28 = vpop.xlane.xlu1 %4603 }
0x1db0   :  { %20119 = vpow2.f32 %v4607_v27  ;;  %v4606_v58 = vsub.f32 %v4598_v25, %v4604_v28  ;;  %v4949_v27 = vld [vmem:[#allocation16 + $0x38] sm:$0xff] }
0x1db1   :  { %v18454_v28 = vpack.c.bf16 %v4949_v27, %v4948_v14 }
0x1db2   :  { %v4609_v22 = vmul.f32 1.442695, %v4606_v58 }
0x1db3   :  { %v4698_v29 = vpop.permute.xlu1 %4697 }
0x1db4   :  { %20121 = vpow2.f32 %v4609_v22  ;;  %18082 = vmatpush3.msra.mxu1 %v4698_v29 }
0x1db7   :  { %v4776_v9 = vpop.permute.xlu1 %4775 }
0x1db8   :  { %v4797_v55 = vsel %vm1578_vm4, %v21750_v45, %v4776_v9 }
0x1dba   :  { %v20120_v30 = vpop.eup %20119 }
0x1dbb   :  { %v4611_v5 = vsel %vm1578_vm4, %v20120_v30, 0.0  ;;  %v4778_v49 = vpop.permute.xlu1 %4777 }
0x1dbc   :  { %4612 = vadd.xlane.f32.xlu0 %v4611_v5  ;;  %v4798_v21 = vsel %vm1578_vm4, %v21752_v47, %v4778_v49  ;;  %v16461_v49 = vld [vmem:[%s23639_s23 + $0x70] sm:$0xff] }
0x1dbe   :  { %v20122_v4 = vpop.eup %20121 }
0x1dbf   :  { %v4614_v31 = vsel %vm1578_vm4, %v20122_v4, 0.0  ;;  %v4786_v34 = vpop.permute.xlu1 %4785 }
0x1dc0   :  { %4615 = vadd.xlane.f32.xlu0 %v4614_v31  ;;  %v4800_v59 = vsel %vm2948_vm6, %v4798_v21, %v4786_v34 }
0x1dd6   :  { %4621 = vrot.lane.b32.xlu0 %v21696_v8, %s20826_s3  ;;  %v4806_v8 = vld [vmem:[#allocation10 + $0x30] sm:$0xff] }
0x1dd7   :  { %v18446_v44 = vpack.c.bf16 %v4807_v40, %v4806_v8  ;;  %v16456_v8 = vld [vmem:[%s23639_s23 + $0x48] sm:$0xff] }
0x1dda   :  { %4783 = vrot.lane.b32.xlu0 %v4359_v51, %s20787_s2 }
0x1e49   :  { %v4613_v2 = vpop.xlane.xlu0 %4612 }
0x1e4a   :  { %20123 = vrcp.f32 %v4613_v2  ;;  %v16450_v2 = vld [vmem:[#allocation13 + $0x1] ss:$0 sm:$0xff] }
0x1e4d   :  { %v4616_v33 = vpop.xlane.xlu0 %4615 }
0x1e4e   :  { %20125 = vrcp.f32 %v4616_v33 }
0x1e51   :  { %v4622_v35 = vpop.permute.xlu0 %4621 }
0x1e52   :  { %18077 = vmatpush3.msra.mxu0 %v4622_v35  ;;  %v16451_v35 = vld [vmem:[#allocation15 + $0x1] ss:$0 sm:$0xff] }
0x1e53   :  { %18443 = vmatprep.subr.bf16.mxu0 %v18442_v39 }
0x1e54   :  { %v20124_v36 = vpop.eup %20123 }
0x1e55   :  { %v4619_v37 = vmul.f32 %v20124_v36, %v20120_v30  ;;  %v4784_v50 = vpop.permute.xlu0 %4783 }
0x1e56   :  { %v4799_v56 = vsel %vm2948_vm6, %v4797_v55, %v4784_v50  ;;  %v16462_v50 = vld [vmem:[%s23639_s23 + $0x78] sm:$0xff]  ;;  %v16452_v55 = vld [vmem:[#allocation18 + $0x1] ss:$0 sm:$0xff] }
0x1e57   :  { %18079 = vmatmul.mubr.msk.f32.vlgmr.msra.gmra.mrb[42].mxu0 %vm1578_vm4, %v4619_v37 }
0x1e58   :  { %v20126_v7 = vpop.eup %20125  ;;  %18445 = vmatpush3.bf16.msra.mxu0 %v18442_v39  ;;  %v16455_v39 = vld [vmem:[%s23639_s23 + $0x40] sm:$0xff] }
0x1e59   :  { %v4620_v13 = vmul.f32 %v20126_v7, %v20122_v4  ;;  %18447 = vmatprep.subr.bf16.mxu0 %v18446_v44  ;;  %v18458_v40 = vpack.c.bf16 %v16456_v8, %v16455_v39 }
0x1e5b   :  { %18084 = vmatmul.mubr.msk.f32.vlgmr.msra.gmra.mrb[44].mxu1 %vm1578_vm4, %v4620_v13 }
0x1e5c   :  { %18449 = vmatpush3.bf16.msra.mxu0 %v18446_v44  ;;  %v16457_v44 = vld [vmem:[%s23639_s23 + $0x50] sm:$0xff] }
0x1e5d   :  { %18459 = vmatprep.subr.bf16.mxu0 %v18458_v40 }
0x1f2a   :  { %v4693_v41 = vpop.f32.mrb[42].mxu0 }
0x1f2b   :  { %4791 = vrot.lane.b32.xlu0 %v4693_v41, %s20827_s6  ;;  %v18080_v43 = vpop.f32.mrb[43].mxu0  ;;  %v16458_v41 = vld [vmem:[%s23639_s23 + $0x58] sm:$0xff] }
0x1f2c   :  { %v18462_v43 = vpack.c.bf16 %v16458_v41, %v16457_v44 }
0x1f2e   :  { %v4769_v54 = vpop.f32.mrb[44].mxu1 }
0x1f2f   :  { %4793 = vrot.lane.b32.xlu1 %v4769_v54, %s20827_s6  ;;  %v18085_v48 = vpop.f32.mrb[45].mxu1  ;;  %v16459_v54 = vld [vmem:[%s23639_s23 + $0x60] sm:$0xff] }
0x1f30   :  { %v16460_v48 = vld [vmem:[%s23639_s23 + $0x68] sm:$0xff] }
0x1f31   :  { %v18466_v9 = vpack.c.bf16 %v16460_v48, %v16459_v54  ;;  %v16466_v54 = vld [vmem:[#allocation21 + $0x1] ss:$0 sm:$0xff] }
0x1f9d   :  { %v4792_v57 = vpop.permute.xlu0 %4791 }
0x1f9e   :  { %v4801_v18 = vsel %vm2951_vm5, %v4799_v56, %v4792_v57 }
0x1f9f   :  { %18094 = vmatprep.mubr.msk.f32.mxu0 %vm1437_vm2, %v4801_v18 }
0x1fa1   :  { %v4794_v60 = vpop.permute.xlu1 %4793 }
0x1fa2   :  { %v4802_v61 = vsel %vm2951_vm5, %v4800_v59, %v4794_v60 }
0x1fa3   :  { %18095 = vmatmul.mubr.msk.f32.vlgmr.msra.gmra.mrb[44].mxu0 %vm1437_vm2, %v4802_v61 }
0x1fa4   :  { %18461 = vmatpush3.bf16.msra.mxu0 %v18458_v40 }
0x1fa5   :  { %18463 = vmatprep.subr.bf16.mxu0 %v18462_v43 }
0x1fa8   :  { %18465 = vmatpush3.bf16.msra.mxu0 %v18462_v43 }
0x1fa9   :  { %18467 = vmatprep.subr.bf16.mxu0 %v18466_v9 }
0x1fac   :  { %18469 = vmatpush3.bf16.msra.mxu0 %v18466_v9 }
0x2076   :  { %v18096_v45 = vpop.f32.mrb[44].mxu0 }
0x2077   :  { %v4894_v46 = vadd.f32 %v18096_v45, %v16447_v62  ;;  %v4888_v3 = vpop.f32.mrb[45].mxu0 }
0x2078   :  { %v4889_v51 = vadd.f32 %v16447_v62, %v4888_v3 }
0x2079   :  { %v4898_v6 = vadd.f32 %v4894_v46, %v21686_v1 }
0x207a   :  { %v4897_v10 = vadd.f32 %v4889_v51, %v21684_v63  ;;  %v4946_v63 = vld [vmem:[#allocation16 + $0x20] sm:$0xff] }
0x207b   :  { %v4906_v11 = vsel %vm1437_vm2, %v4898_v6, 0.0  ;;  %v18450_v52 = vpack.c.bf16 %v4947_v26, %v4946_v63 }
0x207c   :  { %4907 = vadd.xlane.f32.xlu1 %v4906_v11  ;;  %v4903_v47 = vsel %vm1437_vm2, %v4897_v10, 0.0 }
0x207d   :  { %4904 = vadd.xlane.f32.xlu0 %v4903_v47  ;;  %18451 = vmatprep.subr.bf16.mxu1 %v18450_v52 }
0x207e   :  { %18453 = vmatpush3.bf16.msra.mxu1 %v18450_v52 }
0x207f   :  { %18455 = vmatprep.subr.bf16.mxu1 %v18454_v28 }
0x2082   :  { %18457 = vmatpush3.bf16.msra.mxu1 %v18454_v28 }
0x2109   :  { %v4908_v12 = vpop.xlane.xlu1 %4907 }
0x210a   :  { %v4910_v15 = vmul.f32 0.03125, %v4908_v12  ;;  %v4905_v53 = vpop.xlane.xlu0 %4904 }
0x210b   :  { %v4909_v16 = vmul.f32 0.03125, %v4905_v53 }
0x210c   :  { %v4912_v17 = vsub.f32 %v4898_v6, %v4910_v15 }
0x210d   :  { %v4911_v19 = vsub.f32 %v4897_v10, %v4909_v16 }
0x210e   :  { %v4914_v25 = vmul.f32 %v4912_v17, %v4912_v17 }
0x210f   :  { %v4913_v23 = vmul.f32 %v4911_v19, %v4911_v19 }
0x2110   :  { %v4918_v1 = vsel %vm1437_vm2, %v4914_v25, 0.0 }
0x2111   :  { %v4915_v24 = vsel %vm1437_vm2, %v4913_v23, 0.0 }
0x2112   :  { %4916 = vadd.xlane.f32.xlu0 %v4915_v24 }
0x2116   :  { %4919 = vadd.xlane.f32.xlu0 %v4918_v1 }
0x219f   :  { %v4917_v58 = vpop.xlane.xlu0 %4916 }
0x21a0   :  { %v4921_v22 = vmul.f32 0.03125, %v4917_v58 }
0x21a2   :  { %v4923_v29 = vadd.f32 1e-12, %v4921_v22 }
0x21a3   :  { %v4920_v30 = vpop.xlane.xlu0 %4919 }
0x21a4   :  { %20127 = vrsqrt.f32 %v4923_v29  ;;  %v4922_v5 = vmul.f32 0.03125, %v4920_v30 }
0x21a6   :  { %v4924_v4 = vadd.f32 1e-12, %v4922_v5 }
0x21a8   :  { %20129 = vrsqrt.f32 %v4924_v4 }
0x21ae   :  { %v20128_v31 = vpop.eup %20127 }
0x21af   :  { %v4927_v33 = vmul.f32 %v20128_v31, %v4911_v19  ;;  %v16463_v19 = vld [vmem:[#allocation19 + $0x1] ss:$0 sm:$0xff] }
0x21b1   :  { %v4935_v36 = vmul.f32 %v16450_v2, %v4927_v33  ;;  %v5208_v33 = vld [vmem:[#allocation24] sm:$0xff] }
0x21b2   :  { %v20130_v37 = vpop.eup %20129 }
0x21b3   :  { %v4928_v7 = vmul.f32 %v20130_v37, %v4912_v17  ;;  %v4943_v13 = vadd.f32 %v16451_v35, %v4935_v36  ;;  %v5210_v37 = vld [vmem:[#allocation24 + $0x10] sm:$0xff] }
0x21b5   :  { %v4936_v38 = vmul.f32 %v16450_v2, %v4928_v7  ;;  %18105 = vmatprep.mubr.msk.f32.mxu1 %vm1437_vm2, %v4943_v13  ;;  %v5211_v7 = vld [vmem:[#allocation24 + $0x18] sm:$0xff] }
0x21b7   :  { %v4944_v32 = vadd.f32 %v16451_v35, %v4936_v38  ;;  %v5209_v35 = vld [vmem:[#allocation24 + $0x8] sm:$0xff]  ;;  %v18478_v38 = vpack.c.bf16 %v5211_v7, %v5210_v37  ;;  %v18691_v7 = vld [vmem:[#allocation27 + $0x100] ss:$16 sps:$4 sm:$0xff]  }
0x21b8   :  { %v18475_v36 = vpack.c.bf16 %v5209_v35, %v5208_v33  ;;  %v18685_v33 = vld [vmem:[#allocation27 + $0xe0] ss:$16 sps:$4 sm:$0xff]   ;;  %v18688_v35 = vld [vmem:[#allocation27 + $0xe8] ss:$16 sps:$4 sm:$0xff]   ;;  %v18696_v37 = vld [vmem:[#allocation27 + $0x10c] ss:$16 sps:$4 sm:$0xff]  }
0x21b9   :  { %18106 = vmatmul.mubr.msk.f32.vlgmr.msra.gmra.mrb[46].mxu1 %vm1437_vm2, %v4944_v32 }
0x21ba   :  { %18135 = vmatprep.mubr.msk.f32.mxu1 %vm20816_vm3, %v20814_v42  ;;  %v18470_v42 = vpack.c.bf16 %v16462_v50, %v16461_v49  ;;  %v16467_v50 = vld [vmem:[#allocation22 + $0x1] ss:$0 sm:$0xff] }
0x21bc   :  { %18471 = vmatprep.subr.bf16.mxu0 %v18470_v42 }
0x21bd   :  { %18473 = vmatpush3.bf16.msra.mxu0 %v18470_v42 }
0x228c   :  { %v18107_v34 = vpop.f32.mrb[46].mxu1 }
0x228d   :  { %v5036_v56 = vadd.f32 %v18107_v34, %v16452_v55  ;;  %v5030_v57 = vpop.f32.mrb[47].mxu1 }
0x228e   :  { %v5031_v18 = vadd.f32 %v16452_v55, %v5030_v57 }
0x228f   :  { %v5040_v21 = vmul.f32 %v5036_v56, %v5036_v56 }
0x2290   :  { %v5039_v59 = vmul.f32 %v5031_v18, %v5031_v18 }
0x2291   :  { %v5042_v60 = vmul.f32 %v5040_v21, %v5036_v56  ;;  %v18645_v21 = vld [vmem:[#allocation27 + $0x4] ss:$16 sps:$4 sm:$0xff]  }
0x2292   :  { %v5041_v61 = vmul.f32 %v5039_v59, %v5031_v18  ;;  %v18648_v59 = vld [vmem:[#allocation27 + $0xc] ss:$16 sps:$4 sm:$0xff]  }
0x2293   :  { %v5044_v62 = vmul.f32 0.044715, %v5042_v60  ;;  %v18643_v60 = vld [vmem:[#allocation27] ss:$16 sps:$4 sm:$0xff]   ;;  %5768 = vmatprep.subr.bf16.mxu0 %v18648_v59  ;;  %v18729_v59 = vld [vmem:[#allocation27 + $0x1c4] ss:$16 sps:$4 sm:$0xff]  }
0x2294   :  { %v5043_v45 = vmul.f32 0.044715, %v5041_v61  ;;  %v18646_v61 = vld [vmem:[#allocation27 + $0x8] ss:$16 sps:$4 sm:$0xff]  }
0x2295   :  { %v5046_v46 = vadd.f32 %v5044_v62, %v5036_v56  ;;  %v18651_v62 = vld [vmem:[#allocation27 + $0x24] ss:$16 sps:$4 sm:$0xff]  }
0x2296   :  { %v5045_v3 = vadd.f32 %v5043_v45, %v5031_v18  ;;  %v18654_v45 = vld [vmem:[#allocation27 + $0x2c] ss:$16 sps:$4 sm:$0xff]  }
0x2297   :  { %v5048_v51 = vmul.f32 0.7978846, %v5046_v46  ;;  %v18649_v46 = vld [vmem:[#allocation27 + $0x20] ss:$16 sps:$4 sm:$0xff]  }
0x2298   :  { %v5047_v6 = vmul.f32 0.7978846, %v5045_v3  ;;  %v18652_v3 = vld [vmem:[#allocation27 + $0x28] ss:$16 sps:$4 sm:$0xff]  }
0x2299   :  { %20131 = vtanh.f32 %v5048_v51  ;;  %v20829_v51 = vmov 0  }
0x229a   :  { %20133 = vtanh.f32 %v5047_v6  ;;  %v18657_v6 = vld [vmem:[#allocation27 + $0x44] ss:$16 sps:$4 sm:$0xff]  }
0x22a3   :  { %v20132_v10 = vpop.eup %20131 }
0x22a4   :  { %v20134_v11 = vpop.eup %20133  ;;  %v5052_v47 = vadd.f32 1.0, %v20132_v10  ;;  %v18660_v10 = vld [vmem:[#allocation27 + $0x4c] ss:$16 sps:$4 sm:$0xff]  }
0x22a5   :  { %v5051_v12 = vadd.f32 1.0, %v20134_v11  ;;  %v16468_v11 = vld [vmem:[#allocation25] ss:$0 sm:$0xff] }
0x22a6   :  { %v5054_v15 = vmul.f32 0.5, %v5052_v47 }
0x22a7   :  { %v5053_v53 = vmul.f32 0.5, %v5051_v12 }
0x22a8   :  { %v5056_v17 = vmul.f32 %v5054_v15, %v5036_v56 }
0x22a9   :  { %v5055_v16 = vmul.f32 %v5053_v53, %v5031_v18 }
0x22ab   :  { %18124 = vmatprep.mubr.msk.f32.mxu0 %vm3217_vm7, %v5055_v16  ;;  %v18655_v16 = vld [vmem:[#allocation27 + $0x40] ss:$16 sps:$4 sm:$0xff]  }
0x22ac   :  { %18125 = vmatmul.mubr.msk.f32.vlgmr.msra.gmra.mrb[46].mxu0 %vm3217_vm7, %v5056_v17  ;;  %v18658_v17 = vld [vmem:[#allocation27 + $0x48] ss:$16 sps:$4 sm:$0xff]  }
0x22ad   :  { %5769 = vmatpush1.bf16.msra.mxu0 %v18646_v61  ;;  %5800 = vmatprep.mubr.bf16.mxu0 %v20829_v51  ;;  %v18727_v61 = vld [vmem:[#allocation27 + $0x1c0] ss:$16 sps:$4 sm:$0xff]  }
0x22ae   :  { %5770 = vmatprep.subr.bf16.mxu0 %v18654_v45  ;;  %v18735_v45 = vld [vmem:[#allocation27 + $0x1e4] ss:$16 sps:$4 sm:$0xff]  }
0x22b1   :  { %5771 = vmatpush1.bf16.msra.mxu0 %v18652_v3  ;;  %v18733_v3 = vld [vmem:[#allocation27 + $0x1e0] ss:$16 sps:$4 sm:$0xff]  }
0x22b2   :  { %5890 = vmatprep.subr.bf16.mxu0 %v18660_v10  ;;  %v18741_v10 = vld [vmem:[#allocation27 + $0x204] ss:$16 sps:$4 sm:$0xff]  }
0x237f   :  { %v18126_v23 = vpop.f32.mrb[46].mxu0 }
0x2380   :  { %v5152_v24 = vadd.f32 %v18126_v23, %v16463_v19  ;;  %v5146_v25 = vpop.f32.mrb[47].mxu0  ;;  %v18663_v23 = vld [vmem:[#allocation27 + $0x64] ss:$16 sps:$4 sm:$0xff]  }
0x2381   :  { %v5147_v1 = vadd.f32 %v16463_v19, %v5146_v25  ;;  %v18661_v25 = vld [vmem:[#allocation27 + $0x60] ss:$16 sps:$4 sm:$0xff]  }
0x2382   :  { %v5156_v63 = vadd.f32 %v5152_v24, %v4944_v32  ;;  %v18666_v24 = vld [vmem:[#allocation27 + $0x6c] ss:$16 sps:$4 sm:$0xff]  }
0x2383   :  { %v5155_v26 = vadd.f32 %v5147_v1, %v4943_v13  ;;  %v20828_v13 = vmov 0.0|0.0   ;;  %v18664_v1 = vld [vmem:[#allocation27 + $0x68] ss:$16 sps:$4 sm:$0xff]  }
0x2384   :  { %v5164_v52 = vsel %vm1437_vm2, %v5156_v63, 0.0  ;;  %18474 = vmatprep.subr.bf16.mxu1 %v20828_v13 }
0x2385   :  { %5165 = vadd.xlane.f32.xlu0 %v5164_v52  ;;  %v5161_v14 = vsel %vm1437_vm2, %v5155_v26, 0.0  ;;  %18476 = vmatpush3.bf16.msra.mxu1 %v18475_v36  ;;  %v18667_v52 = vld [vmem:[#allocation27 + $0x80] ss:$16 sps:$4 sm:$0xff]   ;;  %v18693_v36 = vld [vmem:[#allocation27 + $0x104] ss:$16 sps:$4 sm:$0xff]  }
0x2386   :  { %5162 = vadd.xlane.f32.xlu1 %v5161_v14  ;;  %18477 = vmatprep.subr.bf16.mxu1 %v20828_v13  ;;  %v18670_v14 = vld [vmem:[#allocation27 + $0x88] ss:$16 sps:$4 sm:$0xff]  }
0x2387   :  { %v18694_v13 = vld [vmem:[#allocation27 + $0x108] ss:$16 sps:$4 sm:$0xff]  }
0x2389   :  { %18479 = vmatpush3.bf16.msra.mxu1 %v18478_v38  ;;  %v18699_v38 = vld [vmem:[#allocation27 + $0x124] ss:$16 sps:$4 sm:$0xff]  }
0x238a   :  { %5727 = vmatprep.subr.bf16.mxu1 %v18645_v21  ;;  %v18724_v21 = vld [vmem:[#allocation27 + $0x1a8] ss:$16 sps:$4 sm:$0xff]  }
0x2412   :  { %v5166_v27 = vpop.xlane.xlu0 %5165 }
0x2413   :  { %v5168_v28 = vmul.f32 0.03125, %v5166_v27  ;;  %v5163_v58 = vpop.xlane.xlu1 %5162  ;;  %v18675_v27 = vld [vmem:[#allocation27 + $0xa4] ss:$16 sps:$4 sm:$0xff]  }
0x2414   :  { %v5167_v22 = vmul.f32 0.03125, %v5163_v58  ;;  %v18673_v58 = vld [vmem:[#allocation27 + $0xa0] ss:$16 sps:$4 sm:$0xff]  }
0x2415   :  { %v5170_v29 = vsub.f32 %v5156_v63, %v5168_v28  ;;  %v18669_v63 = vld [vmem:[#allocation27 + $0x84] ss:$16 sps:$4 sm:$0xff]   ;;  %v18678_v28 = vld [vmem:[#allocation27 + $0xac] ss:$16 sps:$4 sm:$0xff]  }
0x2416   :  { %v5169_v30 = vsub.f32 %v5155_v26, %v5167_v22  ;;  %v18672_v26 = vld [vmem:[#allocation27 + $0x8c] ss:$16 sps:$4 sm:$0xff]   ;;  %v18676_v22 = vld [vmem:[#allocation27 + $0xa8] ss:$16 sps:$4 sm:$0xff]  }
0x2417   :  { %v5172_v5 = vmul.f32 %v5170_v29, %v5170_v29 }
0x2418   :  { %v5171_v4 = vmul.f32 %v5169_v30, %v5169_v30 }
0x2419   :  { %v5176_v31 = vsel %vm1437_vm2, %v5172_v5, 0.0  ;;  %v18679_v5 = vld [vmem:[#allocation27 + $0xc0] ss:$16 sps:$4 sm:$0xff]  }
0x241a   :  { %5177 = vadd.xlane.f32.xlu0 %v5176_v31  ;;  %v5173_v2 = vsel %vm1437_vm2, %v5171_v4, 0.0  ;;  %v18682_v4 = vld [vmem:[#allocation27 + $0xc8] ss:$16 sps:$4 sm:$0xff]   ;;  %v18687_v31 = vld [vmem:[#allocation27 + $0xe4] ss:$16 sps:$4 sm:$0xff]  }
0x241b   :  { %5174 = vadd.xlane.f32.xlu1 %v5173_v2  ;;  %v18690_v2 = vld [vmem:[#allocation27 + $0xec] ss:$16 sps:$4 sm:$0xff]  }
0x24a7   :  { %v5178_v32 = vpop.xlane.xlu0 %5177 }
0x24a8   :  { %v5180_v39 = vmul.f32 0.03125, %v5178_v32  ;;  %v5175_v8 = vpop.xlane.xlu1 %5174  ;;  %v18702_v32 = vld [vmem:[#allocation27 + $0x12c] ss:$16 sps:$4 sm:$0xff]  }
0x24a9   :  { %v5179_v40 = vmul.f32 0.03125, %v5175_v8  ;;  %v18700_v8 = vld [vmem:[#allocation27 + $0x128] ss:$16 sps:$4 sm:$0xff]  }
0x24aa   :  { %v5182_v44 = vadd.f32 1e-12, %v5180_v39  ;;  %v18697_v39 = vld [vmem:[#allocation27 + $0x120] ss:$16 sps:$4 sm:$0xff]  }
0x24ab   :  { %v5181_v41 = vadd.f32 1e-12, %v5179_v40  ;;  %v18705_v40 = vld [vmem:[#allocation27 + $0x144] ss:$16 sps:$4 sm:$0xff]  }
0x24ac   :  { %20135 = vrsqrt.f32 %v5182_v44  ;;  %v18708_v44 = vld [vmem:[#allocation27 + $0x14c] ss:$16 sps:$4 sm:$0xff]  }
0x24ad   :  { %20137 = vrsqrt.f32 %v5181_v41  ;;  %v18703_v41 = vld [vmem:[#allocation27 + $0x140] ss:$16 sps:$4 sm:$0xff]  }
0x24b6   :  { %v20136_v43 = vpop.eup %20135 }
0x24b7   :  { %v20138_v48 = vpop.eup %20137  ;;  %v5186_v9 = vmul.f32 %v20136_v43, %v5170_v29  ;;  %v18681_v29 = vld [vmem:[#allocation27 + $0xc4] ss:$16 sps:$4 sm:$0xff]   ;;  %v18706_v43 = vld [vmem:[#allocation27 + $0x148] ss:$16 sps:$4 sm:$0xff]  }
0x24b8   :  { %v5185_v49 = vmul.f32 %v20138_v48, %v5169_v30  ;;  %v18684_v30 = vld [vmem:[#allocation27 + $0xcc] ss:$16 sps:$4 sm:$0xff]  }
0x24b9   :  { %v5194_v42 = vmul.f32 %v16466_v54, %v5186_v9  ;;  %v18714_v48 = vld [vmem:[#allocation27 + $0x16c] ss:$16 sps:$4 sm:$0xff]   ;;  %v18709_v9 = vld [vmem:[#allocation27 + $0x160] ss:$16 sps:$4 sm:$0xff]  }
0x24ba   :  { %v5193_v55 = vmul.f32 %v16466_v54, %v5185_v49  ;;  %v18711_v54 = vld [vmem:[#allocation27 + $0x164] ss:$16 sps:$4 sm:$0xff]   ;;  %v18712_v49 = vld [vmem:[#allocation27 + $0x168] ss:$16 sps:$4 sm:$0xff]  }
0x24bb   :  { %v5202_v34 = vadd.f32 %v16467_v50, %v5194_v42  ;;  %v18720_v42 = vld [vmem:[#allocation27 + $0x18c] ss:$16 sps:$4 sm:$0xff]  }
0x24bc   :  { %v5201_v56 = vadd.f32 %v16467_v50, %v5193_v55  ;;  %v18717_v50 = vld [vmem:[#allocation27 + $0x184] ss:$16 sps:$4 sm:$0xff]   ;;  %v18715_v55 = vld [vmem:[#allocation27 + $0x180] ss:$16 sps:$4 sm:$0xff]  }
0x24bd   :  { %v5204_v57 = vrot.slane %v5202_v34, 7  ;;  %v18718_v34 = vld [vmem:[#allocation27 + $0x188] ss:$16 sps:$4 sm:$0xff]  }
0x24bf   :  { %v5207_v18 = vsel %vm5206_vm8, %v5201_v56, %v5204_v57  ;;  %v18723_v56 = vld [vmem:[#allocation27 + $0x1a4] ss:$16 sps:$4 sm:$0xff]   ;;  %v18726_v57 = vld [vmem:[#allocation27 + $0x1ac] ss:$16 sps:$4 sm:$0xff]  }
0x24c0   :  { %18136 = vmatmul.mubr.msk.f32.vlgmr.msra.gmra.mrb[48].mxu1 %vm1437_vm2, %v5207_v18  ;;  %v18721_v18 = vld [vmem:[#allocation27 + $0x1a0] ss:$16 sps:$4 sm:$0xff]  }
0x24c1   :  { %5728 = vmatpush1.bf16.msra.mxu1 %v18643_v60  ;;  %5759 = vmatprep.mubr.bf16.mxu1 %v20829_v51  ;;  %v18732_v60 = vld [vmem:[#allocation27 + $0x1cc] ss:$16 sps:$4 sm:$0xff]  }
0x24c2   :  { %5729 = vmatprep.subr.bf16.mxu1 %v18651_v62  ;;  %v18730_v62 = vld [vmem:[#allocation27 + $0x1c8] ss:$16 sps:$4 sm:$0xff]  }
0x24c5   :  { %5730 = vmatpush1.bf16.msra.mxu1 %v18649_v46  ;;  %v18738_v46 = vld [vmem:[#allocation27 + $0x1ec] ss:$16 sps:$4 sm:$0xff]  }
0x24c6   :  { %5849 = vmatprep.subr.bf16.mxu1 %v18657_v6  ;;  %v18736_v6 = vld [vmem:[#allocation27 + $0x1e8] ss:$16 sps:$4 sm:$0xff]  }
0x2593   :  { %v5288_v47 = vpop.f32.mrb[48].mxu1 }
0x2594   :  { %v5289_v12 = vadd.f32 %v16468_v11, %v5288_v47  ;;  %v18137_v15 = vpop.f32.mrb[49].mxu1  ;;  %v18744_v11 = vld [vmem:[#allocation27 + $0x20c] ss:$16 sps:$4 sm:$0xff]   ;;  %v18739_v47 = vld [vmem:[#allocation27 + $0x200] ss:$16 sps:$4 sm:$0xff]  }
0x2595   :  { %v18747_v15 = vld [vmem:[#allocation27 + $0x224] ss:$16 sps:$4 sm:$0xff]  }
0x2596   :  { %20139 = vtanh.f32 %v5289_v12  ;;  %v18742_v12 = vld [vmem:[#allocation27 + $0x208] ss:$16 sps:$4 sm:$0xff]  }
0x25a0   :  { %v20140_v53 = vpop.eup %20139 }
0x25a1   :  { %v21893_v19 = vpack.c.bf16 %v20140_v53, %v20140_v53  ;;  %v18750_v53 = vld [vmem:[#allocation27 + $0x22c] ss:$16 sps:$4 sm:$0xff]  }
0x25a3   :  { %16478 = vmatmul.mubr.msk.bf16.vlgmr.msra.gmra.mrb[52].mxu1 %vm1437_vm2, %v21893_v19  ;;  %16479 = vmatmul.mubr.msk.bf16.vlgmr.msra.gmra.mrb[48].mxu0 %vm1437_vm2, %v21893_v19 }
0x25a4   :  { %5850 = vmatpush1.bf16.msra.mxu1 %v18655_v16  ;;  %5891 = vmatpush1.bf16.msra.mxu0 %v18658_v17  ;;  %v18745_v16 = vld [vmem:[#allocation27 + $0x220] ss:$16 sps:$4 sm:$0xff]   ;;  %v18748_v17 = vld [vmem:[#allocation27 + $0x228] ss:$16 sps:$4 sm:$0xff]  }
0x25a5   :  { %5851 = vmatprep.subr.bf16.mxu1 %v18663_v23  ;;  %5892 = vmatprep.subr.bf16.mxu0 %v18666_v24  ;;  %v18753_v23 = vld [vmem:[#allocation27 + $0x244] ss:$16 sps:$4 sm:$0xff]   ;;  %v18756_v24 = vld [vmem:[#allocation27 + $0x24c] ss:$16 sps:$4 sm:$0xff]  }
0x25a6   :  { %5881 = vmatprep.mubr.bf16.mxu1 %v20829_v51  ;;  %5922 = vmatprep.mubr.bf16.mxu0 %v20829_v51 }
0x25a8   :  { %5852 = vmatpush1.bf16.msra.mxu1 %v18661_v25  ;;  %5893 = vmatpush1.bf16.msra.mxu0 %v18664_v1  ;;  %v18751_v25 = vld [vmem:[#allocation27 + $0x240] ss:$16 sps:$4 sm:$0xff]   ;;  %v18754_v1 = vld [vmem:[#allocation27 + $0x248] ss:$16 sps:$4 sm:$0xff]  }
0x25a9   :  { %5971 = vmatprep.subr.bf16.mxu1 %v18669_v63  ;;  %6012 = vmatprep.subr.bf16.mxu0 %v18672_v26  ;;  %v18759_v63 = vld [vmem:[#allocation27 + $0x264] ss:$16 sps:$4 sm:$0xff]   ;;  %v18762_v26 = vld [vmem:[#allocation27 + $0x26c] ss:$16 sps:$4 sm:$0xff]  }
0x25ab   :  { %16488 = vmatmul.mubr.msk.bf16.vlgmr.msra.gmra.mrb[56].mxu1 %vm1437_vm2, %v21893_v19  ;;  %16489 = vmatmul.mubr.msk.bf16.vlgmr.msra.gmra.mrb[52].mxu0 %vm1437_vm2, %v21893_v19 }
0x25ac   :  { %5972 = vmatpush1.bf16.msra.mxu1 %v18667_v52  ;;  %6013 = vmatpush1.bf16.msra.mxu0 %v18670_v14  ;;  %v18757_v52 = vld [vmem:[#allocation27 + $0x260] ss:$16 sps:$4 sm:$0xff]   ;;  %v18760_v14 = vld [vmem:[#allocation27 + $0x268] ss:$16 sps:$4 sm:$0xff]  }
0x25ad   :  { %5973 = vmatprep.subr.bf16.mxu1 %v18675_v27  ;;  %6014 = vmatprep.subr.bf16.mxu0 %v18678_v28  ;;  %v18765_v27 = vld [vmem:[#allocation27 + $0x284] ss:$16 sps:$4 sm:$0xff]   ;;  %v18768_v28 = vld [vmem:[#allocation27 + $0x28c] ss:$16 sps:$4 sm:$0xff]  }
0x25ae   :  { %6003 = vmatprep.mubr.bf16.mxu1 %v20829_v51  ;;  %6044 = vmatprep.mubr.bf16.mxu0 %v20829_v51 }
0x25b0   :  { %5974 = vmatpush1.bf16.msra.mxu1 %v18673_v58  ;;  %6015 = vmatpush1.bf16.msra.mxu0 %v18676_v22  ;;  %v18763_v58 = vld [vmem:[#allocation27 + $0x280] ss:$16 sps:$4 sm:$0xff]   ;;  %v18766_v22 = vld [vmem:[#allocation27 + $0x288] ss:$16 sps:$4 sm:$0xff]  }
0x25b1   :  { %6093 = vmatprep.subr.bf16.mxu1 %v18681_v29  ;;  %6134 = vmatprep.subr.bf16.mxu0 %v18684_v30  ;;  %v18771_v29 = vld [vmem:[#allocation27 + $0x2a4] ss:$16 sps:$4 sm:$0xff]   ;;  %v18774_v30 = vld [vmem:[#allocation27 + $0x2ac] ss:$16 sps:$4 sm:$0xff]  }
0x25b3   :  { %16498 = vmatmul.mubr.msk.bf16.vlgmr.msra.gmra.mrb[60].mxu1 %vm1437_vm2, %v21893_v19  ;;  %16499 = vmatmul.mubr.msk.bf16.vlgmr.msra.gmra.mrb[56].mxu0 %vm1437_vm2, %v21893_v19 }
0x25b4   :  { %6094 = vmatpush1.bf16.msra.mxu1 %v18679_v5  ;;  %6135 = vmatpush1.bf16.msra.mxu0 %v18682_v4  ;;  %v18769_v5 = vld [vmem:[#allocation27 + $0x2a0] ss:$16 sps:$4 sm:$0xff]   ;;  %v18772_v4 = vld [vmem:[#allocation27 + $0x2a8] ss:$16 sps:$4 sm:$0xff]  }
0x25b5   :  { %6095 = vmatprep.subr.bf16.mxu1 %v18687_v31  ;;  %6136 = vmatprep.subr.bf16.mxu0 %v18690_v2  ;;  %v18777_v31 = vld [vmem:[#allocation27 + $0x2c4] ss:$16 sps:$4 sm:$0xff]   ;;  %v18780_v2 = vld [vmem:[#allocation27 + $0x2cc] ss:$16 sps:$4 sm:$0xff]  }
0x25b6   :  { %6125 = vmatprep.mubr.bf16.mxu1 %v20829_v51  ;;  %6166 = vmatprep.mubr.bf16.mxu0 %v20829_v51 }
0x25b8   :  { %6096 = vmatpush1.bf16.msra.mxu1 %v18685_v33  ;;  %6137 = vmatpush1.bf16.msra.mxu0 %v18688_v35  ;;  %v18775_v33 = vld [vmem:[#allocation27 + $0x2c0] ss:$16 sps:$4 sm:$0xff]   ;;  %v18778_v35 = vld [vmem:[#allocation27 + $0x2c8] ss:$16 sps:$4 sm:$0xff]  }
0x25b9   :  { %6215 = vmatprep.subr.bf16.mxu1 %v18693_v36  ;;  %6256 = vmatprep.subr.bf16.mxu0 %v18696_v37  ;;  %v18783_v36 = vld [vmem:[#allocation27 + $0x2e4] ss:$16 sps:$4 sm:$0xff]   ;;  %v18786_v37 = vld [vmem:[#allocation27 + $0x2ec] ss:$16 sps:$4 sm:$0xff]  }
0x25bb   :  { %16508 = vmatmul.mubr.msk.bf16.vlgmr.msra.gmra.mrb[64].mxu1 %vm1437_vm2, %v21893_v19  ;;  %16509 = vmatmul.mubr.msk.bf16.vlgmr.msra.gmra.mrb[60].mxu0 %vm1437_vm2, %v21893_v19 }
0x25bc   :  { %6216 = vmatpush1.bf16.msra.mxu1 %v18691_v7  ;;  %6257 = vmatpush1.bf16.msra.mxu0 %v18694_v13  ;;  %v18781_v7 = vld [vmem:[#allocation27 + $0x2e0] ss:$16 sps:$4 sm:$0xff]   ;;  %v18784_v13 = vld [vmem:[#allocation27 + $0x2e8] ss:$16 sps:$4 sm:$0xff]  }
0x25bd   :  { %6217 = vmatprep.subr.bf16.mxu1 %v18699_v38  ;;  %6258 = vmatprep.subr.bf16.mxu0 %v18702_v32  ;;  %v18789_v38 = vld [vmem:[#allocation27 + $0x304] ss:$16 sps:$4 sm:$0xff]   ;;  %v18792_v32 = vld [vmem:[#allocation27 + $0x30c] ss:$16 sps:$4 sm:$0xff]  }
0x25be   :  { %6247 = vmatprep.mubr.bf16.mxu1 %v20829_v51  ;;  %6288 = vmatprep.mubr.bf16.mxu0 %v20829_v51 }
0x25c0   :  { %6218 = vmatpush1.bf16.msra.mxu1 %v18697_v39  ;;  %6259 = vmatpush1.bf16.msra.mxu0 %v18700_v8  ;;  %v18787_v39 = vld [vmem:[#allocation27 + $0x300] ss:$16 sps:$4 sm:$0xff]   ;;  %v18790_v8 = vld [vmem:[#allocation27 + $0x308] ss:$16 sps:$4 sm:$0xff]  }
0x25c1   :  { %6337 = vmatprep.subr.bf16.mxu1 %v18705_v40  ;;  %6378 = vmatprep.subr.bf16.mxu0 %v18708_v44  ;;  %v18795_v40 = vld [vmem:[#allocation27 + $0x324] ss:$16 sps:$4 sm:$0xff]   ;;  %v18798_v44 = vld [vmem:[#allocation27 + $0x32c] ss:$16 sps:$4 sm:$0xff]  }
0x25c3   :  { %16518 = vmatmul.mubr.msk.bf16.vlgmr.msra.gmra.mrb[68].mxu1 %vm1437_vm2, %v21893_v19  ;;  %16519 = vmatmul.mubr.msk.bf16.vlgmr.msra.gmra.mrb[64].mxu0 %vm1437_vm2, %v21893_v19 }
0x25c4   :  { %6338 = vmatpush1.bf16.msra.mxu1 %v18703_v41  ;;  %6379 = vmatpush1.bf16.msra.mxu0 %v18706_v43  ;;  %v18793_v41 = vld [vmem:[#allocation27 + $0x320] ss:$16 sps:$4 sm:$0xff]   ;;  %v18796_v43 = vld [vmem:[#allocation27 + $0x328] ss:$16 sps:$4 sm:$0xff]  }
0x25c5   :  { %6339 = vmatprep.subr.bf16.mxu1 %v18711_v54  ;;  %6380 = vmatprep.subr.bf16.mxu0 %v18714_v48  ;;  %v21972_v54 = vsub.s32 1, %v21198_v0  ;;  %v21975_v48 = vsub.s32 2, %v21198_v0 }
0x25c6   :  { %6369 = vmatprep.mubr.bf16.mxu1 %v20829_v51  ;;  %6410 = vmatprep.mubr.bf16.mxu0 %v20829_v51 }
0x25c8   :  { %6340 = vmatpush1.bf16.msra.mxu1 %v18709_v9  ;;  %6381 = vmatpush1.bf16.msra.mxu0 %v18712_v49  ;;  %v5398_v9 = vld [vmem:[#allocation28] sm:$0xf]  ;;  %v21978_v49 = vsub.s32 3, %v21198_v0 }
0x25c9   :  { %6459 = vmatprep.subr.bf16.mxu1 %v18717_v50  ;;  %6500 = vmatprep.subr.bf16.mxu0 %v18720_v42  ;;  %v5435_v50 = vrot.slane %v5398_v9, %v21975_v48  ;;  %v5431_v42 = vrot.slane %v5398_v9, %v21972_v54 }
0x25cb   :  { %16528 = vmatmul.mubr.msk.bf16.vlgmr.msra.gmra.mrb[72].mxu1 %vm1437_vm2, %v21893_v19  ;;  %16529 = vmatmul.mubr.msk.bf16.vlgmr.msra.gmra.mrb[68].mxu0 %vm1437_vm2, %v21893_v19 }
0x25cc   :  { %6460 = vmatpush1.bf16.msra.mxu1 %v18715_v55  ;;  %6501 = vmatpush1.bf16.msra.mxu0 %v18718_v34 }
0x25cd   :  { %6461 = vmatprep.subr.bf16.mxu1 %v18723_v56  ;;  %6502 = vmatprep.subr.bf16.mxu0 %v18726_v57 }
0x25ce   :  { %6491 = vmatprep.mubr.bf16.mxu1 %v20829_v51  ;;  %6532 = vmatprep.mubr.bf16.mxu0 %v20829_v51 }
0x25d0   :  { %6462 = vmatpush1.bf16.msra.mxu1 %v18721_v18  ;;  %6503 = vmatpush1.bf16.msra.mxu0 %v18724_v21 }
0x25d1   :  { %6581 = vmatprep.subr.bf16.mxu1 %v18729_v59  ;;  %6622 = vmatprep.subr.bf16.mxu0 %v18732_v60 }
0x25d3   :  { %16538 = vmatmul.mubr.msk.bf16.vlgmr.msra.gmra.mrb[76].mxu1 %vm1437_vm2, %v21893_v19  ;;  %16539 = vmatmul.mubr.msk.bf16.vlgmr.msra.gmra.mrb[72].mxu0 %vm1437_vm2, %v21893_v19 }
0x25d4   :  { %6582 = vmatpush1.bf16.msra.mxu1 %v18727_v61  ;;  %6623 = vmatpush1.bf16.msra.mxu0 %v18730_v62  ;;  %v5399_v61 = vld [vmem:[#allocation28 + $0x4] sm:$0xf] }
0x25d5   :  { %6583 = vmatprep.subr.bf16.mxu1 %v18735_v45  ;;  %6624 = vmatprep.subr.bf16.mxu0 %v18738_v46 }
0x25d6   :  { %6613 = vmatprep.mubr.bf16.mxu1 %v20829_v51  ;;  %6654 = vmatprep.mubr.bf16.mxu0 %v20829_v51 }
0x25d8   :  { %6584 = vmatpush1.bf16.msra.mxu1 %v18733_v3  ;;  %6625 = vmatpush1.bf16.msra.mxu0 %v18736_v6 }
0x25d9   :  { %6703 = vmatprep.subr.bf16.mxu1 %v18741_v10  ;;  %6744 = vmatprep.subr.bf16.mxu0 %v18744_v11  ;;  %v5443_v11 = vrot.slane %v5399_v61, %v21461_v20 }
0x25db   :  { %16548 = vmatmul.mubr.msk.bf16.vlgmr.msra.gmra.mrb[80].mxu1 %vm1437_vm2, %v21893_v19  ;;  %16549 = vmatmul.mubr.msk.bf16.vlgmr.msra.gmra.mrb[76].mxu0 %vm1437_vm2, %v21893_v19 }
0x25dc   :  { %6704 = vmatpush1.bf16.msra.mxu1 %v18739_v47  ;;  %6745 = vmatpush1.bf16.msra.mxu0 %v18742_v12  ;;  %v5451_v12 = vrot.slane %v5399_v61, %v21975_v48 }
0x25dd   :  { %6705 = vmatprep.subr.bf16.mxu1 %v18747_v15  ;;  %6746 = vmatprep.subr.bf16.mxu0 %v18750_v53  ;;  %v5447_v15 = vrot.slane %v5399_v61, %v21972_v54 }
0x25de   :  { %6735 = vmatprep.mubr.bf16.mxu1 %v20829_v51  ;;  %6776 = vmatprep.mubr.bf16.mxu0 %v20829_v51 }
0x25e0   :  { %6706 = vmatpush1.bf16.msra.mxu1 %v18745_v16  ;;  %6747 = vmatpush1.bf16.msra.mxu0 %v18748_v17 }
0x25e1   :  { %6825 = vmatprep.subr.bf16.mxu1 %v18753_v23  ;;  %6866 = vmatprep.subr.bf16.mxu0 %v18756_v24  ;;  %v5455_v24 = vrot.slane %v5399_v61, %v21978_v49 }
0x25e3   :  { %16558 = vmatmul.mubr.msk.bf16.vlgmr.msra.gmra.mrb[84].mxu1 %vm1437_vm2, %v21893_v19  ;;  %16559 = vmatmul.mubr.msk.bf16.vlgmr.msra.gmra.mrb[80].mxu0 %vm1437_vm2, %v21893_v19 }
0x25e4   :  { %6826 = vmatpush1.bf16.msra.mxu1 %v18751_v25  ;;  %6867 = vmatpush1.bf16.msra.mxu0 %v18754_v1 }
0x25e5   :  { %6827 = vmatprep.subr.bf16.mxu1 %v18759_v63  ;;  %6868 = vmatprep.subr.bf16.mxu0 %v18762_v26 }
0x25e6   :  { %6857 = vmatprep.mubr.bf16.mxu1 %v20829_v51  ;;  %6898 = vmatprep.mubr.bf16.mxu0 %v20829_v51 }
0x25e8   :  { %6828 = vmatpush1.bf16.msra.mxu1 %v18757_v52  ;;  %6869 = vmatpush1.bf16.msra.mxu0 %v18760_v14 }
0x25e9   :  { %6947 = vmatprep.subr.bf16.mxu1 %v18765_v27  ;;  %6988 = vmatprep.subr.bf16.mxu0 %v18768_v28 }
0x25eb   :  { %16568 = vmatmul.mubr.msk.bf16.vlgmr.msra.gmra.mrb[88].mxu1 %vm1437_vm2, %v21893_v19  ;;  %16569 = vmatmul.mubr.msk.bf16.vlgmr.msra.gmra.mrb[84].mxu0 %vm1437_vm2, %v21893_v19 }
0x25ec   :  { %6948 = vmatpush1.bf16.msra.mxu1 %v18763_v58  ;;  %6989 = vmatpush1.bf16.msra.mxu0 %v18766_v22 }
0x25ed   :  { %6949 = vmatprep.subr.bf16.mxu1 %v18771_v29  ;;  %6990 = vmatprep.subr.bf16.mxu0 %v18774_v30 }
0x25ee   :  { %6979 = vmatprep.mubr.bf16.mxu1 %v20829_v51  ;;  %7020 = vmatprep.mubr.bf16.mxu0 %v20829_v51 }
0x25f0   :  { %6950 = vmatpush1.bf16.msra.mxu1 %v18769_v5  ;;  %6991 = vmatpush1.bf16.msra.mxu0 %v18772_v4 }
0x25f1   :  { %7069 = vmatprep.subr.bf16.mxu1 %v18777_v31  ;;  %7110 = vmatprep.subr.bf16.mxu0 %v18780_v2 }
0x25f3   :  { %16578 = vmatmul.mubr.msk.bf16.vlgmr.msra.gmra.mrb[92].mxu1 %vm1437_vm2, %v21893_v19  ;;  %16579 = vmatmul.mubr.msk.bf16.vlgmr.msra.gmra.mrb[88].mxu0 %vm1437_vm2, %v21893_v19 }
0x25f4   :  { %7070 = vmatpush1.bf16.msra.mxu1 %v18775_v33  ;;  %7111 = vmatpush1.bf16.msra.mxu0 %v18778_v35 }
0x25f5   :  { %7071 = vmatprep.subr.bf16.mxu1 %v18783_v36  ;;  %7112 = vmatprep.subr.bf16.mxu0 %v18786_v37 }
0x25f6   :  { %7101 = vmatprep.mubr.bf16.mxu1 %v20829_v51  ;;  %7142 = vmatprep.mubr.bf16.mxu0 %v20829_v51 }
0x25f8   :  { %7072 = vmatpush1.bf16.msra.mxu1 %v18781_v7  ;;  %7113 = vmatpush1.bf16.msra.mxu0 %v18784_v13 }
0x25f9   :  { %7191 = vmatprep.subr.bf16.mxu1 %v18789_v38  ;;  %7232 = vmatprep.subr.bf16.mxu0 %v18792_v32 }
0x25fb   :  { %16588 = vmatmul.mubr.msk.bf16.vlgmr.msra.gmra.mrb[96].mxu1 %vm1437_vm2, %v21893_v19  ;;  %16589 = vmatmul.mubr.msk.bf16.vlgmr.msra.gmra.mrb[92].mxu0 %vm1437_vm2, %v21893_v19 }
0x25fc   :  { %7192 = vmatpush1.bf16.msra.mxu1 %v18787_v39  ;;  %7233 = vmatpush1.bf16.msra.mxu0 %v18790_v8 }
0x25fd   :  { %7193 = vmatprep.subr.bf16.mxu1 %v18795_v40  ;;  %7234 = vmatprep.subr.bf16.mxu0 %v18798_v44 }
0x25fe   :  { %7223 = vmatprep.mubr.bf16.mxu1 %v20829_v51  ;;  %7264 = vmatprep.mubr.bf16.mxu0 %v20829_v51  ;;  %v5427_v51 = vrot.slane %v5398_v9, %v21461_v20 }
0x2600   :  { %7194 = vmatpush1.bf16.msra.mxu1 %v18793_v41  ;;  %7235 = vmatpush1.bf16.msra.mxu0 %v18796_v43 }
0x2603   :  { %16598 = vmatmul.mubr.msk.bf16.vlgmr.msra.gmra.mrb[100].mxu1 %vm1437_vm2, %v21893_v19  ;;  %16599 = vmatmul.mubr.msk.bf16.vlgmr.msra.gmra.mrb[96].mxu0 %vm1437_vm2, %v21893_v19  ;;  %v5439_v19 = vrot.slane %v5398_v9, %v21978_v49 }
0x2676   :  { %v5761_v55 = vpop.f32.mrb[52].mxu1  ;;  %v5802_v34 = vpop.f32.mrb[48].mxu0 }
0x2677   :  { %v21984_v56 = vadd.f32 %v5761_v55, %v5427_v51  ;;  %v5763_v57 = vpop.f32.mrb[53].mxu1  ;;  %v5804_v18 = vpop.f32.mrb[49].mxu0  ;;  %v21986_v21 = vadd.f32 %v5802_v34, %v5435_v50 }
0x2678   :  { %v21988_v59 = vadd.f32 %v5763_v57, %v5431_v42  ;;  %v5765_v0 = vpop.f32.mrb[54].mxu1  ;;  %v5806_v60 = vpop.f32.mrb[50].mxu0  ;;  %v21994_v6 = vadd.f32 %v5804_v18, %v5439_v19 }
0x2679   :  { %v7300_v62 = vsel %vm7299_vm9, %v21984_v56, 0.0  ;;  %v5766_v45 = vpop.f32.mrb[55].mxu1  ;;  %v5807_v46 = vpop.f32.mrb[51].mxu0  ;;  %v7303_v47 = vsel %vm7299_vm9, %v21986_v21, 0.0 }
0x267a   :  { %v7301_v3 = vsel %vm7299_vm9, %v21988_v59, 0.0  ;;  %v7305_v16 = vsel %vm7299_vm9, %v21994_v6, 0.0 }
0x267b   :  { %v7302_v10 = vadd.f32 %v7301_v3, %v7300_v62 }
0x267d   :  { %v7304_v53 = vadd.f32 %v7303_v47, %v7302_v10 }
0x267e   :  { %v5883_v17 = vpop.f32.mrb[56].mxu1  ;;  %v5924_v23 = vpop.f32.mrb[52].mxu0 }
0x267f   :  { %v7306_v25 = vadd.f32 %v7305_v16, %v7304_v53  ;;  %v22004_v1 = vadd.f32 %v5883_v17, %v5443_v11  ;;  %v5885_v63 = vpop.f32.mrb[57].mxu1  ;;  %v5926_v26 = vpop.f32.mrb[53].mxu0  ;;  %v22006_v52 = vadd.f32 %v5924_v23, %v5451_v12 }
0x2680   :  { %v22008_v14 = vadd.f32 %v5885_v63, %v5447_v15  ;;  %v5887_v27 = vpop.f32.mrb[58].mxu1  ;;  %v5928_v28 = vpop.f32.mrb[54].mxu0  ;;  %v22014_v5 = vadd.f32 %v5926_v26, %v5455_v24  ;;  %v18801_v63 = vld [vmem:[#allocation33 + $0x4] ss:$8 sps:$4 sm:$0xff]  }
0x2681   :  { %v7309_v58 = vsel %vm7299_vm9, %v22004_v1, 0.0  ;;  %v5888_v22 = vpop.f32.mrb[59].mxu1  ;;  %v5929_v29 = vpop.f32.mrb[55].mxu0  ;;  %7307 = vadd.xlane.f32.xlu0 %v7306_v25  ;;  %v7312_v31 = vsel %vm7299_vm9, %v22006_v52, 0.0  ;;  %v18799_v25 = vld [vmem:[#allocation33] ss:$8 sps:$4 sm:$0xff]   ;;  %9909 = vmatprep.subr.bf16.mxu1 %v18801_v63 }
0x2682   :  { %v7310_v30 = vsel %vm7299_vm9, %v22008_v14, 0.0  ;;  %v7314_v33 = vsel %vm7299_vm9, %v22014_v5, 0.0  ;;  %v18804_v28 = vld [vmem:[#allocation33 + $0x14] ss:$8 sps:$4 sm:$0xff]   ;;  %9910 = vmatpush1.bf16.msra.mxu1 %v18799_v25  ;;  %v18808_v22 = vld [vmem:[#allocation33 + $0x200] ss:$8 sps:$4 sm:$0xff]  }
0x2683   :  { %v7311_v4 = vadd.f32 %v7310_v30, %v7309_v58  ;;  %v18802_v58 = vld [vmem:[#allocation33 + $0x10] ss:$8 sps:$4 sm:$0xff]   ;;  %v18810_v29 = vld [vmem:[#allocation33 + $0x204] ss:$8 sps:$4 sm:$0xff]   ;;  %9911 = vmatprep.subr.bf16.mxu1 %v18804_v28 }
0x2684   :  { %v18807_v30 = vld [vmem:[#allocation33 + $0x24] ss:$8 sps:$4 sm:$0xff]   ;;  %10311 = vmatprep.subr.bf16.mxu0 %v18810_v29  ;;  %v18823_v29 = vld [vmem:[#allocation33 + $0x50] ss:$8 sps:$4 sm:$0xff]  }
0x2685   :  { %v7313_v2 = vadd.f32 %v7312_v31, %v7311_v4  ;;  %v18816_v4 = vld [vmem:[#allocation33 + $0x214] ss:$8 sps:$4 sm:$0xff]   ;;  %10312 = vmatpush1.bf16.msra.mxu0 %v18808_v22  ;;  %v18834_v25 = vld [vmem:[#allocation33 + $0x244] ss:$8 sps:$4 sm:$0xff]   ;;  %v18832_v22 = vld [vmem:[#allocation33 + $0x240] ss:$8 sps:$4 sm:$0xff]  }
0x2686   :  { %v22020_v35 = vpop.f32.mrb[60].mxu1  ;;  %v22022_v36 = vpop.f32.mrb[56].mxu0  ;;  %9912 = vmatpush1.bf16.msra.mxu1 %v18802_v58  ;;  %10313 = vmatprep.subr.bf16.mxu0 %v18816_v4  ;;  %v18831_v4 = vld [vmem:[#allocation33 + $0x64] ss:$8 sps:$4 sm:$0xff]  }
0x2687   :  { %v7315_v37 = vadd.f32 %v7314_v33, %v7313_v2  ;;  %v22024_v7 = vpop.f32.mrb[61].mxu1  ;;  %v22026_v13 = vpop.f32.mrb[57].mxu0  ;;  %v18814_v33 = vld [vmem:[#allocation33 + $0x210] ss:$8 sps:$4 sm:$0xff]   ;;  %9913 = vmatprep.subr.bf16.mxu1 %v18807_v30  ;;  %v18840_v30 = vld [vmem:[#allocation33 + $0x254] ss:$8 sps:$4 sm:$0xff]  }
0x2688   :  { %v6009_v38 = vpop.f32.mrb[62].mxu1  ;;  %v6050_v32 = vpop.f32.mrb[58].mxu0 }
0x2689   :  { %v6010_v39 = vpop.f32.mrb[63].mxu1  ;;  %v6051_v8 = vpop.f32.mrb[59].mxu0  ;;  %7316 = vadd.xlane.f32.xlu0 %v7315_v37  ;;  %v18805_v32 = vld [vmem:[#allocation33 + $0x20] ss:$8 sps:$4 sm:$0xff]   ;;  %10314 = vmatpush1.bf16.msra.mxu0 %v18814_v33 }
0x268a   :  { %v18822_v39 = vld [vmem:[#allocation33 + $0x224] ss:$8 sps:$4 sm:$0xff]   ;;  %9914 = vmatpush1.bf16.msra.mxu1 %v18805_v32 }
0x268b   :  { %10315 = vmatprep.subr.bf16.mxu0 %v18822_v39  ;;  %v18838_v39 = vld [vmem:[#allocation33 + $0x250] ss:$8 sps:$4 sm:$0xff]  }
0x268e   :  { %v22028_v40 = vpop.f32.mrb[64].mxu1  ;;  %v22030_v44 = vpop.f32.mrb[60].mxu0 }
0x268f   :  { %v22032_v41 = vpop.f32.mrb[65].mxu1  ;;  %v22034_v43 = vpop.f32.mrb[61].mxu0 }
0x2690   :  { %v6131_v9 = vpop.f32.mrb[66].mxu1  ;;  %v6172_v51 = vpop.f32.mrb[62].mxu0 }
0x2691   :  { %v6132_v50 = vpop.f32.mrb[67].mxu1  ;;  %v6173_v42 = vpop.f32.mrb[63].mxu0  ;;  %v18813_v51 = vld [vmem:[#allocation33 + $0x34] ss:$8 sps:$4 sm:$0xff]  }
0x2692   :  { %9915 = vmatprep.subr.bf16.mxu1 %v18813_v51  ;;  %v18829_v51 = vld [vmem:[#allocation33 + $0x60] ss:$8 sps:$4 sm:$0xff]  }
0x2696   :  { %v22036_v55 = vpop.f32.mrb[68].mxu1  ;;  %v22038_v34 = vpop.f32.mrb[64].mxu0 }
0x2697   :  { %v22040_v19 = vpop.f32.mrb[69].mxu1  ;;  %v22042_v57 = vpop.f32.mrb[65].mxu0 }
0x2698   :  { %v6253_v18 = vpop.f32.mrb[70].mxu1  ;;  %v6294_v0 = vpop.f32.mrb[66].mxu0 }
0x2699   :  { %v6254_v60 = vpop.f32.mrb[71].mxu1  ;;  %v6295_v61 = vpop.f32.mrb[67].mxu0  ;;  %v18820_v18 = vld [vmem:[#allocation33 + $0x220] ss:$8 sps:$4 sm:$0xff]   ;;  %v18811_v0 = vld [vmem:[#allocation33 + $0x30] ss:$8 sps:$4 sm:$0xff]  }
0x269a   :  { %v18828_v60 = vld [vmem:[#allocation33 + $0x234] ss:$8 sps:$4 sm:$0xff]   ;;  %v18819_v61 = vld [vmem:[#allocation33 + $0x44] ss:$8 sps:$4 sm:$0xff]   ;;  %10316 = vmatpush1.bf16.msra.mxu0 %v18820_v18  ;;  %9916 = vmatpush1.bf16.msra.mxu1 %v18811_v0 }
0x269b   :  { %10317 = vmatprep.subr.bf16.mxu0 %v18828_v60  ;;  %9917 = vmatprep.subr.bf16.mxu1 %v18819_v61  ;;  %v18837_v0 = vld [vmem:[#allocation33 + $0x74] ss:$8 sps:$4 sm:$0xff]  }
0x269e   :  { %v22044_v62 = vpop.f32.mrb[72].mxu1  ;;  %v22046_v45 = vpop.f32.mrb[68].mxu0 }
0x269f   :  { %v22048_v46 = vpop.f32.mrb[73].mxu1  ;;  %v22050_v3 = vpop.f32.mrb[69].mxu0 }
0x26a0   :  { %v6375_v10 = vpop.f32.mrb[74].mxu1  ;;  %v6416_v11 = vpop.f32.mrb[70].mxu0 }
0x26a1   :  { %v6376_v47 = vpop.f32.mrb[75].mxu1  ;;  %v6417_v12 = vpop.f32.mrb[71].mxu0 }
0x26a2   :  { %v18826_v47 = vld [vmem:[#allocation33 + $0x230] ss:$8 sps:$4 sm:$0xff]  }
0x26a3   :  { %10318 = vmatpush1.bf16.msra.mxu0 %v18826_v47  ;;  %v18844_v47 = vld [vmem:[#allocation33 + $0x260] ss:$8 sps:$4 sm:$0xff]  }
0x26a4   :  { %10319 = vmatprep.subr.bf16.mxu0 %v18834_v25  ;;  %v18852_v25 = vld [vmem:[#allocation33 + $0x274] ss:$8 sps:$4 sm:$0xff]  }
0x26a6   :  { %v22052_v15 = vpop.f32.mrb[76].mxu1  ;;  %v22054_v53 = vpop.f32.mrb[72].mxu0 }
0x26a7   :  { %v22056_v16 = vpop.f32.mrb[77].mxu1  ;;  %v22058_v17 = vpop.f32.mrb[73].mxu0  ;;  %10320 = vmatpush1.bf16.msra.mxu0 %v18832_v22 }
0x26a8   :  { %v6497_v23 = vpop.f32.mrb[78].mxu1  ;;  %v6538_v24 = vpop.f32.mrb[74].mxu0  ;;  %10321 = vmatprep.subr.bf16.mxu0 %v18840_v30 }
0x26a9   :  { %v6498_v26 = vpop.f32.mrb[79].mxu1  ;;  %v6539_v27 = vpop.f32.mrb[75].mxu0  ;;  %v18817_v24 = vld [vmem:[#allocation33 + $0x40] ss:$8 sps:$4 sm:$0xff]  }
0x26aa   :  { %v18825_v27 = vld [vmem:[#allocation33 + $0x54] ss:$8 sps:$4 sm:$0xff]   ;;  %9918 = vmatpush1.bf16.msra.mxu1 %v18817_v24  ;;  %v18835_v24 = vld [vmem:[#allocation33 + $0x70] ss:$8 sps:$4 sm:$0xff]  }
0x26ab   :  { %9919 = vmatprep.subr.bf16.mxu1 %v18825_v27  ;;  %10322 = vmatpush1.bf16.msra.mxu0 %v18838_v39  ;;  %v18849_v39 = vld [vmem:[#allocation33 + $0x94] ss:$8 sps:$4 sm:$0xff]  }
0x26ae   :  { %v22060_v31 = vpop.f32.mrb[80].mxu1  ;;  %v22062_v2 = vpop.f32.mrb[76].mxu0  ;;  %9920 = vmatpush1.bf16.msra.mxu1 %v18823_v29  ;;  %v18841_v29 = vld [vmem:[#allocation33 + $0x80] ss:$8 sps:$4 sm:$0xff]  }
0x26af   :  { %v22064_v37 = vpop.f32.mrb[81].mxu1  ;;  %v22066_v38 = vpop.f32.mrb[77].mxu0  ;;  %9921 = vmatprep.subr.bf16.mxu1 %v18831_v4 }
0x26b0   :  { %v6619_v8 = vpop.f32.mrb[82].mxu1  ;;  %v6660_v9 = vpop.f32.mrb[78].mxu0 }
0x26b1   :  { %v6620_v50 = vpop.f32.mrb[83].mxu1  ;;  %v6661_v42 = vpop.f32.mrb[79].mxu0 }
0x26b2   :  { %v18846_v50 = vld [vmem:[#allocation33 + $0x264] ss:$8 sps:$4 sm:$0xff]   ;;  %9922 = vmatpush1.bf16.msra.mxu1 %v18829_v51 }
0x26b3   :  { %10323 = vmatprep.subr.bf16.mxu0 %v18846_v50  ;;  %9923 = vmatprep.subr.bf16.mxu1 %v18837_v0 }
0x26b4   :  { %10324 = vmatpush1.bf16.msra.mxu0 %v18844_v47 }
0x26b5   :  { %10325 = vmatprep.subr.bf16.mxu0 %v18852_v25 }
0x26b6   :  { %v22068_v10 = vpop.f32.mrb[84].mxu1  ;;  %v22070_v11 = vpop.f32.mrb[80].mxu0  ;;  %9924 = vmatpush1.bf16.msra.mxu1 %v18835_v24 }
0x26b7   :  { %23640 = vst [vmem:[#allocation66_spill] sm:$0xff] %v22068_v10  ;;  %23641 = vst [vmem:[#allocation67_spill] sm:$0xff] %v22070_v11  ;;  %v22072_v12 = vpop.f32.mrb[85].mxu1  ;;  %v22074_v23 = vpop.f32.mrb[81].mxu0 }
0x26b8   :  { %23642 = vst [vmem:[#allocation68_spill] sm:$0xff] %v22072_v12  ;;  %23643 = vst [vmem:[#allocation69_spill] sm:$0xff] %v22074_v23  ;;  %v6741_v63 = vpop.f32.mrb[86].mxu1  ;;  %v6782_v26 = vpop.f32.mrb[82].mxu0 }
0x26b9   :  { %v6742_v28 = vpop.f32.mrb[87].mxu1  ;;  %v6783_v58 = vpop.f32.mrb[83].mxu0  ;;  %v18843_v63 = vld [vmem:[#allocation33 + $0x84] ss:$8 sps:$4 sm:$0xff]  }
0x26ba   :  { %v18850_v28 = vld [vmem:[#allocation33 + $0x270] ss:$8 sps:$4 sm:$0xff]   ;;  %9925 = vmatprep.subr.bf16.mxu1 %v18843_v63 }
0x26bb   :  { %10326 = vmatpush1.bf16.msra.mxu0 %v18850_v28  ;;  %9926 = vmatpush1.bf16.msra.mxu1 %v18841_v29 }
0x26bc   :  { %9927 = vmatprep.subr.bf16.mxu1 %v18849_v39 }
0x26be   :  { %v22076_v33 = vpop.f32.mrb[88].mxu1  ;;  %v22078_v32 = vpop.f32.mrb[84].mxu0 }
0x26bf   :  { %23644 = vst [vmem:[#allocation70_spill] sm:$0xff] %v22076_v33  ;;  %23645 = vst [vmem:[#allocation71_spill] sm:$0xff] %v22078_v32  ;;  %v22080_v8 = vpop.f32.mrb[89].mxu1  ;;  %v22082_v9 = vpop.f32.mrb[85].mxu0 }
0x26c0   :  { %23646 = vst [vmem:[#allocation72_spill] sm:$0xff] %v22080_v8  ;;  %23647 = vst [vmem:[#allocation73_spill] sm:$0xff] %v22082_v9  ;;  %v6863_v42 = vpop.f32.mrb[90].mxu1  ;;  %v6904_v18 = vpop.f32.mrb[86].mxu0 }
0x26c1   :  { %v6864_v60 = vpop.f32.mrb[91].mxu1  ;;  %v6905_v61 = vpop.f32.mrb[87].mxu0  ;;  %v18847_v42 = vld [vmem:[#allocation33 + $0x90] ss:$8 sps:$4 sm:$0xff]  }
0x26c2   :  { %9928 = vmatpush1.bf16.msra.mxu1 %v18847_v42 }
0x26c6   :  { %v22084_v26 = vpop.f32.mrb[92].mxu1  ;;  %v22086_v27 = vpop.f32.mrb[88].mxu0 }
0x26c7   :  { %23648 = vst [vmem:[#allocation74_spill] sm:$0xff] %v22084_v26  ;;  %23649 = vst [vmem:[#allocation75_spill] sm:$0xff] %v22086_v27  ;;  %v22088_v58 = vpop.f32.mrb[93].mxu1  ;;  %v22090_v22 = vpop.f32.mrb[89].mxu0 }
0x26c8   :  { %23650 = vst [vmem:[#allocation76_spill] sm:$0xff] %v22088_v58  ;;  %23651 = vst [vmem:[#allocation77_spill] sm:$0xff] %v22090_v22  ;;  %v6985_v30 = vpop.f32.mrb[94].mxu1  ;;  %v7026_v4 = vpop.f32.mrb[90].mxu0  ;;  %v5400_v22 = vld [vmem:[#allocation28 + $0x8] sm:$0xf] }
0x26c9   :  { %v6986_v51 = vpop.f32.mrb[95].mxu1  ;;  %v7027_v50 = vpop.f32.mrb[91].mxu0  ;;  %v5463_v42 = vrot.slane %v5400_v22, %v21972_v54 }
0x26ce   :  { %v22092_v18 = vpop.f32.mrb[96].mxu1  ;;  %v22094_v0 = vpop.f32.mrb[92].mxu0 }
0x26cf   :  { %23652 = vst [vmem:[#allocation78_spill] sm:$0xff] %v22092_v18  ;;  %23653 = vst [vmem:[#allocation79_spill] sm:$0xff] %v22094_v0  ;;  %v22096_v60 = vpop.f32.mrb[97].mxu1  ;;  %v22098_v61 = vpop.f32.mrb[93].mxu0 }
0x26d0   :  { %23654 = vst [vmem:[#allocation80_spill] sm:$0xff] %v22096_v60  ;;  %23655 = vst [vmem:[#allocation81_spill] sm:$0xff] %v22098_v61  ;;  %v7107_v47 = vpop.f32.mrb[98].mxu1  ;;  %v7148_v24 = vpop.f32.mrb[94].mxu0  ;;  %v5459_v61 = vrot.slane %v5400_v22, %v21461_v20 }
0x26d1   :  { %v7108_v25 = vpop.f32.mrb[99].mxu1  ;;  %v7149_v63 = vpop.f32.mrb[95].mxu0 }
0x26d2   :  { %v22111_v47 = vadd.f32 %v22020_v35, %v5459_v61  ;;  %v22114_v25 = vadd.f32 %v22024_v7, %v5463_v42  ;;  %v5401_v63 = vld [vmem:[#allocation28 + $0xc] sm:$0xf]  ;;  %v5471_v42 = vrot.slane %v5400_v22, %v21978_v49 }
0x26d3   :  { %v5475_v61 = vrot.slane %v5401_v63, %v21461_v20  ;;  %v5483_v26 = vrot.slane %v5401_v63, %v21975_v48 }
0x26d4   :  { %v7318_v7 = vsel %vm7299_vm9, %v22111_v47, 0.0 }
0x26d5   :  { %v22150_v18 = vadd.f32 %v22028_v40, %v5475_v61 }
0x26d6   :  { %v22100_v30 = vpop.f32.mrb[100].mxu1  ;;  %v22102_v4 = vpop.f32.mrb[96].mxu0 }
0x26d7   :  { %23656 = vst [vmem:[#allocation82_spill] sm:$0xff] %v22100_v30  ;;  %23657 = vst [vmem:[#allocation83_spill] sm:$0xff] %v22102_v4  ;;  %v22104_v28 = vpop.f32.mrb[101].mxu1  ;;  %v22106_v29 = vpop.f32.mrb[97].mxu0 }
0x26d8   :  { %23658 = vst [vmem:[#allocation84_spill] sm:$0xff] %v22104_v28  ;;  %23659 = vst [vmem:[#allocation85_spill] sm:$0xff] %v22106_v29  ;;  %v7229_v39 = vpop.f32.mrb[102].mxu1  ;;  %v7270_v51 = vpop.f32.mrb[98].mxu0  ;;  %v5467_v29 = vrot.slane %v5400_v22, %v21975_v48 }
0x26d9   :  { %v7230_v50 = vpop.f32.mrb[103].mxu1  ;;  %v7271_v0 = vpop.f32.mrb[99].mxu0 }
0x26da   :  { %v5479_v50 = vrot.slane %v5401_v63, %v21972_v54 }
0x270e   :  { %v7308_v24 = vpop.xlane.xlu0 %7307 }
0x270f   :  { %v7418_v4 = vmul.f32 0.001953125, %v7308_v24 }
0x2711   :  { %v22118_v39 = vsub.f32 %v21984_v56, %v7418_v4  ;;  %v22121_v0 = vsub.f32 %v21988_v59, %v7418_v4  ;;  %v22124_v51 = vsub.f32 %v21986_v21, %v7418_v4  ;;  %v22127_v35 = vsub.f32 %v21994_v6, %v7418_v4 }
0x2712   :  { %v7319_v56 = vsel %vm7299_vm9, %v22114_v25, 0.0  ;;  %v22142_v4 = vadd.f32 %v22022_v36, %v5467_v29  ;;  %v22154_v36 = vadd.f32 %v22032_v41, %v5479_v50 }
0x2713   :  { %v7483_v59 = vmul.f32 %v22118_v39, %v22118_v39  ;;  %v7484_v21 = vmul.f32 %v22121_v0, %v22121_v0  ;;  %v7485_v6 = vmul.f32 %v22124_v51, %v22124_v51  ;;  %v7486_v24 = vmul.f32 %v22127_v35, %v22127_v35 }
0x2714   :  { %v7320_v60 = vadd.f32 %v7319_v56, %v7318_v7  ;;  %v7321_v9 = vsel %vm7299_vm9, %v22142_v4, 0.0 }
0x2715   :  { %v7535_v28 = vsel %vm7299_vm9, %v7483_v59, 0.0  ;;  %v7536_v30 = vsel %vm7299_vm9, %v7484_v21, 0.0  ;;  %v7538_v22 = vsel %vm7299_vm9, %v7485_v6, 0.0  ;;  %v22160_v59 = vadd.f32 %v22026_v13, %v5471_v42 }
0x2716   :  { %v7317_v27 = vpop.xlane.xlu0 %7316  ;;  %v7537_v58 = vadd.f32 %v7536_v30, %v7535_v28  ;;  %v7540_v40 = vsel %vm7299_vm9, %v7486_v24, 0.0  ;;  %v7322_v28 = vadd.f32 %v7321_v9, %v7320_v60  ;;  %v7327_v13 = vsel %vm7299_vm9, %v22150_v18, 0.0 }
0x2717   :  { %v7419_v29 = vmul.f32 0.001953125, %v7317_v27  ;;  %v5487_v9 = vrot.slane %v5401_v63, %v21978_v49  ;;  %v22189_v60 = vadd.f32 %v22030_v44, %v5483_v26 }
0x2718   :  { %v7539_v7 = vadd.f32 %v7538_v22, %v7537_v58  ;;  %v7328_v58 = vsel %vm7299_vm9, %v22154_v36, 0.0 }
0x2719   :  { %v22164_v61 = vsub.f32 %v22004_v1, %v7419_v29  ;;  %v22167_v30 = vsub.f32 %v22008_v14, %v7419_v29  ;;  %v22170_v41 = vsub.f32 %v22006_v52, %v7419_v29  ;;  %v22173_v27 = vsub.f32 %v22014_v5, %v7419_v29 }
0x271a   :  { %v7541_v50 = vadd.f32 %v7540_v40, %v7539_v7  ;;  %v7323_v5 = vsel %vm7299_vm9, %v22160_v59, 0.0  ;;  %v7329_v24 = vadd.f32 %v7328_v58, %v7327_v13  ;;  %v7330_v63 = vsel %vm7299_vm9, %v22189_v60, 0.0  ;;  %v18855_v58 = vld [vmem:[#allocation33 + $0xa4] ss:$8 sps:$4 sm:$0xff]  }
0x271b   :  { %v7487_v1 = vmul.f32 %v22164_v61, %v22164_v61  ;;  %v7488_v14 = vmul.f32 %v22167_v30, %v22167_v30  ;;  %v7489_v52 = vmul.f32 %v22170_v41, %v22170_v41  ;;  %v7490_v56 = vmul.f32 %v22173_v27, %v22173_v27  ;;  %9929 = vmatprep.subr.bf16.mxu1 %v18855_v58  ;;  %v18885_v58 = vld [vmem:[#allocation33 + $0xf4] ss:$8 sps:$4 sm:$0xff]  }
0x271c   :  { %7542 = vadd.xlane.f32.xlu1 %v7541_v50  ;;  %v7324_v42 = vadd.f32 %v7323_v5, %v7322_v28  ;;  %v22199_v44 = vadd.f32 %v22034_v43, %v5487_v9  ;;  %v7331_v40 = vadd.f32 %v7330_v63, %v7329_v24  ;;  %v18861_v43 = vld [vmem:[#allocation33 + $0xb4] ss:$8 sps:$4 sm:$0xff]   ;;  %v18859_v9 = vld [vmem:[#allocation33 + $0xb0] ss:$8 sps:$4 sm:$0xff]   ;;  %v18868_v24 = vld [vmem:[#allocation33 + $0x2a0] ss:$8 sps:$4 sm:$0xff]  }
0x271d   :  { %v7544_v21 = vsel %vm7299_vm9, %v7487_v1, 0.0  ;;  %v7545_v6 = vsel %vm7299_vm9, %v7488_v14, 0.0  ;;  %v7547_v22 = vsel %vm7299_vm9, %v7489_v52, 0.0  ;;  %v7549_v26 = vsel %vm7299_vm9, %v7490_v56, 0.0  ;;  %v18858_v1 = vld [vmem:[#allocation33 + $0x284] ss:$8 sps:$4 sm:$0xff]  }
0x271e   :  { %v7546_v29 = vadd.f32 %v7545_v6, %v7544_v21  ;;  %v7332_v28 = vsel %vm7299_vm9, %v22199_v44, 0.0  ;;  %v18853_v14 = vld [vmem:[#allocation33 + $0xa0] ss:$8 sps:$4 sm:$0xff]   ;;  %10327 = vmatprep.subr.bf16.mxu0 %v18858_v1  ;;  %v18864_v5 = vld [vmem:[#allocation33 + $0x294] ss:$8 sps:$4 sm:$0xff]  }
0x271f   :  { %v7333_v13 = vadd.f32 %v7332_v28, %v7331_v40  ;;  %v18856_v52 = vld [vmem:[#allocation33 + $0x280] ss:$8 sps:$4 sm:$0xff]   ;;  %9930 = vmatpush1.bf16.msra.mxu1 %v18853_v14  ;;  %v18862_v56 = vld [vmem:[#allocation33 + $0x290] ss:$8 sps:$4 sm:$0xff]   ;;  %v18867_v21 = vld [vmem:[#allocation33 + $0xc4] ss:$8 sps:$4 sm:$0xff]  }
0x2720   :  { %7325 = vadd.xlane.f32.xlu1 %v7324_v42  ;;  %v7548_v7 = vadd.f32 %v7547_v22, %v7546_v29  ;;  %10328 = vmatpush1.bf16.msra.mxu0 %v18856_v52  ;;  %v18870_v6 = vld [vmem:[#allocation33 + $0x2a4] ss:$8 sps:$4 sm:$0xff]   ;;  %v18865_v42 = vld [vmem:[#allocation33 + $0xc0] ss:$8 sps:$4 sm:$0xff]   ;;  %v18873_v29 = vld [vmem:[#allocation33 + $0xd4] ss:$8 sps:$4 sm:$0xff]  }
0x2721   :  { %9931 = vmatprep.subr.bf16.mxu1 %v18861_v43  ;;  %10329 = vmatprep.subr.bf16.mxu0 %v18864_v5  ;;  %v18876_v22 = vld [vmem:[#allocation33 + $0x2b4] ss:$8 sps:$4 sm:$0xff]   ;;  %v18874_v63 = vld [vmem:[#allocation33 + $0x2b0] ss:$8 sps:$4 sm:$0xff]   ;;  %v18879_v40 = vld [vmem:[#allocation33 + $0xe4] ss:$8 sps:$4 sm:$0xff]  }
0x2722   :  { %v7550_v50 = vadd.f32 %v7549_v26, %v7548_v7  ;;  %v18871_v7 = vld [vmem:[#allocation33 + $0xd0] ss:$8 sps:$4 sm:$0xff]   ;;  %v18877_v26 = vld [vmem:[#allocation33 + $0xe0] ss:$8 sps:$4 sm:$0xff]   ;;  %v18882_v28 = vld [vmem:[#allocation33 + $0x2c4] ss:$8 sps:$4 sm:$0xff]  }
0x2723   :  { %9932 = vmatpush1.bf16.msra.mxu1 %v18859_v9  ;;  %v18886_v1 = vld [vmem:[#allocation33 + $0x2d0] ss:$8 sps:$4 sm:$0xff]   ;;  %v18888_v14 = vld [vmem:[#allocation33 + $0x2d4] ss:$8 sps:$4 sm:$0xff]   ;;  %v18891_v52 = vld [vmem:[#allocation33 + $0x104] ss:$8 sps:$4 sm:$0xff]  }
0x2724   :  { %7551 = vadd.xlane.f32.xlu0 %v7550_v50  ;;  %10330 = vmatpush1.bf16.msra.mxu0 %v18862_v56  ;;  %v18880_v50 = vld [vmem:[#allocation33 + $0x2c0] ss:$8 sps:$4 sm:$0xff]   ;;  %v18894_v43 = vld [vmem:[#allocation33 + $0x2e4] ss:$8 sps:$4 sm:$0xff]   ;;  %v18898_v9 = vld [vmem:[#allocation33 + $0x2f0] ss:$8 sps:$4 sm:$0xff]  }
0x2725   :  { %9933 = vmatprep.subr.bf16.mxu1 %v18867_v21  ;;  %10331 = vmatprep.subr.bf16.mxu0 %v18870_v6  ;;  %v18892_v5 = vld [vmem:[#allocation33 + $0x2e0] ss:$8 sps:$4 sm:$0xff]   ;;  %v18900_v56 = vld [vmem:[#allocation33 + $0x2f4] ss:$8 sps:$4 sm:$0xff]   ;;  %v18906_v21 = vld [vmem:[#allocation33 + $0x304] ss:$8 sps:$4 sm:$0xff]  }
0x2726   :  { %v5402_v6 = vld [vmem:[#allocation28 + $0x10] sm:$0xf] }
0x2727   :  { %9934 = vmatpush1.bf16.msra.mxu1 %v18865_v42  ;;  %v5491_v42 = vrot.slane %v5402_v6, %v21461_v20 }
0x2728   :  { %7334 = vadd.xlane.f32.xlu0 %v7333_v13  ;;  %10332 = vmatpush1.bf16.msra.mxu0 %v18868_v24  ;;  %v18883_v13 = vld [vmem:[#allocation33 + $0xf0] ss:$8 sps:$4 sm:$0xff]   ;;  %v5495_v24 = vrot.slane %v5402_v6, %v21972_v54 }
0x2729   :  { %9935 = vmatprep.subr.bf16.mxu1 %v18873_v29  ;;  %10333 = vmatprep.subr.bf16.mxu0 %v18876_v22  ;;  %v5403_v29 = vld [vmem:[#allocation28 + $0x14] sm:$0xf]  ;;  %v22207_v22 = vadd.f32 %v22036_v55, %v5491_v42 }
0x272b   :  { %9936 = vmatpush1.bf16.msra.mxu1 %v18871_v7  ;;  %v22210_v7 = vadd.f32 %v22040_v19, %v5495_v24 }
0x272c   :  { %10334 = vmatpush1.bf16.msra.mxu0 %v18874_v63  ;;  %9937 = vmatprep.subr.bf16.mxu1 %v18879_v40  ;;  %v5499_v63 = vrot.slane %v5402_v6, %v21975_v48  ;;  %v5511_v40 = vrot.slane %v5403_v29, %v21972_v54 }
0x272d   :  { %10335 = vmatprep.subr.bf16.mxu0 %v18882_v28  ;;  %v7337_v28 = vsel %vm7299_vm9, %v22210_v7, 0.0 }
0x272e   :  { %v22221_v55 = vadd.f32 %v22038_v34, %v5499_v63 }
0x272f   :  { %9938 = vmatpush1.bf16.msra.mxu1 %v18877_v26  ;;  %v5507_v26 = vrot.slane %v5403_v29, %v21461_v20 }
0x2730   :  { %10336 = vmatpush1.bf16.msra.mxu0 %v18880_v50  ;;  %9939 = vmatprep.subr.bf16.mxu1 %v18885_v58  ;;  %v7336_v50 = vsel %vm7299_vm9, %v22207_v22, 0.0  ;;  %v22227_v58 = vadd.f32 %v22048_v46, %v5511_v40 }
0x2731   :  { %10337 = vmatprep.subr.bf16.mxu0 %v18888_v14  ;;  %v22224_v19 = vadd.f32 %v22044_v62, %v5507_v26  ;;  %v5515_v14 = vrot.slane %v5403_v29, %v21975_v48  ;;  %v22245_v26 = vld [vmem:[#allocation30] sm:$0xf] }
0x2732   :  { %v7346_v62 = vsel %vm7299_vm9, %v22227_v58, 0.0 }
0x2733   :  { %9940 = vmatpush1.bf16.msra.mxu1 %v18883_v13  ;;  %v5503_v13 = vrot.slane %v5402_v6, %v21978_v49  ;;  %v7345_v34 = vsel %vm7299_vm9, %v22224_v19, 0.0  ;;  %v22240_v46 = vadd.f32 %v22046_v45, %v5515_v14 }
0x2734   :  { %10338 = vmatpush1.bf16.msra.mxu0 %v18886_v1  ;;  %9950 = vmatprep.subr.bf16.mxu1 %v18891_v52  ;;  %v7338_v1 = vadd.f32 %v7337_v28, %v7336_v50  ;;  %v7347_v6 = vadd.f32 %v7346_v62, %v7345_v34  ;;  %v22280_v62 = vld [vmem:[#allocation30 + $0x4] sm:$0xf] }
0x2735   :  { %10339 = vmatprep.subr.bf16.mxu0 %v18894_v43  ;;  %v22231_v52 = vadd.f32 %v22042_v57, %v5503_v13  ;;  %v5519_v57 = vrot.slane %v5403_v29, %v21978_v49  ;;  %v7348_v50 = vsel %vm7299_vm9, %v22240_v46, 0.0 }
0x2737   :  { %v7341_v24 = vsel %vm7299_vm9, %v22231_v52, 0.0  ;;  %v22266_v14 = vadd.f32 %v22050_v3, %v5519_v57 }
0x2738   :  { %10340 = vmatpush1.bf16.msra.mxu0 %v18892_v5  ;;  %v7339_v5 = vsel %vm7299_vm9, %v22221_v55, 0.0 }
0x2739   :  { %10341 = vmatprep.subr.bf16.mxu0 %v18900_v56  ;;  %v7340_v56 = vadd.f32 %v7339_v5, %v7338_v1  ;;  %v22263_v1 = vld [vmem:[#allocation31] sm:$0xf] }
0x273a   :  { %v8096_v23 = vrot.slane %v22263_v1, %v21978_v49 }
0x273b   :  { %v22247_v40 = vadd.f32 %v7341_v24, %v7340_v56  ;;  %v8088_v56 = vrot.slane %v22263_v1, %v21972_v54 }
0x273c   :  { %10342 = vmatpush1.bf16.msra.mxu0 %v18898_v9 }
0x273d   :  { %10352 = vmatprep.subr.bf16.mxu0 %v18906_v21 }
0x27a9   :  { %v7543_v43 = vpop.xlane.xlu1 %7542 }
0x27aa   :  { %v7652_v9 = vmul.f32 0.001953125, %v7543_v43  ;;  %v22268_v43 = vadd.f32 %v7348_v50, %v7347_v6  ;;  %v7767_v6 = vrot.slane %v22245_v26, %v21975_v48  ;;  %v22294_v50 = vld [vmem:[#allocation31 + $0x4] sm:$0xf] }
0x27ab   :  { %v8112_v10 = vrot.slane %v22294_v50, %v21978_v49 }
0x27ac   :  { %v7665_v21 = vadd.f32 1e-05, %v7652_v9 }
0x27ad   :  { %v7326_v42 = vpop.xlane.xlu1 %7325 }
0x27ae   :  { %20141 = vrsqrt.f32 %v7665_v21  ;;  %v7420_v63 = vmul.f32 0.001953125, %v7326_v42  ;;  %v7771_v21 = vrot.slane %v22245_v26, %v21978_v49 }
0x27b0   :  { %v22252_v45 = vsub.f32 %v22111_v47, %v7420_v63  ;;  %v22255_v28 = vsub.f32 %v22114_v25, %v7420_v63  ;;  %v22258_v29 = vsub.f32 %v22142_v4, %v7420_v63  ;;  %v22261_v13 = vsub.f32 %v22160_v59, %v7420_v63 }
0x27b1   :  { %v7552_v5 = vpop.xlane.xlu0 %7551  ;;  %v7763_v47 = vrot.slane %v22245_v26, %v21972_v54  ;;  %v7759_v25 = vrot.slane %v22245_v26, %v21461_v20  ;;  %v8084_v63 = vrot.slane %v22263_v1, %v21461_v20  ;;  %v8092_v26 = vrot.slane %v22263_v1, %v21975_v48 }
0x27b2   :  { %v7491_v4 = vmul.f32 %v22252_v45, %v22252_v45  ;;  %v7492_v59 = vmul.f32 %v22255_v28, %v22255_v28  ;;  %v7653_v34 = vmul.f32 0.001953125, %v7552_v5  ;;  %v7493_v3 = vmul.f32 %v22258_v29, %v22258_v29 }
0x27b3   :  { %v7494_v9 = vmul.f32 %v22261_v13, %v22261_v13 }
0x27b4   :  { %v7666_v57 = vadd.f32 1e-05, %v7653_v34  ;;  %v7553_v42 = vsel %vm7299_vm9, %v7491_v4, 0.0  ;;  %v7554_v24 = vsel %vm7299_vm9, %v7492_v59, 0.0  ;;  %v7556_v59 = vsel %vm7299_vm9, %v7493_v3, 0.0 }
0x27b5   :  { %v7335_v5 = vpop.xlane.xlu0 %7334  ;;  %v7555_v32 = vadd.f32 %v7554_v24, %v7553_v42  ;;  %v7775_v34 = vrot.slane %v22280_v62, %v21461_v20  ;;  %v7558_v11 = vsel %vm7299_vm9, %v7494_v9, 0.0  ;;  %v7787_v24 = vrot.slane %v22280_v62, %v21978_v49 }
0x27b6   :  { %20143 = vrsqrt.f32 %v7666_v57  ;;  %v7421_v4 = vmul.f32 0.001953125, %v7335_v5  ;;  %v8100_v42 = vrot.slane %v22294_v50, %v21461_v20 }
0x27b7   :  { %v7557_v33 = vadd.f32 %v7556_v59, %v7555_v32 }
0x27b8   :  { %v20142_v8 = vpop.eup %20141  ;;  %v22311_v12 = vsub.f32 %v22150_v18, %v7421_v4  ;;  %v22314_v1 = vsub.f32 %v22154_v36, %v7421_v4  ;;  %v22317_v3 = vsub.f32 %v22189_v60, %v7421_v4  ;;  %v22320_v32 = vsub.f32 %v22199_v44, %v7421_v4 }
0x27b9   :  { %v7559_v9 = vadd.f32 %v7558_v11, %v7557_v33  ;;  %v7692_v57 = vmul.f32 %v20142_v8, %v22121_v0  ;;  %v7691_v5 = vmul.f32 %v20142_v8, %v22118_v39  ;;  %v7694_v59 = vmul.f32 %v20142_v8, %v22127_v35 }
0x27ba   :  { %23660 = vst [vmem:[#allocation86_spill] sm:$0xff] %v22311_v12  ;;  %23661 = vst [vmem:[#allocation87_spill] sm:$0xff] %v22314_v1  ;;  %v7495_v18 = vmul.f32 %v22311_v12, %v22311_v12  ;;  %v7496_v36 = vmul.f32 %v22314_v1, %v22314_v1  ;;  %v7497_v60 = vmul.f32 %v22317_v3, %v22317_v3 }
0x27bb   :  { %23662 = vst [vmem:[#allocation88_spill] sm:$0xff] %v22317_v3  ;;  %23663 = vst [vmem:[#allocation89_spill] sm:$0xff] %v22320_v32  ;;  %v7498_v44 = vmul.f32 %v22320_v32, %v22320_v32  ;;  %7560 = vadd.xlane.f32.xlu1 %v7559_v9  ;;  %v8017_v11 = vmul.f32 %v7763_v47, %v7692_v57  ;;  %v8016_v33 = vmul.f32 %v7759_v25, %v7691_v5 }
0x27bc   :  { %v8019_v0 = vmul.f32 %v7771_v21, %v7694_v59  ;;  %v7693_v39 = vmul.f32 %v20142_v8, %v22124_v51  ;;  %v7562_v35 = vsel %vm7299_vm9, %v7495_v18, 0.0  ;;  %v7563_v4 = vsel %vm7299_vm9, %v7496_v36, 0.0 }
0x27bd   :  { %v7564_v3 = vadd.f32 %v7563_v4, %v7562_v35  ;;  %v8342_v12 = vadd.f32 %v8088_v56, %v8017_v11  ;;  %v8341_v1 = vadd.f32 %v8084_v63, %v8016_v33  ;;  %v7565_v47 = vsel %vm7299_vm9, %v7497_v60, 0.0  ;;  %v18889_v60 = vld [vmem:[#allocation33 + $0x100] ss:$8 sps:$4 sm:$0xff]  }
0x27be   :  { %v8344_v32 = vadd.f32 %v8096_v23, %v8019_v0  ;;  %v7567_v25 = vsel %vm7299_vm9, %v7498_v44, 0.0  ;;  %v8018_v21 = vmul.f32 %v7767_v6, %v7693_v39  ;;  %v7783_v8 = vrot.slane %v22280_v62, %v21975_v48  ;;  %v18897_v0 = vld [vmem:[#allocation33 + $0x114] ss:$8 sps:$4 sm:$0xff]  }
0x27bf   :  { %7343 = vadd.xlane.f32.xlu1 %v22247_v40  ;;  %v7566_v51 = vadd.f32 %v7565_v47, %v7564_v3  ;;  %vm8394_vm10 = vcmp.gt.f32.partialorder %v8342_v12, 0.0  ;;  %v8446_v9 = vmul.f32 0.01, %v8342_v12  ;;  %vm8393_vm11 = vcmp.gt.f32.partialorder %v8341_v1, 0.0 }
0x27c0   :  { %v20144_v57 = vpop.eup %20143  ;;  %v8445_v5 = vmul.f32 0.01, %v8341_v1  ;;  %vm8396_vm12 = vcmp.gt.f32.partialorder %v8344_v32, 0.0  ;;  %v8448_v56 = vmul.f32 0.01, %v8344_v32  ;;  %v22345_v63 = vadd.f32 %v8092_v26, %v8018_v21 }
0x27c1   :  { %v7568_v23 = vadd.f32 %v7567_v25, %v7566_v51  ;;  %v8498_v59 = vsel %vm8394_vm10, %v8342_v12, %v8446_v9  ;;  %v7696_v18 = vmul.f32 %v20144_v57, %v22167_v30  ;;  %v7695_v6 = vmul.f32 %v20144_v57, %v22164_v61 }
0x27c2   :  { %v8550_v36 = vpack.c.bf16 %v8498_v59, %v8498_v59  ;;  %v8497_v44 = vsel %vm8393_vm11, %v8341_v1, %v8445_v5  ;;  %v8500_v40 = vsel %vm8396_vm12, %v8344_v32, %v8448_v56  ;;  %v7698_v3 = vmul.f32 %v20144_v57, %v22173_v27  ;;  %v18904_v5 = vld [vmem:[#allocation33 + $0x300] ss:$8 sps:$4 sm:$0xff]  }
0x27c3   :  { %v7350_v11 = vsel %vm7299_vm9, %v22266_v14, 0.0  ;;  %7569 = vadd.xlane.f32.xlu0 %v7568_v23  ;;  %v8549_v33 = vpack.c.bf16 %v8497_v44, %v8497_v44  ;;  %v23664_v26 = vrot.slane %v22280_v62, %v21972_v54  ;;  %v8020_v39 = vmul.f32 %v7775_v34, %v7695_v6  ;;  %v18895_v62 = vld [vmem:[#allocation33 + $0x110] ss:$8 sps:$4 sm:$0xff]   ;;  %v18903_v34 = vld [vmem:[#allocation33 + $0x124] ss:$8 sps:$4 sm:$0xff]  }
0x27c4   :  { %9941 = vmatprep.mubr.bf16.mxu1 %v8550_v36  ;;  %v8552_v30 = vpack.c.bf16 %v8500_v40, %v8500_v40  ;;  %v8023_v61 = vmul.f32 %v7787_v24, %v7698_v3  ;;  %v7697_v35 = vmul.f32 %v20144_v57, %v22170_v41  ;;  %v8108_v1 = vrot.slane %v22294_v50, %v21975_v48  ;;  %v18910_v6 = vld [vmem:[#allocation33 + $0x310] ss:$8 sps:$4 sm:$0xff]   ;;  %v18915_v36 = vld [vmem:[#allocation33 + $0x144] ss:$8 sps:$4 sm:$0xff]   ;;  %v18913_v44 = vld [vmem:[#allocation33 + $0x140] ss:$8 sps:$4 sm:$0xff]  }
0x27c5   :  { %v8021_v12 = vmul.f32 %v23664_v26, %v7696_v18  ;;  %v7351_v27 = vadd.f32 %v7350_v11, %v22268_v43  ;;  %9942 = vmatmul.mubr.bf16.vlgmr.msra.gmra.mrb[104].mxu1 %v8549_v33  ;;  %v23665_v32 = vrot.slane %v22294_v50, %v21972_v54  ;;  %v8345_v47 = vadd.f32 %v8100_v42, %v8020_v39  ;;  %v18901_v42 = vld [vmem:[#allocation33 + $0x120] ss:$8 sps:$4 sm:$0xff]   ;;  %v18907_v18 = vld [vmem:[#allocation33 + $0x130] ss:$8 sps:$4 sm:$0xff]   ;;  %v18921_v3 = vld [vmem:[#allocation33 + $0x154] ss:$8 sps:$4 sm:$0xff]  }
0x27c6   :  { %9951 = vmatpush1.bf16.msra.mxu1 %v18889_v60  ;;  %9982 = vmatprep.mubr.bf16.mxu1 %v8552_v30  ;;  %v8348_v25 = vadd.f32 %v8112_v10, %v8023_v61  ;;  %v8022_v21 = vmul.f32 %v7783_v8, %v7697_v35  ;;  %v18909_v10 = vld [vmem:[#allocation33 + $0x134] ss:$8 sps:$4 sm:$0xff]   ;;  %v18918_v60 = vld [vmem:[#allocation33 + $0x324] ss:$8 sps:$4 sm:$0xff]   ;;  %v18916_v40 = vld [vmem:[#allocation33 + $0x320] ss:$8 sps:$4 sm:$0xff]  }
0x27c7   :  { %v8346_v4 = vadd.f32 %v23665_v32, %v8021_v12  ;;  %7352 = vadd.xlane.f32.xlu0 %v7351_v27  ;;  %9952 = vmatprep.subr.bf16.mxu1 %v18897_v0  ;;  %vm8397_vm14 = vcmp.gt.f32.partialorder %v8345_v47, 0.0  ;;  %v8449_v24 = vmul.f32 0.01, %v8345_v47  ;;  %v18912_v8 = vld [vmem:[#allocation33 + $0x314] ss:$8 sps:$4 sm:$0xff]   ;;  %vm8395_vm0 = vcmp.gt.f32.partialorder %v22345_v63, 0.0 }
0x27c8   :  { %vm8400_vm15 = vcmp.gt.f32.partialorder %v8348_v25, 0.0  ;;  %v8452_v43 = vmul.f32 0.01, %v8348_v25  ;;  %v22362_v51 = vadd.f32 %v8108_v1, %v8022_v21  ;;  %v18924_v11 = vld [vmem:[#allocation33 + $0x334] ss:$8 sps:$4 sm:$0xff]  }
0x27c9   :  { %vm8398_vm13 = vcmp.gt.f32.partialorder %v8346_v4, 0.0  ;;  %v8450_v41 = vmul.f32 0.01, %v8346_v4  ;;  %v8501_v50 = vsel %vm8397_vm14, %v8345_v47, %v8449_v24  ;;  %v18919_v33 = vld [vmem:[#allocation33 + $0x150] ss:$8 sps:$4 sm:$0xff]  }
0x27ca   :  { %9953 = vmatpush1.bf16.msra.mxu1 %v18895_v62  ;;  %v8553_v56 = vpack.c.bf16 %v8501_v50, %v8501_v50  ;;  %v8504_v23 = vsel %vm8400_vm15, %v8348_v25, %v8452_v43  ;;  %v18922_v0 = vld [vmem:[#allocation33 + $0x330] ss:$8 sps:$4 sm:$0xff]   ;;  %v18927_v26 = vld [vmem:[#allocation33 + $0x164] ss:$8 sps:$4 sm:$0xff]   ;;  %v18925_v39 = vld [vmem:[#allocation33 + $0x160] ss:$8 sps:$4 sm:$0xff]  }
0x27cb   :  { %v8502_v9 = vsel %vm8398_vm13, %v8346_v4, %v8450_v41  ;;  %9954 = vmatprep.subr.bf16.mxu1 %v18903_v34  ;;  %v8556_v59 = vpack.c.bf16 %v8504_v23, %v8504_v23  ;;  %v18930_v12 = vld [vmem:[#allocation33 + $0x344] ss:$8 sps:$4 sm:$0xff]   ;;  %v18928_v30 = vld [vmem:[#allocation33 + $0x340] ss:$8 sps:$4 sm:$0xff]   ;;  %v18933_v61 = vld [vmem:[#allocation33 + $0x174] ss:$8 sps:$4 sm:$0xff]  }
0x27cc   :  { %v8554_v57 = vpack.c.bf16 %v8502_v9, %v8502_v9  ;;  %v18936_v35 = vld [vmem:[#allocation33 + $0x354] ss:$8 sps:$4 sm:$0xff]   ;;  %v18931_v1 = vld [vmem:[#allocation33 + $0x170] ss:$8 sps:$4 sm:$0xff]   ;;  %v18939_v32 = vld [vmem:[#allocation33 + $0x184] ss:$8 sps:$4 sm:$0xff]  }
0x27cd   :  { %v18934_v27 = vld [vmem:[#allocation33 + $0x350] ss:$8 sps:$4 sm:$0xff]   ;;  %v18942_v4 = vld [vmem:[#allocation33 + $0x364] ss:$8 sps:$4 sm:$0xff]   ;;  %v18937_v47 = vld [vmem:[#allocation33 + $0x180] ss:$8 sps:$4 sm:$0xff]  }
0x27ce   :  { %10343 = vmatprep.mubr.bf16.mxu0 %v8554_v57  ;;  %9955 = vmatpush1.bf16.msra.mxu1 %v18901_v42  ;;  %v18940_v62 = vld [vmem:[#allocation33 + $0x360] ss:$8 sps:$4 sm:$0xff]   ;;  %v18945_v34 = vld [vmem:[#allocation33 + $0x194] ss:$8 sps:$4 sm:$0xff]   ;;  %v18943_v21 = vld [vmem:[#allocation33 + $0x190] ss:$8 sps:$4 sm:$0xff]  }
0x27cf   :  { %10344 = vmatmul.mubr.bf16.vlgmr.msra.gmra.mrb[100].mxu0 %v8553_v56  ;;  %9956 = vmatprep.subr.bf16.mxu1 %v18909_v10  ;;  %v18948_v25 = vld [vmem:[#allocation33 + $0x374] ss:$8 sps:$4 sm:$0xff]   ;;  %v18946_v41 = vld [vmem:[#allocation33 + $0x370] ss:$8 sps:$4 sm:$0xff]   ;;  %v18951_v24 = vld [vmem:[#allocation33 + $0x1a4] ss:$8 sps:$4 sm:$0xff]  }
0x27d0   :  { %10353 = vmatpush1.bf16.msra.mxu0 %v18904_v5  ;;  %10384 = vmatprep.mubr.bf16.mxu0 %v8556_v59  ;;  %v18954_v43 = vld [vmem:[#allocation33 + $0x384] ss:$8 sps:$4 sm:$0xff]   ;;  %v18949_v9 = vld [vmem:[#allocation33 + $0x1a0] ss:$8 sps:$4 sm:$0xff]   ;;  %v18957_v42 = vld [vmem:[#allocation33 + $0x1b4] ss:$8 sps:$4 sm:$0xff]  }
0x27d1   :  { %10354 = vmatprep.subr.bf16.mxu0 %v18912_v8  ;;  %v18952_v50 = vld [vmem:[#allocation33 + $0x380] ss:$8 sps:$4 sm:$0xff]   ;;  %v18960_v57 = vld [vmem:[#allocation33 + $0x394] ss:$8 sps:$4 sm:$0xff]   ;;  %v18955_v5 = vld [vmem:[#allocation33 + $0x1b0] ss:$8 sps:$4 sm:$0xff]  }
0x27d2   :  { %9957 = vmatpush1.bf16.msra.mxu1 %v18907_v18  ;;  %v18958_v56 = vld [vmem:[#allocation33 + $0x390] ss:$8 sps:$4 sm:$0xff]   ;;  %v18963_v23 = vld [vmem:[#allocation33 + $0x1c4] ss:$8 sps:$4 sm:$0xff]   ;;  %v18961_v8 = vld [vmem:[#allocation33 + $0x1c0] ss:$8 sps:$4 sm:$0xff]  }
0x27d3   :  { %9958 = vmatprep.subr.bf16.mxu1 %v18915_v36  ;;  %v18966_v10 = vld [vmem:[#allocation33 + $0x3a4] ss:$8 sps:$4 sm:$0xff]   ;;  %v18964_v59 = vld [vmem:[#allocation33 + $0x3a0] ss:$8 sps:$4 sm:$0xff]   ;;  %v18969_v18 = vld [vmem:[#allocation33 + $0x1d4] ss:$8 sps:$4 sm:$0xff]  }
0x27d4   :  { %10355 = vmatpush1.bf16.msra.mxu0 %v18910_v6  ;;  %v18972_v6 = vld [vmem:[#allocation33 + $0x3b4] ss:$8 sps:$4 sm:$0xff]   ;;  %v18967_v36 = vld [vmem:[#allocation33 + $0x1d0] ss:$8 sps:$4 sm:$0xff]   ;;  %vm8399_vm1 = vcmp.gt.f32.partialorder %v22362_v51, 0.0 }
0x27d5   :  { %10356 = vmatprep.subr.bf16.mxu0 %v18918_v60  ;;  %v18970_v60 = vld [vmem:[#allocation33 + $0x3b0] ss:$8 sps:$4 sm:$0xff]  }
0x27d6   :  { %9959 = vmatpush1.bf16.msra.mxu1 %v18913_v44  ;;  %v18975_v44 = vld [vmem:[#allocation33 + $0x1e4] ss:$8 sps:$4 sm:$0xff]  }
0x27d7   :  { %9960 = vmatprep.subr.bf16.mxu1 %v18921_v3  ;;  %v18973_v3 = vld [vmem:[#allocation33 + $0x1e0] ss:$8 sps:$4 sm:$0xff]  }
0x27d8   :  { %10357 = vmatpush1.bf16.msra.mxu0 %v18916_v40  ;;  %v18978_v40 = vld [vmem:[#allocation33 + $0x3c4] ss:$8 sps:$4 sm:$0xff]  }
0x27d9   :  { %10358 = vmatprep.subr.bf16.mxu0 %v18924_v11  ;;  %v18976_v11 = vld [vmem:[#allocation33 + $0x3c0] ss:$8 sps:$4 sm:$0xff]  }
0x27da   :  { %9961 = vmatpush1.bf16.msra.mxu1 %v18919_v33  ;;  %v18981_v33 = vld [vmem:[#allocation33 + $0x1f4] ss:$8 sps:$4 sm:$0xff]  }
0x27db   :  { %9962 = vmatprep.subr.bf16.mxu1 %v18927_v26  ;;  %v8447_v26 = vmul.f32 0.01, %v22345_v63 }
0x27dc   :  { %10359 = vmatpush1.bf16.msra.mxu0 %v18922_v0  ;;  %v18984_v0 = vld [vmem:[#allocation33 + $0x3d4] ss:$8 sps:$4 sm:$0xff]  }
0x27dd   :  { %10360 = vmatprep.subr.bf16.mxu0 %v18930_v12  ;;  %v18979_v12 = vld [vmem:[#allocation33 + $0x1f0] ss:$8 sps:$4 sm:$0xff]  }
0x27de   :  { %9963 = vmatpush1.bf16.msra.mxu1 %v18925_v39  ;;  %v18982_v39 = vld [vmem:[#allocation33 + $0x3d0] ss:$8 sps:$4 sm:$0xff]  }
0x27df   :  { %9964 = vmatprep.subr.bf16.mxu1 %v18933_v61  ;;  %v18993_v61 = vld [vmem:[#allocation33 + $0x404] ss:$8 sps:$4 sm:$0xff]  }
0x27e0   :  { %10361 = vmatpush1.bf16.msra.mxu0 %v18928_v30  ;;  %v18987_v30 = vld [vmem:[#allocation33 + $0x3e4] ss:$8 sps:$4 sm:$0xff]  }
0x27e1   :  { %10362 = vmatprep.subr.bf16.mxu0 %v18936_v35  ;;  %v8499_v35 = vsel %vm8395_vm0, %v22345_v63, %v8447_v26  ;;  %v18999_v63 = vld [vmem:[#allocation33 + $0x424] ss:$8 sps:$4 sm:$0xff]  }
0x27e2   :  { %9965 = vmatpush1.bf16.msra.mxu1 %v18931_v1  ;;  %v18985_v1 = vld [vmem:[#allocation33 + $0x3e0] ss:$8 sps:$4 sm:$0xff]   ;;  %v19035_v26 = vld [vmem:[#allocation33 + $0x484] ss:$8 sps:$4 sm:$0xff]  }
0x27e3   :  { %9966 = vmatprep.subr.bf16.mxu1 %v18939_v32  ;;  %v8551_v32 = vpack.c.bf16 %v8499_v35, %v8499_v35  ;;  %v19044_v35 = vld [vmem:[#allocation33 + $0x674] ss:$8 sps:$4 sm:$0xff]  }
0x27e4   :  { %10363 = vmatpush1.bf16.msra.mxu0 %v18934_v27  ;;  %v18991_v27 = vld [vmem:[#allocation33 + $0x400] ss:$8 sps:$4 sm:$0xff]  }
0x27e5   :  { %10364 = vmatprep.subr.bf16.mxu0 %v18942_v4  ;;  %v18990_v4 = vld [vmem:[#allocation33 + $0x3f4] ss:$8 sps:$4 sm:$0xff]  }
0x27e6   :  { %9967 = vmatpush1.bf16.msra.mxu1 %v18937_v47  ;;  %v18996_v47 = vld [vmem:[#allocation33 + $0x414] ss:$8 sps:$4 sm:$0xff]  }
0x27e7   :  { %9968 = vmatprep.subr.bf16.mxu1 %v18945_v34  ;;  %v18988_v34 = vld [vmem:[#allocation33 + $0x3f0] ss:$8 sps:$4 sm:$0xff]  }
0x27e8   :  { %10365 = vmatpush1.bf16.msra.mxu0 %v18940_v62  ;;  %v8451_v62 = vmul.f32 0.01, %v22362_v51 }
0x27e9   :  { %10366 = vmatprep.subr.bf16.mxu0 %v18948_v25  ;;  %v18994_v25 = vld [vmem:[#allocation33 + $0x410] ss:$8 sps:$4 sm:$0xff]  }
0x27ea   :  { %9969 = vmatpush1.bf16.msra.mxu1 %v18943_v21  ;;  %v19002_v21 = vld [vmem:[#allocation33 + $0x604] ss:$8 sps:$4 sm:$0xff]  }
0x27eb   :  { %9970 = vmatprep.subr.bf16.mxu1 %v18951_v24  ;;  %v18997_v24 = vld [vmem:[#allocation33 + $0x420] ss:$8 sps:$4 sm:$0xff]  }
0x27ec   :  { %10367 = vmatpush1.bf16.msra.mxu0 %v18946_v41  ;;  %v8503_v41 = vsel %vm8399_vm1, %v22362_v51, %v8451_v62  ;;  %v19009_v51 = vld [vmem:[#allocation33 + $0x440] ss:$8 sps:$4 sm:$0xff]  }
0x27ed   :  { %10368 = vmatprep.subr.bf16.mxu0 %v18954_v43  ;;  %v19000_v43 = vld [vmem:[#allocation33 + $0x600] ss:$8 sps:$4 sm:$0xff]  }
0x27ee   :  { %9971 = vmatpush1.bf16.msra.mxu1 %v18949_v9  ;;  %v8555_v9 = vpack.c.bf16 %v8503_v41, %v8503_v41  ;;  %v19048_v62 = vld [vmem:[#allocation33 + $0x680] ss:$8 sps:$4 sm:$0xff]   ;;  %v19059_v41 = vld [vmem:[#allocation33 + $0x4c4] ss:$8 sps:$4 sm:$0xff]  }
0x27ef   :  { %9972 = vmatprep.subr.bf16.mxu1 %v18957_v42  ;;  %v19008_v42 = vld [vmem:[#allocation33 + $0x614] ss:$8 sps:$4 sm:$0xff]  }
0x27f0   :  { %10369 = vmatpush1.bf16.msra.mxu0 %v18952_v50  ;;  %v19005_v50 = vld [vmem:[#allocation33 + $0x434] ss:$8 sps:$4 sm:$0xff]  }
0x27f1   :  { %10370 = vmatprep.subr.bf16.mxu0 %v18960_v57  ;;  %v19003_v57 = vld [vmem:[#allocation33 + $0x430] ss:$8 sps:$4 sm:$0xff]  }
0x27f2   :  { %9973 = vmatpush1.bf16.msra.mxu1 %v18955_v5  ;;  %v19006_v5 = vld [vmem:[#allocation33 + $0x610] ss:$8 sps:$4 sm:$0xff]  }
0x27f3   :  { %9974 = vmatprep.subr.bf16.mxu1 %v18963_v23  ;;  %v19014_v23 = vld [vmem:[#allocation33 + $0x624] ss:$8 sps:$4 sm:$0xff]  }
0x27f4   :  { %10371 = vmatpush1.bf16.msra.mxu0 %v18958_v56  ;;  %v19011_v56 = vld [vmem:[#allocation33 + $0x444] ss:$8 sps:$4 sm:$0xff]  }
0x27f5   :  { %10372 = vmatprep.subr.bf16.mxu0 %v18966_v10  ;;  %v19012_v10 = vld [vmem:[#allocation33 + $0x620] ss:$8 sps:$4 sm:$0xff]  }
0x27f6   :  { %9975 = vmatpush1.bf16.msra.mxu1 %v18961_v8  ;;  %v19017_v8 = vld [vmem:[#allocation33 + $0x454] ss:$8 sps:$4 sm:$0xff]  }
0x27f7   :  { %9976 = vmatprep.subr.bf16.mxu1 %v18969_v18  ;;  %v19015_v18 = vld [vmem:[#allocation33 + $0x450] ss:$8 sps:$4 sm:$0xff]  }
0x27f8   :  { %10373 = vmatpush1.bf16.msra.mxu0 %v18964_v59  ;;  %v19020_v59 = vld [vmem:[#allocation33 + $0x634] ss:$8 sps:$4 sm:$0xff]  }
0x27f9   :  { %10374 = vmatprep.subr.bf16.mxu0 %v18972_v6  ;;  %v19018_v6 = vld [vmem:[#allocation33 + $0x630] ss:$8 sps:$4 sm:$0xff]  }
0x27fa   :  { %9977 = vmatpush1.bf16.msra.mxu1 %v18967_v36  ;;  %v19023_v36 = vld [vmem:[#allocation33 + $0x464] ss:$8 sps:$4 sm:$0xff]  }
0x27fb   :  { %9978 = vmatprep.subr.bf16.mxu1 %v18975_v44  ;;  %v19021_v44 = vld [vmem:[#allocation33 + $0x460] ss:$8 sps:$4 sm:$0xff]  }
0x27fc   :  { %10375 = vmatpush1.bf16.msra.mxu0 %v18970_v60  ;;  %v19026_v60 = vld [vmem:[#allocation33 + $0x644] ss:$8 sps:$4 sm:$0xff]  }
0x27fd   :  { %10376 = vmatprep.subr.bf16.mxu0 %v18978_v40  ;;  %v19024_v40 = vld [vmem:[#allocation33 + $0x640] ss:$8 sps:$4 sm:$0xff]  }
0x27fe   :  { %9979 = vmatpush1.bf16.msra.mxu1 %v18973_v3  ;;  %v19029_v3 = vld [vmem:[#allocation33 + $0x474] ss:$8 sps:$4 sm:$0xff]  }
0x27ff   :  { %9980 = vmatprep.subr.bf16.mxu1 %v18981_v33  ;;  %v19027_v33 = vld [vmem:[#allocation33 + $0x470] ss:$8 sps:$4 sm:$0xff]  }
0x2800   :  { %10377 = vmatpush1.bf16.msra.mxu0 %v18976_v11  ;;  %v19032_v11 = vld [vmem:[#allocation33 + $0x654] ss:$8 sps:$4 sm:$0xff]  }
0x2801   :  { %10378 = vmatprep.subr.bf16.mxu0 %v18984_v0  ;;  %v19030_v0 = vld [vmem:[#allocation33 + $0x650] ss:$8 sps:$4 sm:$0xff]  }
0x2802   :  { %9981 = vmatpush1.bf16.msra.mxu1 %v18979_v12  ;;  %v19038_v12 = vld [vmem:[#allocation33 + $0x664] ss:$8 sps:$4 sm:$0xff]  }
0x2803   :  { %10713 = vmatprep.subr.bf16.mxu1 %v18993_v61  ;;  %v19041_v61 = vld [vmem:[#allocation33 + $0x494] ss:$8 sps:$4 sm:$0xff]  }
0x2804   :  { %10379 = vmatpush1.bf16.msra.mxu0 %v18982_v39  ;;  %v19033_v39 = vld [vmem:[#allocation33 + $0x480] ss:$8 sps:$4 sm:$0xff]  }
0x2805   :  { %10380 = vmatprep.subr.bf16.mxu0 %v18987_v30  ;;  %9983 = vmatmul.mubr.bf16.vlgmr.msra.gmra.mrb[104].mxu1 %v8551_v32  ;;  %v19036_v30 = vld [vmem:[#allocation33 + $0x660] ss:$8 sps:$4 sm:$0xff]   ;;  %v19047_v32 = vld [vmem:[#allocation33 + $0x4a4] ss:$8 sps:$4 sm:$0xff]  }
0x2806   :  { %10714 = vmatpush1.bf16.msra.mxu1 %v18991_v27  ;;  %v19042_v27 = vld [vmem:[#allocation33 + $0x670] ss:$8 sps:$4 sm:$0xff]  }
0x2807   :  { %10715 = vmatprep.subr.bf16.mxu1 %v18996_v47  ;;  %v19045_v47 = vld [vmem:[#allocation33 + $0x4a0] ss:$8 sps:$4 sm:$0xff]  }
0x2808   :  { %10381 = vmatpush1.bf16.msra.mxu0 %v18985_v1  ;;  %v19039_v1 = vld [vmem:[#allocation33 + $0x490] ss:$8 sps:$4 sm:$0xff]  }
0x2809   :  { %10382 = vmatprep.subr.bf16.mxu0 %v18990_v4  ;;  %v19050_v4 = vld [vmem:[#allocation33 + $0x684] ss:$8 sps:$4 sm:$0xff]  }
0x280a   :  { %10716 = vmatpush1.bf16.msra.mxu1 %v18994_v25  ;;  %v19056_v25 = vld [vmem:[#allocation33 + $0x694] ss:$8 sps:$4 sm:$0xff]  }
0x280b   :  { %10717 = vmatprep.subr.bf16.mxu1 %v18999_v63  ;;  %v19051_v63 = vld [vmem:[#allocation33 + $0x4b0] ss:$8 sps:$4 sm:$0xff]  }
0x280c   :  { %10383 = vmatpush1.bf16.msra.mxu0 %v18988_v34  ;;  %v19053_v34 = vld [vmem:[#allocation33 + $0x4b4] ss:$8 sps:$4 sm:$0xff]  }
0x280d   :  { %11115 = vmatprep.subr.bf16.mxu0 %v19002_v21  ;;  %v19054_v21 = vld [vmem:[#allocation33 + $0x690] ss:$8 sps:$4 sm:$0xff]  }
0x280e   :  { %10718 = vmatpush1.bf16.msra.mxu1 %v18997_v24  ;;  %v19062_v24 = vld [vmem:[#allocation33 + $0x6a4] ss:$8 sps:$4 sm:$0xff]  }
0x280f   :  { %10385 = vmatmul.mubr.bf16.vlgmr.msra.gmra.mrb[100].mxu0 %v8555_v9  ;;  %10719 = vmatprep.subr.bf16.mxu1 %v19005_v50  ;;  %v19060_v9 = vld [vmem:[#allocation33 + $0x6a0] ss:$8 sps:$4 sm:$0xff]   ;;  %v19065_v50 = vld [vmem:[#allocation33 + $0x4d4] ss:$8 sps:$4 sm:$0xff]  }
0x2810   :  { %11116 = vmatpush1.bf16.msra.mxu0 %v19000_v43  ;;  %v19057_v43 = vld [vmem:[#allocation33 + $0x4c0] ss:$8 sps:$4 sm:$0xff]  }
0x2811   :  { %11117 = vmatprep.subr.bf16.mxu0 %v19008_v42  ;;  %v19068_v42 = vld [vmem:[#allocation33 + $0x6b4] ss:$8 sps:$4 sm:$0xff]  }
0x2812   :  { %10720 = vmatpush1.bf16.msra.mxu1 %v19003_v57  ;;  %v19063_v57 = vld [vmem:[#allocation33 + $0x4d0] ss:$8 sps:$4 sm:$0xff]  }
0x2813   :  { %10721 = vmatprep.subr.bf16.mxu1 %v19011_v56  ;;  %v19071_v56 = vld [vmem:[#allocation33 + $0x4e4] ss:$8 sps:$4 sm:$0xff]  }
0x2814   :  { %11118 = vmatpush1.bf16.msra.mxu0 %v19006_v5  ;;  %v19066_v5 = vld [vmem:[#allocation33 + $0x6b0] ss:$8 sps:$4 sm:$0xff]  }
0x2815   :  { %11119 = vmatprep.subr.bf16.mxu0 %v19014_v23  ;;  %v19074_v23 = vld [vmem:[#allocation33 + $0x6c4] ss:$8 sps:$4 sm:$0xff]  }
0x2816   :  { %10722 = vmatpush1.bf16.msra.mxu1 %v19009_v51  ;;  %v5404_v51 = vld [vmem:[#allocation28 + $0x18] sm:$0xf] }
0x2817   :  { %10723 = vmatprep.subr.bf16.mxu1 %v19017_v8  ;;  %v19072_v8 = vld [vmem:[#allocation33 + $0x6c0] ss:$8 sps:$4 sm:$0xff]  }
0x2818   :  { %11120 = vmatpush1.bf16.msra.mxu0 %v19012_v10  ;;  %v19069_v10 = vld [vmem:[#allocation33 + $0x4e0] ss:$8 sps:$4 sm:$0xff]  }
0x2819   :  { %11121 = vmatprep.subr.bf16.mxu0 %v19020_v59  ;;  %v5523_v59 = vrot.slane %v5404_v51, %v21461_v20 }
0x281a   :  { %10724 = vmatpush1.bf16.msra.mxu1 %v19015_v18  ;;  %v5527_v18 = vrot.slane %v5404_v51, %v21972_v54 }
0x281b   :  { %10725 = vmatprep.subr.bf16.mxu1 %v19023_v36  ;;  %v19080_v36 = vld [vmem:[#allocation33 + $0x6d4] ss:$8 sps:$4 sm:$0xff]  }
0x281c   :  { %11122 = vmatpush1.bf16.msra.mxu0 %v19018_v6  ;;  %v19077_v6 = vld [vmem:[#allocation33 + $0x4f4] ss:$8 sps:$4 sm:$0xff]  }
0x281d   :  { %11123 = vmatprep.subr.bf16.mxu0 %v19026_v60  ;;  %v5405_v60 = vld [vmem:[#allocation28 + $0x1c] sm:$0xf] }
0x281e   :  { %10726 = vmatpush1.bf16.msra.mxu1 %v19021_v44  ;;  %v19075_v44 = vld [vmem:[#allocation33 + $0x4f0] ss:$8 sps:$4 sm:$0xff]  }
0x281f   :  { %10727 = vmatprep.subr.bf16.mxu1 %v19029_v3  ;;  %v22373_v3 = vadd.f32 %v22052_v15, %v5523_v59  ;;  %v22429_v59 = vld [vmem:[#allocation31 + $0x8] sm:$0xf] }
0x2820   :  { %11124 = vmatpush1.bf16.msra.mxu0 %v19024_v40  ;;  %v19078_v40 = vld [vmem:[#allocation33 + $0x6d0] ss:$8 sps:$4 sm:$0xff]  }
0x2821   :  { %11125 = vmatprep.subr.bf16.mxu0 %v19032_v11  ;;  %v22376_v11 = vadd.f32 %v22056_v16, %v5527_v18  ;;  %v7354_v15 = vsel %vm7299_vm9, %v22373_v3, 0.0 }
0x2822   :  { %10728 = vmatpush1.bf16.msra.mxu1 %v19027_v33  ;;  %v19083_v33 = vld [vmem:[#allocation33 + $0x504] ss:$8 sps:$4 sm:$0xff]  }
0x2823   :  { %10729 = vmatprep.subr.bf16.mxu1 %v19035_v26  ;;  %v5531_v26 = vrot.slane %v5404_v51, %v21975_v48  ;;  %v7355_v16 = vsel %vm7299_vm9, %v22376_v11, 0.0 }
0x2824   :  { %11126 = vmatpush1.bf16.msra.mxu0 %v19030_v0  ;;  %v19086_v0 = vld [vmem:[#allocation33 + $0x6e4] ss:$8 sps:$4 sm:$0xff]  }
0x2825   :  { %11127 = vmatprep.subr.bf16.mxu0 %v19038_v12  ;;  %v5539_v12 = vrot.slane %v5405_v60, %v21461_v20 }
0x2826   :  { %10730 = vmatpush1.bf16.msra.mxu1 %v19033_v39  ;;  %v5543_v39 = vrot.slane %v5405_v60, %v21972_v54 }
0x2827   :  { %10731 = vmatprep.subr.bf16.mxu1 %v19041_v61  ;;  %v19092_v61 = vld [vmem:[#allocation33 + $0x6f4] ss:$8 sps:$4 sm:$0xff]  }
0x2828   :  { %11128 = vmatpush1.bf16.msra.mxu0 %v19036_v30  ;;  %v19084_v30 = vld [vmem:[#allocation33 + $0x6e0] ss:$8 sps:$4 sm:$0xff]  }
0x2829   :  { %11129 = vmatprep.subr.bf16.mxu0 %v19044_v35  ;;  %v5535_v35 = vrot.slane %v5404_v51, %v21978_v49 }
0x282a   :  { %10732 = vmatpush1.bf16.msra.mxu1 %v19039_v1  ;;  %v22387_v1 = vadd.f32 %v22054_v53, %v5531_v26 }
0x282b   :  { %10733 = vmatprep.subr.bf16.mxu1 %v19047_v32  ;;  %v22393_v32 = vadd.f32 %v22064_v37, %v5543_v39 }
0x282c   :  { %11130 = vmatpush1.bf16.msra.mxu0 %v19042_v27  ;;  %v22390_v27 = vadd.f32 %v22060_v31, %v5539_v12  ;;  %v7357_v53 = vsel %vm7299_vm9, %v22387_v1, 0.0 }
0x282d   :  { %11131 = vmatprep.subr.bf16.mxu0 %v19050_v4  ;;  %v7356_v4 = vadd.f32 %v7355_v16, %v7354_v15  ;;  %v7364_v37 = vsel %vm7299_vm9, %v22393_v32, 0.0  ;;  %v8116_v15 = vrot.slane %v22429_v59, %v21461_v20 }
0x282e   :  { %10734 = vmatpush1.bf16.msra.mxu1 %v19045_v47  ;;  %v5547_v47 = vrot.slane %v5405_v60, %v21975_v48  ;;  %v7363_v31 = vsel %vm7299_vm9, %v22390_v27, 0.0 }
0x282f   :  { %10735 = vmatprep.subr.bf16.mxu1 %v19053_v34  ;;  %v19098_v34 = vld [vmem:[#allocation33 + $0x704] ss:$8 sps:$4 sm:$0xff]  }
0x2830   :  { %11132 = vmatpush1.bf16.msra.mxu0 %v19048_v62  ;;  %v19090_v62 = vld [vmem:[#allocation33 + $0x6f0] ss:$8 sps:$4 sm:$0xff]  }
0x2831   :  { %11133 = vmatprep.subr.bf16.mxu0 %v19056_v25  ;;  %v22397_v25 = vadd.f32 %v22058_v17, %v5535_v35  ;;  %v7365_v17 = vadd.f32 %v7364_v37, %v7363_v31  ;;  %v8128_v35 = vrot.slane %v22429_v59, %v21978_v49 }
0x2832   :  { %10736 = vmatpush1.bf16.msra.mxu1 %v19051_v63 }
0x2833   :  { %10737 = vmatprep.subr.bf16.mxu1 %v19059_v41  ;;  %v7358_v41 = vadd.f32 %v7357_v53, %v7356_v4 }
0x2834   :  { %11134 = vmatpush1.bf16.msra.mxu0 %v19054_v21 }
0x2835   :  { %11135 = vmatprep.subr.bf16.mxu0 %v19062_v24  ;;  %v22406_v24 = vadd.f32 %v22062_v2, %v5547_v47  ;;  %v8124_v47 = vrot.slane %v22429_v59, %v21975_v48 }
0x2836   :  { %10738 = vmatpush1.bf16.msra.mxu1 %v19057_v43 }
0x2837   :  { %10739 = vmatprep.subr.bf16.mxu1 %v19065_v50  ;;  %v7366_v2 = vsel %vm7299_vm9, %v22406_v24, 0.0 }
0x2838   :  { %11136 = vmatpush1.bf16.msra.mxu0 %v19060_v9  ;;  %v5551_v9 = vrot.slane %v5405_v60, %v21978_v49 }
0x2839   :  { %11137 = vmatprep.subr.bf16.mxu0 %v19068_v42  ;;  %v7359_v42 = vsel %vm7299_vm9, %v22397_v25, 0.0 }
0x283a   :  { %10740 = vmatpush1.bf16.msra.mxu1 %v19063_v57  ;;  %v22432_v18 = vadd.f32 %v22066_v38, %v5551_v9 }
0x283b   :  { %10741 = vmatprep.subr.bf16.mxu1 %v19071_v56  ;;  %v22413_v56 = vadd.f32 %v7359_v42, %v7358_v41 }
0x283c   :  { %11138 = vmatpush1.bf16.msra.mxu0 %v19066_v5  ;;  %v22411_v5 = vld [vmem:[#allocation30 + $0x8] sm:$0xf] }
0x283d   :  { %11139 = vmatprep.subr.bf16.mxu0 %v19074_v23  ;;  %v7799_v26 = vrot.slane %v22411_v5, %v21975_v48 }
0x283e   :  { %10742 = vmatpush1.bf16.msra.mxu1 %v19069_v10 }
0x283f   :  { %10743 = vmatprep.subr.bf16.mxu1 %v19077_v6  ;;  %v22434_v6 = vadd.f32 %v7366_v2, %v7365_v17 }
0x2840   :  { %11140 = vmatpush1.bf16.msra.mxu0 %v19072_v8 }
0x2841   :  { %11141 = vmatprep.subr.bf16.mxu0 %v19080_v36 }
0x2842   :  { %10744 = vmatpush1.bf16.msra.mxu1 %v19075_v44  ;;  %v22446_v44 = vld [vmem:[#allocation30 + $0xc] sm:$0xf] }
0x2843   :  { %10754 = vmatprep.subr.bf16.mxu1 %v19083_v33  ;;  %v8120_v33 = vrot.slane %v22429_v59, %v21972_v54  ;;  %v7811_v4 = vrot.slane %v22446_v44, %v21972_v54  ;;  %v7819_v37 = vrot.slane %v22446_v44, %v21978_v49  ;;  %v22489_v59 = vld [vmem:[#allocation31 + $0xc] sm:$0xf] }
0x2844   :  { %11142 = vmatpush1.bf16.msra.mxu0 %v19078_v40 }
0x2845   :  { %11143 = vmatprep.subr.bf16.mxu0 %v19086_v0  ;;  %v7803_v0 = vrot.slane %v22411_v5, %v21978_v49 }
0x2848   :  { %11144 = vmatpush1.bf16.msra.mxu0 %v19084_v30  ;;  %v7561_v63 = vpop.xlane.xlu1 %7560 }
0x2849   :  { %11145 = vmatprep.subr.bf16.mxu0 %v19092_v61  ;;  %v7654_v21 = vmul.f32 0.001953125, %v7561_v63  ;;  %v7807_v63 = vrot.slane %v22446_v44, %v21461_v20 }
0x284b   :  { %v7667_v43 = vadd.f32 1e-05, %v7654_v21  ;;  %v7815_v21 = vrot.slane %v22446_v44, %v21975_v48  ;;  %v19101_v44 = vld [vmem:[#allocation33 + $0x534] ss:$8 sps:$4 sm:$0xff]  }
0x284c   :  { %11146 = vmatpush1.bf16.msra.mxu0 %v19090_v62  ;;  %v7344_v50 = vpop.xlane.xlu1 %7343 }
0x284d   :  { %11156 = vmatprep.subr.bf16.mxu0 %v19098_v34  ;;  %20145 = vrsqrt.f32 %v7667_v43  ;;  %v7422_v57 = vmul.f32 0.001953125, %v7344_v50 }
0x284f   :  { %v22418_v23 = vsub.f32 %v22207_v22, %v7422_v57  ;;  %v22421_v51 = vsub.f32 %v22210_v7, %v7422_v57  ;;  %v22424_v10 = vsub.f32 %v22221_v55, %v7422_v57  ;;  %v22427_v8 = vsub.f32 %v22231_v52, %v7422_v57 }
0x2850   :  { %v7570_v36 = vpop.xlane.xlu0 %7569  ;;  %v7795_v22 = vrot.slane %v22411_v5, %v21972_v54  ;;  %v7791_v7 = vrot.slane %v22411_v5, %v21461_v20 }
0x2851   :  { %v7499_v55 = vmul.f32 %v22418_v23, %v22418_v23  ;;  %v7500_v52 = vmul.f32 %v22421_v51, %v22421_v51  ;;  %v7655_v60 = vmul.f32 0.001953125, %v7570_v36  ;;  %v7501_v38 = vmul.f32 %v22424_v10, %v22424_v10 }
0x2852   :  { %v7502_v40 = vmul.f32 %v22427_v8, %v22427_v8 }
0x2853   :  { %v7668_v12 = vadd.f32 1e-05, %v7655_v60  ;;  %v7571_v39 = vsel %vm7299_vm9, %v7499_v55, 0.0  ;;  %v7572_v30 = vsel %vm7299_vm9, %v7500_v52, 0.0  ;;  %v7574_v34 = vsel %vm7299_vm9, %v7501_v38, 0.0 }
0x2854   :  { %v7353_v16 = vpop.xlane.xlu0 %7352  ;;  %v7573_v61 = vadd.f32 %v7572_v30, %v7571_v39  ;;  %v7576_v31 = vsel %vm7299_vm9, %v7502_v40, 0.0  ;;  %v8136_v60 = vrot.slane %v22489_v59, %v21972_v54  ;;  %v8132_v38 = vrot.slane %v22489_v59, %v21461_v20 }
0x2855   :  { %20147 = vrsqrt.f32 %v7668_v12  ;;  %v7423_v62 = vmul.f32 0.001953125, %v7353_v16 }
0x2856   :  { %v7575_v53 = vadd.f32 %v7574_v34, %v7573_v61 }
0x2857   :  { %v20146_v41 = vpop.eup %20145  ;;  %v22475_v43 = vsub.f32 %v22224_v19, %v7423_v62  ;;  %v22478_v17 = vsub.f32 %v22227_v58, %v7423_v62  ;;  %v22481_v9 = vsub.f32 %v22240_v46, %v7423_v62  ;;  %v22484_v50 = vsub.f32 %v22266_v14, %v7423_v62 }
0x2858   :  { %v7577_v42 = vadd.f32 %v7576_v31, %v7575_v53  ;;  %v7700_v57 = vmul.f32 %v20146_v41, %v22255_v28  ;;  %v7699_v5 = vmul.f32 %v20146_v41, %v22252_v45  ;;  %v7702_v2 = vmul.f32 %v20146_v41, %v22261_v13  ;;  %v23666_v31 = vld [vmem:[#allocation87_spill] sm:$0xff] }
0x2859   :  { %v7503_v19 = vmul.f32 %v22475_v43, %v22475_v43  ;;  %v7504_v58 = vmul.f32 %v22478_v17, %v22478_v17  ;;  %v7505_v46 = vmul.f32 %v22481_v9, %v22481_v9  ;;  %v7506_v14 = vmul.f32 %v22484_v50, %v22484_v50 }
0x285a   :  { %7578 = vadd.xlane.f32.xlu1 %v7577_v42  ;;  %v8025_v28 = vmul.f32 %v7795_v22, %v7700_v57  ;;  %v8024_v36 = vmul.f32 %v7791_v7, %v7699_v5  ;;  %v8027_v45 = vmul.f32 %v7803_v0, %v7702_v2  ;;  %v7701_v13 = vmul.f32 %v20146_v41, %v22258_v29  ;;  %v23667_v42 = vld [vmem:[#allocation86_spill] sm:$0xff] }
0x285b   :  { %v7580_v55 = vsel %vm7299_vm9, %v7503_v19, 0.0  ;;  %v7581_v52 = vsel %vm7299_vm9, %v7504_v58, 0.0  ;;  %v7583_v22 = vsel %vm7299_vm9, %v7505_v46, 0.0  ;;  %v7585_v7 = vsel %vm7299_vm9, %v7506_v14, 0.0  ;;  %v23668_v19 = vld [vmem:[#allocation89_spill] sm:$0xff] }
0x285c   :  { %v7582_v40 = vadd.f32 %v7581_v52, %v7580_v55  ;;  %v8350_v12 = vadd.f32 %v8120_v33, %v8025_v28  ;;  %v8349_v39 = vadd.f32 %v8116_v15, %v8024_v36  ;;  %v8352_v30 = vadd.f32 %v8128_v35, %v8027_v45  ;;  %v19089_v28 = vld [vmem:[#allocation33 + $0x514] ss:$8 sps:$4 sm:$0xff]  }
0x285d   :  { %v8144_v29 = vrot.slane %v22489_v59, %v21978_v49  ;;  %v8026_v0 = vmul.f32 %v7799_v26, %v7701_v13  ;;  %v19081_v26 = vld [vmem:[#allocation33 + $0x500] ss:$8 sps:$4 sm:$0xff]   ;;  %v7368_v46 = vsel %vm7299_vm9, %v22432_v18, 0.0 }
0x285e   :  { %7361 = vadd.xlane.f32.xlu1 %v22413_v56  ;;  %v7584_v16 = vadd.f32 %v7583_v22, %v7582_v40  ;;  %vm8402_vm2 = vcmp.gt.f32.partialorder %v8350_v12, 0.0  ;;  %v8454_v61 = vmul.f32 0.01, %v8350_v12  ;;  %vm8401_vm3 = vcmp.gt.f32.partialorder %v8349_v39, 0.0  ;;  %v23669_v55 = vld [vmem:[#allocation88_spill] sm:$0xff] }
0x285f   :  { %v20148_v62 = vpop.eup %20147  ;;  %v8453_v34 = vmul.f32 0.01, %v8349_v39  ;;  %vm8404_vm4 = vcmp.gt.f32.partialorder %v8352_v30, 0.0  ;;  %v8456_v33 = vmul.f32 0.01, %v8352_v30  ;;  %v22511_v15 = vadd.f32 %v8124_v47, %v8026_v0 }
0x2860   :  { %v7586_v35 = vadd.f32 %v7585_v7, %v7584_v16  ;;  %v8506_v53 = vsel %vm8402_vm2, %v8350_v12, %v8454_v61  ;;  %v7704_v41 = vmul.f32 %v20148_v62, %v23666_v31  ;;  %v7703_v57 = vmul.f32 %v20148_v62, %v23667_v42  ;;  %v19087_v22 = vld [vmem:[#allocation33 + $0x510] ss:$8 sps:$4 sm:$0xff]   ;;  %v19095_v7 = vld [vmem:[#allocation33 + $0x524] ss:$8 sps:$4 sm:$0xff]   ;;  %v19093_v16 = vld [vmem:[#allocation33 + $0x520] ss:$8 sps:$4 sm:$0xff]  }
0x2861   :  { %v8558_v5 = vpack.c.bf16 %v8506_v53, %v8506_v53  ;;  %v8505_v2 = vsel %vm8401_vm3, %v8349_v39, %v8453_v34  ;;  %v8508_v56 = vsel %vm8404_vm4, %v8352_v30, %v8456_v33  ;;  %v7706_v58 = vmul.f32 %v20148_v62, %v23668_v19  ;;  %v19102_v53 = vld [vmem:[#allocation33 + $0x710] ss:$8 sps:$4 sm:$0xff]   ;;  %v19107_v31 = vld [vmem:[#allocation33 + $0x544] ss:$8 sps:$4 sm:$0xff]   ;;  %v19105_v42 = vld [vmem:[#allocation33 + $0x540] ss:$8 sps:$4 sm:$0xff]  }
0x2862   :  { %7587 = vadd.xlane.f32.xlu0 %v7586_v35  ;;  %v8557_v14 = vpack.c.bf16 %v8505_v2, %v8505_v2  ;;  %v8029_v47 = vmul.f32 %v7811_v4, %v7704_v41  ;;  %v8028_v36 = vmul.f32 %v7807_v63, %v7703_v57  ;;  %v8560_v45 = vpack.c.bf16 %v8508_v56, %v8508_v56  ;;  %v19099_v35 = vld [vmem:[#allocation33 + $0x530] ss:$8 sps:$4 sm:$0xff]   ;;  %v19110_v41 = vld [vmem:[#allocation33 + $0x724] ss:$8 sps:$4 sm:$0xff]   ;;  %v19108_v57 = vld [vmem:[#allocation33 + $0x720] ss:$8 sps:$4 sm:$0xff]  }
0x2863   :  { %10745 = vmatprep.mubr.bf16.mxu1 %v8558_v5  ;;  %v8031_v13 = vmul.f32 %v7819_v37, %v7706_v58  ;;  %v7705_v52 = vmul.f32 %v20148_v62, %v23669_v55  ;;  %v8140_v40 = vrot.slane %v22489_v59, %v21975_v48  ;;  %v7369_v12 = vadd.f32 %v7368_v46, %v22434_v6  ;;  %v19113_v5 = vld [vmem:[#allocation33 + $0x554] ss:$8 sps:$4 sm:$0xff]   ;;  %v19111_v2 = vld [vmem:[#allocation33 + $0x550] ss:$8 sps:$4 sm:$0xff]   ;;  %v19119_v19 = vld [vmem:[#allocation33 + $0x564] ss:$8 sps:$4 sm:$0xff]  }
0x2864   :  { %10746 = vmatmul.mubr.bf16.vlgmr.msra.gmra.mrb[108].mxu1 %v8557_v14  ;;  %v8354_v39 = vadd.f32 %v8136_v60, %v8029_v47  ;;  %v8353_v30 = vadd.f32 %v8132_v38, %v8028_v36  ;;  %v19114_v56 = vld [vmem:[#allocation33 + $0x730] ss:$8 sps:$4 sm:$0xff]   ;;  %v19122_v58 = vld [vmem:[#allocation33 + $0x744] ss:$8 sps:$4 sm:$0xff]   ;;  %v19117_v46 = vld [vmem:[#allocation33 + $0x560] ss:$8 sps:$4 sm:$0xff]  }
0x2865   :  { %10755 = vmatpush1.bf16.msra.mxu1 %v19081_v26  ;;  %10786 = vmatprep.mubr.bf16.mxu1 %v8560_v45  ;;  %v8356_v0 = vadd.f32 %v8144_v29, %v8031_v13  ;;  %v8030_v4 = vmul.f32 %v7815_v21, %v7705_v52  ;;  %v19096_v29 = vld [vmem:[#allocation33 + $0x700] ss:$8 sps:$4 sm:$0xff]   ;;  %v19104_v21 = vld [vmem:[#allocation33 + $0x714] ss:$8 sps:$4 sm:$0xff]   ;;  %v19123_v36 = vld [vmem:[#allocation33 + $0x570] ss:$8 sps:$4 sm:$0xff]  }
0x2866   :  { %7370 = vadd.xlane.f32.xlu0 %v7369_v12  ;;  %10756 = vmatprep.subr.bf16.mxu1 %v19089_v28  ;;  %vm8406_vm5 = vcmp.gt.f32.partialorder %v8354_v39, 0.0  ;;  %v8458_v63 = vmul.f32 0.01, %v8354_v39  ;;  %vm8405_vm6 = vcmp.gt.f32.partialorder %v8353_v30, 0.0  ;;  %v8457_v37 = vmul.f32 0.01, %v8353_v30 }
0x2867   :  { %vm8408_vm7 = vcmp.gt.f32.partialorder %v8356_v0, 0.0  ;;  %v8460_v6 = vmul.f32 0.01, %v8356_v0  ;;  %v22528_v59 = vadd.f32 %v8140_v40, %v8030_v4  ;;  %v19116_v26 = vld [vmem:[#allocation33 + $0x734] ss:$8 sps:$4 sm:$0xff]   ;;  %vm8403_vm8 = vcmp.gt.f32.partialorder %v22511_v15, 0.0 }
0x2868   :  { %v8510_v60 = vsel %vm8406_vm5, %v8354_v39, %v8458_v63  ;;  %v8509_v38 = vsel %vm8405_vm6, %v8353_v30, %v8457_v37  ;;  %v19120_v14 = vld [vmem:[#allocation33 + $0x740] ss:$8 sps:$4 sm:$0xff]   ;;  %v19125_v28 = vld [vmem:[#allocation33 + $0x574] ss:$8 sps:$4 sm:$0xff]   ;;  %v19126_v45 = vld [vmem:[#allocation33 + $0x750] ss:$8 sps:$4 sm:$0xff]  }
0x2869   :  { %10757 = vmatpush1.bf16.msra.mxu1 %v19087_v22  ;;  %v8562_v61 = vpack.c.bf16 %v8510_v60, %v8510_v60  ;;  %v8561_v62 = vpack.c.bf16 %v8509_v38, %v8509_v38  ;;  %v8512_v34 = vsel %vm8408_vm7, %v8356_v0, %v8460_v6  ;;  %v19128_v47 = vld [vmem:[#allocation33 + $0x754] ss:$8 sps:$4 sm:$0xff]   ;;  %v19131_v13 = vld [vmem:[#allocation33 + $0x584] ss:$8 sps:$4 sm:$0xff]   ;;  %v19129_v52 = vld [vmem:[#allocation33 + $0x580] ss:$8 sps:$4 sm:$0xff]  }
0x286a   :  { %10758 = vmatprep.subr.bf16.mxu1 %v19095_v7  ;;  %v8564_v33 = vpack.c.bf16 %v8512_v34, %v8512_v34  ;;  %v19134_v55 = vld [vmem:[#allocation33 + $0x764] ss:$8 sps:$4 sm:$0xff]   ;;  %v19132_v40 = vld [vmem:[#allocation33 + $0x760] ss:$8 sps:$4 sm:$0xff]   ;;  %v19137_v12 = vld [vmem:[#allocation33 + $0x594] ss:$8 sps:$4 sm:$0xff]  }
0x286b   :  { %11147 = vmatprep.mubr.bf16.mxu0 %v8562_v61  ;;  %v19140_v39 = vld [vmem:[#allocation33 + $0x774] ss:$8 sps:$4 sm:$0xff]   ;;  %v19135_v30 = vld [vmem:[#allocation33 + $0x590] ss:$8 sps:$4 sm:$0xff]   ;;  %v19143_v7 = vld [vmem:[#allocation33 + $0x5a4] ss:$8 sps:$4 sm:$0xff]  }
0x286c   :  { %11148 = vmatmul.mubr.bf16.vlgmr.msra.gmra.mrb[104].mxu0 %v8561_v62  ;;  %v19138_v22 = vld [vmem:[#allocation33 + $0x770] ss:$8 sps:$4 sm:$0xff]   ;;  %v19146_v0 = vld [vmem:[#allocation33 + $0x784] ss:$8 sps:$4 sm:$0xff]   ;;  %v19141_v4 = vld [vmem:[#allocation33 + $0x5a0] ss:$8 sps:$4 sm:$0xff]  }
0x286d   :  { %10759 = vmatpush1.bf16.msra.mxu1 %v19093_v16  ;;  %11157 = vmatpush1.bf16.msra.mxu0 %v19096_v29  ;;  %v19144_v63 = vld [vmem:[#allocation33 + $0x780] ss:$8 sps:$4 sm:$0xff]   ;;  %v19149_v37 = vld [vmem:[#allocation33 + $0x5b4] ss:$8 sps:$4 sm:$0xff]   ;;  %v19147_v60 = vld [vmem:[#allocation33 + $0x5b0] ss:$8 sps:$4 sm:$0xff]  }
0x286e   :  { %11188 = vmatprep.mubr.bf16.mxu0 %v8564_v33  ;;  %10760 = vmatprep.subr.bf16.mxu1 %v19101_v44  ;;  %v19152_v6 = vld [vmem:[#allocation33 + $0x794] ss:$8 sps:$4 sm:$0xff]   ;;  %v19150_v38 = vld [vmem:[#allocation33 + $0x790] ss:$8 sps:$4 sm:$0xff]   ;;  %v19155_v16 = vld [vmem:[#allocation33 + $0x5c4] ss:$8 sps:$4 sm:$0xff]  }
0x286f   :  { %11158 = vmatprep.subr.bf16.mxu0 %v19104_v21  ;;  %v19158_v61 = vld [vmem:[#allocation33 + $0x7a4] ss:$8 sps:$4 sm:$0xff]   ;;  %v19153_v29 = vld [vmem:[#allocation33 + $0x5c0] ss:$8 sps:$4 sm:$0xff]   ;;  %v19161_v34 = vld [vmem:[#allocation33 + $0x5d4] ss:$8 sps:$4 sm:$0xff]  }
0x2870   :  { %v19156_v62 = vld [vmem:[#allocation33 + $0x7a0] ss:$8 sps:$4 sm:$0xff]   ;;  %v19164_v44 = vld [vmem:[#allocation33 + $0x7b4] ss:$8 sps:$4 sm:$0xff]   ;;  %v19159_v21 = vld [vmem:[#allocation33 + $0x5d0] ss:$8 sps:$4 sm:$0xff]  }
0x2871   :  { %10761 = vmatpush1.bf16.msra.mxu1 %v19099_v35  ;;  %11159 = vmatpush1.bf16.msra.mxu0 %v19102_v53  ;;  %v19162_v33 = vld [vmem:[#allocation33 + $0x7b0] ss:$8 sps:$4 sm:$0xff]   ;;  %v19167_v35 = vld [vmem:[#allocation33 + $0x5e4] ss:$8 sps:$4 sm:$0xff]   ;;  %vm8407_vm10 = vcmp.gt.f32.partialorder %v22528_v59, 0.0 }
0x2872   :  { %10762 = vmatprep.subr.bf16.mxu1 %v19107_v31  ;;  %11160 = vmatprep.subr.bf16.mxu0 %v19110_v41  ;;  %v19170_v53 = vld [vmem:[#allocation33 + $0x7c4] ss:$8 sps:$4 sm:$0xff]   ;;  %v19165_v31 = vld [vmem:[#allocation33 + $0x5e0] ss:$8 sps:$4 sm:$0xff]  }
0x2873   :  { %v19168_v41 = vld [vmem:[#allocation33 + $0x7c0] ss:$8 sps:$4 sm:$0xff]  }
0x2875   :  { %10763 = vmatpush1.bf16.msra.mxu1 %v19105_v42  ;;  %11161 = vmatpush1.bf16.msra.mxu0 %v19108_v57  ;;  %v19173_v42 = vld [vmem:[#allocation33 + $0x5f4] ss:$8 sps:$4 sm:$0xff]  }
0x2876   :  { %10764 = vmatprep.subr.bf16.mxu1 %v19113_v5  ;;  %11162 = vmatprep.subr.bf16.mxu0 %v19116_v26  ;;  %v19176_v57 = vld [vmem:[#allocation33 + $0x7d4] ss:$8 sps:$4 sm:$0xff]   ;;  %v8455_v5 = vmul.f32 0.01, %v22511_v15  ;;  %v19171_v26 = vld [vmem:[#allocation33 + $0x5f0] ss:$8 sps:$4 sm:$0xff]  }
0x2879   :  { %10765 = vmatpush1.bf16.msra.mxu1 %v19111_v2  ;;  %11163 = vmatpush1.bf16.msra.mxu0 %v19114_v56  ;;  %v19174_v2 = vld [vmem:[#allocation33 + $0x7d0] ss:$8 sps:$4 sm:$0xff]   ;;  %v19179_v56 = vld [vmem:[#allocation33 + $0x7e4] ss:$8 sps:$4 sm:$0xff]  }
0x287a   :  { %10766 = vmatprep.subr.bf16.mxu1 %v19119_v19  ;;  %11164 = vmatprep.subr.bf16.mxu0 %v19122_v58  ;;  %v19185_v19 = vld [vmem:[#allocation33 + $0x804] ss:$8 sps:$4 sm:$0xff]   ;;  %v8507_v58 = vsel %vm8403_vm8, %v22511_v15, %v8455_v5  ;;  %v19233_v5 = vld [vmem:[#allocation33 + $0x894] ss:$8 sps:$4 sm:$0xff]  }
0x287b   :  { %v19191_v15 = vld [vmem:[#allocation33 + $0x824] ss:$8 sps:$4 sm:$0xff]  }
0x287d   :  { %10767 = vmatpush1.bf16.msra.mxu1 %v19117_v46  ;;  %11165 = vmatpush1.bf16.msra.mxu0 %v19120_v14  ;;  %v19177_v46 = vld [vmem:[#allocation33 + $0x7e0] ss:$8 sps:$4 sm:$0xff]  }
0x287e   :  { %10768 = vmatprep.subr.bf16.mxu1 %v19125_v28  ;;  %11166 = vmatprep.subr.bf16.mxu0 %v19128_v47  ;;  %v19183_v14 = vld [vmem:[#allocation33 + $0x800] ss:$8 sps:$4 sm:$0xff]   ;;  %v8559_v28 = vpack.c.bf16 %v8507_v58, %v8507_v58  ;;  %v19182_v47 = vld [vmem:[#allocation33 + $0x7f4] ss:$8 sps:$4 sm:$0xff]   ;;  %v19242_v58 = vld [vmem:[#allocation33 + $0xa84] ss:$8 sps:$4 sm:$0xff]  }
0x2881   :  { %10769 = vmatpush1.bf16.msra.mxu1 %v19123_v36  ;;  %11167 = vmatpush1.bf16.msra.mxu0 %v19126_v45  ;;  %v19188_v36 = vld [vmem:[#allocation33 + $0x814] ss:$8 sps:$4 sm:$0xff]   ;;  %v8459_v45 = vmul.f32 0.01, %v22528_v59 }
0x2882   :  { %10770 = vmatprep.subr.bf16.mxu1 %v19131_v13  ;;  %11168 = vmatprep.subr.bf16.mxu0 %v19134_v55  ;;  %v19180_v13 = vld [vmem:[#allocation33 + $0x7f0] ss:$8 sps:$4 sm:$0xff]  }
0x2883   :  { %v19186_v55 = vld [vmem:[#allocation33 + $0x810] ss:$8 sps:$4 sm:$0xff]  }
0x2885   :  { %10771 = vmatpush1.bf16.msra.mxu1 %v19129_v52  ;;  %11169 = vmatpush1.bf16.msra.mxu0 %v19132_v40  ;;  %v19194_v52 = vld [vmem:[#allocation33 + $0xa04] ss:$8 sps:$4 sm:$0xff]   ;;  %v8511_v40 = vsel %vm8407_vm10, %v22528_v59, %v8459_v45  ;;  %v19201_v59 = vld [vmem:[#allocation33 + $0x840] ss:$8 sps:$4 sm:$0xff]   ;;  %v19246_v45 = vld [vmem:[#allocation33 + $0xa90] ss:$8 sps:$4 sm:$0xff]  }
0x2886   :  { %10772 = vmatprep.subr.bf16.mxu1 %v19137_v12  ;;  %11170 = vmatprep.subr.bf16.mxu0 %v19140_v39  ;;  %v19189_v12 = vld [vmem:[#allocation33 + $0x820] ss:$8 sps:$4 sm:$0xff]  }
0x2887   :  { %v19192_v39 = vld [vmem:[#allocation33 + $0xa00] ss:$8 sps:$4 sm:$0xff]  }
0x2889   :  { %10773 = vmatpush1.bf16.msra.mxu1 %v19135_v30  ;;  %11171 = vmatpush1.bf16.msra.mxu0 %v19138_v22  ;;  %v8563_v30 = vpack.c.bf16 %v8511_v40, %v8511_v40  ;;  %v19197_v22 = vld [vmem:[#allocation33 + $0x834] ss:$8 sps:$4 sm:$0xff]  }
0x288a   :  { %10774 = vmatprep.subr.bf16.mxu1 %v19143_v7  ;;  %11172 = vmatprep.subr.bf16.mxu0 %v19146_v0  ;;  %v19200_v7 = vld [vmem:[#allocation33 + $0xa14] ss:$8 sps:$4 sm:$0xff]   ;;  %v19195_v0 = vld [vmem:[#allocation33 + $0x830] ss:$8 sps:$4 sm:$0xff]  }
0x288b   :  { %v19257_v40 = vld [vmem:[#allocation33 + $0x8d4] ss:$8 sps:$4 sm:$0xff]  }
0x288d   :  { %10775 = vmatpush1.bf16.msra.mxu1 %v19141_v4  ;;  %11173 = vmatpush1.bf16.msra.mxu0 %v19144_v63  ;;  %v19198_v4 = vld [vmem:[#allocation33 + $0xa10] ss:$8 sps:$4 sm:$0xff]   ;;  %v19203_v63 = vld [vmem:[#allocation33 + $0x844] ss:$8 sps:$4 sm:$0xff]  }
0x288e   :  { %10776 = vmatprep.subr.bf16.mxu1 %v19149_v37  ;;  %11174 = vmatprep.subr.bf16.mxu0 %v19152_v6  ;;  %v19206_v37 = vld [vmem:[#allocation33 + $0xa24] ss:$8 sps:$4 sm:$0xff]   ;;  %v19204_v6 = vld [vmem:[#allocation33 + $0xa20] ss:$8 sps:$4 sm:$0xff]  }
0x2891   :  { %10777 = vmatpush1.bf16.msra.mxu1 %v19147_v60  ;;  %11175 = vmatpush1.bf16.msra.mxu0 %v19150_v38  ;;  %v19209_v60 = vld [vmem:[#allocation33 + $0x854] ss:$8 sps:$4 sm:$0xff]  }
0x2892   :  { %10778 = vmatprep.subr.bf16.mxu1 %v19155_v16  ;;  %11176 = vmatprep.subr.bf16.mxu0 %v19158_v61  ;;  %v19212_v38 = vld [vmem:[#allocation33 + $0xa34] ss:$8 sps:$4 sm:$0xff]   ;;  %v19207_v16 = vld [vmem:[#allocation33 + $0x850] ss:$8 sps:$4 sm:$0xff]  }
0x2893   :  { %v19210_v61 = vld [vmem:[#allocation33 + $0xa30] ss:$8 sps:$4 sm:$0xff]  }
0x2895   :  { %10779 = vmatpush1.bf16.msra.mxu1 %v19153_v29  ;;  %11177 = vmatpush1.bf16.msra.mxu0 %v19156_v62  ;;  %v19215_v29 = vld [vmem:[#allocation33 + $0x864] ss:$8 sps:$4 sm:$0xff]  }
0x2896   :  { %10780 = vmatprep.subr.bf16.mxu1 %v19161_v34  ;;  %11178 = vmatprep.subr.bf16.mxu0 %v19164_v44  ;;  %v19218_v62 = vld [vmem:[#allocation33 + $0xa44] ss:$8 sps:$4 sm:$0xff]   ;;  %v19213_v34 = vld [vmem:[#allocation33 + $0x860] ss:$8 sps:$4 sm:$0xff]  }
0x2897   :  { %v19216_v44 = vld [vmem:[#allocation33 + $0xa40] ss:$8 sps:$4 sm:$0xff]  }
0x2899   :  { %10781 = vmatpush1.bf16.msra.mxu1 %v19159_v21  ;;  %11179 = vmatpush1.bf16.msra.mxu0 %v19162_v33  ;;  %v19221_v21 = vld [vmem:[#allocation33 + $0x874] ss:$8 sps:$4 sm:$0xff]  }
0x289a   :  { %10782 = vmatprep.subr.bf16.mxu1 %v19167_v35  ;;  %11180 = vmatprep.subr.bf16.mxu0 %v19170_v53  ;;  %v19224_v33 = vld [vmem:[#allocation33 + $0xa54] ss:$8 sps:$4 sm:$0xff]   ;;  %v19219_v35 = vld [vmem:[#allocation33 + $0x870] ss:$8 sps:$4 sm:$0xff]  }
0x289b   :  { %v19222_v53 = vld [vmem:[#allocation33 + $0xa50] ss:$8 sps:$4 sm:$0xff]  }
0x289d   :  { %10783 = vmatpush1.bf16.msra.mxu1 %v19165_v31  ;;  %11181 = vmatpush1.bf16.msra.mxu0 %v19168_v41  ;;  %v19227_v31 = vld [vmem:[#allocation33 + $0x884] ss:$8 sps:$4 sm:$0xff]  }
0x289e   :  { %10784 = vmatprep.subr.bf16.mxu1 %v19173_v42  ;;  %11182 = vmatprep.subr.bf16.mxu0 %v19176_v57  ;;  %v19230_v41 = vld [vmem:[#allocation33 + $0xa64] ss:$8 sps:$4 sm:$0xff]   ;;  %v19225_v42 = vld [vmem:[#allocation33 + $0x880] ss:$8 sps:$4 sm:$0xff]  }
0x289f   :  { %v19228_v57 = vld [vmem:[#allocation33 + $0xa60] ss:$8 sps:$4 sm:$0xff]  }
0x28a1   :  { %10785 = vmatpush1.bf16.msra.mxu1 %v19171_v26  ;;  %11183 = vmatpush1.bf16.msra.mxu0 %v19174_v2  ;;  %v19236_v26 = vld [vmem:[#allocation33 + $0xa74] ss:$8 sps:$4 sm:$0xff]   ;;  %v19231_v2 = vld [vmem:[#allocation33 + $0x890] ss:$8 sps:$4 sm:$0xff]  }
0x28a2   :  { %11184 = vmatprep.subr.bf16.mxu0 %v19179_v56  ;;  %11517 = vmatprep.subr.bf16.mxu1 %v19185_v19  ;;  %v19234_v56 = vld [vmem:[#allocation33 + $0xa70] ss:$8 sps:$4 sm:$0xff]   ;;  %v19239_v19 = vld [vmem:[#allocation33 + $0x8a4] ss:$8 sps:$4 sm:$0xff]  }
0x28a4   :  { %10787 = vmatmul.mubr.bf16.vlgmr.msra.gmra.mrb[108].mxu1 %v8559_v28  ;;  %v19245_v28 = vld [vmem:[#allocation33 + $0x8b4] ss:$8 sps:$4 sm:$0xff]  }
0x28a5   :  { %11185 = vmatpush1.bf16.msra.mxu0 %v19177_v46  ;;  %11518 = vmatpush1.bf16.msra.mxu1 %v19183_v14  ;;  %v19237_v46 = vld [vmem:[#allocation33 + $0x8a0] ss:$8 sps:$4 sm:$0xff]  }
0x28a6   :  { %11186 = vmatprep.subr.bf16.mxu0 %v19182_v47  ;;  %11519 = vmatprep.subr.bf16.mxu1 %v19188_v36  ;;  %v19240_v14 = vld [vmem:[#allocation33 + $0xa80] ss:$8 sps:$4 sm:$0xff]   ;;  %v19248_v47 = vld [vmem:[#allocation33 + $0xa94] ss:$8 sps:$4 sm:$0xff]   ;;  %v19243_v36 = vld [vmem:[#allocation33 + $0x8b0] ss:$8 sps:$4 sm:$0xff]  }
0x28a9   :  { %11187 = vmatpush1.bf16.msra.mxu0 %v19180_v13  ;;  %11520 = vmatpush1.bf16.msra.mxu1 %v19186_v55  ;;  %v19251_v13 = vld [vmem:[#allocation33 + $0x8c4] ss:$8 sps:$4 sm:$0xff]  }
0x28aa   :  { %11521 = vmatprep.subr.bf16.mxu1 %v19191_v15  ;;  %11919 = vmatprep.subr.bf16.mxu0 %v19194_v52  ;;  %v19254_v55 = vld [vmem:[#allocation33 + $0xaa4] ss:$8 sps:$4 sm:$0xff]   ;;  %v19249_v15 = vld [vmem:[#allocation33 + $0x8c0] ss:$8 sps:$4 sm:$0xff]  }
0x28ab   :  { %v19252_v52 = vld [vmem:[#allocation33 + $0xaa0] ss:$8 sps:$4 sm:$0xff]  }
0x28ac   :  { %11189 = vmatmul.mubr.bf16.vlgmr.msra.gmra.mrb[104].mxu0 %v8563_v30  ;;  %v19258_v30 = vld [vmem:[#allocation33 + $0xab0] ss:$8 sps:$4 sm:$0xff]  }
0x28ad   :  { %11522 = vmatpush1.bf16.msra.mxu1 %v19189_v12  ;;  %11920 = vmatpush1.bf16.msra.mxu0 %v19192_v39  ;;  %v19260_v12 = vld [vmem:[#allocation33 + $0xab4] ss:$8 sps:$4 sm:$0xff]   ;;  %v19255_v39 = vld [vmem:[#allocation33 + $0x8d0] ss:$8 sps:$4 sm:$0xff]  }
0x28ae   :  { %11523 = vmatprep.subr.bf16.mxu1 %v19197_v22  ;;  %11921 = vmatprep.subr.bf16.mxu0 %v19200_v7  ;;  %v19263_v22 = vld [vmem:[#allocation33 + $0x8e4] ss:$8 sps:$4 sm:$0xff]  }
0x28af   :  { %v19266_v7 = vld [vmem:[#allocation33 + $0xac4] ss:$8 sps:$4 sm:$0xff]  }
0x28b1   :  { %11524 = vmatpush1.bf16.msra.mxu1 %v19195_v0  ;;  %11922 = vmatpush1.bf16.msra.mxu0 %v19198_v4  ;;  %v5406_v0 = vld [vmem:[#allocation28 + $0x20] sm:$0xf] }
0x28b2   :  { %11525 = vmatprep.subr.bf16.mxu1 %v19203_v63  ;;  %11923 = vmatprep.subr.bf16.mxu0 %v19206_v37  ;;  %v19261_v37 = vld [vmem:[#allocation33 + $0x8e0] ss:$8 sps:$4 sm:$0xff]  }
0x28b5   :  { %11526 = vmatpush1.bf16.msra.mxu1 %v19201_v59  ;;  %11924 = vmatpush1.bf16.msra.mxu0 %v19204_v6  ;;  %v19264_v59 = vld [vmem:[#allocation33 + $0xac0] ss:$8 sps:$4 sm:$0xff]   ;;  %v5555_v6 = vrot.slane %v5406_v0, %v21461_v20 }
0x28b6   :  { %11527 = vmatprep.subr.bf16.mxu1 %v19209_v60  ;;  %11925 = vmatprep.subr.bf16.mxu0 %v19212_v38  ;;  %v5559_v60 = vrot.slane %v5406_v0, %v21972_v54 }
0x28b9   :  { %11528 = vmatpush1.bf16.msra.mxu1 %v19207_v16  ;;  %11926 = vmatpush1.bf16.msra.mxu0 %v19210_v61  ;;  %v19269_v16 = vld [vmem:[#allocation33 + $0x8f4] ss:$8 sps:$4 sm:$0xff]  }
0x28ba   :  { %11529 = vmatprep.subr.bf16.mxu1 %v19215_v29  ;;  %11927 = vmatprep.subr.bf16.mxu0 %v19218_v62  ;;  %v19272_v61 = vld [vmem:[#allocation33 + $0xad4] ss:$8 sps:$4 sm:$0xff]   ;;  %v5407_v62 = vld [vmem:[#allocation28 + $0x24] sm:$0xf] }
0x28bd   :  { %11530 = vmatpush1.bf16.msra.mxu1 %v19213_v34  ;;  %11928 = vmatpush1.bf16.msra.mxu0 %v19216_v44  ;;  %v19267_v34 = vld [vmem:[#allocation33 + $0x8f0] ss:$8 sps:$4 sm:$0xff]  }
0x28be   :  { %11531 = vmatprep.subr.bf16.mxu1 %v19221_v21  ;;  %11929 = vmatprep.subr.bf16.mxu0 %v19224_v33  ;;  %v19270_v44 = vld [vmem:[#allocation33 + $0xad0] ss:$8 sps:$4 sm:$0xff]  }
0x28bf   :  { %v23670_v21 = vld [vmem:[#allocation66_spill] sm:$0xff] }
0x28c0   :  { %v22543_v33 = vadd.f32 %v23670_v21, %v5555_v6 }
0x28c1   :  { %11532 = vmatpush1.bf16.msra.mxu1 %v19219_v35  ;;  %11930 = vmatpush1.bf16.msra.mxu0 %v19222_v53  ;;  %v23671_v35 = vld [vmem:[#allocation68_spill] sm:$0xff] }
0x28c2   :  { %11533 = vmatprep.subr.bf16.mxu1 %v19227_v31  ;;  %11931 = vmatprep.subr.bf16.mxu0 %v19230_v41  ;;  %v22546_v53 = vadd.f32 %v23671_v35, %v5559_v60  ;;  %v19275_v31 = vld [vmem:[#allocation33 + $0x904] ss:$8 sps:$4 sm:$0xff]  }
0x28c3   :  { %v19278_v41 = vld [vmem:[#allocation33 + $0xae4] ss:$8 sps:$4 sm:$0xff]  }
0x28c5   :  { %11534 = vmatpush1.bf16.msra.mxu1 %v19225_v42  ;;  %11932 = vmatpush1.bf16.msra.mxu0 %v19228_v57  ;;  %v5563_v42 = vrot.slane %v5406_v0, %v21975_v48  ;;  %v5571_v57 = vrot.slane %v5407_v62, %v21461_v20 }
0x28c6   :  { %11535 = vmatprep.subr.bf16.mxu1 %v19233_v5  ;;  %11933 = vmatprep.subr.bf16.mxu0 %v19236_v26  ;;  %v5575_v5 = vrot.slane %v5407_v62, %v21972_v54 }
0x28c9   :  { %11536 = vmatpush1.bf16.msra.mxu1 %v19231_v2  ;;  %11934 = vmatpush1.bf16.msra.mxu0 %v19234_v56  ;;  %v19276_v56 = vld [vmem:[#allocation33 + $0xae0] ss:$8 sps:$4 sm:$0xff]  }
0x28ca   :  { %11537 = vmatprep.subr.bf16.mxu1 %v19239_v19  ;;  %11935 = vmatprep.subr.bf16.mxu0 %v19242_v58  ;;  %v7372_v19 = vsel %vm7299_vm9, %v22543_v33, 0.0  ;;  %v7373_v58 = vsel %vm7299_vm9, %v22546_v53, 0.0 }
0x28cd   :  { %11538 = vmatpush1.bf16.msra.mxu1 %v19237_v46  ;;  %11936 = vmatpush1.bf16.msra.mxu0 %v19240_v14  ;;  %v19284_v14 = vld [vmem:[#allocation33 + $0xaf4] ss:$8 sps:$4 sm:$0xff]  }
0x28ce   :  { %11539 = vmatprep.subr.bf16.mxu1 %v19245_v28  ;;  %11937 = vmatprep.subr.bf16.mxu0 %v19248_v47  ;;  %v5567_v28 = vrot.slane %v5406_v0, %v21978_v49 }
0x28d1   :  { %11540 = vmatpush1.bf16.msra.mxu1 %v19243_v36  ;;  %11938 = vmatpush1.bf16.msra.mxu0 %v19246_v45  ;;  %v23674_v36 = vld [vmem:[#allocation67_spill] sm:$0xff] }
0x28d2   :  { %11541 = vmatprep.subr.bf16.mxu1 %v19251_v13  ;;  %11939 = vmatprep.subr.bf16.mxu0 %v19254_v55  ;;  %v22561_v45 = vadd.f32 %v23674_v36, %v5563_v42  ;;  %v23675_v13 = vld [vmem:[#allocation70_spill] sm:$0xff] }
0x28d3   :  { %v22564_v55 = vadd.f32 %v23675_v13, %v5571_v57 }
0x28d5   :  { %11542 = vmatpush1.bf16.msra.mxu1 %v19249_v15  ;;  %11940 = vmatpush1.bf16.msra.mxu0 %v19252_v52  ;;  %v23676_v15 = vld [vmem:[#allocation72_spill] sm:$0xff] }
0x28d6   :  { %11543 = vmatprep.subr.bf16.mxu1 %v19257_v40  ;;  %11941 = vmatprep.subr.bf16.mxu0 %v19260_v12  ;;  %v22567_v52 = vadd.f32 %v23676_v15, %v5575_v5  ;;  %v7374_v40 = vadd.f32 %v7373_v58, %v7372_v19  ;;  %v5579_v12 = vrot.slane %v5407_v62, %v21975_v48  ;;  %v22603_v58 = vld [vmem:[#allocation31 + $0x10] sm:$0xf]  ;;  %v22620_v15 = vld [vmem:[#allocation30 + $0x14] sm:$0xf] }
0x28d8   :  { %v22536_v4 = vpop.f32.mrb[104].mxu1  ;;  %v7382_v6 = vsel %vm7299_vm9, %v22567_v52, 0.0 }
0x28d9   :  { %v22538_v63 = vpop.f32.mrb[105].mxu1  ;;  %11544 = vmatpush1.bf16.msra.mxu1 %v19255_v39  ;;  %11942 = vmatpush1.bf16.msra.mxu0 %v19258_v30  ;;  %v19282_v39 = vld [vmem:[#allocation33 + $0xaf0] ss:$8 sps:$4 sm:$0xff]   ;;  %v19290_v30 = vld [vmem:[#allocation33 + $0xb04] ss:$8 sps:$4 sm:$0xff]  }
0x28da   :  { %v9988_v38 = vpop.f32.mrb[106].mxu1  ;;  %11545 = vmatprep.subr.bf16.mxu1 %v19263_v22  ;;  %11943 = vmatprep.subr.bf16.mxu0 %v19266_v7  ;;  %v23677_v22 = vld [vmem:[#allocation69_spill] sm:$0xff] }
0x28db   :  { %v9989_v29 = vpop.f32.mrb[107].mxu1  ;;  %v22571_v7 = vadd.f32 %v23677_v22, %v5567_v28 }
0x28dd   :  { %11546 = vmatpush1.bf16.msra.mxu1 %v19261_v37  ;;  %11944 = vmatpush1.bf16.msra.mxu0 %v19264_v59  ;;  %v7375_v37 = vsel %vm7299_vm9, %v22561_v45, 0.0  ;;  %v7381_v59 = vsel %vm7299_vm9, %v22564_v55, 0.0  ;;  %v7377_v35 = vsel %vm7299_vm9, %v22571_v7, 0.0 }
0x28de   :  { %11547 = vmatprep.subr.bf16.mxu1 %v19269_v16  ;;  %11945 = vmatprep.subr.bf16.mxu0 %v19272_v61  ;;  %v7376_v38 = vadd.f32 %v7375_v37, %v7374_v40  ;;  %v23678_v16 = vld [vmem:[#allocation71_spill] sm:$0xff] }
0x28df   :  { %v22580_v61 = vadd.f32 %v23678_v16, %v5579_v12  ;;  %v8152_v12 = vrot.slane %v22603_v58, %v21972_v54 }
0x28e0   :  { %v22587_v42 = vadd.f32 %v7377_v35, %v7376_v38  ;;  %v8160_v38 = vrot.slane %v22603_v58, %v21978_v49 }
0x28e1   :  { %11548 = vmatpush1.bf16.msra.mxu1 %v19267_v34  ;;  %11946 = vmatpush1.bf16.msra.mxu0 %v19270_v44  ;;  %v7383_v34 = vadd.f32 %v7382_v6, %v7381_v59  ;;  %v5583_v44 = vrot.slane %v5407_v62, %v21978_v49  ;;  %v7384_v57 = vsel %vm7299_vm9, %v22580_v61, 0.0  ;;  %v8148_v59 = vrot.slane %v22603_v58, %v21461_v20 }
0x28e2   :  { %v22551_v26 = vpop.f32.mrb[100].mxu0  ;;  %11558 = vmatprep.subr.bf16.mxu1 %v19275_v31  ;;  %11947 = vmatprep.subr.bf16.mxu0 %v19278_v41  ;;  %v22585_v41 = vld [vmem:[#allocation30 + $0x10] sm:$0xf] }
0x28e3   :  { %23672 = vst [vmem:[#allocation87_spill] sm:$0xff] %v22551_v26  ;;  %v22553_v2 = vpop.f32.mrb[101].mxu0  ;;  %v22608_v28 = vadd.f32 %v7384_v57, %v7383_v34 }
0x28e4   :  { %23673 = vst [vmem:[#allocation86_spill] sm:$0xff] %v22553_v2  ;;  %v10390_v46 = vpop.f32.mrb[102].mxu0 }
0x28e5   :  { %v10391_v47 = vpop.f32.mrb[103].mxu0  ;;  %11948 = vmatpush1.bf16.msra.mxu0 %v19276_v56  ;;  %v23679_v46 = vld [vmem:[#allocation73_spill] sm:$0xff] }
0x28e6   :  { %11949 = vmatprep.subr.bf16.mxu0 %v19284_v14  ;;  %v22606_v14 = vadd.f32 %v23679_v46, %v5583_v44 }
0x28e7   :  { %v7579_v0 = vpop.xlane.xlu1 %7578 }
0x28e8   :  { %v7656_v60 = vmul.f32 0.001953125, %v7579_v0 }
0x28e9   :  { %11950 = vmatpush1.bf16.msra.mxu0 %v19282_v39  ;;  %v7835_v39 = vrot.slane %v22585_v41, %v21978_v49 }
0x28ea   :  { %v7669_v29 = vadd.f32 1e-05, %v7656_v60  ;;  %11960 = vmatprep.subr.bf16.mxu0 %v19290_v30  ;;  %v7831_v30 = vrot.slane %v22585_v41, %v21975_v48 }
0x28eb   :  { %v7362_v21 = vpop.xlane.xlu1 %7361 }
0x28ec   :  { %20149 = vrsqrt.f32 %v7669_v29  ;;  %v7424_v31 = vmul.f32 0.001953125, %v7362_v21  ;;  %v8156_v29 = vrot.slane %v22603_v58, %v21975_v48  ;;  %v7839_v21 = vrot.slane %v22620_v15, %v21461_v20 }
0x28ee   :  { %v22592_v5 = vsub.f32 %v22373_v3, %v7424_v31  ;;  %v22595_v56 = vsub.f32 %v22376_v11, %v7424_v31  ;;  %v22598_v62 = vsub.f32 %v22387_v1, %v7424_v31  ;;  %v22601_v19 = vsub.f32 %v22397_v25, %v7424_v31 }
0x28ef   :  { %v7588_v47 = vpop.xlane.xlu0 %7587  ;;  %v7827_v3 = vrot.slane %v22585_v41, %v21972_v54  ;;  %v7823_v11 = vrot.slane %v22585_v41, %v21461_v20  ;;  %v7851_v41 = vrot.slane %v22620_v15, %v21978_v49 }
0x28f0   :  { %v7507_v1 = vmul.f32 %v22592_v5, %v22592_v5  ;;  %v7508_v25 = vmul.f32 %v22595_v56, %v22595_v56  ;;  %v7657_v36 = vmul.f32 0.001953125, %v7588_v47  ;;  %v7509_v13 = vmul.f32 %v22598_v62, %v22598_v62 }
0x28f1   :  { %v7510_v40 = vmul.f32 %v22601_v19, %v22601_v19 }
0x28f2   :  { %v7670_v22 = vadd.f32 1e-05, %v7657_v36  ;;  %v7589_v0 = vsel %vm7299_vm9, %v7507_v1, 0.0  ;;  %v7590_v37 = vsel %vm7299_vm9, %v7508_v25, 0.0  ;;  %v7592_v44 = vsel %vm7299_vm9, %v7509_v13, 0.0 }
0x28f3   :  { %v7371_v6 = vpop.xlane.xlu0 %7370  ;;  %v7591_v60 = vadd.f32 %v7590_v37, %v7589_v0  ;;  %v7594_v31 = vsel %vm7299_vm9, %v7510_v40, 0.0  ;;  %v22663_v0 = vld [vmem:[#allocation31 + $0x14] sm:$0xf] }
0x28f4   :  { %20151 = vrsqrt.f32 %v7670_v22  ;;  %v7425_v34 = vmul.f32 0.001953125, %v7371_v6 }
0x28f5   :  { %v7593_v35 = vadd.f32 %v7592_v44, %v7591_v60  ;;  %v8164_v44 = vrot.slane %v22663_v0, %v21461_v20 }
0x28f6   :  { %v20150_v46 = vpop.eup %20149  ;;  %v22649_v47 = vsub.f32 %v22390_v27, %v7425_v34  ;;  %v22652_v58 = vsub.f32 %v22393_v32, %v7425_v34  ;;  %v22655_v1 = vsub.f32 %v22406_v24, %v7425_v34  ;;  %v22658_v25 = vsub.f32 %v22432_v18, %v7425_v34 }
0x28f7   :  { %v7595_v36 = vadd.f32 %v7594_v31, %v7593_v35  ;;  %v7708_v13 = vmul.f32 %v20150_v46, %v22421_v51  ;;  %v7707_v40 = vmul.f32 %v20150_v46, %v22418_v23  ;;  %v7710_v22 = vmul.f32 %v20150_v46, %v22427_v8 }
0x28f8   :  { %v7511_v27 = vmul.f32 %v22649_v47, %v22649_v47  ;;  %v7512_v32 = vmul.f32 %v22652_v58, %v22652_v58  ;;  %v7513_v24 = vmul.f32 %v22655_v1, %v22655_v1  ;;  %v7514_v18 = vmul.f32 %v22658_v25, %v22658_v25 }
0x28f9   :  { %7596 = vadd.xlane.f32.xlu1 %v7595_v36  ;;  %v8033_v51 = vmul.f32 %v7827_v3, %v7708_v13  ;;  %v8032_v37 = vmul.f32 %v7823_v11, %v7707_v40  ;;  %v8035_v23 = vmul.f32 %v7835_v39, %v7710_v22  ;;  %v7709_v8 = vmul.f32 %v20150_v46, %v22424_v10 }
0x28fa   :  { %v7598_v6 = vsel %vm7299_vm9, %v7511_v27, 0.0  ;;  %v7599_v60 = vsel %vm7299_vm9, %v7512_v32, 0.0  ;;  %v8168_v34 = vrot.slane %v22663_v0, %v21972_v54  ;;  %v7601_v3 = vsel %vm7299_vm9, %v7513_v24, 0.0 }
0x28fb   :  { %v7600_v35 = vadd.f32 %v7599_v60, %v7598_v6  ;;  %v8358_v31 = vadd.f32 %v8152_v12, %v8033_v51  ;;  %v8357_v57 = vadd.f32 %v8148_v59, %v8032_v37  ;;  %v8360_v16 = vadd.f32 %v8160_v38, %v8035_v23 }
0x28fc   :  { %v7603_v11 = vsel %vm7299_vm9, %v7514_v18, 0.0  ;;  %v8176_v10 = vrot.slane %v22663_v0, %v21978_v49  ;;  %v8034_v39 = vmul.f32 %v7831_v30, %v7709_v8  ;;  %v19273_v30 = vld [vmem:[#allocation33 + $0x900] ss:$8 sps:$4 sm:$0xff]   ;;  %v7386_v37 = vsel %vm7299_vm9, %v22606_v14, 0.0  ;;  %v19281_v8 = vld [vmem:[#allocation33 + $0x914] ss:$8 sps:$4 sm:$0xff]  }
0x28fd   :  { %7379 = vadd.xlane.f32.xlu1 %v22587_v42  ;;  %v7602_v46 = vadd.f32 %v7601_v3, %v7600_v35  ;;  %vm8410_vm11 = vcmp.gt.f32.partialorder %v8358_v31, 0.0  ;;  %v8462_v36 = vmul.f32 0.01, %v8358_v31  ;;  %vm8409_vm12 = vcmp.gt.f32.partialorder %v8357_v57, 0.0  ;;  %v19279_v3 = vld [vmem:[#allocation33 + $0x910] ss:$8 sps:$4 sm:$0xff]  }
0x28fe   :  { %v20152_v13 = vpop.eup %20151  ;;  %v8461_v40 = vmul.f32 0.01, %v8357_v57  ;;  %vm8412_vm13 = vcmp.gt.f32.partialorder %v8360_v16, 0.0  ;;  %v8464_v12 = vmul.f32 0.01, %v8360_v16  ;;  %v22685_v59 = vadd.f32 %v8156_v29, %v8034_v39 }
0x28ff   :  { %v7604_v38 = vadd.f32 %v7603_v11, %v7602_v46  ;;  %v8514_v22 = vsel %vm8410_vm11, %v8358_v31, %v8462_v36  ;;  %v7712_v27 = vmul.f32 %v20152_v13, %v22478_v17  ;;  %v7711_v32 = vmul.f32 %v20152_v13, %v22475_v43  ;;  %v19287_v11 = vld [vmem:[#allocation33 + $0x924] ss:$8 sps:$4 sm:$0xff]   ;;  %v19285_v36 = vld [vmem:[#allocation33 + $0x920] ss:$8 sps:$4 sm:$0xff]  }
0x2900   :  { %v8566_v24 = vpack.c.bf16 %v8514_v22, %v8514_v22  ;;  %v8513_v18 = vsel %vm8409_vm12, %v8357_v57, %v8461_v40  ;;  %v8516_v42 = vsel %vm8412_vm13, %v8360_v16, %v8464_v12  ;;  %v7714_v51 = vmul.f32 %v20152_v13, %v22484_v50 }
0x2901   :  { %7605 = vadd.xlane.f32.xlu0 %v7604_v38  ;;  %v8565_v23 = vpack.c.bf16 %v8513_v18, %v8513_v18  ;;  %v23680_v29 = vrot.slane %v22620_v15, %v21972_v54  ;;  %v8036_v60 = vmul.f32 %v7839_v21, %v7711_v32  ;;  %v8568_v17 = vpack.c.bf16 %v8516_v42, %v8516_v42  ;;  %v19296_v38 = vld [vmem:[#allocation33 + $0xb14] ss:$8 sps:$4 sm:$0xff]   ;;  %v19294_v32 = vld [vmem:[#allocation33 + $0xb10] ss:$8 sps:$4 sm:$0xff]   ;;  %v19297_v18 = vld [vmem:[#allocation33 + $0x940] ss:$8 sps:$4 sm:$0xff]  }
0x2902   :  { %11549 = vmatprep.mubr.bf16.mxu1 %v8566_v24  ;;  %v8039_v43 = vmul.f32 %v7851_v41, %v7714_v51  ;;  %v7713_v35 = vmul.f32 %v20152_v13, %v22481_v9  ;;  %v8172_v16 = vrot.slane %v22663_v0, %v21975_v48  ;;  %v7387_v50 = vadd.f32 %v7386_v37, %v22608_v28  ;;  %v19299_v24 = vld [vmem:[#allocation33 + $0x944] ss:$8 sps:$4 sm:$0xff]   ;;  %v19300_v42 = vld [vmem:[#allocation33 + $0xb20] ss:$8 sps:$4 sm:$0xff]   ;;  %v19305_v51 = vld [vmem:[#allocation33 + $0x954] ss:$8 sps:$4 sm:$0xff]  }
0x2903   :  { %v8037_v6 = vmul.f32 %v23680_v29, %v7712_v27  ;;  %11550 = vmatmul.mubr.bf16.vlgmr.msra.gmra.mrb[112].mxu1 %v8565_v23  ;;  %v8361_v31 = vadd.f32 %v8164_v44, %v8036_v60  ;;  %v23681_v21 = vrot.slane %v22620_v15, %v21975_v48  ;;  %v19293_v15 = vld [vmem:[#allocation33 + $0x934] ss:$8 sps:$4 sm:$0xff]   ;;  %v19291_v27 = vld [vmem:[#allocation33 + $0x930] ss:$8 sps:$4 sm:$0xff]   ;;  %v19311_v29 = vld [vmem:[#allocation33 + $0x964] ss:$8 sps:$4 sm:$0xff]  }
0x2904   :  { %11559 = vmatpush1.bf16.msra.mxu1 %v19273_v30  ;;  %11590 = vmatprep.mubr.bf16.mxu1 %v8568_v17  ;;  %v8364_v39 = vadd.f32 %v8176_v10, %v8039_v43  ;;  %v19288_v10 = vld [vmem:[#allocation33 + $0xb00] ss:$8 sps:$4 sm:$0xff]   ;;  %v19302_v30 = vld [vmem:[#allocation33 + $0xb24] ss:$8 sps:$4 sm:$0xff]   ;;  %v19308_v37 = vld [vmem:[#allocation33 + $0xb34] ss:$8 sps:$4 sm:$0xff]  }
0x2905   :  { %v8362_v57 = vadd.f32 %v8168_v34, %v8037_v6  ;;  %v8038_v46 = vmul.f32 %v23681_v21, %v7713_v35  ;;  %7388 = vadd.xlane.f32.xlu0 %v7387_v50  ;;  %11560 = vmatprep.subr.bf16.mxu1 %v19281_v8  ;;  %vm8413_vm15 = vcmp.gt.f32.partialorder %v8361_v31, 0.0  ;;  %v8465_v41 = vmul.f32 0.01, %v8361_v31  ;;  %v19303_v23 = vld [vmem:[#allocation33 + $0x950] ss:$8 sps:$4 sm:$0xff]  }
0x2906   :  { %vm8416_vm0 = vcmp.gt.f32.partialorder %v8364_v39, 0.0  ;;  %v8468_v28 = vmul.f32 0.01, %v8364_v39  ;;  %v19306_v8 = vld [vmem:[#allocation33 + $0xb30] ss:$8 sps:$4 sm:$0xff]   ;;  %vm8411_vm1 = vcmp.gt.f32.partialorder %v22685_v59, 0.0 }
0x2907   :  { %vm8414_vm14 = vcmp.gt.f32.partialorder %v8362_v57, 0.0  ;;  %v8466_v9 = vmul.f32 0.01, %v8362_v57  ;;  %v22702_v0 = vadd.f32 %v8172_v16, %v8038_v46  ;;  %v8517_v44 = vsel %vm8413_vm15, %v8361_v31, %v8465_v41  ;;  %v19314_v6 = vld [vmem:[#allocation33 + $0xb44] ss:$8 sps:$4 sm:$0xff]  }
0x2908   :  { %11561 = vmatpush1.bf16.msra.mxu1 %v19279_v3  ;;  %v8569_v40 = vpack.c.bf16 %v8517_v44, %v8517_v44  ;;  %v8520_v12 = vsel %vm8416_vm0, %v8364_v39, %v8468_v28  ;;  %v19309_v60 = vld [vmem:[#allocation33 + $0x960] ss:$8 sps:$4 sm:$0xff]   ;;  %v19317_v43 = vld [vmem:[#allocation33 + $0x974] ss:$8 sps:$4 sm:$0xff]   ;;  %v19315_v16 = vld [vmem:[#allocation33 + $0x970] ss:$8 sps:$4 sm:$0xff]  }
0x2909   :  { %v8518_v34 = vsel %vm8414_vm14, %v8362_v57, %v8466_v9  ;;  %11562 = vmatprep.subr.bf16.mxu1 %v19287_v11  ;;  %v8572_v22 = vpack.c.bf16 %v8520_v12, %v8520_v12  ;;  %v19312_v17 = vld [vmem:[#allocation33 + $0xb40] ss:$8 sps:$4 sm:$0xff]   ;;  %v19320_v35 = vld [vmem:[#allocation33 + $0xb54] ss:$8 sps:$4 sm:$0xff]   ;;  %v19318_v50 = vld [vmem:[#allocation33 + $0xb50] ss:$8 sps:$4 sm:$0xff]  }
0x290a   :  { %v8570_v13 = vpack.c.bf16 %v8518_v34, %v8518_v34  ;;  %v19323_v57 = vld [vmem:[#allocation33 + $0x984] ss:$8 sps:$4 sm:$0xff]   ;;  %v19321_v3 = vld [vmem:[#allocation33 + $0x980] ss:$8 sps:$4 sm:$0xff]   ;;  %v19329_v39 = vld [vmem:[#allocation33 + $0x994] ss:$8 sps:$4 sm:$0xff]  }
0x290b   :  { %v19326_v31 = vld [vmem:[#allocation33 + $0xb64] ss:$8 sps:$4 sm:$0xff]   ;;  %v19324_v11 = vld [vmem:[#allocation33 + $0xb60] ss:$8 sps:$4 sm:$0xff]   ;;  %v19332_v21 = vld [vmem:[#allocation33 + $0xb74] ss:$8 sps:$4 sm:$0xff]  }
0x290c   :  { %11951 = vmatprep.mubr.bf16.mxu0 %v8570_v13  ;;  %11563 = vmatpush1.bf16.msra.mxu1 %v19285_v36  ;;  %v19327_v46 = vld [vmem:[#allocation33 + $0x990] ss:$8 sps:$4 sm:$0xff]   ;;  %v19335_v41 = vld [vmem:[#allocation33 + $0x9a4] ss:$8 sps:$4 sm:$0xff]   ;;  %v19333_v34 = vld [vmem:[#allocation33 + $0x9a0] ss:$8 sps:$4 sm:$0xff]  }
0x290d   :  { %11952 = vmatmul.mubr.bf16.vlgmr.msra.gmra.mrb[108].mxu0 %v8569_v40  ;;  %11564 = vmatprep.subr.bf16.mxu1 %v19293_v15  ;;  %v19330_v9 = vld [vmem:[#allocation33 + $0xb70] ss:$8 sps:$4 sm:$0xff]   ;;  %v19338_v28 = vld [vmem:[#allocation33 + $0xb84] ss:$8 sps:$4 sm:$0xff]   ;;  %v19336_v44 = vld [vmem:[#allocation33 + $0xb80] ss:$8 sps:$4 sm:$0xff]  }
0x290e   :  { %11961 = vmatpush1.bf16.msra.mxu0 %v19288_v10  ;;  %11992 = vmatprep.mubr.bf16.mxu0 %v8572_v22  ;;  %v19341_v36 = vld [vmem:[#allocation33 + $0x9b4] ss:$8 sps:$4 sm:$0xff]   ;;  %v19339_v10 = vld [vmem:[#allocation33 + $0x9b0] ss:$8 sps:$4 sm:$0xff]   ;;  %v19347_v12 = vld [vmem:[#allocation33 + $0x9c4] ss:$8 sps:$4 sm:$0xff]  }
0x290f   :  { %11962 = vmatprep.subr.bf16.mxu0 %v19296_v38  ;;  %v19344_v13 = vld [vmem:[#allocation33 + $0xb94] ss:$8 sps:$4 sm:$0xff]   ;;  %v19342_v40 = vld [vmem:[#allocation33 + $0xb90] ss:$8 sps:$4 sm:$0xff]   ;;  %v19350_v15 = vld [vmem:[#allocation33 + $0xba4] ss:$8 sps:$4 sm:$0xff]  }
0x2910   :  { %11565 = vmatpush1.bf16.msra.mxu1 %v19291_v27  ;;  %v19345_v38 = vld [vmem:[#allocation33 + $0x9c0] ss:$8 sps:$4 sm:$0xff]   ;;  %v19353_v27 = vld [vmem:[#allocation33 + $0x9d4] ss:$8 sps:$4 sm:$0xff]   ;;  %vm8415_vm2 = vcmp.gt.f32.partialorder %v22702_v0, 0.0 }
0x2911   :  { %11566 = vmatprep.subr.bf16.mxu1 %v19299_v24  ;;  %v19348_v22 = vld [vmem:[#allocation33 + $0xba0] ss:$8 sps:$4 sm:$0xff]   ;;  %v19351_v24 = vld [vmem:[#allocation33 + $0x9d0] ss:$8 sps:$4 sm:$0xff]  }
0x2912   :  { %11963 = vmatpush1.bf16.msra.mxu0 %v19294_v32  ;;  %v19356_v32 = vld [vmem:[#allocation33 + $0xbb4] ss:$8 sps:$4 sm:$0xff]  }
0x2913   :  { %11964 = vmatprep.subr.bf16.mxu0 %v19302_v30  ;;  %v19354_v30 = vld [vmem:[#allocation33 + $0xbb0] ss:$8 sps:$4 sm:$0xff]  }
0x2914   :  { %11567 = vmatpush1.bf16.msra.mxu1 %v19297_v18  ;;  %v19359_v18 = vld [vmem:[#allocation33 + $0x9e4] ss:$8 sps:$4 sm:$0xff]  }
0x2915   :  { %11568 = vmatprep.subr.bf16.mxu1 %v19305_v51  ;;  %v19357_v51 = vld [vmem:[#allocation33 + $0x9e0] ss:$8 sps:$4 sm:$0xff]  }
0x2916   :  { %11965 = vmatpush1.bf16.msra.mxu0 %v19300_v42  ;;  %v19362_v42 = vld [vmem:[#allocation33 + $0xbc4] ss:$8 sps:$4 sm:$0xff]  }
0x2917   :  { %11966 = vmatprep.subr.bf16.mxu0 %v19308_v37  ;;  %v19360_v37 = vld [vmem:[#allocation33 + $0xbc0] ss:$8 sps:$4 sm:$0xff]  }
0x2918   :  { %11569 = vmatpush1.bf16.msra.mxu1 %v19303_v23  ;;  %v19365_v23 = vld [vmem:[#allocation33 + $0x9f4] ss:$8 sps:$4 sm:$0xff]  }
0x2919   :  { %11570 = vmatprep.subr.bf16.mxu1 %v19311_v29  ;;  %v8463_v29 = vmul.f32 0.01, %v22685_v59 }
0x291a   :  { %11967 = vmatpush1.bf16.msra.mxu0 %v19306_v8  ;;  %v19368_v8 = vld [vmem:[#allocation33 + $0xbd4] ss:$8 sps:$4 sm:$0xff]  }
0x291b   :  { %11968 = vmatprep.subr.bf16.mxu0 %v19314_v6  ;;  %v19363_v6 = vld [vmem:[#allocation33 + $0x9f0] ss:$8 sps:$4 sm:$0xff]  }
0x291c   :  { %11571 = vmatpush1.bf16.msra.mxu1 %v19309_v60  ;;  %v19366_v60 = vld [vmem:[#allocation33 + $0xbd0] ss:$8 sps:$4 sm:$0xff]  }
0x291d   :  { %11572 = vmatprep.subr.bf16.mxu1 %v19317_v43  ;;  %v19377_v43 = vld [vmem:[#allocation33 + $0xc04] ss:$8 sps:$4 sm:$0xff]  }
0x291e   :  { %11969 = vmatpush1.bf16.msra.mxu0 %v19312_v17  ;;  %v19371_v17 = vld [vmem:[#allocation33 + $0xbe4] ss:$8 sps:$4 sm:$0xff]  }
0x291f   :  { %11970 = vmatprep.subr.bf16.mxu0 %v19320_v35  ;;  %v8515_v35 = vsel %vm8411_vm1, %v22685_v59, %v8463_v29  ;;  %v19383_v59 = vld [vmem:[#allocation33 + $0xc24] ss:$8 sps:$4 sm:$0xff]  }
0x2920   :  { %11573 = vmatpush1.bf16.msra.mxu1 %v19315_v16  ;;  %v19369_v16 = vld [vmem:[#allocation33 + $0xbe0] ss:$8 sps:$4 sm:$0xff]   ;;  %v19419_v29 = vld [vmem:[#allocation33 + $0xc84] ss:$8 sps:$4 sm:$0xff]  }
0x2921   :  { %11574 = vmatprep.subr.bf16.mxu1 %v19323_v57  ;;  %v8567_v57 = vpack.c.bf16 %v8515_v35, %v8515_v35  ;;  %v19428_v35 = vld [vmem:[#allocation33 + $0xe74] ss:$8 sps:$4 sm:$0xff]  }
0x2922   :  { %11971 = vmatpush1.bf16.msra.mxu0 %v19318_v50  ;;  %v19375_v50 = vld [vmem:[#allocation33 + $0xc00] ss:$8 sps:$4 sm:$0xff]  }
0x2923   :  { %11972 = vmatprep.subr.bf16.mxu0 %v19326_v31  ;;  %v19374_v31 = vld [vmem:[#allocation33 + $0xbf4] ss:$8 sps:$4 sm:$0xff]  }
0x2924   :  { %11575 = vmatpush1.bf16.msra.mxu1 %v19321_v3  ;;  %v19380_v3 = vld [vmem:[#allocation33 + $0xc14] ss:$8 sps:$4 sm:$0xff]  }
0x2925   :  { %11576 = vmatprep.subr.bf16.mxu1 %v19329_v39  ;;  %v19372_v39 = vld [vmem:[#allocation33 + $0xbf0] ss:$8 sps:$4 sm:$0xff]  }
0x2926   :  { %11973 = vmatpush1.bf16.msra.mxu0 %v19324_v11  ;;  %v8467_v11 = vmul.f32 0.01, %v22702_v0 }
0x2927   :  { %11974 = vmatprep.subr.bf16.mxu0 %v19332_v21  ;;  %v19378_v21 = vld [vmem:[#allocation33 + $0xc10] ss:$8 sps:$4 sm:$0xff]  }
0x2928   :  { %11577 = vmatpush1.bf16.msra.mxu1 %v19327_v46  ;;  %v19386_v46 = vld [vmem:[#allocation33 + $0xe04] ss:$8 sps:$4 sm:$0xff]  }
0x2929   :  { %11578 = vmatprep.subr.bf16.mxu1 %v19335_v41  ;;  %v19381_v41 = vld [vmem:[#allocation33 + $0xc20] ss:$8 sps:$4 sm:$0xff]  }
0x292a   :  { %11975 = vmatpush1.bf16.msra.mxu0 %v19330_v9  ;;  %v8519_v9 = vsel %vm8415_vm2, %v22702_v0, %v8467_v11  ;;  %v19393_v0 = vld [vmem:[#allocation33 + $0xc40] ss:$8 sps:$4 sm:$0xff]  }
0x292b   :  { %11976 = vmatprep.subr.bf16.mxu0 %v19338_v28  ;;  %v19384_v28 = vld [vmem:[#allocation33 + $0xe00] ss:$8 sps:$4 sm:$0xff]  }
0x292c   :  { %11579 = vmatpush1.bf16.msra.mxu1 %v19333_v34  ;;  %v8571_v34 = vpack.c.bf16 %v8519_v9, %v8519_v9  ;;  %v19432_v11 = vld [vmem:[#allocation33 + $0xe80] ss:$8 sps:$4 sm:$0xff]   ;;  %v19443_v9 = vld [vmem:[#allocation33 + $0xcc4] ss:$8 sps:$4 sm:$0xff]  }
0x292d   :  { %11580 = vmatprep.subr.bf16.mxu1 %v19341_v36  ;;  %v19392_v36 = vld [vmem:[#allocation33 + $0xe14] ss:$8 sps:$4 sm:$0xff]  }
0x292e   :  { %11977 = vmatpush1.bf16.msra.mxu0 %v19336_v44  ;;  %v19389_v44 = vld [vmem:[#allocation33 + $0xc34] ss:$8 sps:$4 sm:$0xff]  }
0x292f   :  { %11978 = vmatprep.subr.bf16.mxu0 %v19344_v13  ;;  %v19387_v13 = vld [vmem:[#allocation33 + $0xc30] ss:$8 sps:$4 sm:$0xff]  }
0x2930   :  { %11581 = vmatpush1.bf16.msra.mxu1 %v19339_v10  ;;  %v19390_v10 = vld [vmem:[#allocation33 + $0xe10] ss:$8 sps:$4 sm:$0xff]  }
0x2931   :  { %11582 = vmatprep.subr.bf16.mxu1 %v19347_v12  ;;  %v19398_v12 = vld [vmem:[#allocation33 + $0xe24] ss:$8 sps:$4 sm:$0xff]  }
0x2932   :  { %11979 = vmatpush1.bf16.msra.mxu0 %v19342_v40  ;;  %v19395_v40 = vld [vmem:[#allocation33 + $0xc44] ss:$8 sps:$4 sm:$0xff]  }
0x2933   :  { %11980 = vmatprep.subr.bf16.mxu0 %v19350_v15  ;;  %v19396_v15 = vld [vmem:[#allocation33 + $0xe20] ss:$8 sps:$4 sm:$0xff]  }
0x2934   :  { %11583 = vmatpush1.bf16.msra.mxu1 %v19345_v38  ;;  %v19401_v38 = vld [vmem:[#allocation33 + $0xc54] ss:$8 sps:$4 sm:$0xff]  }
0x2935   :  { %11584 = vmatprep.subr.bf16.mxu1 %v19353_v27  ;;  %v19399_v27 = vld [vmem:[#allocation33 + $0xc50] ss:$8 sps:$4 sm:$0xff]  }
0x2936   :  { %11981 = vmatpush1.bf16.msra.mxu0 %v19348_v22  ;;  %v19404_v22 = vld [vmem:[#allocation33 + $0xe34] ss:$8 sps:$4 sm:$0xff]  }
0x2937   :  { %11982 = vmatprep.subr.bf16.mxu0 %v19356_v32  ;;  %v19402_v32 = vld [vmem:[#allocation33 + $0xe30] ss:$8 sps:$4 sm:$0xff]  }
0x2938   :  { %11585 = vmatpush1.bf16.msra.mxu1 %v19351_v24  ;;  %v19407_v24 = vld [vmem:[#allocation33 + $0xc64] ss:$8 sps:$4 sm:$0xff]  }
0x2939   :  { %11586 = vmatprep.subr.bf16.mxu1 %v19359_v18  ;;  %v19405_v18 = vld [vmem:[#allocation33 + $0xc60] ss:$8 sps:$4 sm:$0xff]  }
0x293a   :  { %11983 = vmatpush1.bf16.msra.mxu0 %v19354_v30  ;;  %v19410_v30 = vld [vmem:[#allocation33 + $0xe44] ss:$8 sps:$4 sm:$0xff]  }
0x293b   :  { %11984 = vmatprep.subr.bf16.mxu0 %v19362_v42  ;;  %v19408_v42 = vld [vmem:[#allocation33 + $0xe40] ss:$8 sps:$4 sm:$0xff]  }
0x293c   :  { %11587 = vmatpush1.bf16.msra.mxu1 %v19357_v51  ;;  %v19413_v51 = vld [vmem:[#allocation33 + $0xc74] ss:$8 sps:$4 sm:$0xff]  }
0x293d   :  { %11588 = vmatprep.subr.bf16.mxu1 %v19365_v23  ;;  %v19411_v23 = vld [vmem:[#allocation33 + $0xc70] ss:$8 sps:$4 sm:$0xff]  }
0x293e   :  { %11985 = vmatpush1.bf16.msra.mxu0 %v19360_v37  ;;  %v19416_v37 = vld [vmem:[#allocation33 + $0xe54] ss:$8 sps:$4 sm:$0xff]  }
0x293f   :  { %11986 = vmatprep.subr.bf16.mxu0 %v19368_v8  ;;  %v19414_v8 = vld [vmem:[#allocation33 + $0xe50] ss:$8 sps:$4 sm:$0xff]  }
0x2940   :  { %11589 = vmatpush1.bf16.msra.mxu1 %v19363_v6  ;;  %v19422_v6 = vld [vmem:[#allocation33 + $0xe64] ss:$8 sps:$4 sm:$0xff]  }
0x2941   :  { %12321 = vmatprep.subr.bf16.mxu1 %v19377_v43  ;;  %v19425_v43 = vld [vmem:[#allocation33 + $0xc94] ss:$8 sps:$4 sm:$0xff]  }
0x2942   :  { %11987 = vmatpush1.bf16.msra.mxu0 %v19366_v60  ;;  %v19417_v60 = vld [vmem:[#allocation33 + $0xc80] ss:$8 sps:$4 sm:$0xff]  }
0x2943   :  { %11988 = vmatprep.subr.bf16.mxu0 %v19371_v17  ;;  %11591 = vmatmul.mubr.bf16.vlgmr.msra.gmra.mrb[112].mxu1 %v8567_v57  ;;  %v19420_v17 = vld [vmem:[#allocation33 + $0xe60] ss:$8 sps:$4 sm:$0xff]   ;;  %v19431_v57 = vld [vmem:[#allocation33 + $0xca4] ss:$8 sps:$4 sm:$0xff]  }
0x2944   :  { %12322 = vmatpush1.bf16.msra.mxu1 %v19375_v50  ;;  %v19426_v50 = vld [vmem:[#allocation33 + $0xe70] ss:$8 sps:$4 sm:$0xff]  }
0x2945   :  { %12323 = vmatprep.subr.bf16.mxu1 %v19380_v3  ;;  %v19429_v3 = vld [vmem:[#allocation33 + $0xca0] ss:$8 sps:$4 sm:$0xff]  }
0x2946   :  { %11989 = vmatpush1.bf16.msra.mxu0 %v19369_v16  ;;  %v19423_v16 = vld [vmem:[#allocation33 + $0xc90] ss:$8 sps:$4 sm:$0xff]  }
0x2947   :  { %11990 = vmatprep.subr.bf16.mxu0 %v19374_v31  ;;  %v19434_v31 = vld [vmem:[#allocation33 + $0xe84] ss:$8 sps:$4 sm:$0xff]  }
0x2948   :  { %12324 = vmatpush1.bf16.msra.mxu1 %v19378_v21  ;;  %v19440_v21 = vld [vmem:[#allocation33 + $0xe94] ss:$8 sps:$4 sm:$0xff]  }
0x2949   :  { %12325 = vmatprep.subr.bf16.mxu1 %v19383_v59  ;;  %v19435_v59 = vld [vmem:[#allocation33 + $0xcb0] ss:$8 sps:$4 sm:$0xff]  }
0x294a   :  { %11991 = vmatpush1.bf16.msra.mxu0 %v19372_v39  ;;  %v19437_v39 = vld [vmem:[#allocation33 + $0xcb4] ss:$8 sps:$4 sm:$0xff]  }
0x294b   :  { %12723 = vmatprep.subr.bf16.mxu0 %v19386_v46  ;;  %v19438_v46 = vld [vmem:[#allocation33 + $0xe90] ss:$8 sps:$4 sm:$0xff]  }
0x294c   :  { %12326 = vmatpush1.bf16.msra.mxu1 %v19381_v41  ;;  %v19446_v41 = vld [vmem:[#allocation33 + $0xea4] ss:$8 sps:$4 sm:$0xff]  }
0x294d   :  { %11993 = vmatmul.mubr.bf16.vlgmr.msra.gmra.mrb[108].mxu0 %v8571_v34  ;;  %12327 = vmatprep.subr.bf16.mxu1 %v19389_v44  ;;  %v19444_v34 = vld [vmem:[#allocation33 + $0xea0] ss:$8 sps:$4 sm:$0xff]   ;;  %v19449_v44 = vld [vmem:[#allocation33 + $0xcd4] ss:$8 sps:$4 sm:$0xff]  }
0x294e   :  { %12724 = vmatpush1.bf16.msra.mxu0 %v19384_v28  ;;  %v19441_v28 = vld [vmem:[#allocation33 + $0xcc0] ss:$8 sps:$4 sm:$0xff]  }
0x294f   :  { %12725 = vmatprep.subr.bf16.mxu0 %v19392_v36  ;;  %v19452_v36 = vld [vmem:[#allocation33 + $0xeb4] ss:$8 sps:$4 sm:$0xff]  }
0x2950   :  { %12328 = vmatpush1.bf16.msra.mxu1 %v19387_v13  ;;  %v19447_v13 = vld [vmem:[#allocation33 + $0xcd0] ss:$8 sps:$4 sm:$0xff]  }
0x2951   :  { %12329 = vmatprep.subr.bf16.mxu1 %v19395_v40  ;;  %v19455_v40 = vld [vmem:[#allocation33 + $0xce4] ss:$8 sps:$4 sm:$0xff]  }
0x2952   :  { %12726 = vmatpush1.bf16.msra.mxu0 %v19390_v10  ;;  %v19450_v10 = vld [vmem:[#allocation33 + $0xeb0] ss:$8 sps:$4 sm:$0xff]  }
0x2953   :  { %12727 = vmatprep.subr.bf16.mxu0 %v19398_v12  ;;  %v19458_v12 = vld [vmem:[#allocation33 + $0xec4] ss:$8 sps:$4 sm:$0xff]  }
0x2954   :  { %12330 = vmatpush1.bf16.msra.mxu1 %v19393_v0  ;;  %v5408_v0 = vld [vmem:[#allocation28 + $0x28] sm:$0xf] }
0x2955   :  { %12331 = vmatprep.subr.bf16.mxu1 %v19401_v38 }
0x2956   :  { %12728 = vmatpush1.bf16.msra.mxu0 %v19396_v15 }
0x2957   :  { %12729 = vmatprep.subr.bf16.mxu0 %v19404_v22  ;;  %v19453_v22 = vld [vmem:[#allocation33 + $0xce0] ss:$8 sps:$4 sm:$0xff]  }
0x2958   :  { %12332 = vmatpush1.bf16.msra.mxu1 %v19399_v27  ;;  %v19456_v27 = vld [vmem:[#allocation33 + $0xec0] ss:$8 sps:$4 sm:$0xff]  }
0x2959   :  { %12333 = vmatprep.subr.bf16.mxu1 %v19407_v24  ;;  %v5591_v24 = vrot.slane %v5408_v0, %v21972_v54 }
0x295a   :  { %12730 = vmatpush1.bf16.msra.mxu0 %v19402_v32  ;;  %v5587_v32 = vrot.slane %v5408_v0, %v21461_v20 }
0x295b   :  { %12731 = vmatprep.subr.bf16.mxu0 %v19410_v30 }
0x295c   :  { %12334 = vmatpush1.bf16.msra.mxu1 %v19405_v18  ;;  %v19461_v18 = vld [vmem:[#allocation33 + $0xcf4] ss:$8 sps:$4 sm:$0xff]  }
0x295d   :  { %12335 = vmatprep.subr.bf16.mxu1 %v19413_v51 }
0x295e   :  { %12732 = vmatpush1.bf16.msra.mxu0 %v19408_v42  ;;  %v19464_v42 = vld [vmem:[#allocation33 + $0xed4] ss:$8 sps:$4 sm:$0xff]  }
0x295f   :  { %12733 = vmatprep.subr.bf16.mxu0 %v19416_v37  ;;  %v5409_v37 = vld [vmem:[#allocation28 + $0x2c] sm:$0xf] }
0x2960   :  { %12336 = vmatpush1.bf16.msra.mxu1 %v19411_v23  ;;  %v19459_v23 = vld [vmem:[#allocation33 + $0xcf0] ss:$8 sps:$4 sm:$0xff]  }
0x2961   :  { %12337 = vmatprep.subr.bf16.mxu1 %v19419_v29  ;;  %v23682_v29 = vld [vmem:[#allocation74_spill] sm:$0xff] }
0x2962   :  { %12734 = vmatpush1.bf16.msra.mxu0 %v19414_v8  ;;  %v19462_v8 = vld [vmem:[#allocation33 + $0xed0] ss:$8 sps:$4 sm:$0xff]  }
0x2963   :  { %12735 = vmatprep.subr.bf16.mxu0 %v19422_v6  ;;  %v22717_v6 = vadd.f32 %v23682_v29, %v5587_v32  ;;  %v23689_v32 = vld [vmem:[#allocation77_spill] sm:$0xff] }
0x2964   :  { %12338 = vmatpush1.bf16.msra.mxu1 %v19417_v60  ;;  %v23683_v60 = vld [vmem:[#allocation76_spill] sm:$0xff] }
0x2965   :  { %12339 = vmatprep.subr.bf16.mxu1 %v19425_v43  ;;  %v19467_v43 = vld [vmem:[#allocation33 + $0xd04] ss:$8 sps:$4 sm:$0xff]  }
0x2966   :  { %12736 = vmatpush1.bf16.msra.mxu0 %v19420_v17  ;;  %v22720_v17 = vadd.f32 %v23683_v60, %v5591_v24 }
0x2967   :  { %12737 = vmatprep.subr.bf16.mxu0 %v19428_v35  ;;  %v19470_v35 = vld [vmem:[#allocation33 + $0xee4] ss:$8 sps:$4 sm:$0xff]  }
0x2968   :  { %12340 = vmatpush1.bf16.msra.mxu1 %v19423_v16  ;;  %v5595_v16 = vrot.slane %v5408_v0, %v21975_v48 }
0x2969   :  { %12341 = vmatprep.subr.bf16.mxu1 %v19431_v57  ;;  %v5607_v57 = vrot.slane %v5409_v37, %v21972_v54 }
0x296a   :  { %12738 = vmatpush1.bf16.msra.mxu0 %v19426_v50  ;;  %v5603_v50 = vrot.slane %v5409_v37, %v21461_v20 }
0x296b   :  { %12739 = vmatprep.subr.bf16.mxu0 %v19434_v31 }
0x296c   :  { %12342 = vmatpush1.bf16.msra.mxu1 %v19429_v3 }
0x296d   :  { %12343 = vmatprep.subr.bf16.mxu1 %v19437_v39  ;;  %v7390_v39 = vsel %vm7299_vm9, %v22717_v6, 0.0 }
0x296e   :  { %12740 = vmatpush1.bf16.msra.mxu0 %v19432_v11  ;;  %v19468_v11 = vld [vmem:[#allocation33 + $0xee0] ss:$8 sps:$4 sm:$0xff]  }
0x296f   :  { %12741 = vmatprep.subr.bf16.mxu0 %v19440_v21  ;;  %v7391_v21 = vsel %vm7299_vm9, %v22720_v17, 0.0 }
0x2970   :  { %12344 = vmatpush1.bf16.msra.mxu1 %v19435_v59 }
0x2971   :  { %12345 = vmatprep.subr.bf16.mxu1 %v19443_v9  ;;  %v5599_v9 = vrot.slane %v5408_v0, %v21978_v49 }
0x2972   :  { %12742 = vmatpush1.bf16.msra.mxu0 %v19438_v46  ;;  %v19476_v46 = vld [vmem:[#allocation33 + $0xef4] ss:$8 sps:$4 sm:$0xff]  }
0x2973   :  { %12743 = vmatprep.subr.bf16.mxu0 %v19446_v41  ;;  %v22745_v24 = vadd.f32 %v23689_v32, %v5599_v9 }
0x2974   :  { %12346 = vmatpush1.bf16.msra.mxu1 %v19441_v28  ;;  %v23686_v28 = vld [vmem:[#allocation75_spill] sm:$0xff] }
0x2975   :  { %12347 = vmatprep.subr.bf16.mxu1 %v19449_v44  ;;  %v23687_v44 = vld [vmem:[#allocation78_spill] sm:$0xff] }
0x2976   :  { %12744 = vmatpush1.bf16.msra.mxu0 %v19444_v34  ;;  %v22735_v34 = vadd.f32 %v23686_v28, %v5595_v16  ;;  %v23691_v28 = vld [vmem:[#allocation81_spill] sm:$0xff] }
0x2977   :  { %12745 = vmatprep.subr.bf16.mxu0 %v19452_v36  ;;  %v22710_v15 = vpop.f32.mrb[108].mxu1  ;;  %v22738_v36 = vadd.f32 %v23687_v44, %v5603_v50  ;;  %v7395_v50 = vsel %vm7299_vm9, %v22745_v24, 0.0 }
0x2978   :  { %v22712_v38 = vpop.f32.mrb[109].mxu1  ;;  %12348 = vmatpush1.bf16.msra.mxu1 %v19447_v13  ;;  %v23688_v13 = vld [vmem:[#allocation80_spill] sm:$0xff] }
0x2979   :  { %v10792_v30 = vpop.f32.mrb[110].mxu1  ;;  %12349 = vmatprep.subr.bf16.mxu1 %v19455_v40  ;;  %v7392_v40 = vadd.f32 %v7391_v21, %v7390_v39 }
0x297a   :  { %12746 = vmatpush1.bf16.msra.mxu0 %v19450_v10  ;;  %v10793_v51 = vpop.f32.mrb[111].mxu1  ;;  %v22741_v10 = vadd.f32 %v23688_v13, %v5607_v57  ;;  %v7393_v30 = vsel %vm7299_vm9, %v22735_v34, 0.0 }
0x297b   :  { %12747 = vmatprep.subr.bf16.mxu0 %v19458_v12  ;;  %v5611_v12 = vrot.slane %v5409_v37, %v21975_v48 }
0x297c   :  { %12350 = vmatpush1.bf16.msra.mxu1 %v19453_v22  ;;  %v19474_v22 = vld [vmem:[#allocation33 + $0xef0] ss:$8 sps:$4 sm:$0xff]  }
0x297d   :  { %12351 = vmatprep.subr.bf16.mxu1 %v19461_v18  ;;  %v7399_v18 = vsel %vm7299_vm9, %v22738_v36, 0.0 }
0x297e   :  { %12748 = vmatpush1.bf16.msra.mxu0 %v19456_v27  ;;  %v19482_v27 = vld [vmem:[#allocation33 + $0xf04] ss:$8 sps:$4 sm:$0xff]  }
0x297f   :  { %12749 = vmatprep.subr.bf16.mxu0 %v19464_v42  ;;  %v22725_v31 = vpop.f32.mrb[104].mxu0  ;;  %v7400_v42 = vsel %vm7299_vm9, %v22741_v10, 0.0 }
0x2980   :  { %23684 = vst [vmem:[#allocation89_spill] sm:$0xff] %v22725_v31  ;;  %v22727_v3 = vpop.f32.mrb[105].mxu0  ;;  %12352 = vmatpush1.bf16.msra.mxu1 %v19459_v23  ;;  %v7394_v23 = vadd.f32 %v7393_v30, %v7392_v40 }
0x2981   :  { %23685 = vst [vmem:[#allocation88_spill] sm:$0xff] %v22727_v3  ;;  %v11194_v59 = vpop.f32.mrb[106].mxu0  ;;  %12362 = vmatprep.subr.bf16.mxu1 %v19467_v43  ;;  %v7401_v43 = vadd.f32 %v7400_v42, %v7399_v18 }
0x2982   :  { %12750 = vmatpush1.bf16.msra.mxu0 %v19462_v8  ;;  %v11195_v41 = vpop.f32.mrb[107].mxu0  ;;  %v23690_v8 = vld [vmem:[#allocation79_spill] sm:$0xff]  ;;  %v22761_v39 = vadd.f32 %v7395_v50, %v7394_v23 }
0x2983   :  { %12751 = vmatprep.subr.bf16.mxu0 %v19470_v35  ;;  %v22754_v29 = vadd.f32 %v23690_v8, %v5611_v12  ;;  %v5615_v35 = vrot.slane %v5409_v37, %v21978_v49  ;;  %v22777_v41 = vld [vmem:[#allocation31 + $0x18] sm:$0xf] }
0x2984   :  { %v8180_v8 = vrot.slane %v22777_v41, %v21461_v20  ;;  %v8188_v50 = vrot.slane %v22777_v41, %v21975_v48 }
0x2985   :  { %v7402_v21 = vsel %vm7299_vm9, %v22754_v29, 0.0  ;;  %v22780_v44 = vadd.f32 %v23691_v28, %v5615_v35  ;;  %v8192_v35 = vrot.slane %v22777_v41, %v21978_v49 }
0x2986   :  { %12752 = vmatpush1.bf16.msra.mxu0 %v19468_v11  ;;  %v7597_v0 = vpop.xlane.xlu1 %7596  ;;  %v22759_v11 = vld [vmem:[#allocation30 + $0x18] sm:$0xf]  ;;  %v22782_v13 = vadd.f32 %v7402_v21, %v7401_v43 }
0x2987   :  { %12753 = vmatprep.subr.bf16.mxu0 %v19476_v46  ;;  %v7658_v51 = vmul.f32 0.001953125, %v7597_v0  ;;  %v8184_v0 = vrot.slane %v22777_v41, %v21972_v54  ;;  %v7867_v30 = vrot.slane %v22759_v11, %v21978_v49  ;;  %v7863_v18 = vrot.slane %v22759_v11, %v21975_v48 }
0x2989   :  { %v7671_v60 = vadd.f32 1e-05, %v7658_v51 }
0x298a   :  { %12754 = vmatpush1.bf16.msra.mxu0 %v19474_v22  ;;  %v7380_v16 = vpop.xlane.xlu1 %7379 }
0x298b   :  { %12764 = vmatprep.subr.bf16.mxu0 %v19482_v27  ;;  %20153 = vrsqrt.f32 %v7671_v60  ;;  %v7426_v57 = vmul.f32 0.001953125, %v7380_v16  ;;  %v22794_v27 = vld [vmem:[#allocation30 + $0x1c] sm:$0xf] }
0x298c   :  { %v7871_v21 = vrot.slane %v22794_v27, %v21461_v20 }
0x298d   :  { %v22766_v59 = vsub.f32 %v22543_v33, %v7426_v57  ;;  %v22769_v46 = vsub.f32 %v22546_v53, %v7426_v57  ;;  %v22772_v37 = vsub.f32 %v22561_v45, %v7426_v57  ;;  %v22775_v9 = vsub.f32 %v22571_v7, %v7426_v57 }
0x298e   :  { %v7606_v40 = vpop.xlane.xlu0 %7605  ;;  %v7859_v33 = vrot.slane %v22759_v11, %v21972_v54  ;;  %v7855_v53 = vrot.slane %v22759_v11, %v21461_v20 }
0x298f   :  { %v7515_v45 = vmul.f32 %v22766_v59, %v22766_v59  ;;  %v7516_v7 = vmul.f32 %v22769_v46, %v22769_v46  ;;  %v7659_v12 = vmul.f32 0.001953125, %v7606_v40  ;;  %v7517_v22 = vmul.f32 %v22772_v37, %v22772_v37 }
0x2990   :  { %v7518_v32 = vmul.f32 %v22775_v9, %v22775_v9 }
0x2991   :  { %v7672_v42 = vadd.f32 1e-05, %v7659_v12  ;;  %v7607_v51 = vsel %vm7299_vm9, %v7515_v45, 0.0  ;;  %v7608_v23 = vsel %vm7299_vm9, %v7516_v7, 0.0  ;;  %v7610_v11 = vsel %vm7299_vm9, %v7517_v22, 0.0 }
0x2992   :  { %v7389_v60 = vpop.xlane.xlu0 %7388  ;;  %v7609_v43 = vadd.f32 %v7608_v23, %v7607_v51  ;;  %v7612_v40 = vsel %vm7299_vm9, %v7518_v32, 0.0  ;;  %v7883_v45 = vrot.slane %v22794_v27, %v21978_v49 }
0x2993   :  { %20155 = vrsqrt.f32 %v7672_v42  ;;  %v7427_v57 = vmul.f32 0.001953125, %v7389_v60 }
0x2994   :  { %v7611_v28 = vadd.f32 %v7610_v11, %v7609_v43  ;;  %v22837_v11 = vld [vmem:[#allocation31 + $0x1c] sm:$0xf] }
0x2995   :  { %v20154_v12 = vpop.eup %20153  ;;  %v22823_v51 = vsub.f32 %v22564_v55, %v7427_v57  ;;  %v22826_v41 = vsub.f32 %v22567_v52, %v7427_v57  ;;  %v22829_v22 = vsub.f32 %v22580_v61, %v7427_v57  ;;  %v22832_v42 = vsub.f32 %v22606_v14, %v7427_v57 }
0x2996   :  { %v7613_v32 = vadd.f32 %v7612_v40, %v7611_v28  ;;  %v7716_v23 = vmul.f32 %v20154_v12, %v22595_v56  ;;  %v7715_v60 = vmul.f32 %v20154_v12, %v22592_v5  ;;  %v7718_v43 = vmul.f32 %v20154_v12, %v22601_v19 }
0x2997   :  { %v7519_v55 = vmul.f32 %v22823_v51, %v22823_v51  ;;  %v7520_v52 = vmul.f32 %v22826_v41, %v22826_v41  ;;  %v7521_v61 = vmul.f32 %v22829_v22, %v22829_v22  ;;  %v7522_v14 = vmul.f32 %v22832_v42, %v22832_v42 }
0x2998   :  { %7614 = vadd.xlane.f32.xlu1 %v7613_v32  ;;  %v8041_v56 = vmul.f32 %v7859_v33, %v7716_v23  ;;  %v8040_v57 = vmul.f32 %v7855_v53, %v7715_v60  ;;  %v8043_v5 = vmul.f32 %v7867_v30, %v7718_v43  ;;  %v7717_v19 = vmul.f32 %v20154_v12, %v22598_v62 }
0x2999   :  { %v7616_v28 = vsel %vm7299_vm9, %v7519_v55, 0.0  ;;  %v7617_v40 = vsel %vm7299_vm9, %v7520_v52, 0.0  ;;  %v8200_v7 = vrot.slane %v22837_v11, %v21972_v54  ;;  %v8196_v16 = vrot.slane %v22837_v11, %v21461_v20 }
0x299a   :  { %v7618_v3 = vadd.f32 %v7617_v40, %v7616_v28  ;;  %v8366_v31 = vadd.f32 %v8184_v0, %v8041_v56  ;;  %v8365_v2 = vadd.f32 %v8180_v8, %v8040_v57  ;;  %v8368_v26 = vadd.f32 %v8192_v35, %v8043_v5  ;;  %v19473_v5 = vld [vmem:[#allocation33 + $0xd14] ss:$8 sps:$4 sm:$0xff]  }
0x299b   :  { %v7619_v33 = vsel %vm7299_vm9, %v7521_v61, 0.0  ;;  %v7621_v53 = vsel %vm7299_vm9, %v7522_v14, 0.0  ;;  %v8208_v62 = vrot.slane %v22837_v11, %v21978_v49  ;;  %v8042_v30 = vmul.f32 %v7863_v18, %v7717_v19  ;;  %v19465_v18 = vld [vmem:[#allocation33 + $0xd00] ss:$8 sps:$4 sm:$0xff]  }
0x299c   :  { %7397 = vadd.xlane.f32.xlu1 %v22761_v39  ;;  %v7620_v12 = vadd.f32 %v7619_v33, %v7618_v3  ;;  %vm8418_vm3 = vcmp.gt.f32.partialorder %v8366_v31, 0.0  ;;  %v8470_v32 = vmul.f32 0.01, %v8366_v31  ;;  %vm8417_vm4 = vcmp.gt.f32.partialorder %v8365_v2, 0.0  ;;  %v19471_v33 = vld [vmem:[#allocation33 + $0xd10] ss:$8 sps:$4 sm:$0xff]  }
0x299d   :  { %v20156_v23 = vpop.eup %20155  ;;  %v8469_v60 = vmul.f32 0.01, %v8365_v2  ;;  %vm8420_vm5 = vcmp.gt.f32.partialorder %v8368_v26, 0.0  ;;  %v8472_v0 = vmul.f32 0.01, %v8368_v26  ;;  %v22859_v8 = vadd.f32 %v8188_v50, %v8042_v30 }
0x299e   :  { %v7622_v35 = vadd.f32 %v7621_v53, %v7620_v12  ;;  %v8522_v43 = vsel %vm8418_vm3, %v8366_v31, %v8470_v32  ;;  %v7720_v55 = vmul.f32 %v20156_v23, %v22652_v58  ;;  %v7719_v52 = vmul.f32 %v20156_v23, %v22649_v47  ;;  %v19479_v53 = vld [vmem:[#allocation33 + $0xd24] ss:$8 sps:$4 sm:$0xff]   ;;  %v19477_v32 = vld [vmem:[#allocation33 + $0xd20] ss:$8 sps:$4 sm:$0xff]  }
0x299f   :  { %v8574_v61 = vpack.c.bf16 %v8522_v43, %v8522_v43  ;;  %v8521_v14 = vsel %vm8417_vm4, %v8365_v2, %v8469_v60  ;;  %v8524_v39 = vsel %vm8420_vm5, %v8368_v26, %v8472_v0  ;;  %v7722_v3 = vmul.f32 %v20156_v23, %v22658_v25 }
0x29a0   :  { %v7404_v56 = vsel %vm7299_vm9, %v22780_v44, 0.0  ;;  %7623 = vadd.xlane.f32.xlu0 %v7622_v35  ;;  %v8573_v57 = vpack.c.bf16 %v8521_v14, %v8521_v14  ;;  %v23692_v50 = vrot.slane %v22794_v27, %v21972_v54  ;;  %v8044_v19 = vmul.f32 %v7871_v21, %v7719_v52  ;;  %v19488_v35 = vld [vmem:[#allocation33 + $0xf14] ss:$8 sps:$4 sm:$0xff]   ;;  %v19486_v52 = vld [vmem:[#allocation33 + $0xf10] ss:$8 sps:$4 sm:$0xff]  }
0x29a1   :  { %12353 = vmatprep.mubr.bf16.mxu1 %v8574_v61  ;;  %v8576_v58 = vpack.c.bf16 %v8524_v39, %v8524_v39  ;;  %v8047_v47 = vmul.f32 %v7883_v45, %v7722_v3  ;;  %v7721_v28 = vmul.f32 %v20156_v23, %v22655_v1  ;;  %v8204_v26 = vrot.slane %v22837_v11, %v21975_v48  ;;  %v19491_v61 = vld [vmem:[#allocation33 + $0xd44] ss:$8 sps:$4 sm:$0xff]   ;;  %v19489_v14 = vld [vmem:[#allocation33 + $0xd40] ss:$8 sps:$4 sm:$0xff]   ;;  %v19497_v3 = vld [vmem:[#allocation33 + $0xd54] ss:$8 sps:$4 sm:$0xff]  }
0x29a2   :  { %v8045_v31 = vmul.f32 %v23692_v50, %v7720_v55  ;;  %v7405_v2 = vadd.f32 %v7404_v56, %v22782_v13  ;;  %12354 = vmatmul.mubr.bf16.vlgmr.msra.gmra.mrb[116].mxu1 %v8573_v57  ;;  %v8369_v40 = vadd.f32 %v8196_v16, %v8044_v19  ;;  %v23693_v21 = vrot.slane %v22794_v27, %v21975_v48  ;;  %v19485_v27 = vld [vmem:[#allocation33 + $0xd34] ss:$8 sps:$4 sm:$0xff]   ;;  %v19483_v55 = vld [vmem:[#allocation33 + $0xd30] ss:$8 sps:$4 sm:$0xff]   ;;  %v19492_v39 = vld [vmem:[#allocation33 + $0xf20] ss:$8 sps:$4 sm:$0xff]  }
0x29a3   :  { %12363 = vmatpush1.bf16.msra.mxu1 %v19465_v18  ;;  %12394 = vmatprep.mubr.bf16.mxu1 %v8576_v58  ;;  %v8372_v30 = vadd.f32 %v8208_v62, %v8047_v47  ;;  %v19480_v62 = vld [vmem:[#allocation33 + $0xf00] ss:$8 sps:$4 sm:$0xff]   ;;  %v19494_v18 = vld [vmem:[#allocation33 + $0xf24] ss:$8 sps:$4 sm:$0xff]   ;;  %v19500_v56 = vld [vmem:[#allocation33 + $0xf34] ss:$8 sps:$4 sm:$0xff]  }
0x29a4   :  { %v8370_v25 = vadd.f32 %v8200_v7, %v8045_v31  ;;  %v8046_v12 = vmul.f32 %v23693_v21, %v7721_v28  ;;  %7406 = vadd.xlane.f32.xlu0 %v7405_v2  ;;  %12364 = vmatprep.subr.bf16.mxu1 %v19473_v5  ;;  %vm8421_vm7 = vcmp.gt.f32.partialorder %v8369_v40, 0.0  ;;  %v8473_v45 = vmul.f32 0.01, %v8369_v40  ;;  %v19495_v57 = vld [vmem:[#allocation33 + $0xd50] ss:$8 sps:$4 sm:$0xff]  }
0x29a5   :  { %vm8424_vm8 = vcmp.gt.f32.partialorder %v8372_v30, 0.0  ;;  %v8476_v13 = vmul.f32 0.01, %v8372_v30  ;;  %v19498_v5 = vld [vmem:[#allocation33 + $0xf30] ss:$8 sps:$4 sm:$0xff]   ;;  %vm8419_vm10 = vcmp.gt.f32.partialorder %v22859_v8, 0.0 }
0x29a6   :  { %vm8422_vm6 = vcmp.gt.f32.partialorder %v8370_v25, 0.0  ;;  %v8474_v1 = vmul.f32 0.01, %v8370_v25  ;;  %v22876_v11 = vadd.f32 %v8204_v26, %v8046_v12  ;;  %v8525_v7 = vsel %vm8421_vm7, %v8369_v40, %v8473_v45  ;;  %v19503_v50 = vld [vmem:[#allocation33 + $0xd64] ss:$8 sps:$4 sm:$0xff]  }
0x29a7   :  { %12365 = vmatpush1.bf16.msra.mxu1 %v19471_v33  ;;  %v8577_v60 = vpack.c.bf16 %v8525_v7, %v8525_v7  ;;  %v8528_v0 = vsel %vm8424_vm8, %v8372_v30, %v8476_v13  ;;  %v19506_v31 = vld [vmem:[#allocation33 + $0xf44] ss:$8 sps:$4 sm:$0xff]   ;;  %v19501_v19 = vld [vmem:[#allocation33 + $0xd60] ss:$8 sps:$4 sm:$0xff]   ;;  %v19509_v47 = vld [vmem:[#allocation33 + $0xd74] ss:$8 sps:$4 sm:$0xff]  }
0x29a8   :  { %v8526_v16 = vsel %vm8422_vm6, %v8370_v25, %v8474_v1  ;;  %12366 = vmatprep.subr.bf16.mxu1 %v19479_v53  ;;  %v8580_v43 = vpack.c.bf16 %v8528_v0, %v8528_v0  ;;  %v19504_v58 = vld [vmem:[#allocation33 + $0xf40] ss:$8 sps:$4 sm:$0xff]   ;;  %v19512_v28 = vld [vmem:[#allocation33 + $0xf54] ss:$8 sps:$4 sm:$0xff]   ;;  %v19507_v26 = vld [vmem:[#allocation33 + $0xd70] ss:$8 sps:$4 sm:$0xff]  }
0x29a9   :  { %v8578_v23 = vpack.c.bf16 %v8526_v16, %v8526_v16  ;;  %v19510_v2 = vld [vmem:[#allocation33 + $0xf50] ss:$8 sps:$4 sm:$0xff]   ;;  %v19515_v25 = vld [vmem:[#allocation33 + $0xd84] ss:$8 sps:$4 sm:$0xff]   ;;  %v19513_v33 = vld [vmem:[#allocation33 + $0xd80] ss:$8 sps:$4 sm:$0xff]  }
0x29aa   :  { %v19518_v40 = vld [vmem:[#allocation33 + $0xf64] ss:$8 sps:$4 sm:$0xff]   ;;  %v19516_v53 = vld [vmem:[#allocation33 + $0xf60] ss:$8 sps:$4 sm:$0xff]   ;;  %v19521_v30 = vld [vmem:[#allocation33 + $0xd94] ss:$8 sps:$4 sm:$0xff]  }
0x29ab   :  { %12755 = vmatprep.mubr.bf16.mxu0 %v8578_v23  ;;  %12367 = vmatpush1.bf16.msra.mxu1 %v19477_v32  ;;  %v19524_v21 = vld [vmem:[#allocation33 + $0xf74] ss:$8 sps:$4 sm:$0xff]   ;;  %v19519_v12 = vld [vmem:[#allocation33 + $0xd90] ss:$8 sps:$4 sm:$0xff]   ;;  %v19527_v45 = vld [vmem:[#allocation33 + $0xda4] ss:$8 sps:$4 sm:$0xff]  }
0x29ac   :  { %12756 = vmatmul.mubr.bf16.vlgmr.msra.gmra.mrb[112].mxu0 %v8577_v60  ;;  %12368 = vmatprep.subr.bf16.mxu1 %v19485_v27  ;;  %v19522_v1 = vld [vmem:[#allocation33 + $0xf70] ss:$8 sps:$4 sm:$0xff]   ;;  %v19530_v13 = vld [vmem:[#allocation33 + $0xf84] ss:$8 sps:$4 sm:$0xff]   ;;  %v19525_v16 = vld [vmem:[#allocation33 + $0xda0] ss:$8 sps:$4 sm:$0xff]  }
0x29ad   :  { %12765 = vmatpush1.bf16.msra.mxu0 %v19480_v62  ;;  %12796 = vmatprep.mubr.bf16.mxu0 %v8580_v43  ;;  %v19528_v7 = vld [vmem:[#allocation33 + $0xf80] ss:$8 sps:$4 sm:$0xff]   ;;  %v19533_v32 = vld [vmem:[#allocation33 + $0xdb4] ss:$8 sps:$4 sm:$0xff]   ;;  %v19531_v62 = vld [vmem:[#allocation33 + $0xdb0] ss:$8 sps:$4 sm:$0xff]  }
0x29ae   :  { %12766 = vmatprep.subr.bf16.mxu0 %v19488_v35  ;;  %v19536_v23 = vld [vmem:[#allocation33 + $0xf94] ss:$8 sps:$4 sm:$0xff]   ;;  %v19534_v60 = vld [vmem:[#allocation33 + $0xf90] ss:$8 sps:$4 sm:$0xff]   ;;  %v19539_v0 = vld [vmem:[#allocation33 + $0xdc4] ss:$8 sps:$4 sm:$0xff]  }
0x29af   :  { %12369 = vmatpush1.bf16.msra.mxu1 %v19483_v55  ;;  %v19542_v27 = vld [vmem:[#allocation33 + $0xfa4] ss:$8 sps:$4 sm:$0xff]   ;;  %v19537_v35 = vld [vmem:[#allocation33 + $0xdc0] ss:$8 sps:$4 sm:$0xff]   ;;  %v19545_v55 = vld [vmem:[#allocation33 + $0xdd4] ss:$8 sps:$4 sm:$0xff]  }
0x29b0   :  { %12370 = vmatprep.subr.bf16.mxu1 %v19491_v61  ;;  %v19540_v43 = vld [vmem:[#allocation33 + $0xfa0] ss:$8 sps:$4 sm:$0xff]   ;;  %v19543_v61 = vld [vmem:[#allocation33 + $0xdd0] ss:$8 sps:$4 sm:$0xff]   ;;  %vm8423_vm11 = vcmp.gt.f32.partialorder %v22876_v11, 0.0 }
0x29b1   :  { %12767 = vmatpush1.bf16.msra.mxu0 %v19486_v52  ;;  %v19548_v52 = vld [vmem:[#allocation33 + $0xfb4] ss:$8 sps:$4 sm:$0xff]  }
0x29b2   :  { %12768 = vmatprep.subr.bf16.mxu0 %v19494_v18  ;;  %v19546_v18 = vld [vmem:[#allocation33 + $0xfb0] ss:$8 sps:$4 sm:$0xff]  }
0x29b3   :  { %12371 = vmatpush1.bf16.msra.mxu1 %v19489_v14  ;;  %v19551_v14 = vld [vmem:[#allocation33 + $0xde4] ss:$8 sps:$4 sm:$0xff]  }
0x29b4   :  { %12372 = vmatprep.subr.bf16.mxu1 %v19497_v3  ;;  %v19549_v3 = vld [vmem:[#allocation33 + $0xde0] ss:$8 sps:$4 sm:$0xff]  }
0x29b5   :  { %12769 = vmatpush1.bf16.msra.mxu0 %v19492_v39  ;;  %v19554_v39 = vld [vmem:[#allocation33 + $0xfc4] ss:$8 sps:$4 sm:$0xff]  }
0x29b6   :  { %12770 = vmatprep.subr.bf16.mxu0 %v19500_v56  ;;  %v19552_v56 = vld [vmem:[#allocation33 + $0xfc0] ss:$8 sps:$4 sm:$0xff]  }
0x29b7   :  { %12373 = vmatpush1.bf16.msra.mxu1 %v19495_v57  ;;  %v19557_v57 = vld [vmem:[#allocation33 + $0xdf4] ss:$8 sps:$4 sm:$0xff]  }
0x29b8   :  { %12374 = vmatprep.subr.bf16.mxu1 %v19503_v50  ;;  %v8471_v50 = vmul.f32 0.01, %v22859_v8 }
0x29b9   :  { %12771 = vmatpush1.bf16.msra.mxu0 %v19498_v5  ;;  %v19560_v5 = vld [vmem:[#allocation33 + $0xfd4] ss:$8 sps:$4 sm:$0xff]  }
0x29ba   :  { %12772 = vmatprep.subr.bf16.mxu0 %v19506_v31  ;;  %v19555_v31 = vld [vmem:[#allocation33 + $0xdf0] ss:$8 sps:$4 sm:$0xff]  }
0x29bb   :  { %12375 = vmatpush1.bf16.msra.mxu1 %v19501_v19  ;;  %v19558_v19 = vld [vmem:[#allocation33 + $0xfd0] ss:$8 sps:$4 sm:$0xff]  }
0x29bc   :  { %12376 = vmatprep.subr.bf16.mxu1 %v19509_v47  ;;  %v19569_v47 = vld [vmem:[#allocation33 + $0x1004] ss:$8 sps:$4 sm:$0xff]  }
0x29bd   :  { %12773 = vmatpush1.bf16.msra.mxu0 %v19504_v58  ;;  %v19563_v58 = vld [vmem:[#allocation33 + $0xfe4] ss:$8 sps:$4 sm:$0xff]  }
0x29be   :  { %12774 = vmatprep.subr.bf16.mxu0 %v19512_v28  ;;  %v8523_v28 = vsel %vm8419_vm10, %v22859_v8, %v8471_v50  ;;  %v19575_v8 = vld [vmem:[#allocation33 + $0x1024] ss:$8 sps:$4 sm:$0xff]  }
0x29bf   :  { %12377 = vmatpush1.bf16.msra.mxu1 %v19507_v26  ;;  %v19561_v26 = vld [vmem:[#allocation33 + $0xfe0] ss:$8 sps:$4 sm:$0xff]   ;;  %v19611_v50 = vld [vmem:[#allocation33 + $0x1084] ss:$8 sps:$4 sm:$0xff]  }
0x29c0   :  { %12378 = vmatprep.subr.bf16.mxu1 %v19515_v25  ;;  %v8575_v25 = vpack.c.bf16 %v8523_v28, %v8523_v28  ;;  %v19620_v28 = vld [vmem:[#allocation33 + $0x1274] ss:$8 sps:$4 sm:$0xff]  }
0x29c1   :  { %12775 = vmatpush1.bf16.msra.mxu0 %v19510_v2  ;;  %v19567_v2 = vld [vmem:[#allocation33 + $0x1000] ss:$8 sps:$4 sm:$0xff]  }
0x29c2   :  { %12776 = vmatprep.subr.bf16.mxu0 %v19518_v40  ;;  %v19566_v40 = vld [vmem:[#allocation33 + $0xff4] ss:$8 sps:$4 sm:$0xff]  }
0x29c3   :  { %12379 = vmatpush1.bf16.msra.mxu1 %v19513_v33  ;;  %v19572_v33 = vld [vmem:[#allocation33 + $0x1014] ss:$8 sps:$4 sm:$0xff]  }
0x29c4   :  { %12380 = vmatprep.subr.bf16.mxu1 %v19521_v30  ;;  %v19564_v30 = vld [vmem:[#allocation33 + $0xff0] ss:$8 sps:$4 sm:$0xff]  }
0x29c5   :  { %12777 = vmatpush1.bf16.msra.mxu0 %v19516_v53  ;;  %v8475_v53 = vmul.f32 0.01, %v22876_v11 }
0x29c6   :  { %12778 = vmatprep.subr.bf16.mxu0 %v19524_v21  ;;  %v19570_v21 = vld [vmem:[#allocation33 + $0x1010] ss:$8 sps:$4 sm:$0xff]  }
0x29c7   :  { %12381 = vmatpush1.bf16.msra.mxu1 %v19519_v12  ;;  %v19578_v12 = vld [vmem:[#allocation33 + $0x1204] ss:$8 sps:$4 sm:$0xff]  }
0x29c8   :  { %12382 = vmatprep.subr.bf16.mxu1 %v19527_v45  ;;  %v19573_v45 = vld [vmem:[#allocation33 + $0x1020] ss:$8 sps:$4 sm:$0xff]  }
0x29c9   :  { %12779 = vmatpush1.bf16.msra.mxu0 %v19522_v1  ;;  %v8527_v1 = vsel %vm8423_vm11, %v22876_v11, %v8475_v53  ;;  %v19585_v11 = vld [vmem:[#allocation33 + $0x1040] ss:$8 sps:$4 sm:$0xff]  }
0x29ca   :  { %12780 = vmatprep.subr.bf16.mxu0 %v19530_v13  ;;  %v19576_v13 = vld [vmem:[#allocation33 + $0x1200] ss:$8 sps:$4 sm:$0xff]  }
0x29cb   :  { %12383 = vmatpush1.bf16.msra.mxu1 %v19525_v16  ;;  %v8579_v16 = vpack.c.bf16 %v8527_v1, %v8527_v1  ;;  %v19624_v53 = vld [vmem:[#allocation33 + $0x1280] ss:$8 sps:$4 sm:$0xff]   ;;  %v19635_v1 = vld [vmem:[#allocation33 + $0x10c4] ss:$8 sps:$4 sm:$0xff]  }
0x29cc   :  { %12384 = vmatprep.subr.bf16.mxu1 %v19533_v32  ;;  %v19584_v32 = vld [vmem:[#allocation33 + $0x1214] ss:$8 sps:$4 sm:$0xff]  }
0x29cd   :  { %12781 = vmatpush1.bf16.msra.mxu0 %v19528_v7  ;;  %v19581_v7 = vld [vmem:[#allocation33 + $0x1034] ss:$8 sps:$4 sm:$0xff]  }
0x29ce   :  { %12782 = vmatprep.subr.bf16.mxu0 %v19536_v23  ;;  %v19579_v23 = vld [vmem:[#allocation33 + $0x1030] ss:$8 sps:$4 sm:$0xff]  }
0x29cf   :  { %12385 = vmatpush1.bf16.msra.mxu1 %v19531_v62  ;;  %v19582_v62 = vld [vmem:[#allocation33 + $0x1210] ss:$8 sps:$4 sm:$0xff]  }
0x29d0   :  { %12386 = vmatprep.subr.bf16.mxu1 %v19539_v0  ;;  %v19590_v0 = vld [vmem:[#allocation33 + $0x1224] ss:$8 sps:$4 sm:$0xff]  }
0x29d1   :  { %12783 = vmatpush1.bf16.msra.mxu0 %v19534_v60  ;;  %v19587_v60 = vld [vmem:[#allocation33 + $0x1044] ss:$8 sps:$4 sm:$0xff]  }
0x29d2   :  { %12784 = vmatprep.subr.bf16.mxu0 %v19542_v27  ;;  %v19588_v27 = vld [vmem:[#allocation33 + $0x1220] ss:$8 sps:$4 sm:$0xff]  }
0x29d3   :  { %12387 = vmatpush1.bf16.msra.mxu1 %v19537_v35  ;;  %v19593_v35 = vld [vmem:[#allocation33 + $0x1054] ss:$8 sps:$4 sm:$0xff]  }
0x29d4   :  { %12388 = vmatprep.subr.bf16.mxu1 %v19545_v55  ;;  %v19591_v55 = vld [vmem:[#allocation33 + $0x1050] ss:$8 sps:$4 sm:$0xff]  }
0x29d5   :  { %12785 = vmatpush1.bf16.msra.mxu0 %v19540_v43  ;;  %v19596_v43 = vld [vmem:[#allocation33 + $0x1234] ss:$8 sps:$4 sm:$0xff]  }
0x29d6   :  { %12786 = vmatprep.subr.bf16.mxu0 %v19548_v52  ;;  %v19594_v52 = vld [vmem:[#allocation33 + $0x1230] ss:$8 sps:$4 sm:$0xff]  }
0x29d7   :  { %12389 = vmatpush1.bf16.msra.mxu1 %v19543_v61  ;;  %v19599_v61 = vld [vmem:[#allocation33 + $0x1064] ss:$8 sps:$4 sm:$0xff]  }
0x29d8   :  { %12390 = vmatprep.subr.bf16.mxu1 %v19551_v14  ;;  %v19597_v14 = vld [vmem:[#allocation33 + $0x1060] ss:$8 sps:$4 sm:$0xff]  }
0x29d9   :  { %12787 = vmatpush1.bf16.msra.mxu0 %v19546_v18  ;;  %v19602_v18 = vld [vmem:[#allocation33 + $0x1244] ss:$8 sps:$4 sm:$0xff]  }
0x29da   :  { %12788 = vmatprep.subr.bf16.mxu0 %v19554_v39  ;;  %v19600_v39 = vld [vmem:[#allocation33 + $0x1240] ss:$8 sps:$4 sm:$0xff]  }
0x29db   :  { %12391 = vmatpush1.bf16.msra.mxu1 %v19549_v3  ;;  %v19605_v3 = vld [vmem:[#allocation33 + $0x1074] ss:$8 sps:$4 sm:$0xff]  }
0x29dc   :  { %12392 = vmatprep.subr.bf16.mxu1 %v19557_v57  ;;  %v19603_v57 = vld [vmem:[#allocation33 + $0x1070] ss:$8 sps:$4 sm:$0xff]  }
0x29dd   :  { %12789 = vmatpush1.bf16.msra.mxu0 %v19552_v56  ;;  %v19608_v56 = vld [vmem:[#allocation33 + $0x1254] ss:$8 sps:$4 sm:$0xff]  }
0x29de   :  { %12790 = vmatprep.subr.bf16.mxu0 %v19560_v5  ;;  %v19606_v5 = vld [vmem:[#allocation33 + $0x1250] ss:$8 sps:$4 sm:$0xff]  }
0x29df   :  { %12393 = vmatpush1.bf16.msra.mxu1 %v19555_v31  ;;  %v19614_v31 = vld [vmem:[#allocation33 + $0x1264] ss:$8 sps:$4 sm:$0xff]  }
0x29e0   :  { %13125 = vmatprep.subr.bf16.mxu1 %v19569_v47  ;;  %v19617_v47 = vld [vmem:[#allocation33 + $0x1094] ss:$8 sps:$4 sm:$0xff]  }
0x29e1   :  { %12791 = vmatpush1.bf16.msra.mxu0 %v19558_v19  ;;  %v19609_v19 = vld [vmem:[#allocation33 + $0x1080] ss:$8 sps:$4 sm:$0xff]  }
0x29e2   :  { %12792 = vmatprep.subr.bf16.mxu0 %v19563_v58  ;;  %12395 = vmatmul.mubr.bf16.vlgmr.msra.gmra.mrb[116].mxu1 %v8575_v25  ;;  %v19612_v58 = vld [vmem:[#allocation33 + $0x1260] ss:$8 sps:$4 sm:$0xff]   ;;  %v19623_v25 = vld [vmem:[#allocation33 + $0x10a4] ss:$8 sps:$4 sm:$0xff]  }
0x29e3   :  { %13126 = vmatpush1.bf16.msra.mxu1 %v19567_v2  ;;  %v19618_v2 = vld [vmem:[#allocation33 + $0x1270] ss:$8 sps:$4 sm:$0xff]  }
0x29e4   :  { %13127 = vmatprep.subr.bf16.mxu1 %v19572_v33  ;;  %v19621_v33 = vld [vmem:[#allocation33 + $0x10a0] ss:$8 sps:$4 sm:$0xff]  }
0x29e5   :  { %12793 = vmatpush1.bf16.msra.mxu0 %v19561_v26  ;;  %v19615_v26 = vld [vmem:[#allocation33 + $0x1090] ss:$8 sps:$4 sm:$0xff]  }
0x29e6   :  { %12794 = vmatprep.subr.bf16.mxu0 %v19566_v40  ;;  %v19626_v40 = vld [vmem:[#allocation33 + $0x1284] ss:$8 sps:$4 sm:$0xff]  }
0x29e7   :  { %13128 = vmatpush1.bf16.msra.mxu1 %v19570_v21  ;;  %v19632_v21 = vld [vmem:[#allocation33 + $0x1294] ss:$8 sps:$4 sm:$0xff]  }
0x29e8   :  { %13129 = vmatprep.subr.bf16.mxu1 %v19575_v8  ;;  %v19627_v8 = vld [vmem:[#allocation33 + $0x10b0] ss:$8 sps:$4 sm:$0xff]  }
0x29e9   :  { %12795 = vmatpush1.bf16.msra.mxu0 %v19564_v30  ;;  %v19629_v30 = vld [vmem:[#allocation33 + $0x10b4] ss:$8 sps:$4 sm:$0xff]  }
0x29ea   :  { %13527 = vmatprep.subr.bf16.mxu0 %v19578_v12  ;;  %v19630_v12 = vld [vmem:[#allocation33 + $0x1290] ss:$8 sps:$4 sm:$0xff]  }
0x29eb   :  { %13130 = vmatpush1.bf16.msra.mxu1 %v19573_v45  ;;  %v19638_v45 = vld [vmem:[#allocation33 + $0x12a4] ss:$8 sps:$4 sm:$0xff]  }
0x29ec   :  { %12797 = vmatmul.mubr.bf16.vlgmr.msra.gmra.mrb[112].mxu0 %v8579_v16  ;;  %13131 = vmatprep.subr.bf16.mxu1 %v19581_v7  ;;  %v19636_v16 = vld [vmem:[#allocation33 + $0x12a0] ss:$8 sps:$4 sm:$0xff]   ;;  %v19641_v7 = vld [vmem:[#allocation33 + $0x10d4] ss:$8 sps:$4 sm:$0xff]  }
0x29ed   :  { %13528 = vmatpush1.bf16.msra.mxu0 %v19576_v13  ;;  %v19633_v13 = vld [vmem:[#allocation33 + $0x10c0] ss:$8 sps:$4 sm:$0xff]  }
0x29ee   :  { %13529 = vmatprep.subr.bf16.mxu0 %v19584_v32  ;;  %v19644_v32 = vld [vmem:[#allocation33 + $0x12b4] ss:$8 sps:$4 sm:$0xff]  }
0x29ef   :  { %13132 = vmatpush1.bf16.msra.mxu1 %v19579_v23  ;;  %v19639_v23 = vld [vmem:[#allocation33 + $0x10d0] ss:$8 sps:$4 sm:$0xff]  }
0x29f0   :  { %13133 = vmatprep.subr.bf16.mxu1 %v19587_v60  ;;  %v5410_v60 = vld [vmem:[#allocation28 + $0x30] sm:$0xf] }
0x29f1   :  { %13530 = vmatpush1.bf16.msra.mxu0 %v19582_v62  ;;  %v19642_v62 = vld [vmem:[#allocation33 + $0x12b0] ss:$8 sps:$4 sm:$0xff]  }
0x29f2   :  { %13531 = vmatprep.subr.bf16.mxu0 %v19590_v0  ;;  %v19647_v0 = vld [vmem:[#allocation33 + $0x10e4] ss:$8 sps:$4 sm:$0xff]  }
0x29f3   :  { %13134 = vmatpush1.bf16.msra.mxu1 %v19585_v11  ;;  %v19650_v11 = vld [vmem:[#allocation33 + $0x12c4] ss:$8 sps:$4 sm:$0xff]  }
0x29f4   :  { %13135 = vmatprep.subr.bf16.mxu1 %v19593_v35  ;;  %v5619_v35 = vrot.slane %v5410_v60, %v21461_v20 }
0x29f5   :  { %13532 = vmatpush1.bf16.msra.mxu0 %v19588_v27 }
0x29f6   :  { %13533 = vmatprep.subr.bf16.mxu0 %v19596_v43  ;;  %v5623_v43 = vrot.slane %v5410_v60, %v21972_v54 }
0x29f7   :  { %13136 = vmatpush1.bf16.msra.mxu1 %v19591_v55 }
0x29f8   :  { %13137 = vmatprep.subr.bf16.mxu1 %v19599_v61  ;;  %v19648_v61 = vld [vmem:[#allocation33 + $0x12c0] ss:$8 sps:$4 sm:$0xff]  }
0x29f9   :  { %13534 = vmatpush1.bf16.msra.mxu0 %v19594_v52  ;;  %v19645_v52 = vld [vmem:[#allocation33 + $0x10e0] ss:$8 sps:$4 sm:$0xff]  }
0x29fa   :  { %13535 = vmatprep.subr.bf16.mxu0 %v19602_v18 }
0x29fb   :  { %13138 = vmatpush1.bf16.msra.mxu1 %v19597_v14  ;;  %v19653_v14 = vld [vmem:[#allocation33 + $0x10f4] ss:$8 sps:$4 sm:$0xff]  }
0x29fc   :  { %13139 = vmatprep.subr.bf16.mxu1 %v19605_v3 }
0x29fd   :  { %13536 = vmatpush1.bf16.msra.mxu0 %v19600_v39  ;;  %v19656_v39 = vld [vmem:[#allocation33 + $0x12d4] ss:$8 sps:$4 sm:$0xff]  }
0x29fe   :  { %13537 = vmatprep.subr.bf16.mxu0 %v19608_v56  ;;  %v23694_v56 = vld [vmem:[#allocation82_spill] sm:$0xff] }
0x29ff   :  { %13140 = vmatpush1.bf16.msra.mxu1 %v19603_v57  ;;  %v22891_v57 = vadd.f32 %v23694_v56, %v5619_v35 }
0x2a00   :  { %13141 = vmatprep.subr.bf16.mxu1 %v19611_v50 }
0x2a01   :  { %13538 = vmatpush1.bf16.msra.mxu0 %v19606_v5  ;;  %v23695_v5 = vld [vmem:[#allocation84_spill] sm:$0xff] }
0x2a02   :  { %13539 = vmatprep.subr.bf16.mxu0 %v19614_v31  ;;  %v22894_v50 = vadd.f32 %v23695_v5, %v5623_v43  ;;  %v19651_v31 = vld [vmem:[#allocation33 + $0x10f0] ss:$8 sps:$4 sm:$0xff]  }
0x2a03   :  { %13142 = vmatpush1.bf16.msra.mxu1 %v19609_v19  ;;  %v19654_v19 = vld [vmem:[#allocation33 + $0x12d0] ss:$8 sps:$4 sm:$0xff]  }
0x2a04   :  { %13143 = vmatprep.subr.bf16.mxu1 %v19617_v47  ;;  %v19662_v47 = vld [vmem:[#allocation33 + $0x12e4] ss:$8 sps:$4 sm:$0xff]  }
0x2a05   :  { %13540 = vmatpush1.bf16.msra.mxu0 %v19612_v58  ;;  %v19659_v58 = vld [vmem:[#allocation33 + $0x1104] ss:$8 sps:$4 sm:$0xff]  }
0x2a06   :  { %13541 = vmatprep.subr.bf16.mxu0 %v19620_v28  ;;  %v5627_v28 = vrot.slane %v5410_v60, %v21975_v48 }
0x2a07   :  { %13144 = vmatpush1.bf16.msra.mxu1 %v19615_v26 }
0x2a08   :  { %13145 = vmatprep.subr.bf16.mxu1 %v19623_v25  ;;  %v7409_v25 = vsel %vm7299_vm9, %v22894_v50, 0.0 }
0x2a09   :  { %13542 = vmatpush1.bf16.msra.mxu0 %v19618_v2  ;;  %v7408_v2 = vsel %vm7299_vm9, %v22891_v57, 0.0 }
0x2a0a   :  { %13543 = vmatprep.subr.bf16.mxu0 %v19626_v40 }
0x2a0b   :  { %13146 = vmatpush1.bf16.msra.mxu1 %v19621_v33  ;;  %v19660_v33 = vld [vmem:[#allocation33 + $0x12e0] ss:$8 sps:$4 sm:$0xff]  }
0x2a0c   :  { %13147 = vmatprep.subr.bf16.mxu1 %v19629_v30 }
0x2a0d   :  { %13544 = vmatpush1.bf16.msra.mxu0 %v19624_v53  ;;  %v9433_v53 = vld [vmem:[#allocation34] sm:$0x3] }
0x2a0e   :  { %13545 = vmatprep.subr.bf16.mxu0 %v19632_v21  ;;  %v19668_v21 = vld [vmem:[#allocation33 + $0x12f4] ss:$8 sps:$4 sm:$0xff]  }
0x2a0f   :  { %13148 = vmatpush1.bf16.msra.mxu1 %v19627_v8  ;;  %v23696_v8 = vld [vmem:[#allocation83_spill] sm:$0xff] }
0x2a10   :  { %13149 = vmatprep.subr.bf16.mxu1 %v19635_v1  ;;  %v5631_v1 = vrot.slane %v5410_v60, %v21978_v49 }
0x2a11   :  { %13546 = vmatpush1.bf16.msra.mxu0 %v19630_v12  ;;  %v22906_v12 = vadd.f32 %v23696_v8, %v5627_v28 }
0x2a12   :  { %13547 = vmatprep.subr.bf16.mxu0 %v19638_v45 }
0x2a13   :  { %13150 = vmatpush1.bf16.msra.mxu1 %v19633_v13  ;;  %v7410_v13 = vadd.f32 %v7409_v25, %v7408_v2 }
0x2a14   :  { %13151 = vmatprep.subr.bf16.mxu1 %v19641_v7  ;;  %v9466_v7 = vrot.slane %v9433_v53, %v21972_v54 }
0x2a15   :  { %13548 = vmatpush1.bf16.msra.mxu0 %v19636_v16  ;;  %v9462_v16 = vrot.slane %v9433_v53, %v21461_v20 }
0x2a16   :  { %13549 = vmatprep.subr.bf16.mxu0 %v19644_v32  ;;  %v22884_v27 = vpop.f32.mrb[112].mxu1  ;;  %v19666_v32 = vld [vmem:[#allocation33 + $0x12f0] ss:$8 sps:$4 sm:$0xff]  }
0x2a17   :  { %v22888_v55 = vpop.f32.mrb[113].mxu1  ;;  %13152 = vmatpush1.bf16.msra.mxu1 %v19639_v23  ;;  %v9435_v23 = vld [vmem:[#allocation34 + $0x4] sm:$0x3] }
0x2a18   :  { %v11596_v18 = vpop.f32.mrb[114].mxu1  ;;  %13153 = vmatprep.subr.bf16.mxu1 %v19647_v0  ;;  %v7411_v0 = vsel %vm7299_vm9, %v22906_v12, 0.0  ;;  %v9482_v5 = vrot.slane %v9435_v23, %v21972_v54 }
0x2a19   :  { %13550 = vmatpush1.bf16.msra.mxu0 %v19642_v62  ;;  %v11597_v3 = vpop.f32.mrb[115].mxu1  ;;  %v19674_v62 = vld [vmem:[#allocation33 + $0x1304] ss:$8 sps:$4 sm:$0xff]   ;;  %v22920_v18 = vadd.f32 %v22538_v63, %v9466_v7 }
0x2a1a   :  { %13551 = vmatprep.subr.bf16.mxu0 %v19650_v11  ;;  %v23697_v11 = vld [vmem:[#allocation85_spill] sm:$0xff] }
0x2a1b   :  { %13154 = vmatpush1.bf16.msra.mxu1 %v19645_v52  ;;  %v22914_v35 = vadd.f32 %v23697_v11, %v5631_v1  ;;  %v7412_v52 = vadd.f32 %v7411_v0, %v7410_v13  ;;  %23699 = vst [vmem:[#allocation68_spill] sm:$0xff] %v22920_v18  ;;  %v22974_v13 = vld [vmem:[#allocation30 + $0x24] sm:$0xf] }
0x2a1c   :  { %13155 = vmatprep.subr.bf16.mxu1 %v19653_v14  ;;  %v9478_v14 = vrot.slane %v9435_v23, %v21461_v20 }
0x2a1d   :  { %13552 = vmatpush1.bf16.msra.mxu0 %v19648_v61  ;;  %v22917_v61 = vadd.f32 %v22536_v4, %v9462_v16  ;;  %v7413_v56 = vsel %vm7299_vm9, %v22914_v35, 0.0 }
0x2a1e   :  { %13553 = vmatprep.subr.bf16.mxu0 %v19656_v39  ;;  %v22923_v39 = vld [vmem:[#allocation34 + $0x8] sm:$0x3]  ;;  %v22941_v28 = vadd.f32 %v22710_v15, %v9478_v14  ;;  %v22960_v15 = vadd.f32 %v22712_v38, %v9482_v5 }
0x2a1f   :  { %13156 = vmatpush1.bf16.msra.mxu1 %v19651_v31  ;;  %23698 = vst [vmem:[#allocation66_spill] sm:$0xff] %v22917_v61  ;;  %v22934_v63 = vsel %vm7299_vm9, %v22917_v61, 0.0 }
0x2a20   :  { %v22897_v26 = vpop.f32.mrb[108].mxu0  ;;  %13166 = vmatprep.subr.bf16.mxu1 %v19659_v58  ;;  %v22930_v58 = vld [vmem:[#allocation30 + $0x20] sm:$0xf] }
0x2a21   :  { %v22903_v40 = vpop.f32.mrb[109].mxu0  ;;  %13554 = vmatpush1.bf16.msra.mxu0 %v19654_v19  ;;  %v22928_v19 = vadd.f32 %v7413_v56, %v7412_v52  ;;  %v7895_v23 = vrot.slane %v22930_v58, %v21975_v48 }
0x2a22   :  { %v11998_v30 = vpop.f32.mrb[110].mxu0  ;;  %13555 = vmatprep.subr.bf16.mxu0 %v19662_v47  ;;  %v22938_v47 = vsel %vm7299_vm9, %v22920_v18, 0.0 }
0x2a23   :  { %v11999_v45 = vpop.f32.mrb[111].mxu0 }
0x2a25   :  { %13556 = vmatpush1.bf16.msra.mxu0 %v19660_v33  ;;  %v7615_v43 = vpop.xlane.xlu1 %7614 }
0x2a26   :  { %13557 = vmatprep.subr.bf16.mxu0 %v19668_v21  ;;  %v7660_v60 = vmul.f32 0.001953125, %v7615_v43  ;;  %v22957_v21 = vld [vmem:[#allocation31 + $0x20] sm:$0xf] }
0x2a27   :  { %v8216_v7 = vrot.slane %v22957_v21, %v21972_v54  ;;  %v8212_v43 = vrot.slane %v22957_v21, %v21461_v20  ;;  %v8224_v14 = vrot.slane %v22957_v21, %v21978_v49  ;;  %v8220_v56 = vrot.slane %v22957_v21, %v21975_v48 }
0x2a28   :  { %v7673_v3 = vadd.f32 1e-05, %v7660_v60 }
0x2a29   :  { %13558 = vmatpush1.bf16.msra.mxu0 %v19666_v32  ;;  %v7398_v31 = vpop.xlane.xlu1 %7397  ;;  %v7899_v32 = vrot.slane %v22930_v58, %v21978_v49 }
0x2a2a   :  { %13568 = vmatprep.subr.bf16.mxu0 %v19674_v62  ;;  %20157 = vrsqrt.f32 %v7673_v3  ;;  %v7428_v4 = vmul.f32 0.001953125, %v7398_v31 }
0x2a2c   :  { %v22946_v25 = vsub.f32 %v22717_v6, %v7428_v4  ;;  %v22949_v33 = vsub.f32 %v22720_v17, %v7428_v4  ;;  %v22952_v53 = vsub.f32 %v22735_v34, %v7428_v4  ;;  %v22955_v30 = vsub.f32 %v22745_v24, %v7428_v4 }
0x2a2d   :  { %v7624_v1 = vpop.xlane.xlu0 %7623  ;;  %v7891_v6 = vrot.slane %v22930_v58, %v21972_v54  ;;  %v7887_v17 = vrot.slane %v22930_v58, %v21461_v20  ;;  %v7903_v4 = vrot.slane %v22974_v13, %v21461_v20 }
0x2a2e   :  { %v7523_v34 = vmul.f32 %v22946_v25, %v22946_v25  ;;  %v7524_v24 = vmul.f32 %v22949_v33, %v22949_v33  ;;  %v7661_v45 = vmul.f32 0.001953125, %v7624_v1  ;;  %v7525_v38 = vmul.f32 %v22952_v53, %v22952_v53 }
0x2a2f   :  { %v7526_v16 = vmul.f32 %v22955_v30, %v22955_v30 }
0x2a30   :  { %v7674_v62 = vadd.f32 1e-05, %v7661_v45  ;;  %v7625_v0 = vsel %vm7299_vm9, %v7523_v34, 0.0  ;;  %v7626_v11 = vsel %vm7299_vm9, %v7524_v24, 0.0  ;;  %v7628_v31 = vsel %vm7299_vm9, %v7525_v38, 0.0 }
0x2a31   :  { %v7407_v52 = vpop.xlane.xlu0 %7406  ;;  %v7627_v60 = vadd.f32 %v7626_v11, %v7625_v0  ;;  %v7630_v1 = vsel %vm7299_vm9, %v7526_v16, 0.0  ;;  %v7915_v34 = vrot.slane %v22974_v13, %v21978_v49 }
0x2a32   :  { %20159 = vrsqrt.f32 %v7674_v62  ;;  %v7429_v5 = vmul.f32 0.001953125, %v7407_v52 }
0x2a33   :  { %v7629_v58 = vadd.f32 %v7628_v31, %v7627_v60  ;;  %v23017_v31 = vld [vmem:[#allocation31 + $0x24] sm:$0xf] }
0x2a34   :  { %v20158_v45 = vpop.eup %20157  ;;  %v23003_v0 = vsub.f32 %v22738_v36, %v7429_v5  ;;  %v23006_v21 = vsub.f32 %v22741_v10, %v7429_v5  ;;  %v23009_v38 = vsub.f32 %v22754_v29, %v7429_v5  ;;  %v23012_v62 = vsub.f32 %v22780_v44, %v7429_v5 }
0x2a35   :  { %v7631_v16 = vadd.f32 %v7630_v1, %v7629_v58  ;;  %v7724_v11 = vmul.f32 %v20158_v45, %v22769_v46  ;;  %v7723_v52 = vmul.f32 %v20158_v45, %v22766_v59  ;;  %v7726_v60 = vmul.f32 %v20158_v45, %v22775_v9 }
0x2a36   :  { %v7527_v36 = vmul.f32 %v23003_v0, %v23003_v0  ;;  %v7528_v10 = vmul.f32 %v23006_v21, %v23006_v21  ;;  %v7529_v29 = vmul.f32 %v23009_v38, %v23009_v38  ;;  %v7530_v44 = vmul.f32 %v23012_v62, %v23012_v62 }
0x2a37   :  { %7632 = vadd.xlane.f32.xlu1 %v7631_v16  ;;  %v8049_v46 = vmul.f32 %v7891_v6, %v7724_v11  ;;  %v8048_v5 = vmul.f32 %v7887_v17, %v7723_v52  ;;  %v8051_v59 = vmul.f32 %v7899_v32, %v7726_v60  ;;  %v7725_v9 = vmul.f32 %v20158_v45, %v22772_v37 }
0x2a38   :  { %v7634_v58 = vsel %vm7299_vm9, %v7527_v36, 0.0  ;;  %v7635_v1 = vsel %vm7299_vm9, %v7528_v10, 0.0  ;;  %v8232_v24 = vrot.slane %v23017_v31, %v21972_v54  ;;  %v8228_v8 = vrot.slane %v23017_v31, %v21461_v20 }
0x2a39   :  { %v7636_v2 = vadd.f32 %v7635_v1, %v7634_v58  ;;  %v8374_v3 = vadd.f32 %v8216_v7, %v8049_v46  ;;  %v8373_v18 = vadd.f32 %v8212_v43, %v8048_v5  ;;  %v8376_v61 = vadd.f32 %v8224_v14, %v8051_v59  ;;  %v19665_v59 = vld [vmem:[#allocation33 + $0x1114] ss:$8 sps:$4 sm:$0xff]   ;;  %v19663_v1 = vld [vmem:[#allocation33 + $0x1110] ss:$8 sps:$4 sm:$0xff]  }
0x2a3a   :  { %v7637_v6 = vsel %vm7299_vm9, %v7529_v29, 0.0  ;;  %v7639_v17 = vsel %vm7299_vm9, %v7530_v44, 0.0  ;;  %v8240_v37 = vrot.slane %v23017_v31, %v21978_v49  ;;  %v8050_v32 = vmul.f32 %v7895_v23, %v7725_v9  ;;  %v19657_v23 = vld [vmem:[#allocation33 + $0x1100] ss:$8 sps:$4 sm:$0xff]  }
0x2a3b   :  { %7415 = vadd.xlane.f32.xlu1 %v22928_v19  ;;  %v7638_v45 = vadd.f32 %v7637_v6, %v7636_v2  ;;  %vm8426_vm12 = vcmp.gt.f32.partialorder %v8374_v3, 0.0  ;;  %v8478_v16 = vmul.f32 0.01, %v8374_v3  ;;  %vm8425_vm13 = vcmp.gt.f32.partialorder %v8373_v18, 0.0  ;;  %v19671_v6 = vld [vmem:[#allocation33 + $0x1124] ss:$8 sps:$4 sm:$0xff]  }
0x2a3c   :  { %v20160_v11 = vpop.eup %20159  ;;  %v8477_v52 = vmul.f32 0.01, %v8373_v18  ;;  %vm8428_vm14 = vcmp.gt.f32.partialorder %v8376_v61, 0.0  ;;  %v8480_v7 = vmul.f32 0.01, %v8376_v61  ;;  %v23039_v43 = vadd.f32 %v8220_v56, %v8050_v32 }
0x2a3d   :  { %v7640_v14 = vadd.f32 %v7639_v17, %v7638_v45  ;;  %v8530_v60 = vsel %vm8426_vm12, %v8374_v3, %v8478_v16  ;;  %v7728_v36 = vmul.f32 %v20160_v11, %v22826_v41  ;;  %v7727_v10 = vmul.f32 %v20160_v11, %v22823_v51 }
0x2a3e   :  { %v8582_v29 = vpack.c.bf16 %v8530_v60, %v8530_v60  ;;  %v8529_v44 = vsel %vm8425_vm13, %v8373_v18, %v8477_v52  ;;  %v8532_v19 = vsel %vm8428_vm14, %v8376_v61, %v8480_v7  ;;  %v7730_v2 = vmul.f32 %v20160_v11, %v22832_v42  ;;  %v19669_v52 = vld [vmem:[#allocation33 + $0x1120] ss:$8 sps:$4 sm:$0xff]  }
0x2a3f   :  { %v14843_v46 = vadd.f32 %v22938_v47, %v22934_v63  ;;  %7641 = vadd.xlane.f32.xlu0 %v7640_v14  ;;  %v8581_v5 = vpack.c.bf16 %v8529_v44, %v8529_v44  ;;  %v23700_v56 = vrot.slane %v22974_v13, %v21972_v54  ;;  %v8052_v9 = vmul.f32 %v7903_v4, %v7727_v10  ;;  %v19672_v14 = vld [vmem:[#allocation33 + $0x1300] ss:$8 sps:$4 sm:$0xff]   ;;  %v19677_v10 = vld [vmem:[#allocation33 + $0x1134] ss:$8 sps:$4 sm:$0xff]  }
0x2a40   :  { %13157 = vmatprep.mubr.bf16.mxu1 %v8582_v29  ;;  %v8584_v41 = vpack.c.bf16 %v8532_v19, %v8532_v19  ;;  %v8055_v51 = vmul.f32 %v7915_v34, %v7730_v2  ;;  %v7729_v58 = vmul.f32 %v20160_v11, %v22829_v22  ;;  %v8236_v61 = vrot.slane %v23017_v31, %v21975_v48  ;;  %v19680_v29 = vld [vmem:[#allocation33 + $0x1314] ss:$8 sps:$4 sm:$0xff]   ;;  %v19675_v19 = vld [vmem:[#allocation33 + $0x1130] ss:$8 sps:$4 sm:$0xff]  }
0x2a41   :  { %v8053_v3 = vmul.f32 %v23700_v56, %v7728_v36  ;;  %v14851_v42 = vsel %vm7299_vm9, %v22941_v28, 0.0  ;;  %v23701_v18 = vrot.slane %v22923_v39, %v21461_v20  ;;  %13158 = vmatmul.mubr.bf16.vlgmr.msra.gmra.mrb[120].mxu1 %v8581_v5  ;;  %v8377_v4 = vadd.f32 %v8228_v8, %v8052_v9  ;;  %v19678_v2 = vld [vmem:[#allocation33 + $0x1310] ss:$8 sps:$4 sm:$0xff]   ;;  %v19686_v5 = vld [vmem:[#allocation33 + $0x1324] ss:$8 sps:$4 sm:$0xff]  }
0x2a42   :  { %v14852_v34 = vsel %vm7299_vm9, %v22960_v15, 0.0  ;;  %v23702_v22 = vrot.slane %v22923_v39, %v21972_v54  ;;  %13167 = vmatpush1.bf16.msra.mxu1 %v19657_v23  ;;  %13198 = vmatprep.mubr.bf16.mxu1 %v8584_v41  ;;  %v8380_v17 = vadd.f32 %v8240_v37, %v8055_v51  ;;  %v19684_v56 = vld [vmem:[#allocation33 + $0x1320] ss:$8 sps:$4 sm:$0xff]   ;;  %v19692_v9 = vld [vmem:[#allocation33 + $0x1334] ss:$8 sps:$4 sm:$0xff]   ;;  %vm8427_vm2 = vcmp.gt.f32.partialorder %v23039_v43, 0.0 }
0x2a43   :  { %v23058_v63 = vadd.f32 %v22884_v27, %v23701_v18  ;;  %v8378_v47 = vadd.f32 %v8232_v24, %v8053_v3  ;;  %v23703_v27 = vrot.slane %v22974_v13, %v21975_v48  ;;  %14844 = vadd.xlane.f32.xlu0 %v14843_v46  ;;  %13168 = vmatprep.subr.bf16.mxu1 %v19665_v59  ;;  %vm8429_vm0 = vcmp.gt.f32.partialorder %v8377_v4, 0.0  ;;  %v19683_v46 = vld [vmem:[#allocation33 + $0x1144] ss:$8 sps:$4 sm:$0xff]   ;;  %v19681_v59 = vld [vmem:[#allocation33 + $0x1140] ss:$8 sps:$4 sm:$0xff]  }
0x2a44   :  { %v23066_v31 = vadd.f32 %v22888_v55, %v23702_v22  ;;  %v8481_v24 = vmul.f32 0.01, %v8377_v4  ;;  %vm8432_vm1 = vcmp.gt.f32.partialorder %v8380_v17, 0.0  ;;  %v8484_v39 = vmul.f32 0.01, %v8380_v17 }
0x2a45   :  { %v8054_v32 = vmul.f32 %v23703_v27, %v7729_v58  ;;  %vm8430_vm15 = vcmp.gt.f32.partialorder %v8378_v47, 0.0  ;;  %v8482_v8 = vmul.f32 0.01, %v8378_v47  ;;  %v14853_v55 = vadd.f32 %v14852_v34, %v14851_v42  ;;  %v19689_v3 = vld [vmem:[#allocation33 + $0x1154] ss:$8 sps:$4 sm:$0xff]  }
0x2a46   :  { %v14861_v16 = vsel %vm7299_vm9, %v23058_v63, 0.0  ;;  %v8533_v37 = vsel %vm8429_vm0, %v8377_v4, %v8481_v24  ;;  %v14862_v13 = vsel %vm7299_vm9, %v23066_v31, 0.0  ;;  %13169 = vmatpush1.bf16.msra.mxu1 %v19663_v1  ;;  %v8536_v36 = vsel %vm8432_vm1, %v8380_v17, %v8484_v39  ;;  %v19687_v41 = vld [vmem:[#allocation33 + $0x1150] ss:$8 sps:$4 sm:$0xff]   ;;  %v19695_v58 = vld [vmem:[#allocation33 + $0x1164] ss:$8 sps:$4 sm:$0xff]  }
0x2a47   :  { %v23071_v45 = vadd.f32 %v8236_v61, %v8054_v32  ;;  %v8534_v11 = vsel %vm8430_vm15, %v8378_v47, %v8482_v8  ;;  %v8585_v60 = vpack.c.bf16 %v8533_v37, %v8533_v37  ;;  %14854 = vadd.xlane.f32.xlu0 %v14853_v55  ;;  %13170 = vmatprep.subr.bf16.mxu1 %v19671_v6  ;;  %v19690_v51 = vld [vmem:[#allocation33 + $0x1330] ss:$8 sps:$4 sm:$0xff]   ;;  %v19698_v61 = vld [vmem:[#allocation33 + $0x1344] ss:$8 sps:$4 sm:$0xff]   ;;  %v19693_v42 = vld [vmem:[#allocation33 + $0x1160] ss:$8 sps:$4 sm:$0xff]  }
0x2a48   :  { %v8586_v7 = vpack.c.bf16 %v8534_v11, %v8534_v11  ;;  %v14863_v23 = vadd.f32 %v14862_v13, %v14861_v16  ;;  %v8588_v44 = vpack.c.bf16 %v8536_v36, %v8536_v36  ;;  %v19696_v18 = vld [vmem:[#allocation33 + $0x1340] ss:$8 sps:$4 sm:$0xff]   ;;  %v19701_v47 = vld [vmem:[#allocation33 + $0x1174] ss:$8 sps:$4 sm:$0xff]   ;;  %v19699_v34 = vld [vmem:[#allocation33 + $0x1170] ss:$8 sps:$4 sm:$0xff]  }
0x2a49   :  { %v19704_v4 = vld [vmem:[#allocation33 + $0x1354] ss:$8 sps:$4 sm:$0xff]   ;;  %v19702_v22 = vld [vmem:[#allocation33 + $0x1350] ss:$8 sps:$4 sm:$0xff]   ;;  %v19707_v1 = vld [vmem:[#allocation33 + $0x1184] ss:$8 sps:$4 sm:$0xff]  }
0x2a4a   :  { %13559 = vmatprep.mubr.bf16.mxu0 %v8586_v7  ;;  %13171 = vmatpush1.bf16.msra.mxu1 %v19669_v52  ;;  %v19710_v6 = vld [vmem:[#allocation33 + $0x1364] ss:$8 sps:$4 sm:$0xff]   ;;  %v19705_v17 = vld [vmem:[#allocation33 + $0x1180] ss:$8 sps:$4 sm:$0xff]   ;;  %v19713_v32 = vld [vmem:[#allocation33 + $0x1194] ss:$8 sps:$4 sm:$0xff]  }
0x2a4b   :  { %13560 = vmatmul.mubr.bf16.vlgmr.msra.gmra.mrb[116].mxu0 %v8585_v60  ;;  %14864 = vadd.xlane.f32.xlu0 %v14863_v23  ;;  %v19708_v27 = vld [vmem:[#allocation33 + $0x1360] ss:$8 sps:$4 sm:$0xff]   ;;  %v19716_v8 = vld [vmem:[#allocation33 + $0x1374] ss:$8 sps:$4 sm:$0xff]   ;;  %v19711_v24 = vld [vmem:[#allocation33 + $0x1190] ss:$8 sps:$4 sm:$0xff]  }
0x2a4c   :  { %13569 = vmatpush1.bf16.msra.mxu0 %v19672_v14  ;;  %13600 = vmatprep.mubr.bf16.mxu0 %v8588_v44  ;;  %v19714_v39 = vld [vmem:[#allocation33 + $0x1370] ss:$8 sps:$4 sm:$0xff]   ;;  %v19719_v55 = vld [vmem:[#allocation33 + $0x11a4] ss:$8 sps:$4 sm:$0xff]   ;;  %v19717_v11 = vld [vmem:[#allocation33 + $0x11a0] ss:$8 sps:$4 sm:$0xff]  }
0x2a4d   :  { %13172 = vmatprep.subr.bf16.mxu1 %v19677_v10  ;;  %13570 = vmatprep.subr.bf16.mxu0 %v19680_v29  ;;  %v19722_v16 = vld [vmem:[#allocation33 + $0x1384] ss:$8 sps:$4 sm:$0xff]   ;;  %v19720_v37 = vld [vmem:[#allocation33 + $0x1380] ss:$8 sps:$4 sm:$0xff]   ;;  %v19725_v13 = vld [vmem:[#allocation33 + $0x11b4] ss:$8 sps:$4 sm:$0xff]  }
0x2a4e   :  { %13173 = vmatpush1.bf16.msra.mxu1 %v19675_v19  ;;  %v19728_v52 = vld [vmem:[#allocation33 + $0x1394] ss:$8 sps:$4 sm:$0xff]   ;;  %v19723_v7 = vld [vmem:[#allocation33 + $0x11b0] ss:$8 sps:$4 sm:$0xff]   ;;  %v19731_v60 = vld [vmem:[#allocation33 + $0x11c4] ss:$8 sps:$4 sm:$0xff]  }
0x2a4f   :  { %13174 = vmatprep.subr.bf16.mxu1 %v19683_v46  ;;  %v19726_v14 = vld [vmem:[#allocation33 + $0x1390] ss:$8 sps:$4 sm:$0xff]   ;;  %v19734_v36 = vld [vmem:[#allocation33 + $0x13a4] ss:$8 sps:$4 sm:$0xff]   ;;  %v19729_v10 = vld [vmem:[#allocation33 + $0x11c0] ss:$8 sps:$4 sm:$0xff]  }
0x2a50   :  { %13571 = vmatpush1.bf16.msra.mxu0 %v19678_v2  ;;  %v19732_v29 = vld [vmem:[#allocation33 + $0x13a0] ss:$8 sps:$4 sm:$0xff]   ;;  %v19737_v23 = vld [vmem:[#allocation33 + $0x11d4] ss:$8 sps:$4 sm:$0xff]   ;;  %v19735_v19 = vld [vmem:[#allocation33 + $0x11d0] ss:$8 sps:$4 sm:$0xff]  }
0x2a51   :  { %13572 = vmatprep.subr.bf16.mxu0 %v19686_v5  ;;  %v19740_v44 = vld [vmem:[#allocation33 + $0x13b4] ss:$8 sps:$4 sm:$0xff]   ;;  %v19738_v2 = vld [vmem:[#allocation33 + $0x13b0] ss:$8 sps:$4 sm:$0xff]   ;;  %v19743_v46 = vld [vmem:[#allocation33 + $0x11e4] ss:$8 sps:$4 sm:$0xff]  }
0x2a52   :  { %13175 = vmatpush1.bf16.msra.mxu1 %v19681_v59  ;;  %v19746_v5 = vld [vmem:[#allocation33 + $0x13c4] ss:$8 sps:$4 sm:$0xff]   ;;  %v19741_v59 = vld [vmem:[#allocation33 + $0x11e0] ss:$8 sps:$4 sm:$0xff]   ;;  %vm8431_vm3 = vcmp.gt.f32.partialorder %v23071_v45, 0.0 }
0x2a53   :  { %13176 = vmatprep.subr.bf16.mxu1 %v19689_v3  ;;  %v19749_v3 = vld [vmem:[#allocation33 + $0x11f4] ss:$8 sps:$4 sm:$0xff]  }
0x2a54   :  { %13573 = vmatpush1.bf16.msra.mxu0 %v19684_v56  ;;  %v19744_v56 = vld [vmem:[#allocation33 + $0x13c0] ss:$8 sps:$4 sm:$0xff]  }
0x2a55   :  { %13574 = vmatprep.subr.bf16.mxu0 %v19692_v9  ;;  %v19752_v9 = vld [vmem:[#allocation33 + $0x13d4] ss:$8 sps:$4 sm:$0xff]  }
0x2a56   :  { %13177 = vmatpush1.bf16.msra.mxu1 %v19687_v41  ;;  %v8479_v41 = vmul.f32 0.01, %v23039_v43 }
0x2a57   :  { %13178 = vmatprep.subr.bf16.mxu1 %v19695_v58  ;;  %v19750_v58 = vld [vmem:[#allocation33 + $0x13d0] ss:$8 sps:$4 sm:$0xff]  }
0x2a58   :  { %13575 = vmatpush1.bf16.msra.mxu0 %v19690_v51  ;;  %v19747_v51 = vld [vmem:[#allocation33 + $0x11f0] ss:$8 sps:$4 sm:$0xff]  }
0x2a59   :  { %13576 = vmatprep.subr.bf16.mxu0 %v19698_v61  ;;  %v19755_v61 = vld [vmem:[#allocation33 + $0x13e4] ss:$8 sps:$4 sm:$0xff]  }
0x2a5a   :  { %13179 = vmatpush1.bf16.msra.mxu1 %v19693_v42  ;;  %v19761_v42 = vld [vmem:[#allocation33 + $0x1404] ss:$8 sps:$4 sm:$0xff]  }
0x2a5b   :  { %13180 = vmatprep.subr.bf16.mxu1 %v19701_v47  ;;  %v19753_v47 = vld [vmem:[#allocation33 + $0x13e0] ss:$8 sps:$4 sm:$0xff]  }
0x2a5c   :  { %13577 = vmatpush1.bf16.msra.mxu0 %v19696_v18  ;;  %v8531_v18 = vsel %vm8427_vm2, %v23039_v43, %v8479_v41  ;;  %v19767_v43 = vld [vmem:[#allocation33 + $0x1424] ss:$8 sps:$4 sm:$0xff]   ;;  %v19801_v41 = vld [vmem:[#allocation33 + $0x1480] ss:$8 sps:$4 sm:$0xff]  }
0x2a5d   :  { %13578 = vmatprep.subr.bf16.mxu0 %v19704_v4  ;;  %v19759_v4 = vld [vmem:[#allocation33 + $0x1400] ss:$8 sps:$4 sm:$0xff]  }
0x2a5e   :  { %13181 = vmatpush1.bf16.msra.mxu1 %v19699_v34  ;;  %v8583_v34 = vpack.c.bf16 %v8531_v18, %v8531_v18  ;;  %v19810_v18 = vld [vmem:[#allocation33 + $0x1670] ss:$8 sps:$4 sm:$0xff]  }
0x2a5f   :  { %13182 = vmatprep.subr.bf16.mxu1 %v19707_v1  ;;  %v19764_v1 = vld [vmem:[#allocation33 + $0x1414] ss:$8 sps:$4 sm:$0xff]  }
0x2a60   :  { %13579 = vmatpush1.bf16.msra.mxu0 %v19702_v22  ;;  %v19758_v22 = vld [vmem:[#allocation33 + $0x13f4] ss:$8 sps:$4 sm:$0xff]  }
0x2a61   :  { %13580 = vmatprep.subr.bf16.mxu0 %v19710_v6  ;;  %v8483_v6 = vmul.f32 0.01, %v23071_v45 }
0x2a62   :  { %13183 = vmatpush1.bf16.msra.mxu1 %v19705_v17  ;;  %v19756_v17 = vld [vmem:[#allocation33 + $0x13f0] ss:$8 sps:$4 sm:$0xff]  }
0x2a63   :  { %13184 = vmatprep.subr.bf16.mxu1 %v19713_v32  ;;  %v19770_v32 = vld [vmem:[#allocation33 + $0x1604] ss:$8 sps:$4 sm:$0xff]  }
0x2a64   :  { %13581 = vmatpush1.bf16.msra.mxu0 %v19708_v27  ;;  %v19762_v27 = vld [vmem:[#allocation33 + $0x1410] ss:$8 sps:$4 sm:$0xff]  }
0x2a65   :  { %13582 = vmatprep.subr.bf16.mxu0 %v19716_v8  ;;  %v8535_v8 = vsel %vm8431_vm3, %v23071_v45, %v8483_v6  ;;  %v19777_v45 = vld [vmem:[#allocation33 + $0x1440] ss:$8 sps:$4 sm:$0xff]   ;;  %v19824_v6 = vld [vmem:[#allocation33 + $0x1694] ss:$8 sps:$4 sm:$0xff]  }
0x2a66   :  { %13185 = vmatpush1.bf16.msra.mxu1 %v19711_v24  ;;  %v19765_v24 = vld [vmem:[#allocation33 + $0x1420] ss:$8 sps:$4 sm:$0xff]  }
0x2a67   :  { %13186 = vmatprep.subr.bf16.mxu1 %v19719_v55  ;;  %v8587_v55 = vpack.c.bf16 %v8535_v8, %v8535_v8  ;;  %v19825_v8 = vld [vmem:[#allocation33 + $0x14c0] ss:$8 sps:$4 sm:$0xff]  }
0x2a68   :  { %13583 = vmatpush1.bf16.msra.mxu0 %v19714_v39  ;;  %v19768_v39 = vld [vmem:[#allocation33 + $0x1600] ss:$8 sps:$4 sm:$0xff]  }
0x2a69   :  { %13584 = vmatprep.subr.bf16.mxu0 %v19722_v16  ;;  %v19773_v16 = vld [vmem:[#allocation33 + $0x1434] ss:$8 sps:$4 sm:$0xff]  }
0x2a6a   :  { %13187 = vmatpush1.bf16.msra.mxu1 %v19717_v11  ;;  %v19776_v11 = vld [vmem:[#allocation33 + $0x1614] ss:$8 sps:$4 sm:$0xff]  }
0x2a6b   :  { %13188 = vmatprep.subr.bf16.mxu1 %v19725_v13  ;;  %v19774_v13 = vld [vmem:[#allocation33 + $0x1610] ss:$8 sps:$4 sm:$0xff]  }
0x2a6c   :  { %13585 = vmatpush1.bf16.msra.mxu0 %v19720_v37  ;;  %v19771_v37 = vld [vmem:[#allocation33 + $0x1430] ss:$8 sps:$4 sm:$0xff]  }
0x2a6d   :  { %13586 = vmatprep.subr.bf16.mxu0 %v19728_v52  ;;  %v19779_v52 = vld [vmem:[#allocation33 + $0x1444] ss:$8 sps:$4 sm:$0xff]  }
0x2a6e   :  { %13189 = vmatpush1.bf16.msra.mxu1 %v19723_v7  ;;  %v19782_v7 = vld [vmem:[#allocation33 + $0x1624] ss:$8 sps:$4 sm:$0xff]  }
0x2a6f   :  { %13190 = vmatprep.subr.bf16.mxu1 %v19731_v60  ;;  %v19785_v60 = vld [vmem:[#allocation33 + $0x1454] ss:$8 sps:$4 sm:$0xff]  }
0x2a70   :  { %13587 = vmatpush1.bf16.msra.mxu0 %v19726_v14  ;;  %v19780_v14 = vld [vmem:[#allocation33 + $0x1620] ss:$8 sps:$4 sm:$0xff]  }
0x2a71   :  { %13588 = vmatprep.subr.bf16.mxu0 %v19734_v36  ;;  %v19788_v36 = vld [vmem:[#allocation33 + $0x1634] ss:$8 sps:$4 sm:$0xff]  }
0x2a72   :  { %13191 = vmatpush1.bf16.msra.mxu1 %v19729_v10  ;;  %v19783_v10 = vld [vmem:[#allocation33 + $0x1450] ss:$8 sps:$4 sm:$0xff]  }
0x2a73   :  { %13192 = vmatprep.subr.bf16.mxu1 %v19737_v23  ;;  %v19791_v23 = vld [vmem:[#allocation33 + $0x1464] ss:$8 sps:$4 sm:$0xff]  }
0x2a74   :  { %13589 = vmatpush1.bf16.msra.mxu0 %v19732_v29  ;;  %v19786_v29 = vld [vmem:[#allocation33 + $0x1630] ss:$8 sps:$4 sm:$0xff]  }
0x2a75   :  { %13590 = vmatprep.subr.bf16.mxu0 %v19740_v44  ;;  %v19794_v44 = vld [vmem:[#allocation33 + $0x1644] ss:$8 sps:$4 sm:$0xff]  }
0x2a76   :  { %13193 = vmatpush1.bf16.msra.mxu1 %v19735_v19  ;;  %v19789_v19 = vld [vmem:[#allocation33 + $0x1460] ss:$8 sps:$4 sm:$0xff]  }
0x2a77   :  { %13194 = vmatprep.subr.bf16.mxu1 %v19743_v46  ;;  %v19797_v46 = vld [vmem:[#allocation33 + $0x1474] ss:$8 sps:$4 sm:$0xff]  }
0x2a78   :  { %13591 = vmatpush1.bf16.msra.mxu0 %v19738_v2  ;;  %v19792_v2 = vld [vmem:[#allocation33 + $0x1640] ss:$8 sps:$4 sm:$0xff]  }
0x2a79   :  { %13592 = vmatprep.subr.bf16.mxu0 %v19746_v5  ;;  %v19800_v5 = vld [vmem:[#allocation33 + $0x1654] ss:$8 sps:$4 sm:$0xff]  }
0x2a7a   :  { %13195 = vmatpush1.bf16.msra.mxu1 %v19741_v59  ;;  %v19795_v59 = vld [vmem:[#allocation33 + $0x1470] ss:$8 sps:$4 sm:$0xff]  }
0x2a7b   :  { %13196 = vmatprep.subr.bf16.mxu1 %v19749_v3  ;;  %v19803_v3 = vld [vmem:[#allocation33 + $0x1484] ss:$8 sps:$4 sm:$0xff]  }
0x2a7c   :  { %13593 = vmatpush1.bf16.msra.mxu0 %v19744_v56  ;;  %v19798_v56 = vld [vmem:[#allocation33 + $0x1650] ss:$8 sps:$4 sm:$0xff]  }
0x2a7d   :  { %13594 = vmatprep.subr.bf16.mxu0 %v19752_v9  ;;  %v19806_v9 = vld [vmem:[#allocation33 + $0x1664] ss:$8 sps:$4 sm:$0xff]  }
0x2a7e   :  { %13197 = vmatpush1.bf16.msra.mxu1 %v19747_v51  ;;  %v19804_v51 = vld [vmem:[#allocation33 + $0x1660] ss:$8 sps:$4 sm:$0xff]  }
0x2a7f   :  { %13929 = vmatprep.subr.bf16.mxu1 %v19761_v42  ;;  %v19807_v42 = vld [vmem:[#allocation33 + $0x1490] ss:$8 sps:$4 sm:$0xff]  }
0x2a80   :  { %13595 = vmatpush1.bf16.msra.mxu0 %v19750_v58  ;;  %v19809_v58 = vld [vmem:[#allocation33 + $0x1494] ss:$8 sps:$4 sm:$0xff]  }
0x2a81   :  { %13596 = vmatprep.subr.bf16.mxu0 %v19755_v61  ;;  %13199 = vmatmul.mubr.bf16.vlgmr.msra.gmra.mrb[120].mxu1 %v8583_v34  ;;  %v19812_v61 = vld [vmem:[#allocation33 + $0x1674] ss:$8 sps:$4 sm:$0xff]   ;;  %v19813_v34 = vld [vmem:[#allocation33 + $0x14a0] ss:$8 sps:$4 sm:$0xff]  }
0x2a82   :  { %13930 = vmatpush1.bf16.msra.mxu1 %v19759_v4  ;;  %v19818_v4 = vld [vmem:[#allocation33 + $0x1684] ss:$8 sps:$4 sm:$0xff]  }
0x2a83   :  { %13931 = vmatprep.subr.bf16.mxu1 %v19764_v1  ;;  %v19821_v1 = vld [vmem:[#allocation33 + $0x14b4] ss:$8 sps:$4 sm:$0xff]  }
0x2a84   :  { %13597 = vmatpush1.bf16.msra.mxu0 %v19753_v47  ;;  %v19815_v47 = vld [vmem:[#allocation33 + $0x14a4] ss:$8 sps:$4 sm:$0xff]  }
0x2a85   :  { %13598 = vmatprep.subr.bf16.mxu0 %v19758_v22  ;;  %v19816_v22 = vld [vmem:[#allocation33 + $0x1680] ss:$8 sps:$4 sm:$0xff]  }
0x2a86   :  { %13932 = vmatpush1.bf16.msra.mxu1 %v19762_v27  ;;  %v19822_v27 = vld [vmem:[#allocation33 + $0x1690] ss:$8 sps:$4 sm:$0xff]  }
0x2a87   :  { %13933 = vmatprep.subr.bf16.mxu1 %v19767_v43  ;;  %v19827_v43 = vld [vmem:[#allocation33 + $0x14c4] ss:$8 sps:$4 sm:$0xff]  }
0x2a88   :  { %13599 = vmatpush1.bf16.msra.mxu0 %v19756_v17  ;;  %v19819_v17 = vld [vmem:[#allocation33 + $0x14b0] ss:$8 sps:$4 sm:$0xff]  }
0x2a89   :  { %14331 = vmatprep.subr.bf16.mxu0 %v19770_v32  ;;  %v19830_v32 = vld [vmem:[#allocation33 + $0x16a4] ss:$8 sps:$4 sm:$0xff]  }
0x2a8a   :  { %13934 = vmatpush1.bf16.msra.mxu1 %v19765_v24  ;;  %v19828_v24 = vld [vmem:[#allocation33 + $0x16a0] ss:$8 sps:$4 sm:$0xff]  }
0x2a8b   :  { %13601 = vmatmul.mubr.bf16.vlgmr.msra.gmra.mrb[116].mxu0 %v8587_v55  ;;  %13935 = vmatprep.subr.bf16.mxu1 %v19773_v16  ;;  %v19833_v55 = vld [vmem:[#allocation33 + $0x14d4] ss:$8 sps:$4 sm:$0xff]  }
0x2a8c   :  { %14332 = vmatpush1.bf16.msra.mxu0 %v19768_v39  ;;  %v9439_v39 = vld [vmem:[#allocation34 + $0xc] sm:$0x3]  ;;  %v19836_v16 = vld [vmem:[#allocation33 + $0x16b4] ss:$8 sps:$4 sm:$0xff]  }
0x2a8d   :  { %14333 = vmatprep.subr.bf16.mxu0 %v19776_v11  ;;  %v9510_v11 = vrot.slane %v9439_v39, %v21461_v20 }
0x2a8e   :  { %13936 = vmatpush1.bf16.msra.mxu1 %v19771_v37  ;;  %v19831_v37 = vld [vmem:[#allocation33 + $0x14d0] ss:$8 sps:$4 sm:$0xff]  }
0x2a8f   :  { %13937 = vmatprep.subr.bf16.mxu1 %v19779_v52  ;;  %v9514_v52 = vrot.slane %v9439_v39, %v21972_v54 }
0x2a90   :  { %14334 = vmatpush1.bf16.msra.mxu0 %v19774_v13  ;;  %v19834_v13 = vld [vmem:[#allocation33 + $0x16b0] ss:$8 sps:$4 sm:$0xff]  }
0x2a91   :  { %14335 = vmatprep.subr.bf16.mxu0 %v19782_v7  ;;  %v19839_v7 = vld [vmem:[#allocation33 + $0x14e4] ss:$8 sps:$4 sm:$0xff]  }
0x2a92   :  { %13938 = vmatpush1.bf16.msra.mxu1 %v19777_v45  ;;  %v19842_v45 = vld [vmem:[#allocation33 + $0x16c4] ss:$8 sps:$4 sm:$0xff]  }
0x2a93   :  { %13939 = vmatprep.subr.bf16.mxu1 %v19785_v60 }
0x2a94   :  { %14336 = vmatpush1.bf16.msra.mxu0 %v19780_v14 }
0x2a95   :  { %14337 = vmatprep.subr.bf16.mxu0 %v19788_v36 }
0x2a96   :  { %13940 = vmatpush1.bf16.msra.mxu1 %v19783_v10  ;;  %v19837_v10 = vld [vmem:[#allocation33 + $0x14e0] ss:$8 sps:$4 sm:$0xff]  }
0x2a97   :  { %13941 = vmatprep.subr.bf16.mxu1 %v19791_v23 }
0x2a98   :  { %14338 = vmatpush1.bf16.msra.mxu0 %v19786_v29  ;;  %v19840_v29 = vld [vmem:[#allocation33 + $0x16c0] ss:$8 sps:$4 sm:$0xff]  }
0x2a99   :  { %14339 = vmatprep.subr.bf16.mxu0 %v19794_v44 }
0x2a9a   :  { %13942 = vmatpush1.bf16.msra.mxu1 %v19789_v19  ;;  %v19845_v19 = vld [vmem:[#allocation33 + $0x14f4] ss:$8 sps:$4 sm:$0xff]  }
0x2a9b   :  { %13943 = vmatprep.subr.bf16.mxu1 %v19797_v46 }
0x2a9c   :  { %14340 = vmatpush1.bf16.msra.mxu0 %v19792_v2  ;;  %v19848_v2 = vld [vmem:[#allocation33 + $0x16d4] ss:$8 sps:$4 sm:$0xff]  }
0x2a9d   :  { %14341 = vmatprep.subr.bf16.mxu0 %v19800_v5 }
0x2a9e   :  { %13944 = vmatpush1.bf16.msra.mxu1 %v19795_v59 }
0x2a9f   :  { %13945 = vmatprep.subr.bf16.mxu1 %v19803_v3  ;;  %v19843_v3 = vld [vmem:[#allocation33 + $0x14f0] ss:$8 sps:$4 sm:$0xff]  }
0x2aa0   :  { %14342 = vmatpush1.bf16.msra.mxu0 %v19798_v56 }
0x2aa1   :  { %14343 = vmatprep.subr.bf16.mxu0 %v19806_v9  ;;  %v19846_v9 = vld [vmem:[#allocation33 + $0x16d0] ss:$8 sps:$4 sm:$0xff]  }
0x2aa2   :  { %13946 = vmatpush1.bf16.msra.mxu1 %v19801_v41  ;;  %v19851_v41 = vld [vmem:[#allocation33 + $0x1504] ss:$8 sps:$4 sm:$0xff]  }
0x2aa3   :  { %13947 = vmatprep.subr.bf16.mxu1 %v19809_v58 }
0x2aa4   :  { %14344 = vmatpush1.bf16.msra.mxu0 %v19804_v51  ;;  %v19854_v51 = vld [vmem:[#allocation33 + $0x16e4] ss:$8 sps:$4 sm:$0xff]  }
0x2aa5   :  { %14345 = vmatprep.subr.bf16.mxu0 %v19812_v61 }
0x2aa6   :  { %13948 = vmatpush1.bf16.msra.mxu1 %v19807_v42  ;;  %v19852_v42 = vld [vmem:[#allocation33 + $0x16e0] ss:$8 sps:$4 sm:$0xff]  }
0x2aa7   :  { %13949 = vmatprep.subr.bf16.mxu1 %v19815_v47  ;;  %v19860_v47 = vld [vmem:[#allocation33 + $0x16f4] ss:$8 sps:$4 sm:$0xff]  }
0x2aa8   :  { %14346 = vmatpush1.bf16.msra.mxu0 %v19810_v18 }
0x2aa9   :  { %14347 = vmatprep.subr.bf16.mxu0 %v19818_v4 }
0x2aaa   :  { %13950 = vmatpush1.bf16.msra.mxu1 %v19813_v34  ;;  %v19858_v34 = vld [vmem:[#allocation33 + $0x16f0] ss:$8 sps:$4 sm:$0xff]  }
0x2aab   :  { %13951 = vmatprep.subr.bf16.mxu1 %v19821_v1  ;;  %v19866_v1 = vld [vmem:[#allocation33 + $0x1704] ss:$8 sps:$4 sm:$0xff]  }
0x2aac   :  { %14348 = vmatpush1.bf16.msra.mxu0 %v19816_v22  ;;  %v9434_v22 = vld [vmem:[#allocation34 + $0x2] sm:$0x3] }
0x2aad   :  { %14349 = vmatprep.subr.bf16.mxu0 %v19824_v6 }
0x2aae   :  { %13952 = vmatpush1.bf16.msra.mxu1 %v19819_v17  ;;  %v9436_v17 = vld [vmem:[#allocation34 + $0x6] sm:$0x3] }
0x2aaf   :  { %13953 = vmatprep.subr.bf16.mxu1 %v19827_v43  ;;  %v9470_v43 = vrot.slane %v9434_v22, %v21461_v20  ;;  %v9490_v39 = vrot.slane %v9436_v17, %v21972_v54 }
0x2ab0   :  { %14350 = vmatpush1.bf16.msra.mxu0 %v19822_v27 }
0x2ab1   :  { %14351 = vmatprep.subr.bf16.mxu0 %v19830_v32  ;;  %v9474_v32 = vrot.slane %v9434_v22, %v21972_v54 }
0x2ab2   :  { %13954 = vmatpush1.bf16.msra.mxu1 %v19825_v8 }
0x2ab3   :  { %13955 = vmatprep.subr.bf16.mxu1 %v19833_v55 }
0x2ab4   :  { %14352 = vmatpush1.bf16.msra.mxu0 %v19828_v24  ;;  %v9486_v24 = vrot.slane %v9436_v17, %v21461_v20 }
0x2ab5   :  { %14353 = vmatprep.subr.bf16.mxu0 %v19836_v16  ;;  %v12396_v14 = vpop.f32.mrb[116].mxu1  ;;  %v9438_v16 = vld [vmem:[#allocation34 + $0xa] sm:$0x3] }
0x2ab6   :  { %v23085_v60 = vadd.f32 %v12396_v14, %v9510_v11  ;;  %v12398_v36 = vpop.f32.mrb[117].mxu1  ;;  %13956 = vmatpush1.bf16.msra.mxu1 %v19831_v37  ;;  %v23704_v37 = vld [vmem:[#allocation87_spill] sm:$0xff] }
0x2ab7   :  { %v23087_v23 = vadd.f32 %v12398_v36, %v9514_v52  ;;  %v12400_v44 = vpop.f32.mrb[118].mxu1  ;;  %13957 = vmatprep.subr.bf16.mxu1 %v19839_v7  ;;  %v23705_v52 = vld [vmem:[#allocation86_spill] sm:$0xff] }
0x2ab8   :  { %14354 = vmatpush1.bf16.msra.mxu0 %v19834_v13  ;;  %v14871_v46 = vsel %vm7299_vm9, %v23085_v60, 0.0  ;;  %v12401_v5 = vpop.f32.mrb[119].mxu1  ;;  %v23102_v13 = vadd.f32 %v23704_v37, %v9470_v43  ;;  %v23105_v7 = vadd.f32 %v23705_v52, %v9474_v32 }
0x2ab9   :  { %14355 = vmatprep.subr.bf16.mxu0 %v19842_v45  ;;  %v14872_v59 = vsel %vm7299_vm9, %v23087_v23, 0.0 }
0x2aba   :  { %v14873_v56 = vadd.f32 %v14872_v59, %v14871_v46  ;;  %13958 = vmatpush1.bf16.msra.mxu1 %v19837_v10  ;;  %v9502_v46 = vrot.slane %v9438_v16, %v21461_v20 }
0x2abb   :  { %13959 = vmatprep.subr.bf16.mxu1 %v19845_v19  ;;  %v23707_v19 = vld [vmem:[#allocation88_spill] sm:$0xff] }
0x2abc   :  { %14356 = vmatpush1.bf16.msra.mxu0 %v19840_v29  ;;  %14874 = vadd.xlane.f32.xlu0 %v14873_v56  ;;  %v23706_v29 = vld [vmem:[#allocation89_spill] sm:$0xff]  ;;  %v14846_v56 = vsel %vm7299_vm9, %v23102_v13, 0.0  ;;  %v23146_v22 = vadd.f32 %v22897_v26, %v9502_v46 }
0x2abd   :  { %14357 = vmatprep.subr.bf16.mxu0 %v19848_v2  ;;  %v23120_v44 = vadd.f32 %v23706_v29, %v9486_v24  ;;  %v23123_v2 = vadd.f32 %v23707_v19, %v9490_v39 }
0x2abe   :  { %13960 = vmatpush1.bf16.msra.mxu1 %v19843_v3  ;;  %v14847_v3 = vsel %vm7299_vm9, %v23105_v7, 0.0 }
0x2abf   :  { %v23093_v58 = vpop.f32.mrb[112].mxu0  ;;  %13970 = vmatprep.subr.bf16.mxu1 %v19851_v41  ;;  %v14848_v46 = vadd.f32 %v14847_v3, %v14846_v56 }
0x2ac0   :  { %v23095_v61 = vpop.f32.mrb[113].mxu0  ;;  %14358 = vmatpush1.bf16.msra.mxu0 %v19846_v9  ;;  %v7283_v9 = vld [vmem:[#allocation30 + $0x28] sm:$0xf] }
0x2ac1   :  { %v12802_v18 = vpop.f32.mrb[114].mxu0  ;;  %14359 = vmatprep.subr.bf16.mxu0 %v19854_v51  ;;  %v7931_v24 = vrot.slane %v7283_v9, %v21978_v49 }
0x2ac2   :  { %v12803_v4 = vpop.f32.mrb[115].mxu0 }
0x2ac3   :  { %v14856_v4 = vsel %vm7299_vm9, %v23120_v44, 0.0 }
0x2ac4   :  { %14360 = vmatpush1.bf16.msra.mxu0 %v19852_v42  ;;  %v7633_v6 = vpop.xlane.xlu1 %7632 }
0x2ac5   :  { %14361 = vmatprep.subr.bf16.mxu0 %v19860_v47  ;;  %v7662_v27 = vmul.f32 0.001953125, %v7633_v6  ;;  %v7296_v47 = vld [vmem:[#allocation31 + $0x28] sm:$0xf] }
0x2ac6   :  { %v8248_v32 = vrot.slane %v7296_v47, %v21972_v54 }
0x2ac7   :  { %v7675_v8 = vadd.f32 1e-05, %v7662_v27  ;;  %v7923_v27 = vrot.slane %v7283_v9, %v21972_v54 }
0x2ac8   :  { %14362 = vmatpush1.bf16.msra.mxu0 %v19858_v34  ;;  %v7416_v55 = vpop.xlane.xlu1 %7415  ;;  %v14857_v34 = vsel %vm7299_vm9, %v23123_v2, 0.0 }
0x2ac9   :  { %14372 = vmatprep.subr.bf16.mxu0 %v19866_v1  ;;  %20161 = vrsqrt.f32 %v7675_v8  ;;  %v7430_v11 = vmul.f32 0.001953125, %v7416_v55  ;;  %v7919_v8 = vrot.slane %v7283_v9, %v21461_v20  ;;  %v8244_v55 = vrot.slane %v7296_v47, %v21461_v20 }
0x2acb   :  { %v23108_v45 = vsub.f32 %v22891_v57, %v7430_v11  ;;  %v23111_v14 = vsub.f32 %v22894_v50, %v7430_v11  ;;  %v23114_v36 = vsub.f32 %v22906_v12, %v7430_v11  ;;  %v23117_v10 = vsub.f32 %v22914_v35, %v7430_v11  ;;  %v9440_v11 = vld [vmem:[#allocation34 + $0xe] sm:$0x3] }
0x2acc   :  { %v9506_v57 = vrot.slane %v9438_v16, %v21972_v54  ;;  %v7642_v5 = vpop.xlane.xlu0 %7641  ;;  %v7927_v16 = vrot.slane %v7283_v9, %v21975_v48 }
0x2acd   :  { %v7531_v50 = vmul.f32 %v23108_v45, %v23108_v45  ;;  %v7532_v12 = vmul.f32 %v23111_v14, %v23111_v14  ;;  %v7663_v59 = vmul.f32 0.001953125, %v7642_v5  ;;  %v7533_v35 = vmul.f32 %v23114_v36, %v23114_v36  ;;  %v23163_v5 = vld [vmem:[#allocation30 + $0x2c] sm:$0xf] }
0x2ace   :  { %v7534_v51 = vmul.f32 %v23117_v10, %v23117_v10  ;;  %v23149_v6 = vadd.f32 %v22903_v40, %v9506_v57  ;;  %v8256_v40 = vrot.slane %v7296_v47, %v21978_v49  ;;  %v14858_v57 = vadd.f32 %v14857_v34, %v14856_v4 }
0x2acf   :  { %v7676_v41 = vadd.f32 1e-05, %v7663_v59  ;;  %v7643_v42 = vsel %vm7299_vm9, %v7531_v50, 0.0  ;;  %v7644_v18 = vsel %vm7299_vm9, %v7532_v12, 0.0  ;;  %v7646_v17 = vsel %vm7299_vm9, %v7533_v35, 0.0 }
0x2ad0   :  { %v7645_v1 = vadd.f32 %v7644_v18, %v7643_v42  ;;  %v7648_v26 = vsel %vm7299_vm9, %v7534_v51, 0.0  ;;  %v8252_v12 = vrot.slane %v7296_v47, %v21975_v48  ;;  %v14866_v59 = vsel %vm7299_vm9, %v23146_v22, 0.0  ;;  %v7297_v42 = vld [vmem:[#allocation31 + $0x2c] sm:$0xf] }
0x2ad1   :  { %20163 = vrsqrt.f32 %v7676_v41  ;;  %v7939_v18 = vrot.slane %v23163_v5, %v21972_v54  ;;  %v7935_v47 = vrot.slane %v23163_v5, %v21461_v20  ;;  %v7947_v4 = vrot.slane %v23163_v5, %v21978_v49 }
0x2ad2   :  { %v7647_v43 = vadd.f32 %v7646_v17, %v7645_v1  ;;  %v7943_v1 = vrot.slane %v23163_v5, %v21975_v48 }
0x2ad3   :  { %v20162_v39 = vpop.eup %20161 }
0x2ad4   :  { %v7649_v37 = vadd.f32 %v7648_v26, %v7647_v43  ;;  %v7732_v52 = vmul.f32 %v20162_v39, %v22949_v33  ;;  %v7731_v29 = vmul.f32 %v20162_v39, %v22946_v25  ;;  %v7734_v19 = vmul.f32 %v20162_v39, %v22955_v30 }
0x2ad5   :  { %v7733_v50 = vmul.f32 %v20162_v39, %v22952_v53  ;;  %v14867_v25 = vsel %vm7299_vm9, %v23149_v6, 0.0  ;;  %v9518_v33 = vrot.slane %v9440_v11, %v21461_v20  ;;  %v9522_v30 = vrot.slane %v9440_v11, %v21972_v54 }
0x2ad6   :  { %7650 = vadd.xlane.f32.xlu1 %v7649_v37  ;;  %v8057_v35 = vmul.f32 %v7923_v27, %v7732_v52  ;;  %v8056_v9 = vmul.f32 %v7919_v8, %v7731_v29  ;;  %v8059_v41 = vmul.f32 %v7931_v24, %v7734_v19  ;;  %v8264_v8 = vrot.slane %v7297_v42, %v21972_v54  ;;  %v19849_v52 = vld [vmem:[#allocation33 + $0x1500] ss:$8 sps:$4 sm:$0xff]  }
0x2ad7   :  { %v8058_v56 = vmul.f32 %v7927_v16, %v7733_v50  ;;  %v8260_v24 = vrot.slane %v7297_v42, %v21461_v20  ;;  %v23188_v16 = vadd.f32 %v23093_v58, %v9518_v33  ;;  %v23191_v11 = vadd.f32 %v23095_v61, %v9522_v30 }
0x2ad8   :  { %v8382_v3 = vadd.f32 %v8248_v32, %v8057_v35  ;;  %v8381_v51 = vadd.f32 %v8244_v55, %v8056_v9  ;;  %v8384_v53 = vadd.f32 %v8256_v40, %v8059_v41  ;;  %v8268_v35 = vrot.slane %v7297_v42, %v21975_v48 }
0x2ad9   :  { %v23179_v34 = vadd.f32 %v8252_v12, %v8058_v56  ;;  %v14868_v61 = vadd.f32 %v14867_v25, %v14866_v59  ;;  %v14877_v30 = vsel %vm7299_vm9, %v23191_v11, 0.0  ;;  %v19863_v56 = vld [vmem:[#allocation33 + $0x1524] ss:$8 sps:$4 sm:$0xff]  }
0x2ada   :  { %14849 = vadd.xlane.f32.xlu1 %v14848_v46  ;;  %vm8434_vm4 = vcmp.gt.f32.partialorder %v8382_v3, 0.0  ;;  %v8486_v17 = vmul.f32 0.01, %v8382_v3  ;;  %vm8433_vm5 = vcmp.gt.f32.partialorder %v8381_v51, 0.0  ;;  %v8485_v27 = vmul.f32 0.01, %v8381_v51 }
0x2adb   :  { %v20164_v43 = vpop.eup %20163  ;;  %vm8436_vm6 = vcmp.gt.f32.partialorder %v8384_v53, 0.0  ;;  %v8488_v32 = vmul.f32 0.01, %v8384_v53  ;;  %v19857_v46 = vld [vmem:[#allocation33 + $0x1514] ss:$8 sps:$4 sm:$0xff]   ;;  %vm8435_vm11 = vcmp.gt.f32.partialorder %v23179_v34, 0.0 }
0x2adc   :  { %v8538_v39 = vsel %vm8434_vm4, %v8382_v3, %v8486_v17  ;;  %v8537_v26 = vsel %vm8433_vm5, %v8381_v51, %v8485_v27  ;;  %v7736_v55 = vmul.f32 %v20164_v43, %v23006_v21  ;;  %v7735_v40 = vmul.f32 %v20164_v43, %v23003_v0  ;;  %v19864_v17 = vld [vmem:[#allocation33 + $0x1700] ss:$8 sps:$4 sm:$0xff]  }
0x2add   :  { %v8590_v37 = vpack.c.bf16 %v8538_v39, %v8538_v39  ;;  %v8589_v29 = vpack.c.bf16 %v8537_v26, %v8537_v26  ;;  %v8540_v19 = vsel %vm8436_vm6, %v8384_v53, %v8488_v32  ;;  %v7738_v12 = vmul.f32 %v20164_v43, %v23012_v62  ;;  %v19855_v62 = vld [vmem:[#allocation33 + $0x1510] ss:$8 sps:$4 sm:$0xff]  }
0x2ade   :  { %14859 = vadd.xlane.f32.xlu1 %v14858_v57  ;;  %v8061_v5 = vmul.f32 %v7939_v18, %v7736_v55  ;;  %v8060_v50 = vmul.f32 %v7935_v47, %v7735_v40  ;;  %v8592_v21 = vpack.c.bf16 %v8540_v19, %v8540_v19  ;;  %v8272_v0 = vrot.slane %v7297_v42, %v21978_v49  ;;  %v19861_v42 = vld [vmem:[#allocation33 + $0x1520] ss:$8 sps:$4 sm:$0xff]   ;;  %v19867_v39 = vld [vmem:[#allocation33 + $0x1530] ss:$8 sps:$4 sm:$0xff]   ;;  %v19875_v55 = vld [vmem:[#allocation33 + $0x1544] ss:$8 sps:$4 sm:$0xff]  }
0x2adf   :  { %13961 = vmatprep.mubr.bf16.mxu1 %v8590_v37  ;;  %v7737_v58 = vmul.f32 %v20164_v43, %v23009_v38  ;;  %v8063_v33 = vmul.f32 %v7947_v4, %v7738_v12  ;;  %v14876_v57 = vsel %vm7299_vm9, %v23188_v16, 0.0  ;;  %v19870_v26 = vld [vmem:[#allocation33 + $0x1710] ss:$8 sps:$4 sm:$0xff]   ;;  %v19878_v40 = vld [vmem:[#allocation33 + $0x1724] ss:$8 sps:$4 sm:$0xff]  }
0x2ae0   :  { %13962 = vmatmul.mubr.bf16.vlgmr.msra.gmra.mrb[124].mxu1 %v8589_v29  ;;  %v8386_v9 = vadd.f32 %v8264_v8, %v8061_v5  ;;  %v8385_v41 = vadd.f32 %v8260_v24, %v8060_v50  ;;  %v14878_v53 = vadd.f32 %v14877_v30, %v14876_v57  ;;  %v19872_v8 = vld [vmem:[#allocation33 + $0x1714] ss:$8 sps:$4 sm:$0xff]   ;;  %v19873_v37 = vld [vmem:[#allocation33 + $0x1540] ss:$8 sps:$4 sm:$0xff]   ;;  %v19882_v5 = vld [vmem:[#allocation33 + $0x1730] ss:$8 sps:$4 sm:$0xff]  }
0x2ae1   :  { %13971 = vmatpush1.bf16.msra.mxu1 %v19849_v52  ;;  %14002 = vmatprep.mubr.bf16.mxu1 %v8592_v21  ;;  %v8062_v3 = vmul.f32 %v7943_v1, %v7737_v58  ;;  %v8388_v25 = vadd.f32 %v8272_v0, %v8063_v33  ;;  %v19869_v1 = vld [vmem:[#allocation33 + $0x1534] ss:$8 sps:$4 sm:$0xff]   ;;  %v19876_v52 = vld [vmem:[#allocation33 + $0x1720] ss:$8 sps:$4 sm:$0xff]   ;;  %v19887_v50 = vld [vmem:[#allocation33 + $0x1564] ss:$8 sps:$4 sm:$0xff]  }
0x2ae2   :  { %14869 = vadd.xlane.f32.xlu1 %v14868_v61  ;;  %13972 = vmatprep.subr.bf16.mxu1 %v19857_v46  ;;  %vm8438_vm7 = vcmp.gt.f32.partialorder %v8386_v9, 0.0  ;;  %v8490_v38 = vmul.f32 0.01, %v8386_v9  ;;  %vm8437_vm8 = vcmp.gt.f32.partialorder %v8385_v41, 0.0  ;;  %v8489_v59 = vmul.f32 0.01, %v8385_v41 }
0x2ae3   :  { %v23201_v51 = vadd.f32 %v8268_v35, %v8062_v3  ;;  %vm8440_vm10 = vcmp.gt.f32.partialorder %v8388_v25, 0.0  ;;  %v8492_v43 = vmul.f32 0.01, %v8388_v25  ;;  %v19881_v29 = vld [vmem:[#allocation33 + $0x1554] ss:$8 sps:$4 sm:$0xff]  }
0x2ae4   :  { %v8542_v18 = vsel %vm8438_vm7, %v8386_v9, %v8490_v38  ;;  %v8541_v47 = vsel %vm8437_vm8, %v8385_v41, %v8489_v59  ;;  %v19884_v19 = vld [vmem:[#allocation33 + $0x1734] ss:$8 sps:$4 sm:$0xff]   ;;  %v19879_v46 = vld [vmem:[#allocation33 + $0x1550] ss:$8 sps:$4 sm:$0xff]   ;;  %v19890_v12 = vld [vmem:[#allocation33 + $0x1744] ss:$8 sps:$4 sm:$0xff]  }
0x2ae5   :  { %13973 = vmatpush1.bf16.msra.mxu1 %v19855_v62  ;;  %v8594_v4 = vpack.c.bf16 %v8542_v18, %v8542_v18  ;;  %v8593_v27 = vpack.c.bf16 %v8541_v47, %v8541_v47  ;;  %v8544_v32 = vsel %vm8440_vm10, %v8388_v25, %v8492_v43  ;;  %v19885_v21 = vld [vmem:[#allocation33 + $0x1560] ss:$8 sps:$4 sm:$0xff]   ;;  %v19893_v58 = vld [vmem:[#allocation33 + $0x1574] ss:$8 sps:$4 sm:$0xff]   ;;  %v19891_v61 = vld [vmem:[#allocation33 + $0x1570] ss:$8 sps:$4 sm:$0xff]  }
0x2ae6   :  { %14879 = vadd.xlane.f32.xlu1 %v14878_v53  ;;  %13974 = vmatprep.subr.bf16.mxu1 %v19863_v56  ;;  %v8596_v24 = vpack.c.bf16 %v8544_v32, %v8544_v32  ;;  %v19888_v0 = vld [vmem:[#allocation33 + $0x1740] ss:$8 sps:$4 sm:$0xff]   ;;  %v19896_v35 = vld [vmem:[#allocation33 + $0x1754] ss:$8 sps:$4 sm:$0xff]   ;;  %v19894_v9 = vld [vmem:[#allocation33 + $0x1750] ss:$8 sps:$4 sm:$0xff]  }
0x2ae7   :  { %14363 = vmatprep.mubr.bf16.mxu0 %v8594_v4  ;;  %v19899_v41 = vld [vmem:[#allocation33 + $0x1584] ss:$8 sps:$4 sm:$0xff]   ;;  %v19897_v57 = vld [vmem:[#allocation33 + $0x1580] ss:$8 sps:$4 sm:$0xff]   ;;  %v19905_v62 = vld [vmem:[#allocation33 + $0x1594] ss:$8 sps:$4 sm:$0xff]  }
0x2ae8   :  { %14364 = vmatmul.mubr.bf16.vlgmr.msra.gmra.mrb[120].mxu0 %v8593_v27  ;;  %v19902_v33 = vld [vmem:[#allocation33 + $0x1764] ss:$8 sps:$4 sm:$0xff]   ;;  %v19900_v30 = vld [vmem:[#allocation33 + $0x1760] ss:$8 sps:$4 sm:$0xff]   ;;  %v19908_v56 = vld [vmem:[#allocation33 + $0x1774] ss:$8 sps:$4 sm:$0xff]  }
0x2ae9   :  { %13975 = vmatpush1.bf16.msra.mxu1 %v19861_v42  ;;  %14373 = vmatpush1.bf16.msra.mxu0 %v19864_v17  ;;  %v19903_v3 = vld [vmem:[#allocation33 + $0x1590] ss:$8 sps:$4 sm:$0xff]   ;;  %v19911_v59 = vld [vmem:[#allocation33 + $0x15a4] ss:$8 sps:$4 sm:$0xff]   ;;  %v19909_v53 = vld [vmem:[#allocation33 + $0x15a0] ss:$8 sps:$4 sm:$0xff]  }
0x2aea   :  { %14404 = vmatprep.mubr.bf16.mxu0 %v8596_v24  ;;  %13976 = vmatprep.subr.bf16.mxu1 %v19869_v1  ;;  %v19906_v38 = vld [vmem:[#allocation33 + $0x1770] ss:$8 sps:$4 sm:$0xff]   ;;  %v19914_v25 = vld [vmem:[#allocation33 + $0x1784] ss:$8 sps:$4 sm:$0xff]   ;;  %v19912_v42 = vld [vmem:[#allocation33 + $0x1780] ss:$8 sps:$4 sm:$0xff]  }
0x2aeb   :  { %14374 = vmatprep.subr.bf16.mxu0 %v19872_v8  ;;  %v19917_v18 = vld [vmem:[#allocation33 + $0x15b4] ss:$8 sps:$4 sm:$0xff]   ;;  %v19915_v4 = vld [vmem:[#allocation33 + $0x15b0] ss:$8 sps:$4 sm:$0xff]   ;;  %v19923_v27 = vld [vmem:[#allocation33 + $0x15c4] ss:$8 sps:$4 sm:$0xff]  }
0x2aec   :  { %v19920_v47 = vld [vmem:[#allocation33 + $0x1794] ss:$8 sps:$4 sm:$0xff]   ;;  %v19918_v17 = vld [vmem:[#allocation33 + $0x1790] ss:$8 sps:$4 sm:$0xff]   ;;  %v19926_v43 = vld [vmem:[#allocation33 + $0x17a4] ss:$8 sps:$4 sm:$0xff]  }
0x2aed   :  { %13977 = vmatpush1.bf16.msra.mxu1 %v19867_v39  ;;  %14375 = vmatpush1.bf16.msra.mxu0 %v19870_v26  ;;  %v19921_v1 = vld [vmem:[#allocation33 + $0x15c0] ss:$8 sps:$4 sm:$0xff]   ;;  %v19929_v8 = vld [vmem:[#allocation33 + $0x15d4] ss:$8 sps:$4 sm:$0xff]   ;;  %v19927_v39 = vld [vmem:[#allocation33 + $0x15d0] ss:$8 sps:$4 sm:$0xff]  }
0x2aee   :  { %13978 = vmatprep.subr.bf16.mxu1 %v19875_v55  ;;  %14376 = vmatprep.subr.bf16.mxu0 %v19878_v40  ;;  %v19924_v32 = vld [vmem:[#allocation33 + $0x17a0] ss:$8 sps:$4 sm:$0xff]   ;;  %v19932_v24 = vld [vmem:[#allocation33 + $0x17b4] ss:$8 sps:$4 sm:$0xff]   ;;  %v19930_v26 = vld [vmem:[#allocation33 + $0x17b0] ss:$8 sps:$4 sm:$0xff]  }
0x2aef   :  { %v19935_v55 = vld [vmem:[#allocation33 + $0x15e4] ss:$8 sps:$4 sm:$0xff]   ;;  %vm8439_vm12 = vcmp.gt.f32.partialorder %v23201_v51, 0.0  ;;  %vm16311_vm7 = vcmask 17408  }
0x2af0   :  { %v19938_v40 = vld [vmem:[#allocation33 + $0x17c4] ss:$8 sps:$4 sm:$0xff]  }
0x2af1   :  { %13979 = vmatpush1.bf16.msra.mxu1 %v19873_v37  ;;  %14377 = vmatpush1.bf16.msra.mxu0 %v19876_v52  ;;  %v19933_v37 = vld [vmem:[#allocation33 + $0x15e0] ss:$8 sps:$4 sm:$0xff]  }
0x2af2   :  { %13980 = vmatprep.subr.bf16.mxu1 %v19881_v29  ;;  %14378 = vmatprep.subr.bf16.mxu0 %v19884_v19  ;;  %v19936_v52 = vld [vmem:[#allocation33 + $0x17c0] ss:$8 sps:$4 sm:$0xff]   ;;  %v19941_v29 = vld [vmem:[#allocation33 + $0x15f4] ss:$8 sps:$4 sm:$0xff]  }
0x2af3   :  { %v19944_v19 = vld [vmem:[#allocation33 + $0x17d4] ss:$8 sps:$4 sm:$0xff]  }
0x2af5   :  { %13981 = vmatpush1.bf16.msra.mxu1 %v19879_v46  ;;  %14379 = vmatpush1.bf16.msra.mxu0 %v19882_v5  ;;  %v8487_v46 = vmul.f32 0.01, %v23179_v34  ;;  %v19939_v5 = vld [vmem:[#allocation33 + $0x15f0] ss:$8 sps:$4 sm:$0xff]  }
0x2af6   :  { %13982 = vmatprep.subr.bf16.mxu1 %v19887_v50  ;;  %14380 = vmatprep.subr.bf16.mxu0 %v19890_v12  ;;  %v19942_v50 = vld [vmem:[#allocation33 + $0x17d0] ss:$8 sps:$4 sm:$0xff]   ;;  %v19947_v12 = vld [vmem:[#allocation33 + $0x17e4] ss:$8 sps:$4 sm:$0xff]  }
0x2af9   :  { %13983 = vmatpush1.bf16.msra.mxu1 %v19885_v21  ;;  %14381 = vmatpush1.bf16.msra.mxu0 %v19888_v0  ;;  %v19953_v21 = vld [vmem:[#allocation33 + $0x1804] ss:$8 sps:$4 sm:$0xff]   ;;  %v8539_v0 = vsel %vm8435_vm11, %v23179_v34, %v8487_v46 }
0x2afa   :  { %13984 = vmatprep.subr.bf16.mxu1 %v19893_v58  ;;  %14382 = vmatprep.subr.bf16.mxu0 %v19896_v35  ;;  %v19945_v58 = vld [vmem:[#allocation33 + $0x17e0] ss:$8 sps:$4 sm:$0xff]   ;;  %v19959_v34 = vld [vmem:[#allocation33 + $0x1824] ss:$8 sps:$4 sm:$0xff]  }
0x2afb   :  { %v19951_v35 = vld [vmem:[#allocation33 + $0x1800] ss:$8 sps:$4 sm:$0xff]  }
0x2afd   :  { %13985 = vmatpush1.bf16.msra.mxu1 %v19891_v61  ;;  %14383 = vmatpush1.bf16.msra.mxu0 %v19894_v9  ;;  %v8591_v61 = vpack.c.bf16 %v8539_v0, %v8539_v0  ;;  %v19950_v9 = vld [vmem:[#allocation33 + $0x17f4] ss:$8 sps:$4 sm:$0xff]  }
0x2afe   :  { %13986 = vmatprep.subr.bf16.mxu1 %v19899_v41  ;;  %14384 = vmatprep.subr.bf16.mxu0 %v19902_v33  ;;  %v19956_v41 = vld [vmem:[#allocation33 + $0x1814] ss:$8 sps:$4 sm:$0xff]   ;;  %v8491_v33 = vmul.f32 0.01, %v23201_v51 }
0x2b01   :  { %13987 = vmatpush1.bf16.msra.mxu1 %v19897_v57  ;;  %14385 = vmatpush1.bf16.msra.mxu0 %v19900_v30  ;;  %v19948_v57 = vld [vmem:[#allocation33 + $0x17f0] ss:$8 sps:$4 sm:$0xff]  }
0x2b02   :  { %13988 = vmatprep.subr.bf16.mxu1 %v19905_v62  ;;  %14386 = vmatprep.subr.bf16.mxu0 %v19908_v56  ;;  %v19954_v30 = vld [vmem:[#allocation33 + $0x1810] ss:$8 sps:$4 sm:$0xff]   ;;  %v8543_v62 = vsel %vm8439_vm12, %v23201_v51, %v8491_v33  ;;  %v19957_v56 = vld [vmem:[#allocation33 + $0x1820] ss:$8 sps:$4 sm:$0xff]   ;;  %v19998_v33 = vld [vmem:[#allocation33 + $0x18f4] ss:$8 sps:$4 sm:$0xff]  }
0x2b03   :  { %v19969_v51 = vld [vmem:[#allocation33 + $0x1860] ss:$8 sps:$4 sm:$0xff]  }
0x2b05   :  { %13989 = vmatpush1.bf16.msra.mxu1 %v19903_v3  ;;  %14387 = vmatpush1.bf16.msra.mxu0 %v19906_v38  ;;  %v8595_v3 = vpack.c.bf16 %v8543_v62, %v8543_v62  ;;  %v19962_v38 = vld [vmem:[#allocation33 + $0x1834] ss:$8 sps:$4 sm:$0xff]  }
0x2b06   :  { %13990 = vmatprep.subr.bf16.mxu1 %v19911_v59  ;;  %14388 = vmatprep.subr.bf16.mxu0 %v19914_v25  ;;  %v19960_v59 = vld [vmem:[#allocation33 + $0x1830] ss:$8 sps:$4 sm:$0xff]   ;;  %v19965_v25 = vld [vmem:[#allocation33 + $0x1844] ss:$8 sps:$4 sm:$0xff]  }
0x2b09   :  { %13991 = vmatpush1.bf16.msra.mxu1 %v19909_v53  ;;  %14389 = vmatpush1.bf16.msra.mxu0 %v19912_v42  ;;  %v19963_v53 = vld [vmem:[#allocation33 + $0x1840] ss:$8 sps:$4 sm:$0xff]   ;;  %v19968_v42 = vld [vmem:[#allocation33 + $0x1854] ss:$8 sps:$4 sm:$0xff]  }
0x2b0a   :  { %13992 = vmatprep.subr.bf16.mxu1 %v19917_v18  ;;  %14390 = vmatprep.subr.bf16.mxu0 %v19920_v47  ;;  %v19966_v18 = vld [vmem:[#allocation33 + $0x1850] ss:$8 sps:$4 sm:$0xff]   ;;  %v19971_v47 = vld [vmem:[#allocation33 + $0x1864] ss:$8 sps:$4 sm:$0xff]  }
0x2b0d   :  { %13993 = vmatpush1.bf16.msra.mxu1 %v19915_v4  ;;  %14391 = vmatpush1.bf16.msra.mxu0 %v19918_v17  ;;  %v19974_v4 = vld [vmem:[#allocation33 + $0x1874] ss:$8 sps:$4 sm:$0xff]   ;;  %v19972_v17 = vld [vmem:[#allocation33 + $0x1870] ss:$8 sps:$4 sm:$0xff]  }
0x2b0e   :  { %13994 = vmatprep.subr.bf16.mxu1 %v19923_v27  ;;  %14392 = vmatprep.subr.bf16.mxu0 %v19926_v43  ;;  %v19977_v27 = vld [vmem:[#allocation33 + $0x1884] ss:$8 sps:$4 sm:$0xff]   ;;  %v19975_v43 = vld [vmem:[#allocation33 + $0x1880] ss:$8 sps:$4 sm:$0xff]  }
0x2b11   :  { %13995 = vmatpush1.bf16.msra.mxu1 %v19921_v1  ;;  %14393 = vmatpush1.bf16.msra.mxu0 %v19924_v32  ;;  %v19980_v1 = vld [vmem:[#allocation33 + $0x1894] ss:$8 sps:$4 sm:$0xff]   ;;  %v19978_v32 = vld [vmem:[#allocation33 + $0x1890] ss:$8 sps:$4 sm:$0xff]  }
0x2b12   :  { %13996 = vmatprep.subr.bf16.mxu1 %v19929_v8  ;;  %14394 = vmatprep.subr.bf16.mxu0 %v19932_v24  ;;  %v19983_v8 = vld [vmem:[#allocation33 + $0x18a4] ss:$8 sps:$4 sm:$0xff]   ;;  %v19981_v24 = vld [vmem:[#allocation33 + $0x18a0] ss:$8 sps:$4 sm:$0xff]  }
0x2b15   :  { %13997 = vmatpush1.bf16.msra.mxu1 %v19927_v39  ;;  %14395 = vmatpush1.bf16.msra.mxu0 %v19930_v26  ;;  %v19986_v39 = vld [vmem:[#allocation33 + $0x18b4] ss:$8 sps:$4 sm:$0xff]   ;;  %v19984_v26 = vld [vmem:[#allocation33 + $0x18b0] ss:$8 sps:$4 sm:$0xff]  }
0x2b16   :  { %13998 = vmatprep.subr.bf16.mxu1 %v19935_v55  ;;  %14396 = vmatprep.subr.bf16.mxu0 %v19938_v40  ;;  %v19989_v55 = vld [vmem:[#allocation33 + $0x18c4] ss:$8 sps:$4 sm:$0xff]   ;;  %v19987_v40 = vld [vmem:[#allocation33 + $0x18c0] ss:$8 sps:$4 sm:$0xff]  }
0x2b19   :  { %13999 = vmatpush1.bf16.msra.mxu1 %v19933_v37  ;;  %14397 = vmatpush1.bf16.msra.mxu0 %v19936_v52  ;;  %v9441_v37 = vld [vmem:[#allocation34 + $0x10] sm:$0x3]  ;;  %v19992_v52 = vld [vmem:[#allocation33 + $0x18d4] ss:$8 sps:$4 sm:$0xff]  }
0x2b1a   :  { %14000 = vmatprep.subr.bf16.mxu1 %v19941_v29  ;;  %14398 = vmatprep.subr.bf16.mxu0 %v19944_v19  ;;  %v9526_v29 = vrot.slane %v9441_v37, %v21461_v20  ;;  %v19990_v19 = vld [vmem:[#allocation33 + $0x18d0] ss:$8 sps:$4 sm:$0xff]   ;;  %v9530_v46 = vrot.slane %v9441_v37, %v21972_v54 }
0x2b1d   :  { %14001 = vmatpush1.bf16.msra.mxu1 %v19939_v5  ;;  %14399 = vmatpush1.bf16.msra.mxu0 %v19942_v50  ;;  %v19995_v5 = vld [vmem:[#allocation33 + $0x18e4] ss:$8 sps:$4 sm:$0xff]   ;;  %v14845_v50 = vpop.xlane.xlu0 %14844 }
0x2b1e   :  { %14400 = vmatprep.subr.bf16.mxu0 %v19947_v12  ;;  %14733 = vmatprep.subr.bf16.mxu1 %v19953_v21 }
0x2b20   :  { %14003 = vmatmul.mubr.bf16.vlgmr.msra.gmra.mrb[124].mxu1 %v8591_v61 }
0x2b21   :  { %14401 = vmatpush1.bf16.msra.mxu0 %v19945_v58  ;;  %14734 = vmatpush1.bf16.msra.mxu1 %v19951_v35  ;;  %v19993_v58 = vld [vmem:[#allocation33 + $0x18e0] ss:$8 sps:$4 sm:$0xff]   ;;  %v14907_v35 = vmul.f32 0.00390625, %v14845_v50 }
0x2b22   :  { %14402 = vmatprep.subr.bf16.mxu0 %v19950_v9  ;;  %14735 = vmatprep.subr.bf16.mxu1 %v19956_v41  ;;  %v9442_v41 = vld [vmem:[#allocation34 + $0x12] sm:$0x3] }
0x2b25   :  { %14403 = vmatpush1.bf16.msra.mxu0 %v19948_v57  ;;  %14736 = vmatpush1.bf16.msra.mxu1 %v19954_v30 }
0x2b26   :  { %14737 = vmatprep.subr.bf16.mxu1 %v19959_v34 }
0x2b28   :  { %14405 = vmatmul.mubr.bf16.vlgmr.msra.gmra.mrb[120].mxu0 %v8595_v3  ;;  %v19996_v3 = vld [vmem:[#allocation33 + $0x18f0] ss:$8 sps:$4 sm:$0xff]  }
0x2b29   :  { %14738 = vmatpush1.bf16.msra.mxu1 %v19957_v56  ;;  %v9534_v56 = vrot.slane %v9442_v41, %v21461_v20 }
0x2b2a   :  { %14739 = vmatprep.subr.bf16.mxu1 %v19962_v38  ;;  %v23708_v38 = vld [vmem:[#allocation66_spill] sm:$0xff] }
0x2b2d   :  { %14740 = vmatpush1.bf16.msra.mxu1 %v19960_v59  ;;  %v23221_v59 = vsub.f32 %v23708_v38, %v14907_v35 }
0x2b2e   :  { %14741 = vmatprep.subr.bf16.mxu1 %v19965_v25  ;;  %v23709_v25 = vld [vmem:[#allocation68_spill] sm:$0xff] }
0x2b31   :  { %14742 = vmatpush1.bf16.msra.mxu1 %v19963_v53  ;;  %v23224_v53 = vsub.f32 %v23709_v25, %v14907_v35  ;;  %v7285_v25 = vld [vmem:[#allocation30 + $0x30] sm:$0xf] }
0x2b32   :  { %14743 = vmatprep.subr.bf16.mxu1 %v19968_v42  ;;  %v14855_v42 = vpop.xlane.xlu0 %14854 }
0x2b35   :  { %14744 = vmatpush1.bf16.msra.mxu1 %v19966_v18  ;;  %v9538_v18 = vrot.slane %v9442_v41, %v21972_v54 }
0x2b36   :  { %14745 = vmatprep.subr.bf16.mxu1 %v19971_v47  ;;  %v20001_v47 = vld [vmem:[#allocation33 + $0x1904] ss:$8 sps:$4 sm:$0xff]  }
0x2b39   :  { %14746 = vmatpush1.bf16.msra.mxu1 %v19969_v51 }
0x2b3a   :  { %14747 = vmatprep.subr.bf16.mxu1 %v19974_v4 }
0x2b3d   :  { %14748 = vmatpush1.bf16.msra.mxu1 %v19972_v17 }
0x2b3e   :  { %14749 = vmatprep.subr.bf16.mxu1 %v19977_v27  ;;  %v14946_v27 = vmul.f32 %v23221_v59, %v23221_v59 }
0x2b40   :  { %v14972_v37 = vsel %vm7299_vm9, %v14946_v27, 0.0 }
0x2b41   :  { %14750 = vmatpush1.bf16.msra.mxu1 %v19975_v43  ;;  %v14947_v43 = vmul.f32 %v23224_v53, %v23224_v53 }
0x2b42   :  { %14751 = vmatprep.subr.bf16.mxu1 %v19980_v1 }
0x2b45   :  { %14752 = vmatpush1.bf16.msra.mxu1 %v19978_v32 }
0x2b46   :  { %14753 = vmatprep.subr.bf16.mxu1 %v19983_v8 }
0x2b49   :  { %14754 = vmatpush1.bf16.msra.mxu1 %v19981_v24 }
0x2b4a   :  { %14755 = vmatprep.subr.bf16.mxu1 %v19986_v39  ;;  %v14865_v39 = vpop.xlane.xlu0 %14864 }
0x2b4d   :  { %14756 = vmatpush1.bf16.msra.mxu1 %v19984_v26 }
0x2b4e   :  { %14757 = vmatprep.subr.bf16.mxu1 %v19989_v55  ;;  %v14909_v55 = vmul.f32 0.00390625, %v14855_v42 }
0x2b50   :  { %v23245_v50 = vsub.f32 %v22960_v15, %v14909_v55  ;;  %v14875_v15 = vpop.xlane.xlu0 %14874 }
0x2b51   :  { %14758 = vmatpush1.bf16.msra.mxu1 %v19987_v40 }
0x2b52   :  { %14759 = vmatprep.subr.bf16.mxu1 %v19992_v52  ;;  %v14973_v52 = vsel %vm7299_vm9, %v14947_v43, 0.0 }
0x2b54   :  { %v13200_v12 = vpop.f32.mrb[120].mxu1 }
0x2b55   :  { %v23211_v21 = vadd.f32 %v13200_v12, %v9526_v29  ;;  %v13202_v0 = vpop.f32.mrb[121].mxu1  ;;  %14760 = vmatpush1.bf16.msra.mxu1 %v19990_v19  ;;  %v14911_v29 = vmul.f32 0.00390625, %v14865_v39  ;;  %v14974_v12 = vadd.f32 %v14973_v52, %v14972_v37  ;;  %v7959_v39 = vrot.slane %v7285_v25, %v21975_v48 }
0x2b56   :  { %v23213_v61 = vadd.f32 %v13202_v0, %v9530_v46  ;;  %v13204_v9 = vpop.f32.mrb[122].mxu1  ;;  %14761 = vmatprep.subr.bf16.mxu1 %v19995_v5  ;;  %v23242_v5 = vsub.f32 %v22941_v28, %v14909_v55  ;;  %v14951_v28 = vmul.f32 %v23245_v50, %v23245_v50 }
0x2b57   :  { %v14881_v57 = vsel %vm7299_vm9, %v23211_v21, 0.0  ;;  %v13205_v30 = vpop.f32.mrb[123].mxu1  ;;  %v23251_v9 = vsub.f32 %v23066_v31, %v14911_v29 }
0x2b58   :  { %v14882_v34 = vsel %vm7299_vm9, %v23213_v61, 0.0 }
0x2b59   :  { %v14883_v62 = vadd.f32 %v14882_v34, %v14881_v57  ;;  %14762 = vmatpush1.bf16.msra.mxu1 %v19993_v58  ;;  %v23248_v58 = vsub.f32 %v23058_v63, %v14911_v29  ;;  %v14955_v31 = vmul.f32 %v23251_v9, %v23251_v9  ;;  %v14913_v34 = vmul.f32 0.00390625, %v14875_v15 }
0x2b5a   :  { %14763 = vmatprep.subr.bf16.mxu1 %v19998_v33  ;;  %v14950_v33 = vmul.f32 %v23242_v5, %v23242_v5 }
0x2b5b   :  { %14884 = vadd.xlane.f32.xlu0 %v14883_v62  ;;  %v14954_v30 = vmul.f32 %v23248_v58, %v23248_v58  ;;  %v14993_v43 = vsel %vm7299_vm9, %v14955_v31, 0.0 }
0x2b5d   :  { %14764 = vmatpush1.bf16.msra.mxu1 %v19996_v3  ;;  %v14982_v3 = vsel %vm7299_vm9, %v14950_v33, 0.0 }
0x2b5e   :  { %v13602_v51 = vpop.f32.mrb[116].mxu0  ;;  %14774 = vmatprep.subr.bf16.mxu1 %v20001_v47  ;;  %v7298_v47 = vld [vmem:[#allocation31 + $0x30] sm:$0xf] }
0x2b5f   :  { %v23227_v4 = vadd.f32 %v13602_v51, %v9534_v56  ;;  %v13604_v17 = vpop.f32.mrb[117].mxu0  ;;  %v23277_v51 = vsub.f32 %v23085_v60, %v14913_v34  ;;  %v8280_v55 = vrot.slane %v7298_v47, %v21972_v54  ;;  %v8276_v60 = vrot.slane %v7298_v47, %v21461_v20 }
0x2b60   :  { %v23233_v1 = vadd.f32 %v13604_v17, %v9538_v18  ;;  %v13606_v32 = vpop.f32.mrb[118].mxu0  ;;  %v14992_v18 = vsel %vm7299_vm9, %v14954_v30, 0.0  ;;  %v23280_v17 = vsub.f32 %v23087_v23, %v14913_v34  ;;  %v8288_v23 = vrot.slane %v7298_v47, %v21978_v49 }
0x2b61   :  { %v14886_v8 = vsel %vm7299_vm9, %v23227_v4, 0.0  ;;  %v13607_v24 = vpop.f32.mrb[119].mxu0  ;;  %v7955_v32 = vrot.slane %v7285_v25, %v21972_v54 }
0x2b62   :  { %v14887_v26 = vsel %vm7299_vm9, %v23233_v1, 0.0  ;;  %v7963_v24 = vrot.slane %v7285_v25, %v21978_v49 }
0x2b63   :  { %v14888_v40 = vadd.f32 %v14887_v26, %v14886_v8  ;;  %v7651_v19 = vpop.xlane.xlu1 %7650  ;;  %v7951_v8 = vrot.slane %v7285_v25, %v21461_v20  ;;  %v20004_v25 = vld [vmem:[#allocation33 + $0x1914] ss:$8 sps:$4 sm:$0xff]  }
0x2b64   :  { %v7664_v46 = vmul.f32 0.001953125, %v7651_v19 }
0x2b65   :  { %14889 = vadd.xlane.f32.xlu1 %v14888_v40  ;;  %v8284_v40 = vrot.slane %v7298_v47, %v21975_v48  ;;  %v14994_v48 = vadd.f32 %v14993_v43, %v14992_v18  ;;  %v20002_v18 = vld [vmem:[#allocation33 + $0x1910] ss:$8 sps:$4 sm:$0xff]   ;;  %v20007_v47 = vld [vmem:[#allocation33 + $0x1924] ss:$8 sps:$4 sm:$0xff]   ;;  %v20010_v43 = vld [vmem:[#allocation33 + $0x1934] ss:$8 sps:$4 sm:$0xff]  }
0x2b66   :  { %v7677_v0 = vadd.f32 1e-05, %v7664_v46  ;;  %v14958_v46 = vmul.f32 %v23277_v51, %v23277_v51 }
0x2b67   :  { %v14850_v35 = vpop.xlane.xlu1 %14849 }
0x2b68   :  { %20165 = vrsqrt.f32 %v7677_v0  ;;  %v14908_v41 = vmul.f32 0.00390625, %v14850_v35 }
0x2b69   :  { %14975 = vadd.xlane.f32.xlu1 %v14974_v12  ;;  %v14959_v12 = vmul.f32 %v23280_v17, %v23280_v17 }
0x2b6a   :  { %v23258_v57 = vsub.f32 %v23102_v13, %v14908_v41  ;;  %v23261_v63 = vsub.f32 %v23105_v7, %v14908_v41  ;;  %v14983_v13 = vsel %vm7299_vm9, %v14951_v28, 0.0 }
0x2b6b   :  { %v14984_v27 = vadd.f32 %v14983_v13, %v14982_v3  ;;  %v19999_v13 = vld [vmem:[#allocation33 + $0x1900] ss:$8 sps:$4 sm:$0xff]  }
0x2b6c   :  { %v14948_v62 = vmul.f32 %v23258_v57, %v23258_v57  ;;  %v14949_v56 = vmul.f32 %v23261_v63, %v23261_v63 }
0x2b6e   :  { %v14977_v7 = vsel %vm7299_vm9, %v14948_v62, 0.0  ;;  %v14978_v38 = vsel %vm7299_vm9, %v14949_v56, 0.0 }
0x2b6f   :  { %v14979_v42 = vadd.f32 %v14978_v38, %v14977_v7 }
0x2b71   :  { %14980 = vadd.xlane.f32.xlu1 %v14979_v42 }
0x2b72   :  { %v20166_v26 = vpop.eup %20165 }
0x2b73   :  { %v7740_v37 = vmul.f32 %v20166_v26, %v23111_v14  ;;  %v7739_v52 = vmul.f32 %v20166_v26, %v23108_v45  ;;  %v7742_v29 = vmul.f32 %v20166_v26, %v23117_v10  ;;  %v7741_v19 = vmul.f32 %v20166_v26, %v23114_v36  ;;  %v20014_v26 = vld [vmem:[#allocation33 + $0x1950] ss:$8 sps:$4 sm:$0xff]  }
0x2b74   :  { %v15002_v10 = vsel %vm7299_vm9, %v14958_v46, 0.0  ;;  %v15003_v36 = vsel %vm7299_vm9, %v14959_v12, 0.0  ;;  %v20023_v12 = vld [vmem:[#allocation33 + $0x1980] ss:$8 sps:$4 sm:$0xff]  }
0x2b75   :  { %14985 = vadd.xlane.f32.xlu1 %v14984_v27  ;;  %v8065_v0 = vmul.f32 %v7955_v32, %v7740_v37  ;;  %v8064_v35 = vmul.f32 %v7951_v8, %v7739_v52  ;;  %v8067_v49 = vmul.f32 %v7963_v24, %v7742_v29  ;;  %v8066_v41 = vmul.f32 %v7959_v39, %v7741_v19  ;;  %v20005_v27 = vld [vmem:[#allocation33 + $0x1920] ss:$8 sps:$4 sm:$0xff]   ;;  %v20008_v32 = vld [vmem:[#allocation33 + $0x1930] ss:$8 sps:$4 sm:$0xff]   ;;  %v20013_v8 = vld [vmem:[#allocation33 + $0x1944] ss:$8 sps:$4 sm:$0xff]  }
0x2b76   :  { %v15004_v34 = vadd.f32 %v15003_v36, %v15002_v10  ;;  %v20011_v24 = vld [vmem:[#allocation33 + $0x1940] ss:$8 sps:$4 sm:$0xff]   ;;  %v20016_v39 = vld [vmem:[#allocation33 + $0x1954] ss:$8 sps:$4 sm:$0xff]   ;;  %v20020_v52 = vld [vmem:[#allocation33 + $0x1970] ss:$8 sps:$4 sm:$0xff]  }
0x2b77   :  { %v8390_v33 = vadd.f32 %v8280_v55, %v8065_v0  ;;  %v8389_v14 = vadd.f32 %v8276_v60, %v8064_v35  ;;  %v8392_v28 = vadd.f32 %v8288_v23, %v8067_v49  ;;  %v23299_v45 = vadd.f32 %v8284_v40, %v8066_v41  ;;  %v17445_v55 = vld.sshfl [vmem:[%s20983_s21] sm:$0x33 pattern:$0x76325410]  ;;  %v20017_v40 = vld [vmem:[#allocation33 + $0x1960] ss:$8 sps:$4 sm:$0xff]  }
0x2b78   :  { %v20019_v60 = vld [vmem:[#allocation33 + $0x1964] ss:$8 sps:$4 sm:$0xff]   ;;  %v15656_v23 = vcombine.high %v17445_v55, %v17445_v55  ;;  %v20022_v37 = vld [vmem:[#allocation33 + $0x1974] ss:$8 sps:$4 sm:$0xff]   ;;  %v20026_v35 = vld [vmem:[#allocation33 + $0x1990] ss:$8 sps:$4 sm:$0xff]  }
0x2b79   :  { %14995 = vadd.xlane.f32.xlu1 %v14994_v48  ;;  %vm8442_vm13 = vcmp.gt.f32.partialorder %v8390_v33, 0.0  ;;  %v8494_v15 = vmul.f32 0.01, %v8390_v33  ;;  %vm8441_vm14 = vcmp.gt.f32.partialorder %v8389_v14, 0.0  ;;  %v8493_v30 = vmul.f32 0.01, %v8389_v14 }
0x2b7a   :  { %vm8444_vm15 = vcmp.gt.f32.partialorder %v8392_v28, 0.0  ;;  %v8496_v31 = vmul.f32 0.01, %v8392_v28  ;;  %15659 = vmatprep.subr.bf16.mxu0 %v15656_v23  ;;  %v20025_v29 = vld [vmem:[#allocation33 + $0x1984] ss:$8 sps:$4 sm:$0xff]   ;;  %vm8443_vm0 = vcmp.gt.f32.partialorder %v23299_v45, 0.0 }
0x2b7b   :  { %v8546_v62 = vsel %vm8442_vm13, %v8390_v33, %v8494_v15  ;;  %v8545_v56 = vsel %vm8441_vm14, %v8389_v14, %v8493_v30  ;;  %15660 = vmatpush1.bf16.xpose.msra.mxu0 %v17445_v55  ;;  %v23305_v19 = vld.sshfl [vmem:[%s20983_s21 + $0x4] sm:$0x33 pattern:$0x76325410]  ;;  %v20031_v49 = vld [vmem:[#allocation33 + $0x19a4] ss:$8 sps:$4 sm:$0xff]  }
0x2b7c   :  { %v8598_v3 = vpack.c.bf16 %v8546_v62, %v8546_v62  ;;  %v8597_v7 = vpack.c.bf16 %v8545_v56, %v8545_v56  ;;  %v8548_v38 = vsel %vm8444_vm15, %v8392_v28, %v8496_v31  ;;  %v15707_v46 = vcombine.high %v23305_v19, %v23305_v19  ;;  %v20028_v0 = vld [vmem:[#allocation33 + $0x1994] ss:$8 sps:$4 sm:$0xff]   ;;  %v20029_v41 = vld [vmem:[#allocation33 + $0x19a0] ss:$8 sps:$4 sm:$0xff]   ;;  %v20032_v33 = vld [vmem:[#allocation33 + $0x19b0] ss:$8 sps:$4 sm:$0xff]  }
0x2b7d   :  { %15005 = vadd.xlane.f32.xlu1 %v15004_v34  ;;  %v8600_v42 = vpack.c.bf16 %v8548_v38, %v8548_v38  ;;  %v20034_v48 = vld [vmem:[#allocation33 + $0x19b4] ss:$8 sps:$4 sm:$0xff]   ;;  %v20037_v14 = vld [vmem:[#allocation33 + $0x19c4] ss:$8 sps:$4 sm:$0xff]   ;;  %v20035_v28 = vld [vmem:[#allocation33 + $0x19c0] ss:$8 sps:$4 sm:$0xff]  }
0x2b7e   :  { %14765 = vmatprep.mubr.bf16.mxu1 %v8598_v3  ;;  %15710 = vmatprep.subr.bf16.mxu0 %v15707_v46  ;;  %v20040_v10 = vld [vmem:[#allocation33 + $0x19d4] ss:$8 sps:$4 sm:$0xff]   ;;  %v20038_v36 = vld [vmem:[#allocation33 + $0x19d0] ss:$8 sps:$4 sm:$0xff]   ;;  %v20043_v15 = vld [vmem:[#allocation33 + $0x19e4] ss:$8 sps:$4 sm:$0xff]  }
0x2b7f   :  { %14766 = vmatmul.mubr.bf16.vlgmr.msra.gmra.mrb[128].mxu1 %v8597_v7  ;;  %v20041_v30 = vld [vmem:[#allocation33 + $0x19e0] ss:$8 sps:$4 sm:$0xff]   ;;  %v20046_v31 = vld [vmem:[#allocation33 + $0x19f4] ss:$8 sps:$4 sm:$0xff]   ;;  %v8495_v34 = vmul.f32 0.01, %v23299_v45 }
0x2b80   :  { %14775 = vmatpush1.bf16.msra.mxu1 %v19999_v13  ;;  %14806 = vmatprep.mubr.bf16.mxu1 %v8600_v42  ;;  %v20044_v62 = vld [vmem:[#allocation33 + $0x19f0] ss:$8 sps:$4 sm:$0xff]   ;;  %v23312_v13 = vpop.xlane.xlu1 %14859 }
0x2b81   :  { %14776 = vmatprep.subr.bf16.mxu1 %v20004_v25  ;;  %v8547_v56 = vsel %vm8443_vm0, %v23299_v45, %v8495_v34 }
0x2b82   :  { %v8599_v3 = vpack.c.bf16 %v8547_v56, %v8547_v56  ;;  %v14815_v56 = vld [vmem:[#allocation36] sm:$0x3] }
0x2b84   :  { %14777 = vmatpush1.bf16.msra.mxu1 %v20002_v18  ;;  %v23314_v7 = vpop.xlane.xlu1 %14869 }
0x2b85   :  { %14778 = vmatprep.subr.bf16.mxu1 %v20007_v47 }
0x2b88   :  { %14779 = vmatpush1.bf16.msra.mxu1 %v20005_v27  ;;  %v23322_v47 = vpop.xlane.xlu1 %14879 }
0x2b89   :  { %14780 = vmatprep.subr.bf16.mxu1 %v20010_v43  ;;  %v9443_v43 = vld [vmem:[#allocation34 + $0x14] sm:$0x3] }
0x2b8c   :  { %14781 = vmatpush1.bf16.msra.mxu1 %v20008_v32 }
0x2b8d   :  { %14782 = vmatprep.subr.bf16.mxu1 %v20013_v8 }
0x2b90   :  { %14783 = vmatpush1.bf16.msra.mxu1 %v20011_v24 }
0x2b91   :  { %14784 = vmatprep.subr.bf16.mxu1 %v20016_v39  ;;  %v9542_v39 = vrot.slane %v9443_v43, %v21461_v20 }
0x2b94   :  { %14785 = vmatpush1.bf16.msra.mxu1 %v20014_v26 }
0x2b95   :  { %14786 = vmatprep.subr.bf16.mxu1 %v20019_v60 }
0x2b98   :  { %14787 = vmatpush1.bf16.msra.mxu1 %v20017_v40 }
0x2b99   :  { %14788 = vmatprep.subr.bf16.mxu1 %v20022_v37 }
0x2b9c   :  { %14789 = vmatpush1.bf16.msra.mxu1 %v20020_v52 }
0x2b9d   :  { %14790 = vmatprep.subr.bf16.mxu1 %v20025_v29  ;;  %v9444_v29 = vld [vmem:[#allocation34 + $0x16] sm:$0x3] }
0x2ba0   :  { %14791 = vmatpush1.bf16.msra.mxu1 %v20023_v12 }
0x2ba1   :  { %14792 = vmatprep.subr.bf16.mxu1 %v20028_v0 }
0x2ba4   :  { %14793 = vmatpush1.bf16.msra.mxu1 %v20026_v35 }
0x2ba5   :  { %14794 = vmatprep.subr.bf16.mxu1 %v20031_v49 }
0x2ba8   :  { %14795 = vmatpush1.bf16.msra.mxu1 %v20029_v41  ;;  %v9550_v41 = vrot.slane %v9444_v29, %v21461_v20 }
0x2ba9   :  { %14796 = vmatprep.subr.bf16.mxu1 %v20034_v48  ;;  %v9554_v48 = vrot.slane %v9444_v29, %v21972_v54 }
0x2bac   :  { %14797 = vmatpush1.bf16.msra.mxu1 %v20032_v33 }
0x2bad   :  { %14798 = vmatprep.subr.bf16.mxu1 %v20037_v14 }
0x2bb0   :  { %14799 = vmatpush1.bf16.msra.mxu1 %v20035_v28 }
0x2bb1   :  { %14800 = vmatprep.subr.bf16.mxu1 %v20040_v10 }
0x2bb4   :  { %14801 = vmatpush1.bf16.msra.mxu1 %v20038_v36 }
0x2bb5   :  { %14802 = vmatprep.subr.bf16.mxu1 %v20043_v15 }
0x2bb8   :  { %14803 = vmatpush1.bf16.msra.mxu1 %v20041_v30 }
0x2bb9   :  { %14804 = vmatprep.subr.bf16.mxu1 %v20046_v31 }
0x2bbc   :  { %14805 = vmatpush1.bf16.msra.mxu1 %v20044_v62 }
0x2bbf   :  { %14807 = vmatmul.mubr.bf16.vlgmr.msra.gmra.mrb[128].mxu1 %v8599_v3 }
0x2be8   :  { %v14885_v38 = vpop.xlane.xlu0 %14884 }
0x2be9   :  { %v14915_v25 = vmul.f32 0.00390625, %v14885_v38 }
0x2beb   :  { %v23317_v42 = vsub.f32 %v23211_v21, %v14915_v25  ;;  %v23320_v18 = vsub.f32 %v23213_v61, %v14915_v25  ;;  %v9546_v61 = vrot.slane %v9443_v43, %v21972_v54  ;;  %v14828_v25 = vld [vmem:[#allocation37] sm:$0x3]  ;;  %v15122_v43 = vrot.slane %v14815_v56, %v21972_v54 }
0x2bed   :  { %v14962_v45 = vmul.f32 %v23317_v42, %v23317_v42  ;;  %v14963_v27 = vmul.f32 %v23320_v18, %v23320_v18 }
0x2bef   :  { %v15012_v32 = vsel %vm7299_vm9, %v14962_v45, 0.0  ;;  %v15013_v8 = vsel %vm7299_vm9, %v14963_v27, 0.0  ;;  %v15118_v27 = vrot.slane %v14815_v56, %v21461_v20  ;;  %v14817_v56 = vld [vmem:[#allocation36 + $0x4] sm:$0x3] }
0x2bf0   :  { %v15014_v21 = vadd.f32 %v15013_v8, %v15012_v32 }
0x2bf2   :  { %v23330_v24 = vpop.xlane.xlu1 %14889  ;;  %15015 = vadd.xlane.f32.xlu1 %v15014_v21 }
0x2bf3   :  { %v14004_v26 = vpop.f32.mrb[124].mxu1 }
0x2bf4   :  { %v23334_v55 = vadd.f32 %v14004_v26, %v9542_v39  ;;  %v14006_v60 = vpop.f32.mrb[125].mxu1  ;;  %v15291_v26 = vrot.slane %v14828_v25, %v21972_v54 }
0x2bf5   :  { %v23336_v40 = vadd.f32 %v14006_v60, %v9546_v61  ;;  %v14008_v52 = vpop.f32.mrb[126].mxu1  ;;  %v15287_v61 = vrot.slane %v14828_v25, %v21461_v20  ;;  %v14830_v25 = vld [vmem:[#allocation37 + $0x4] sm:$0x3] }
0x2bf6   :  { %v14976_v23 = vpop.xlane.xlu1 %14975  ;;  %v14891_v46 = vsel %vm7299_vm9, %v23334_v55, 0.0  ;;  %v14009_v12 = vpop.f32.mrb[127].mxu1 }
0x2bf7   :  { %v15037_v37 = vmul.f32 0.00390625, %v14976_v23  ;;  %v14892_v0 = vsel %vm7299_vm9, %v23336_v40, 0.0  ;;  %v14829_v12 = vld [vmem:[#allocation37 + $0x2] sm:$0x3] }
0x2bf8   :  { %v14893_v49 = vadd.f32 %v14892_v0, %v14891_v46  ;;  %v14816_v46 = vld [vmem:[#allocation36 + $0x2] sm:$0x3] }
0x2bf9   :  { %v15050_v35 = vadd.f32 1e-05, %v15037_v37 }
0x2bfa   :  { %14894 = vadd.xlane.f32.xlu0 %v14893_v49 }
0x2bfb   :  { %20167 = vrsqrt.f32 %v15050_v35  ;;  %v14406_v33 = vpop.f32.mrb[120].mxu0 }
0x2bfc   :  { %v23344_v14 = vadd.f32 %v14406_v33, %v9550_v41  ;;  %v14408_v28 = vpop.f32.mrb[121].mxu0 }
0x2bfd   :  { %v23346_v10 = vadd.f32 %v14408_v28, %v9554_v48  ;;  %v14410_v36 = vpop.f32.mrb[122].mxu0  ;;  %v15130_v48 = vrot.slane %v14816_v46, %v21972_v54 }
0x2bfe   :  { %v14896_v15 = vsel %vm7299_vm9, %v23344_v14, 0.0  ;;  %v14411_v30 = vpop.f32.mrb[123].mxu0  ;;  %v14981_v31 = vpop.xlane.xlu1 %14980 }
0x2bff   :  { %v14897_v34 = vsel %vm7299_vm9, %v23346_v10, 0.0  ;;  %v15038_v62 = vmul.f32 0.00390625, %v14981_v31 }
0x2c00   :  { %v14898_v3 = vadd.f32 %v14897_v34, %v14896_v15  ;;  %v15295_v15 = vrot.slane %v14829_v12, %v21461_v20  ;;  %v15299_v34 = vrot.slane %v14829_v12, %v21972_v54 }
0x2c01   :  { %v15051_v38 = vadd.f32 1e-05, %v15038_v62 }
0x2c02   :  { %14899 = vadd.xlane.f32.xlu0 %v14898_v3  ;;  %v14986_v45 = vpop.xlane.xlu1 %14985 }
0x2c03   :  { %20169 = vrsqrt.f32 %v15051_v38  ;;  %v15039_v8 = vmul.f32 0.00390625, %v14986_v45 }
0x2c05   :  { %v20168_v32 = vpop.eup %20167  ;;  %v15052_v60 = vadd.f32 1e-05, %v15039_v8 }
0x2c06   :  { %v15076_v21 = vmul.f32 %v20168_v32, %v23221_v59  ;;  %v15077_v39 = vmul.f32 %v20168_v32, %v23224_v53  ;;  %v17447_v59 = vld.sshfl [vmem:[%s20983_s21 + $0x8] sm:$0x33 pattern:$0x76325410]  ;;  %v15126_v53 = vrot.slane %v14816_v46, %v21461_v20 }
0x2c07   :  { %20171 = vrsqrt.f32 %v15052_v60  ;;  %v15758_v62 = vcombine.high %v17447_v59, %v17447_v59 }
0x2c08   :  { %v15246_v23 = vmul.f32 %v15122_v43, %v15077_v39  ;;  %v15245_v37 = vmul.f32 %v15118_v27, %v15076_v21  ;;  %v15134_v27 = vrot.slane %v14817_v56, %v21461_v20  ;;  %v15138_v43 = vrot.slane %v14817_v56, %v21972_v54 }
0x2c09   :  { %v15303_v21 = vrot.slane %v14830_v25, %v21461_v20  ;;  %v15307_v39 = vrot.slane %v14830_v25, %v21972_v54 }
0x2c0a   :  { %v15415_v52 = vadd.f32 %v15291_v26, %v15246_v23  ;;  %v15414_v29 = vadd.f32 %v15287_v61, %v15245_v37 }
0x2c0c   :  { %vm15441_vm1 = vcmp.gt.f32.partialorder %v15415_v52, 0.0  ;;  %v15467_v0 = vmul.f32 0.01, %v15415_v52  ;;  %vm15440_vm2 = vcmp.gt.f32.partialorder %v15414_v29, 0.0  ;;  %v15466_v35 = vmul.f32 0.01, %v15414_v29 }
0x2c0d   :  { %v20170_v33 = vpop.eup %20169 }
0x2c0e   :  { %v15493_v49 = vsel %vm15441_vm1, %v15415_v52, %v15467_v0  ;;  %v15492_v41 = vsel %vm15440_vm2, %v15414_v29, %v15466_v35  ;;  %v15078_v30 = vmul.f32 %v20170_v33, %v23258_v57  ;;  %v15079_v31 = vmul.f32 %v20170_v33, %v23261_v63 }
0x2c0f   :  { %v15519_v28 = vpack.c.bf16 %v15493_v49, %v15493_v49  ;;  %v15518_v36 = vpack.c.bf16 %v15492_v41, %v15492_v41 }
0x2c10   :  { %v15248_v3 = vmul.f32 %v15130_v48, %v15079_v31  ;;  %v15247_v38 = vmul.f32 %v15126_v53, %v15078_v30  ;;  %v9445_v30 = vld [vmem:[#allocation34 + $0x18] sm:$0x3] }
0x2c11   :  { %15691 = vmatprep.mubr.bf16.mxu0 %v15519_v28  ;;  %v20172_v45 = vpop.eup %20171  ;;  %v9558_v56 = vrot.slane %v9445_v30, %v21461_v20 }
0x2c12   :  { %15692 = vmatmul.mubr.bf16.vlgmr.msra.gmra.mrb[124].mxu0 %v15518_v36  ;;  %v15080_v57 = vmul.f32 %v20172_v45, %v23242_v5  ;;  %v15081_v63 = vmul.f32 %v20172_v45, %v23245_v50  ;;  %v15417_v32 = vadd.f32 %v15299_v34, %v15248_v3  ;;  %v15416_v8 = vadd.f32 %v15295_v15, %v15247_v38 }
0x2c13   :  { %15711 = vmatpush1.bf16.xpose.msra.mxu0 %v23305_v19  ;;  %v14910_v36 = vmul.f32 0.00390625, %v23312_v13  ;;  %v9562_v3 = vrot.slane %v9445_v30, %v21972_v54  ;;  %v14914_v45 = vmul.f32 0.00390625, %v23322_v47 }
0x2c14   :  { %15761 = vmatprep.subr.bf16.mxu0 %v15758_v62  ;;  %vm15443_vm3 = vcmp.gt.f32.partialorder %v15417_v32, 0.0  ;;  %v15469_v61 = vmul.f32 0.01, %v15417_v32  ;;  %vm15442_vm4 = vcmp.gt.f32.partialorder %v15416_v8, 0.0  ;;  %v15468_v26 = vmul.f32 0.01, %v15416_v8 }
0x2c15   :  { %v15250_v19 = vmul.f32 %v15138_v43, %v15081_v63  ;;  %v15249_v60 = vmul.f32 %v15134_v27, %v15080_v57  ;;  %v14912_v62 = vmul.f32 0.00390625, %v23314_v7  ;;  %v23391_v13 = vsub.f32 %v23123_v2, %v14910_v36 }
0x2c16   :  { %v15495_v23 = vsel %vm15443_vm3, %v15417_v32, %v15469_v61  ;;  %v15494_v37 = vsel %vm15442_vm4, %v15416_v8, %v15468_v26  ;;  %v14916_v26 = vmul.f32 0.00390625, %v23330_v24 }
0x2c17   :  { %v15521_v52 = vpack.c.bf16 %v15495_v23, %v15495_v23  ;;  %v15520_v29 = vpack.c.bf16 %v15494_v37, %v15494_v37  ;;  %v15419_v5 = vadd.f32 %v15307_v39, %v15250_v19  ;;  %v15418_v46 = vadd.f32 %v15303_v21, %v15249_v60 }
0x2c18   :  { %v23395_v25 = vsub.f32 %v23146_v22, %v14912_v62  ;;  %v23405_v2 = vsub.f32 %v23149_v6, %v14912_v62  ;;  %v23416_v21 = vsub.f32 %v23188_v16, %v14914_v45  ;;  %v23419_v39 = vsub.f32 %v23191_v11, %v14914_v45  ;;  %v23460_v62 = vld.sshfl [vmem:[%s20983_s21 + $0x10] sm:$0x33 pattern:$0x76325410] }
0x2c19   :  { %15742 = vmatprep.mubr.bf16.mxu0 %v15521_v52  ;;  %vm15445_vm5 = vcmp.gt.f32.partialorder %v15419_v5, 0.0  ;;  %v15471_v50 = vmul.f32 0.01, %v15419_v5  ;;  %v15470_v12 = vmul.f32 0.01, %v15418_v46  ;;  %vm15444_vm6 = vcmp.gt.f32.partialorder %v15418_v46, 0.0 }
0x2c1a   :  { %15743 = vmatmul.mubr.bf16.vlgmr.msra.gmra.mrb[128].mxu0 %v15520_v29  ;;  %v14956_v8 = vmul.f32 %v23395_v25, %v23395_v25  ;;  %v14957_v61 = vmul.f32 %v23405_v2, %v23405_v2  ;;  %v14960_v37 = vmul.f32 %v23416_v21, %v23416_v21  ;;  %v14961_v16 = vmul.f32 %v23419_v39, %v23419_v39 }
0x2c1b   :  { %15762 = vmatpush1.bf16.xpose.msra.mxu0 %v17447_v59  ;;  %v15497_v0 = vsel %vm15445_vm5, %v15419_v5, %v15471_v50  ;;  %v15496_v49 = vsel %vm15444_vm6, %v15418_v46, %v15470_v12  ;;  %v23432_v29 = vsub.f32 %v23227_v4, %v14916_v26  ;;  %v23435_v24 = vsub.f32 %v23233_v1, %v14916_v26 }
0x2c1c   :  { %v15523_v35 = vpack.c.bf16 %v15497_v0, %v15497_v0  ;;  %v15522_v41 = vpack.c.bf16 %v15496_v49, %v15496_v49  ;;  %v14997_v52 = vsel %vm7299_vm9, %v14956_v8, 0.0  ;;  %v14998_v46 = vsel %vm7299_vm9, %v14957_v61, 0.0 }
0x2c1d   :  { %v14999_v50 = vadd.f32 %v14998_v46, %v14997_v52  ;;  %v15007_v12 = vsel %vm7299_vm9, %v14960_v37, 0.0  ;;  %v15008_v0 = vsel %vm7299_vm9, %v14961_v16, 0.0  ;;  %v14965_v49 = vmul.f32 %v23435_v24, %v23435_v24  ;;  %v14996_v37 = vpop.xlane.xlu1 %14995 }
0x2c1e   :  { %15793 = vmatprep.mubr.bf16.mxu0 %v15523_v35  ;;  %v14964_v35 = vmul.f32 %v23432_v29, %v23432_v29  ;;  %v15041_v16 = vmul.f32 0.00390625, %v14996_v37 }
0x2c22   :  { %15794 = vmatmul.mubr.bf16.vlgmr.msra.gmra.mrb[132].mxu0 %v15522_v41  ;;  %v15009_v41 = vadd.f32 %v15008_v0, %v15007_v12 }
0x2c87   :  { %v14895_v53 = vpop.xlane.xlu0 %14894 }
0x2c88   :  { %v14917_v48 = vmul.f32 0.00390625, %v14895_v53 }
0x2c8a   :  { %v23373_v33 = vsub.f32 %v23334_v55, %v14917_v48  ;;  %v23376_v28 = vsub.f32 %v23336_v40, %v14917_v48  ;;  %v23388_v40 = vsub.f32 %v23120_v44, %v14910_v36  ;;  %v14953_v44 = vmul.f32 %v23391_v13, %v23391_v13 }
0x2c8b   :  { %v15017_v36 = vsel %vm7299_vm9, %v14964_v35, 0.0 }
0x2c8c   :  { %v14966_v15 = vmul.f32 %v23373_v33, %v23373_v33  ;;  %v14967_v59 = vmul.f32 %v23376_v28, %v23376_v28  ;;  %v14952_v43 = vmul.f32 %v23388_v40, %v23388_v40  ;;  %v14988_v60 = vsel %vm7299_vm9, %v14953_v44, 0.0  ;;  %v17433_v44 = vld [vmem:[%s20988_s19 + $0x1] ss:$0 sm:$0xff] }
0x2c8e   :  { %v15022_v31 = vsel %vm7299_vm9, %v14966_v15, 0.0  ;;  %v15023_v34 = vsel %vm7299_vm9, %v14967_v59, 0.0  ;;  %v14987_v19 = vsel %vm7299_vm9, %v14952_v43, 0.0  ;;  %v15018_v15 = vsel %vm7299_vm9, %v14965_v49, 0.0 }
0x2c8f   :  { %v15024_v55 = vadd.f32 %v15023_v34, %v15022_v31  ;;  %v14900_v23 = vpop.xlane.xlu0 %14899  ;;  %v14989_v11 = vadd.f32 %v14988_v60, %v14987_v19  ;;  %v17448_v31 = vld.sshfl [vmem:[%s20983_s21 + $0xc] sm:$0x33 pattern:$0x76325410] }
0x2c90   :  { %v14918_v5 = vmul.f32 0.00390625, %v14900_v23  ;;  %v15809_v34 = vcombine.high %v17448_v31, %v17448_v31 }
0x2c91   :  { %15025 = vadd.xlane.f32.xlu1 %v15024_v55  ;;  %v15860_v55 = vcombine.high %v23460_v62, %v23460_v62 }
0x2c92   :  { %v14808_v38 = vpop.f32.mrb[128].mxu1  ;;  %v23445_v4 = vsub.f32 %v23344_v14, %v14918_v5  ;;  %v23448_v1 = vsub.f32 %v23346_v10, %v14918_v5  ;;  %v15019_v14 = vadd.f32 %v15018_v15, %v15017_v36  ;;  %15812 = vmatprep.subr.bf16.mxu0 %v15809_v34  ;;  %v15006_v5 = vpop.xlane.xlu1 %15005  ;;  %v14819_v36 = vld [vmem:[#allocation36 + $0x8] sm:$0x3] }
0x2c93   :  { %v23398_v27 = vadd.f32 %v14808_v38, %v9558_v56  ;;  %v14810_v7 = vpop.f32.mrb[129].mxu1  ;;  %15813 = vmatpush1.bf16.xpose.msra.mxu0 %v17448_v31  ;;  %v17432_v56 = vld [vmem:[%s20988_s19] ss:$0 sm:$0xff]  ;;  %v15043_v0 = vmul.f32 0.00390625, %v15006_v5  ;;  %v15154_v34 = vrot.slane %v14819_v36, %v21972_v54 }
0x2c94   :  { %v23407_v57 = vadd.f32 %v14810_v7, %v9562_v3  ;;  %v14812_v63 = vpop.f32.mrb[130].mxu1  ;;  %v14968_v53 = vmul.f32 %v23445_v4, %v23445_v4  ;;  %v14969_v48 = vmul.f32 %v23448_v1, %v23448_v1  ;;  %15863 = vmatprep.subr.bf16.mxu0 %v15860_v55  ;;  %v14832_v55 = vld [vmem:[#allocation37 + $0x8] sm:$0x3] }
0x2c95   :  { %v14901_v22 = vsel %vm7299_vm9, %v23398_v27, 0.0  ;;  %v14813_v32 = vpop.f32.mrb[131].mxu1  ;;  %v15319_v37 = vrot.slane %v14832_v55, %v21461_v20 }
0x2c96   :  { %v14902_v47 = vsel %vm7299_vm9, %v23407_v57, 0.0  ;;  %v15027_v59 = vsel %vm7299_vm9, %v14968_v53, 0.0  ;;  %v15028_v10 = vsel %vm7299_vm9, %v14969_v48, 0.0 }
0x2c97   :  { %v14903_v6 = vadd.f32 %v14902_v47, %v14901_v22  ;;  %v15029_v30 = vadd.f32 %v15028_v10, %v15027_v59  ;;  %v15056_v59 = vadd.f32 1e-05, %v15043_v0 }
0x2c99   :  { %14904 = vadd.xlane.f32.xlu0 %v14903_v6  ;;  %v17434_v6 = vld [vmem:[%s20988_s19 + $0x2] ss:$0 sm:$0xff] }
0x2c9d   :  { %14990 = vadd.xlane.f32.xlu0 %v14989_v11  ;;  %v15054_v11 = vadd.f32 1e-05, %v15041_v16 }
0x2c9f   :  { %20173 = vrsqrt.f32 %v15054_v11 }
0x2ca1   :  { %15000 = vadd.xlane.f32.xlu0 %v14999_v50 }
0x2ca5   :  { %15010 = vadd.xlane.f32.xlu0 %v15009_v41 }
0x2ca9   :  { %15020 = vadd.xlane.f32.xlu0 %v15019_v14  ;;  %v20174_v48 = vpop.eup %20173 }
0x2cad   :  { %15030 = vadd.xlane.f32.xlu0 %v15029_v30  ;;  %v15085_v30 = vmul.f32 %v20174_v48, %v23251_v9  ;;  %v15150_v9 = vrot.slane %v14819_v36, %v21461_v20 }
0x2ce5   :  { %v15693_v3 = vpop.f32.mrb[124].mxu0 }
0x2ce6   :  { %v15694_v38 = vadd.f32 %v17432_v56, %v15693_v3  ;;  %v15695_v45 = vpop.f32.mrb[125].mxu0 }
0x2ce7   :  { %v15696_v7 = vpop.f32.mrb[126].mxu0  ;;  %v15323_v45 = vrot.slane %v14832_v55, %v21972_v54 }
0x2ce8   :  { %16312 = vst.msk [vmem:[%s20993_s20] sm:$0x3] %vm16311_vm7, %v15694_v38  ;;  %v15697_v43 = vpop.f32.mrb[127].mxu0  ;;  %v15254_v38 = vmul.f32 %v15154_v34, %v15085_v30 }
0x2ce9   :  { %v14818_v43 = vld [vmem:[#allocation36 + $0x6] sm:$0x3]  ;;  %v17450_v34 = vld.sshfl [vmem:[%s20983_s21 + $0x14] sm:$0x33 pattern:$0x76325410] }
0x2ced   :  { %v15744_v63 = vpop.f32.mrb[128].mxu0 }
0x2cee   :  { %v15745_v22 = vadd.f32 %v17433_v44, %v15744_v63  ;;  %v15746_v32 = vpop.f32.mrb[129].mxu0  ;;  %v15084_v44 = vmul.f32 %v20174_v48, %v23248_v58  ;;  %v14831_v63 = vld [vmem:[#allocation37 + $0x6] sm:$0x3]  ;;  %v14820_v58 = vld [vmem:[#allocation36 + $0xa] sm:$0x3] }
0x2cef   :  { %v15747_v47 = vpop.f32.mrb[130].mxu0  ;;  %v15142_v32 = vrot.slane %v14818_v43, %v21461_v20  ;;  %v15158_v55 = vrot.slane %v14820_v58, %v21461_v20 }
0x2cf0   :  { %16313 = vst.msk [vmem:[%s20993_s20 + $0x2] sm:$0x3] %vm16311_vm7, %v15745_v22  ;;  %v15748_v8 = vpop.f32.mrb[131].mxu0  ;;  %v15423_v22 = vadd.f32 %v15323_v45, %v15254_v38  ;;  %v15146_v47 = vrot.slane %v14818_v43, %v21972_v54  ;;  %v15253_v11 = vmul.f32 %v15150_v9, %v15084_v44 }
0x2cf2   :  { %v15475_v16 = vmul.f32 0.01, %v15423_v22 }
0x2cf5   :  { %v15795_v61 = vpop.f32.mrb[132].mxu0 }
0x2cf6   :  { %v15796_v26 = vadd.f32 %v17434_v6, %v15795_v61  ;;  %v15797_v19 = vpop.f32.mrb[133].mxu0  ;;  %v15016_v61 = vpop.xlane.xlu1 %15015 }
0x2cf7   :  { %v15798_v60 = vpop.f32.mrb[134].mxu0 }
0x2cf8   :  { %16314 = vst.msk [vmem:[%s20993_s20 + $0x4] sm:$0x3] %vm16311_vm7, %v15796_v26  ;;  %v15799_v23 = vpop.f32.mrb[135].mxu0  ;;  %v15311_v60 = vrot.slane %v14831_v63, %v21461_v20 }
0x2cf9   :  { %v15315_v23 = vrot.slane %v14831_v63, %v21972_v54 }
0x2d26   :  { %v14905_v52 = vpop.xlane.xlu0 %14904 }
0x2d27   :  { %v14919_v46 = vmul.f32 0.00390625, %v14905_v52  ;;  %v23497_v52 = vld [vmem:[#allocation36 + $0xc] sm:$0x3] }
0x2d28   :  { %v15170_v36 = vrot.slane %v23497_v52, %v21972_v54 }
0x2d29   :  { %v23474_v50 = vsub.f32 %v23398_v27, %v14919_v46  ;;  %v23477_v12 = vsub.f32 %v23407_v57, %v14919_v46 }
0x2d2a   :  { %v14991_v35 = vpop.xlane.xlu0 %14990 }
0x2d2b   :  { %v14970_v49 = vmul.f32 %v23474_v50, %v23474_v50  ;;  %v14971_v41 = vmul.f32 %v23477_v12, %v23477_v12  ;;  %v15040_v53 = vmul.f32 0.00390625, %v14991_v35  ;;  %v14833_v35 = vld [vmem:[#allocation37 + $0xa] sm:$0x3] }
0x2d2d   :  { %v15053_v15 = vadd.f32 1e-05, %v15040_v53  ;;  %v15032_v14 = vsel %vm7299_vm9, %v14970_v49, 0.0  ;;  %v15033_v27 = vsel %vm7299_vm9, %v14971_v41, 0.0  ;;  %vm15449_vm9 = vcmp.gt.f32.partialorder %v15423_v22, 0.0 }
0x2d2e   :  { %v15001_v10 = vpop.xlane.xlu0 %15000  ;;  %v15034_v57 = vadd.f32 %v15033_v27, %v15032_v14  ;;  %v15501_v14 = vsel %vm15449_vm9, %v15423_v22, %v15475_v16  ;;  %v15422_v27 = vadd.f32 %v15319_v37, %v15253_v11  ;;  %v15911_v22 = vcombine.high %v17450_v34, %v17450_v34  ;;  %v17451_v11 = vld.sshfl [vmem:[%s20983_s21 + $0x18] sm:$0x33 pattern:$0x76325410] }
0x2d2f   :  { %20175 = vrsqrt.f32 %v15053_v15  ;;  %v15042_v31 = vmul.f32 0.00390625, %v15001_v10  ;;  %v23505_v10 = vld [vmem:[#allocation37 + $0xc] sm:$0x3]  ;;  %v15527_v63 = vpack.c.bf16 %v15501_v14, %v15501_v14  ;;  %v14823_v14 = vld [vmem:[#allocation36 + $0x10] sm:$0x3] }
0x2d30   :  { %15035 = vadd.xlane.f32.xlu1 %v15034_v57  ;;  %20177 = vrsqrt.f32 %v15056_v59  ;;  %v15331_v59 = vrot.slane %v14833_v35, %v21972_v54  ;;  %v15339_v44 = vrot.slane %v23505_v10, %v21972_v54  ;;  %v15474_v9 = vmul.f32 0.01, %v15422_v27 }
0x2d31   :  { %v15055_v56 = vadd.f32 1e-05, %v15042_v31  ;;  %vm15448_vm11 = vcmp.gt.f32.partialorder %v15422_v27, 0.0 }
0x2d32   :  { %v15011_v3 = vpop.xlane.xlu0 %15010  ;;  %v15500_v37 = vsel %vm15448_vm11, %v15422_v27, %v15474_v9 }
0x2d33   :  { %20179 = vrsqrt.f32 %v15055_v56  ;;  %v15044_v7 = vmul.f32 0.00390625, %v15011_v3 }
0x2d35   :  { %v15057_v6 = vadd.f32 1e-05, %v15044_v7 }
0x2d36   :  { %v15021_v3 = vpop.xlane.xlu0 %15020 }
0x2d37   :  { %20181 = vrsqrt.f32 %v15057_v6 }
0x2d39   :  { %v20176_v8 = vpop.eup %20175 }
0x2d3a   :  { %v15082_v26 = vmul.f32 %v20176_v8, %v23388_v40  ;;  %v15083_v19 = vmul.f32 %v20176_v8, %v23391_v13  ;;  %v20178_v5 = vpop.eup %20177  ;;  %v15045_v40 = vmul.f32 0.00390625, %v15016_v61  ;;  %v15162_v13 = vrot.slane %v14820_v58, %v21972_v54 }
0x2d3b   :  { %v15089_v15 = vmul.f32 %v20178_v5, %v23280_v17 }
0x2d3c   :  { %v15252_v46 = vmul.f32 %v15146_v47, %v15083_v19  ;;  %v15251_v0 = vmul.f32 %v15142_v32, %v15082_v26  ;;  %v15058_v31 = vadd.f32 1e-05, %v15045_v40  ;;  %v15046_v47 = vmul.f32 0.00390625, %v15021_v3 }
0x2d3d   :  { %v20180_v49 = vpop.eup %20179  ;;  %v15258_v32 = vmul.f32 %v15170_v36, %v15089_v15  ;;  %v15088_v26 = vmul.f32 %v20178_v5, %v23277_v51  ;;  %v15166_v19 = vrot.slane %v23497_v52, %v21461_v20  ;;  %v15526_v40 = vpack.c.bf16 %v15500_v37, %v15500_v37 }
0x2d3e   :  { %v15087_v41 = vmul.f32 %v20180_v49, %v23405_v2  ;;  %v15421_v53 = vadd.f32 %v15315_v23, %v15252_v46  ;;  %v15420_v48 = vadd.f32 %v15311_v60, %v15251_v0  ;;  %v15086_v2 = vmul.f32 %v20180_v49, %v23395_v25  ;;  %v14822_v60 = vld [vmem:[#allocation36 + $0xe] sm:$0x3]  ;;  %v15026_v46 = vpop.xlane.xlu1 %15025  ;;  %v14835_v49 = vld [vmem:[#allocation37 + $0xe] sm:$0x3] }
0x2d3f   :  { %20183 = vrsqrt.f32 %v15058_v31  ;;  %v15327_v25 = vrot.slane %v14833_v35, %v21461_v20  ;;  %v15427_v23 = vadd.f32 %v15339_v44, %v15258_v32  ;;  %v15059_v58 = vadd.f32 1e-05, %v15046_v47  ;;  %v17452_v31 = vld.sshfl [vmem:[%s20983_s21 + $0x1c] sm:$0x33 pattern:$0x76325410] }
0x2d40   :  { %vm15447_vm8 = vcmp.gt.f32.partialorder %v15421_v53, 0.0  ;;  %v15473_v57 = vmul.f32 0.01, %v15421_v53  ;;  %vm15446_vm10 = vcmp.gt.f32.partialorder %v15420_v48, 0.0  ;;  %v15472_v30 = vmul.f32 0.01, %v15420_v48 }
0x2d41   :  { %v15256_v56 = vmul.f32 %v15162_v13, %v15087_v41  ;;  %v15255_v8 = vmul.f32 %v15158_v55, %v15086_v2  ;;  %v20182_v61 = vpop.eup %20181  ;;  %v15178_v51 = vrot.slane %v14822_v60, %v21972_v54  ;;  %v15257_v5 = vmul.f32 %v15166_v19, %v15088_v26  ;;  %v14824_v47 = vld [vmem:[#allocation36 + $0x12] sm:$0x3]  ;;  %v17453_v19 = vld.sshfl [vmem:[%s20983_s21 + $0x20] sm:$0x33 pattern:$0x76325410] }
0x2d42   :  { %v15499_v38 = vsel %vm15447_vm8, %v15421_v53, %v15473_v57  ;;  %v15498_v17 = vsel %vm15446_vm10, %v15420_v48, %v15472_v30  ;;  %v15091_v0 = vmul.f32 %v20182_v61, %v23419_v39  ;;  %v15962_v52 = vcombine.high %v17451_v11, %v17451_v11 }
0x2d43   :  { %v15525_v45 = vpack.c.bf16 %v15499_v38, %v15499_v38  ;;  %v15524_v7 = vpack.c.bf16 %v15498_v17, %v15498_v17  ;;  %v15425_v43 = vadd.f32 %v15331_v59, %v15256_v56  ;;  %v15424_v16 = vadd.f32 %v15327_v25, %v15255_v8  ;;  %v15031_v56 = vpop.xlane.xlu0 %15030  ;;  %v14836_v17 = vld [vmem:[#allocation37 + $0x10] sm:$0x3] }
0x2d44   :  { %vm15453_vm13 = vcmp.gt.f32.partialorder %v15427_v23, 0.0  ;;  %v15479_v13 = vmul.f32 0.01, %v15427_v23  ;;  %v15047_v41 = vmul.f32 0.00390625, %v15026_v46  ;;  %20185 = vrsqrt.f32 %v15059_v58 }
0x2d45   :  { %15844 = vmatprep.mubr.bf16.mxu0 %v15525_v45  ;;  %v15477_v6 = vmul.f32 0.01, %v15425_v43  ;;  %vm15451_vm12 = vcmp.gt.f32.partialorder %v15425_v43, 0.0  ;;  %v15476_v48 = vmul.f32 0.01, %v15424_v16  ;;  %vm15450_vm14 = vcmp.gt.f32.partialorder %v15424_v16, 0.0 }
0x2d46   :  { %15845 = vmatmul.mubr.bf16.vlgmr.msra.gmra.mrb[136].mxu0 %v15524_v7  ;;  %v15260_v39 = vmul.f32 %v15178_v51, %v15091_v0  ;;  %v15347_v36 = vrot.slane %v14835_v49, %v21972_v54  ;;  %v15505_v27 = vsel %vm15453_vm13, %v15427_v23, %v15479_v13  ;;  %v15090_v57 = vmul.f32 %v20182_v61, %v23416_v21 }
0x2d47   :  { %15864 = vmatpush1.bf16.xpose.msra.mxu0 %v23460_v62  ;;  %15895 = vmatprep.mubr.bf16.mxu0 %v15527_v63  ;;  %v15503_v35 = vsel %vm15451_vm12, %v15425_v43, %v15477_v6  ;;  %v15335_v62 = vrot.slane %v23505_v10, %v21461_v20  ;;  %v15060_v10 = vadd.f32 1e-05, %v15047_v41  ;;  %v15502_v30 = vsel %vm15450_vm14, %v15424_v16, %v15476_v48  ;;  %v14837_v16 = vld [vmem:[#allocation37 + $0x12] sm:$0x3] }
0x2d48   :  { %15914 = vmatprep.subr.bf16.mxu0 %v15911_v22  ;;  %v15529_v53 = vpack.c.bf16 %v15503_v35, %v15503_v35  ;;  %v15174_v2 = vrot.slane %v14822_v60, %v21461_v20  ;;  %v15429_v3 = vadd.f32 %v15347_v36, %v15260_v39  ;;  %v15186_v38 = vrot.slane %v14823_v14, %v21972_v54 }
0x2d49   :  { %v20184_v15 = vpop.eup %20183  ;;  %v15426_v59 = vadd.f32 %v15335_v62, %v15257_v5  ;;  %v15531_v45 = vpack.c.bf16 %v15505_v27, %v15505_v27  ;;  %v16013_v43 = vcombine.high %v17452_v31, %v17452_v31  ;;  %20187 = vrsqrt.f32 %v15060_v10  ;;  %v14838_v27 = vld [vmem:[#allocation37 + $0x14] sm:$0x3] }
0x2d4a   :  { %v15093_v55 = vmul.f32 %v20184_v15, %v23320_v18  ;;  %v15048_v44 = vmul.f32 0.00390625, %v15031_v56  ;;  %v15343_v63 = vrot.slane %v14835_v49, %v21461_v20  ;;  %v15259_v21 = vmul.f32 %v15174_v2, %v15090_v57 }
0x2d4b   :  { %v15478_v7 = vmul.f32 0.01, %v15426_v59  ;;  %vm15452_vm15 = vcmp.gt.f32.partialorder %v15426_v59, 0.0  ;;  %v15481_v9 = vmul.f32 0.01, %v15429_v3  ;;  %v15355_v18 = vrot.slane %v14836_v17, %v21972_v54 }
0x2d4c   :  { %v15262_v22 = vmul.f32 %v15186_v38, %v15093_v55  ;;  %vm15455_vm0 = vcmp.gt.f32.partialorder %v15429_v3, 0.0  ;;  %v15182_v25 = vrot.slane %v14823_v14, %v21461_v20  ;;  %v15092_v8 = vmul.f32 %v20184_v15, %v23317_v42 }
0x2d4d   :  { %v15061_v6 = vadd.f32 1e-05, %v15048_v44  ;;  %v15504_v61 = vsel %vm15452_vm15, %v15426_v59, %v15478_v7  ;;  %v15428_v26 = vadd.f32 %v15343_v63, %v15259_v21  ;;  %v15507_v23 = vsel %vm15455_vm0, %v15429_v3, %v15481_v9  ;;  %v14826_v3 = vld [vmem:[#allocation36 + $0x16] sm:$0x3]  ;;  %v14839_v9 = vld [vmem:[#allocation37 + $0x16] sm:$0x3] }
0x2d4e   :  { %15896 = vmatmul.mubr.bf16.vlgmr.msra.gmra.mrb[140].mxu0 %v15526_v40  ;;  %v20186_v32 = vpop.eup %20185  ;;  %v15431_v58 = vadd.f32 %v15355_v18, %v15262_v22  ;;  %v15194_v37 = vrot.slane %v14824_v47, %v21972_v54  ;;  %v16064_v46 = vcombine.high %v17453_v19, %v17453_v19  ;;  %v15351_v0 = vrot.slane %v14836_v17, %v21461_v20  ;;  %v14825_v40 = vld [vmem:[#allocation36 + $0x14] sm:$0x3] }
0x2d4f   :  { %15915 = vmatpush1.bf16.xpose.msra.mxu0 %v17450_v34  ;;  %15946 = vmatprep.mubr.bf16.mxu0 %v15529_v53  ;;  %v15528_v34 = vpack.c.bf16 %v15502_v30, %v15502_v30  ;;  %v15095_v60 = vmul.f32 %v20186_v32, %v23435_v24  ;;  %20189 = vrsqrt.f32 %v15061_v6  ;;  %v15533_v35 = vpack.c.bf16 %v15507_v23, %v15507_v23  ;;  %v17454_v53 = vld.sshfl [vmem:[%s20983_s21 + $0x24] sm:$0x33 pattern:$0x76325410] }
0x2d50   :  { %15965 = vmatprep.subr.bf16.mxu0 %v15962_v52  ;;  %v15480_v51 = vmul.f32 0.01, %v15428_v26  ;;  %v15261_v42 = vmul.f32 %v15182_v25, %v15092_v8  ;;  %vm15454_vm1 = vcmp.gt.f32.partialorder %v15428_v26, 0.0  ;;  %v15483_v62 = vmul.f32 0.01, %v15431_v58 }
0x2d51   :  { %v15264_v5 = vmul.f32 %v15194_v37, %v15095_v60  ;;  %v15363_v24 = vrot.slane %v14837_v16, %v21972_v54  ;;  %vm15457_vm2 = vcmp.gt.f32.partialorder %v15431_v58, 0.0  ;;  %v15094_v52 = vmul.f32 %v20186_v32, %v23432_v29  ;;  %v17456_v23 = vld.sshfl [vmem:[%s20983_s21 + $0x2c] sm:$0x33 pattern:$0x76325410] }
0x2d52   :  { %v15506_v13 = vsel %vm15454_vm1, %v15428_v26, %v15480_v51  ;;  %v15430_v41 = vadd.f32 %v15351_v0, %v15261_v42  ;;  %v15190_v48 = vrot.slane %v14824_v47, %v21461_v20  ;;  %v15509_v36 = vsel %vm15457_vm2, %v15431_v58, %v15483_v62 }
0x2d53   :  { %v20188_v49 = vpop.eup %20187  ;;  %v15433_v15 = vadd.f32 %v15363_v24, %v15264_v5  ;;  %v15202_v14 = vrot.slane %v14825_v40, %v21972_v54  ;;  %v15532_v59 = vpack.c.bf16 %v15506_v13, %v15506_v13  ;;  %v16115_v10 = vcombine.high %v17454_v53, %v17454_v53  ;;  %v17457_v5 = vld.sshfl [vmem:[%s20983_s21 + $0x30] sm:$0x33 pattern:$0x76325410] }
0x2d54   :  { %v15097_v39 = vmul.f32 %v20188_v49, %v23376_v28  ;;  %v15535_v57 = vpack.c.bf16 %v15509_v36, %v15509_v36  ;;  %v15482_v30 = vmul.f32 0.01, %v15430_v41  ;;  %v15263_v29 = vmul.f32 %v15190_v48, %v15094_v52 }
0x2d55   :  { %vm15456_vm3 = vcmp.gt.f32.partialorder %v15430_v41, 0.0  ;;  %v15485_v2 = vmul.f32 0.01, %v15433_v15  ;;  %v15371_v56 = vrot.slane %v14838_v27, %v21972_v54  ;;  %vm15459_vm4 = vcmp.gt.f32.partialorder %v15433_v15, 0.0 }
0x2d56   :  { %15947 = vmatmul.mubr.bf16.vlgmr.msra.gmra.mrb[144].mxu0 %v15528_v34  ;;  %v15266_v55 = vmul.f32 %v15202_v14, %v15097_v39  ;;  %v15096_v38 = vmul.f32 %v20188_v49, %v23373_v33  ;;  %v15508_v17 = vsel %vm15456_vm3, %v15430_v41, %v15482_v30  ;;  %v15198_v7 = vrot.slane %v14825_v40, %v21461_v20  ;;  %v14840_v14 = vld [vmem:[#allocation37 + $0x18] sm:$0x3] }
0x2d57   :  { %15966 = vmatpush1.bf16.xpose.msra.mxu0 %v17451_v11  ;;  %15997 = vmatprep.mubr.bf16.mxu0 %v15531_v45  ;;  %v15530_v11 = vpack.c.bf16 %v15504_v61, %v15504_v61  ;;  %v17455_v45 = vld.sshfl [vmem:[%s20983_s21 + $0x28] sm:$0x33 pattern:$0x76325410]  ;;  %v15511_v44 = vsel %vm15459_vm4, %v15433_v15, %v15485_v2  ;;  %v15210_v21 = vrot.slane %v14826_v3, %v21972_v54  ;;  %v14827_v15 = vld [vmem:[#allocation36 + $0x18] sm:$0x3] }
0x2d58   :  { %16016 = vmatprep.subr.bf16.mxu0 %v16013_v43  ;;  %v15435_v63 = vadd.f32 %v15371_v56, %v15266_v55  ;;  %v15534_v22 = vpack.c.bf16 %v15508_v17, %v15508_v17  ;;  %v16166_v18 = vcombine.high %v17455_v45, %v17455_v45  ;;  %v15537_v32 = vpack.c.bf16 %v15511_v44, %v15511_v44 }
0x2d59   :  { %v20190_v28 = vpop.eup %20189  ;;  %v15367_v25 = vrot.slane %v14838_v27, %v21461_v20  ;;  %v15265_v33 = vmul.f32 %v15198_v7, %v15096_v38  ;;  %v15379_v61 = vrot.slane %v14839_v9, %v21972_v54  ;;  %v15375_v51 = vrot.slane %v14839_v9, %v21461_v20 }
0x2d5a   :  { %v15099_v43 = vmul.f32 %v20190_v28, %v23448_v1  ;;  %v15487_v8 = vmul.f32 0.01, %v15435_v63  ;;  %vm15461_vm6 = vcmp.gt.f32.partialorder %v15435_v63, 0.0  ;;  %v15206_v1 = vrot.slane %v14826_v3, %v21461_v20 }
0x2d5b   :  { %v15098_v26 = vmul.f32 %v20190_v28, %v23445_v4  ;;  %v15434_v60 = vadd.f32 %v15367_v25, %v15265_v33  ;;  %v16268_v40 = vcombine.high %v17457_v5, %v17457_v5  ;;  %v15214_v27 = vrot.slane %v14827_v15, %v21461_v20 }
0x2d5c   :  { %v15268_v6 = vmul.f32 %v15210_v21, %v15099_v43  ;;  %v15513_v58 = vsel %vm15461_vm6, %v15435_v63, %v15487_v8  ;;  %v17436_v63 = vld [vmem:[%s20988_s19 + $0x4] ss:$0 sm:$0xff] }
0x2d5d   :  { %v15539_v0 = vpack.c.bf16 %v15513_v58, %v15513_v58  ;;  %vm15460_vm9 = vcmp.gt.f32.partialorder %v15434_v60, 0.0 }
0x2d5e   :  { %15998 = vmatmul.mubr.bf16.vlgmr.msra.gmra.mrb[148].mxu0 %v15530_v11  ;;  %v15437_v37 = vadd.f32 %v15379_v61, %v15268_v6  ;;  %v16217_v11 = vcombine.high %v17456_v23, %v17456_v23 }
0x2d5f   :  { %16017 = vmatpush1.bf16.xpose.msra.mxu0 %v17452_v31  ;;  %16048 = vmatprep.mubr.bf16.mxu0 %v15533_v35  ;;  %v15359_v31 = vrot.slane %v14837_v16, %v21461_v20  ;;  %v15486_v35 = vmul.f32 0.01, %v15434_v60 }
0x2d60   :  { %16067 = vmatprep.subr.bf16.mxu0 %v16064_v46  ;;  %v15267_v46 = vmul.f32 %v15206_v1, %v15098_v26  ;;  %v15489_v42 = vmul.f32 0.01, %v15437_v37  ;;  %vm15463_vm8 = vcmp.gt.f32.partialorder %v15437_v37, 0.0  ;;  %v17438_v1 = vld [vmem:[%s20988_s19 + $0x6] ss:$0 sm:$0xff] }
0x2d61   :  { %v15432_v34 = vadd.f32 %v15359_v31, %v15263_v29  ;;  %v15512_v4 = vsel %vm15460_vm9, %v15434_v60, %v15486_v35  ;;  %v15383_v31 = vrot.slane %v14840_v14, %v21461_v20  ;;  %v15387_v29 = vrot.slane %v14840_v14, %v21972_v54  ;;  %v17435_v20 = vld [vmem:[%s20988_s19 + $0x3] ss:$0 sm:$0xff] }
0x2d62   :  { %v15436_v62 = vadd.f32 %v15375_v51, %v15267_v46  ;;  %v15515_v24 = vsel %vm15463_vm8, %v15437_v37, %v15489_v42  ;;  %v15538_v49 = vpack.c.bf16 %v15512_v4, %v15512_v4  ;;  %v17439_v37 = vld [vmem:[%s20988_s19 + $0x7] ss:$0 sm:$0xff]  ;;  %v17440_v51 = vld [vmem:[%s20988_s19 + $0x8] ss:$0 sm:$0xff] }
0x2d63   :  { %v15484_v47 = vmul.f32 0.01, %v15432_v34  ;;  %vm15458_vm5 = vcmp.gt.f32.partialorder %v15432_v34, 0.0  ;;  %v15541_v52 = vpack.c.bf16 %v15515_v24, %v15515_v24 }
0x2d64   :  { %v15488_v13 = vmul.f32 0.01, %v15436_v62  ;;  %vm15462_vm10 = vcmp.gt.f32.partialorder %v15436_v62, 0.0 }
0x2d66   :  { %16049 = vmatmul.mubr.bf16.vlgmr.msra.gmra.mrb[152].mxu0 %v15532_v59  ;;  %v15514_v41 = vsel %vm15462_vm10, %v15436_v62, %v15488_v13  ;;  %v15218_v59 = vrot.slane %v14827_v15, %v21972_v54 }
0x2d67   :  { %16068 = vmatpush1.bf16.xpose.msra.mxu0 %v17453_v19  ;;  %16099 = vmatprep.mubr.bf16.mxu0 %v15535_v57  ;;  %v15510_v19 = vsel %vm15458_vm5, %v15432_v34, %v15484_v47  ;;  %v17437_v47 = vld [vmem:[%s20988_s19 + $0x5] ss:$0 sm:$0xff] }
0x2d68   :  { %16118 = vmatprep.subr.bf16.mxu0 %v16115_v10  ;;  %v15536_v16 = vpack.c.bf16 %v15510_v19, %v15510_v19 }
0x2d6e   :  { %16100 = vmatmul.mubr.bf16.vlgmr.msra.gmra.mrb[156].mxu0 %v15534_v22 }
0x2d6f   :  { %16119 = vmatpush1.bf16.xpose.msra.mxu0 %v17454_v53  ;;  %16150 = vmatprep.mubr.bf16.mxu0 %v15537_v32  ;;  %v15540_v53 = vpack.c.bf16 %v15514_v41, %v15514_v41 }
0x2d70   :  { %16169 = vmatprep.subr.bf16.mxu0 %v16166_v18 }
0x2d76   :  { %16151 = vmatmul.mubr.bf16.vlgmr.msra.gmra.mrb[160].mxu0 %v15536_v16 }
0x2d77   :  { %16170 = vmatpush1.bf16.xpose.msra.mxu0 %v17455_v45  ;;  %16201 = vmatprep.mubr.bf16.mxu0 %v15539_v0 }
0x2d78   :  { %16220 = vmatprep.subr.bf16.mxu0 %v16217_v11 }
0x2d7e   :  { %16202 = vmatmul.mubr.bf16.vlgmr.msra.gmra.mrb[164].mxu0 %v15538_v49  ;;  %v17441_v49 = vld [vmem:[%s20988_s19 + $0x9] ss:$0 sm:$0xff] }
0x2d7f   :  { %16221 = vmatpush1.bf16.xpose.msra.mxu0 %v17456_v23  ;;  %16252 = vmatprep.mubr.bf16.mxu0 %v15541_v52 }
0x2d80   :  { %16271 = vmatprep.subr.bf16.mxu0 %v16268_v40 }
0x2d86   :  { %16253 = vmatmul.mubr.bf16.vlgmr.msra.gmra.mrb[168].mxu0 %v15540_v53 }
0x2d87   :  { %16272 = vmatpush1.bf16.xpose.msra.mxu0 %v17457_v5 }
0x2dbd   :  { %v15036_v48 = vpop.xlane.xlu1 %15035 }
0x2dbe   :  { %v15049_v39 = vmul.f32 0.00390625, %v15036_v48  ;;  %v17442_v48 = vld [vmem:[%s20988_s19 + $0xa] ss:$0 sm:$0xff] }
0x2dc0   :  { %v15062_v36 = vadd.f32 1e-05, %v15049_v39 }
0x2dc2   :  { %20191 = vrsqrt.f32 %v15062_v36 }
0x2dcc   :  { %v20192_v10 = vpop.eup %20191 }
0x2dcd   :  { %v15100_v57 = vmul.f32 %v20192_v10, %v23474_v50  ;;  %v15101_v30 = vmul.f32 %v20192_v10, %v23477_v12 }
0x2dcf   :  { %v15269_v2 = vmul.f32 %v15214_v27, %v15100_v57  ;;  %v15270_v55 = vmul.f32 %v15218_v59, %v15101_v30  ;;  %v17443_v59 = vld [vmem:[%s20988_s19 + $0xb] ss:$0 sm:$0xff] }
0x2dd1   :  { %v15439_v56 = vadd.f32 %v15387_v29, %v15270_v55  ;;  %v15438_v28 = vadd.f32 %v15383_v31, %v15269_v2  ;;  %v17444_v2 = vld [vmem:[%s20988_s19 + $0xc] ss:$0 sm:$0xff] }
0x2dd3   :  { %vm15465_vm11 = vcmp.gt.f32.partialorder %v15439_v56, 0.0  ;;  %v15491_v3 = vmul.f32 0.01, %v15439_v56  ;;  %vm15464_vm12 = vcmp.gt.f32.partialorder %v15438_v28, 0.0  ;;  %v15490_v38 = vmul.f32 0.01, %v15438_v28 }
0x2dd5   :  { %v15517_v17 = vsel %vm15465_vm11, %v15439_v56, %v15491_v3  ;;  %v15516_v34 = vsel %vm15464_vm12, %v15438_v28, %v15490_v38 }
0x2dd6   :  { %v15543_v50 = vpack.c.bf16 %v15517_v17, %v15517_v17  ;;  %v15542_v12 = vpack.c.bf16 %v15516_v34, %v15516_v34 }
0x2dd8   :  { %16303 = vmatprep.mubr.bf16.mxu0 %v15543_v50 }
0x2dd9   :  { %16304 = vmatmul.mubr.bf16.vlgmr.msra.gmra.mrb[172].mxu0 %v15542_v12 }
0x2e19   :  { %v15846_v54 = vpop.f32.mrb[136].mxu0 }
0x2e1a   :  { %v15847_v45 = vadd.f32 %v17435_v20, %v15846_v54  ;;  %v15848_v7 = vpop.f32.mrb[137].mxu0 }
0x2e1b   :  { %v15849_v43 = vpop.f32.mrb[138].mxu0 }
0x2e1c   :  { %16315 = vst.msk [vmem:[%s20993_s20 + $0x6] sm:$0x3] %vm16311_vm7, %v15847_v45  ;;  %v15850_v44 = vpop.f32.mrb[139].mxu0 }
0x2e21   :  { %v15897_v21 = vpop.f32.mrb[140].mxu0 }
0x2e22   :  { %v15898_v9 = vadd.f32 %v17436_v63, %v15897_v21  ;;  %v15899_v22 = vpop.f32.mrb[141].mxu0 }
0x2e23   :  { %v15900_v18 = vpop.f32.mrb[142].mxu0 }
0x2e24   :  { %16316 = vst.msk [vmem:[%s20993_s20 + $0x8] sm:$0x3] %vm16311_vm7, %v15898_v9  ;;  %v15901_v32 = vpop.f32.mrb[143].mxu0 }
0x2e29   :  { %v15948_v25 = vpop.f32.mrb[144].mxu0 }
0x2e2a   :  { %v15949_v33 = vadd.f32 %v17437_v47, %v15948_v25  ;;  %v15950_v8 = vpop.f32.mrb[145].mxu0 }
0x2e2b   :  { %v15951_v6 = vpop.f32.mrb[146].mxu0 }
0x2e2c   :  { %16317 = vst.msk [vmem:[%s20993_s20 + $0xa] sm:$0x3] %vm16311_vm7, %v15949_v33  ;;  %v15952_v61 = vpop.f32.mrb[147].mxu0 }
0x2e31   :  { %v15999_v26 = vpop.f32.mrb[148].mxu0 }
0x2e32   :  { %v16000_v19 = vadd.f32 %v17438_v1, %v15999_v26  ;;  %v16001_v60 = vpop.f32.mrb[149].mxu0 }
0x2e33   :  { %v16002_v23 = vpop.f32.mrb[150].mxu0 }
0x2e34   :  { %16318 = vst.msk [vmem:[%s20993_s20 + $0xc] sm:$0x3] %vm16311_vm7, %v16000_v19  ;;  %v16003_v58 = vpop.f32.mrb[151].mxu0 }
0x2e39   :  { %v16050_v16 = vpop.f32.mrb[152].mxu0 }
0x2e3a   :  { %v16051_v11 = vadd.f32 %v17439_v37, %v16050_v16  ;;  %v16052_v46 = vpop.f32.mrb[153].mxu0 }
0x2e3b   :  { %v16053_v0 = vpop.f32.mrb[154].mxu0 }
0x2e3c   :  { %16319 = vst.msk [vmem:[%s20993_s20 + $0xe] sm:$0x3] %vm16311_vm7, %v16051_v11  ;;  %v16054_v35 = vpop.f32.mrb[155].mxu0 }
0x2e41   :  { %v16101_v42 = vpop.f32.mrb[156].mxu0 }
0x2e42   :  { %v16102_v4 = vadd.f32 %v17440_v51, %v16101_v42  ;;  %v16103_v62 = vpop.f32.mrb[157].mxu0 }
0x2e43   :  { %v16104_v5 = vpop.f32.mrb[158].mxu0 }
0x2e44   :  { %16320 = vst.msk [vmem:[%s20993_s20 + $0x10] sm:$0x3] %vm16311_vm7, %v16102_v4  ;;  %v16105_v24 = vpop.f32.mrb[159].mxu0 }
0x2e49   :  { %v16152_v40 = vpop.f32.mrb[160].mxu0 }
0x2e4a   :  { %v16153_v52 = vadd.f32 %v17441_v49, %v16152_v40  ;;  %v16154_v13 = vpop.f32.mrb[161].mxu0 }
0x2e4b   :  { %v16155_v41 = vpop.f32.mrb[162].mxu0 }
0x2e4c   :  { %16321 = vst.msk [vmem:[%s20993_s20 + $0x12] sm:$0x3] %vm16311_vm7, %v16153_v52  ;;  %v16156_v53 = vpop.f32.mrb[163].mxu0 }
0x2e51   :  { %v16203_v39 = vpop.f32.mrb[164].mxu0 }
0x2e52   :  { %v16204_v36 = vadd.f32 %v17442_v48, %v16203_v39  ;;  %v16205_v15 = vpop.f32.mrb[165].mxu0 }
0x2e53   :  { %v16206_v14 = vpop.f32.mrb[166].mxu0 }
0x2e54   :  { %16322 = vst.msk [vmem:[%s20993_s20 + $0x14] sm:$0x3] %vm16311_vm7, %v16204_v36  ;;  %v16207_v27 = vpop.f32.mrb[167].mxu0 }
0x2e59   :  { %v16254_v10 = vpop.f32.mrb[168].mxu0 }
0x2e5a   :  { %v16255_v57 = vadd.f32 %v17443_v59, %v16254_v10  ;;  %v16256_v30 = vpop.f32.mrb[169].mxu0 }
0x2e5b   :  { %v16257_v31 = vpop.f32.mrb[170].mxu0 }
0x2e5c   :  { %16323 = vst.msk [vmem:[%s20993_s20 + $0x16] sm:$0x3] %vm16311_vm7, %v16255_v57  ;;  %v16258_v29 = vpop.f32.mrb[171].mxu0 }
0x2eac   :  { %v16305_v55 = vpop.f32.mrb[172].mxu0 }
0x2ead   :  { %v16306_v56 = vadd.f32 %v17444_v2, %v16305_v55  ;;  %v16307_v28 = vpop.f32.mrb[173].mxu0 }
0x2eae   :  { %v16308_v3 = vpop.f32.mrb[174].mxu0 }
0x2eaf   :  { %16324 = vst.msk [vmem:[%s20993_s20 + $0x18] sm:$0x3] %vm16311_vm7, %v16306_v56  ;;  %v16309_v38 = vpop.f32.mrb[175].mxu0 }
0x2eb0   :  { %16329 = vsyncpa [#allocation3], 1 }
0x2eb1   :  { %16330 = vsyncpa [#allocation5], 1 }
0x2eb2   :  { %16331 = vsyncpa [#allocation8], 1 }
0x2eb3   :  { %16332 = vsyncpa [#allocation11], 1 }
0x2eb4   :  { %16333 = vsyncpa [#allocation14], 1 }
0x2eb5   :  { %16334 = vsyncpa [#allocation17], 1 }
0x2eb6   :  { %16335 = vsyncpa [#allocation20], 1 }
0x2eb7   :  { %16336 = vsyncpa [#allocation23], 1 }
0x2eb8   :  { %16337 = vsyncpa [#allocation26], 1 }
0x2eb9   :  { %16338 = vsyncpa [#allocation29], 1 }
0x2eba   :  { %16339 = vsyncpa [#allocation32], 1 }
0x2ebb   :  { %16340 = vsyncpa [#allocation35], 1 }
0x2ebc   :  { %16341 = vsyncpa [#allocation38], 1 }

</bundles_post_ra>
